<compile_context>
chip_gen: v6e
topology: v6e:2x2x1
jax: 0.10.0
libtpu: 0.0.40
codegen_flags: <defaults>
</compile_context>

<pallas_src>
import functools

import jax
import jax.numpy as jnp
from jax.experimental import pallas as pl
from jax.experimental.pallas import tpu as pltpu


def _round_up(x, m):
    return (x + m - 1) // m * m


def _sigmoid(x):
    # One EUP op (tanh) + cheap VALU instead of exp + reciprocal.
    return 0.5 * jnp.tanh(0.5 * x) + 0.5


# --------------------------------------------------------------------------
# Fused Pallas kernel: all layers, T timesteps per grid step.
# --------------------------------------------------------------------------
def _encoder_kernel(*refs, L, T, kernel_sizes, hidden, cins, chunks, W, HW,
                    forget_bias):
    """refs layout:
       [0]              x_ref   (T, C_in, HW)        current time block
       [1 + 2*i]        w_ref   (4*ch_i, K_i)  bf16  packed stacked weights
       [2 + 2*i]        m_ref   (k_i*k_i, HW)  f32   boundary tap masks
       [1+2L .. 1+3L)   h_ref   (ch_i, HW)     f32   resident recurrent state
       [1+3L .. 1+4L)   c_ref   (ch_i, HW)     f32   resident recurrent state

    CORRECTNESS NOTE: the h/c output BlockSpec index depends ONLY on the batch
    grid axis and the time axis is the innermost ("arbitrary") grid dim; this
    is what keeps the recurrent state VMEM-resident and correct across time
    blocks.  Do not reorder the grid or the out index_map.
    """
    x_ref = refs[0]
    w_refs = [refs[1 + 2 * i] for i in range(L)]
    m_refs = [refs[2 + 2 * i] for i in range(L)]
    h_refs = refs[1 + 2 * L: 1 + 3 * L]
    c_refs = refs[1 + 3 * L: 1 + 4 * L]

    # Zero the recurrent state on the first time block of every batch element.
    @pl.when(pl.program_id(1) == 0)
    def _init():
        for i in range(L):
            h_refs[i][...] = jnp.zeros_like(h_refs[i])
            c_refs[i][...] = jnp.zeros_like(c_refs[i])

    ones_row = jnp.ones((1, HW), jnp.float32)           # bias row

    for t in range(T):                                  # static unroll
        x = x_ref[t]                                    # (C_in, HW), layer-0 input
        for li in range(L):
            k = kernel_sizes[li]
            ch = hidden[li]
            cin = cins[li]
            chunk = chunks[li]
            p = k // 2
            pad = chunk - (cin + ch)

            h_prev = h_refs[li][...]                    # (ch, HW)
            c_prev = c_refs[li][...]                    # (ch, HW)

            # [x; h_prev] padded to a multiple of 8 rows -> aligned concats.
            parts = [x, h_prev]
            if pad:
                parts.append(jnp.zeros((pad, HW), jnp.float32))
            xh = jnp.concatenate(parts, axis=0)         # (chunk, HW)

            # Stack all k*k shifted/masked copies along the contraction axis,
            # plus a ones-row for the bias -> single MXU matmul per layer.
            pieces = []
            ti = 0
            for dy in range(k):
                for dx in range(k):
                    off = (dy - p) * W + (dx - p)
                    if off == 0:                        # center tap: mask == 1
                        pieces.append(xh)
                    else:
                        shift = (-off) % HW
                        m = m_refs[li][ti:ti + 1, :]    # (1, HW) 0/1 mask
                        pieces.append(pltpu.roll(xh, shift, 1) * m)
                    ti += 1
            pieces.append(ones_row)
            stacked = jnp.concatenate(pieces, axis=0).astype(jnp.bfloat16)

            # (4*ch, K) bf16 @ (K, HW) bf16 -> (4*ch, HW) f32 accumulation.
            gates = jnp.dot(w_refs[li][...], stacked,
                            preferred_element_type=jnp.float32)

            i_g = _sigmoid(gates[0 * ch:1 * ch])
            f_g = _sigmoid(gates[1 * ch:2 * ch] + forget_bias)
            g_g = jnp.tanh(gates[2 * ch:3 * ch])
            o_g = _sigmoid(gates[3 * ch:4 * ch])
            c_new = f_g * c_prev + i_g * g_g
            h_new = o_g * jnp.tanh(c_new)

            c_refs[li][...] = c_new                     # dense full-lane stores
            h_refs[li][...] = h_new
            x = h_new                                   # feeds the next layer


# --------------------------------------------------------------------------
# Wrapper helpers
# --------------------------------------------------------------------------
def _make_tap_masks(k, H, W):
    """(k*k, H*W) 0/1 masks: validity of tap (dy,dx) at each output pixel."""
    p = k // 2
    ii = jnp.arange(H).reshape(H, 1)
    jj = jnp.arange(W).reshape(1, W)
    rows = []
    for dy in range(k):
        for dx in range(k):
            dyp, dxp = dy - p, dx - p
            valid = ((ii + dyp >= 0) & (ii + dyp < H) &
                     (jj + dxp >= 0) & (jj + dxp < W))
            rows.append(valid.reshape(-1))
    return jnp.stack(rows).astype(jnp.float32)


def _pack_layer_weights(wx, wh, b, pad):
    """(k*k,4ch,cin)+(k*k,4ch,ch)+(4ch,1) -> lane-dense (4ch, k*k*chunk+1) bf16.

    Per-tap column order is [wx | wh | zero-pad]; the final column is the bias
    (multiplied by the kernel's constant ones-row)."""
    kk, four_ch, _ = wx.shape
    taps = []
    for t in range(kk):
        cols = [wx[t], wh[t]]
        if pad:
            cols.append(jnp.zeros((four_ch, pad), jnp.float32))
        taps.append(jnp.concatenate(cols, axis=1))
    return jnp.concatenate(taps + [b], axis=1).astype(jnp.bfloat16)


def encoder_forward(inputs, params, hidden_list, kernel_list, forget_bias,
                    time_block=4):
    """Encoder.forward: inputs (B, S, C, H, W) -> (h_list, c_list), NCHW."""
    B, S, C, H, W = inputs.shape
    HW = H * W
    L = len(hidden_list)

    # Largest time block <= time_block that divides S.
    T = 1
    for cand in range(min(time_block, S), 0, -1):
        if S % cand == 0:
            T = cand
            break

    # TODO(synk): if a future config has H*W not a multiple of 128, pad the
    # flattened spatial axis in the wrapper to keep stores lane-dense.
    x_flat = inputs.reshape(B, S, C, HW).astype(jnp.float32)

    cins = [C] + list(hidden_list[:-1])
    chunks = [_round_up(cins[i] + hidden_list[i], 8) for i in range(L)]

    in_arrays = [x_flat]
    in_specs = [pl.BlockSpec((None, T, C, HW), lambda b, t: (b, t, 0, 0))]
    for i in range(L):
        cell = params["cells"][i]
        pad = chunks[i] - (cins[i] + hidden_list[i])
        w_packed = _pack_layer_weights(cell["wx"], cell["wh"], cell["b"], pad)
        masks = _make_tap_masks(kernel_list[i], H, W)
        in_arrays += [w_packed, masks]
        in_specs += [
            pl.BlockSpec(w_packed.shape, lambda b, t: (0, 0)),
            pl.BlockSpec(masks.shape, lambda b, t: (0, 0)),
        ]

    out_shape = tuple(
        [jax.ShapeDtypeStruct((B, ch, HW), jnp.float32) for ch in hidden_list] +
        [jax.ShapeDtypeStruct((B, ch, HW), jnp.float32) for ch in hidden_list])
    # Output block index depends only on the batch axis -> h/c stay
    # VMEM-resident across the innermost "arbitrary" time axis.
    out_specs = (
        [pl.BlockSpec((None, ch, HW), lambda b, t: (b, 0, 0))
         for ch in hidden_list] +
        [pl.BlockSpec((None, ch, HW), lambda b, t: (b, 0, 0))
         for ch in hidden_list])

    kernel = functools.partial(
        _encoder_kernel, L=L, T=T, kernel_sizes=tuple(kernel_list),
        hidden=tuple(hidden_list), cins=tuple(cins), chunks=tuple(chunks),
        W=W, HW=HW, forget_bias=float(forget_bias))

    outs = pl.pallas_call(
        kernel,
        out_shape=out_shape,
        grid_spec=pltpu.PrefetchScalarGridSpec(
            num_scalar_prefetch=0,
            grid=(B, S // T),
            in_specs=in_specs,
            out_specs=out_specs,
        ),
        compiler_params=pltpu.CompilerParams(
            dimension_semantics=("parallel", "arbitrary"),
            vmem_limit_bytes=32 * 1024 * 1024),
    )(*in_arrays)

    h_list = [outs[i].reshape(B, hidden_list[i], H, W) for i in range(L)]
    c_list = [outs[L + i].reshape(B, hidden_list[i], H, W) for i in range(L)]
    return h_list, c_list


# --------------------------------------------------------------------------
# Pure-JAX reference (for correctness check)
# --------------------------------------------------------------------------
def _taps_to_oihw(wx, wh, k):
    w_full = jnp.concatenate([wx, wh], axis=-1)          # (k*k, 4Ch, Cin+Ch)
    w_full = w_full.reshape(k, k, w_full.shape[1], w_full.shape[2])
    return jnp.transpose(w_full, (2, 3, 0, 1))           # (4Ch, Cin+Ch, k, k)


def _ref_cell(x, h, c, w_oihw, b, forget_bias):
    k = w_oihw.shape[-1]
    p = k // 2
    xh = jnp.concatenate([x, h], axis=1)
    gates = jax.lax.conv_general_dilated(
        xh, w_oihw, window_strides=(1, 1), padding=((p, p), (p, p)),
        dimension_numbers=("NCHW", "OIHW", "NCHW"),
        precision=jax.lax.Precision.HIGHEST)
    gates = gates + b.reshape(1, -1, 1, 1)
    gi, gf, gg, go = jnp.split(gates, 4, axis=1)
    i_g = jax.nn.sigmoid(gi)
    f_g = jax.nn.sigmoid(gf + forget_bias)
    g_g = jnp.tanh(gg)
    o_g = jax.nn.sigmoid(go)
    c_new = f_g * c + i_g * g_g
    h_new = o_g * jnp.tanh(c_new)
    return h_new, c_new


def encoder_forward_ref(inputs, params, hidden_list, kernel_list, forget_bias):
    B, S, C, H, W = inputs.shape
    L = len(hidden_list)
    h = [jnp.zeros((B, ch, H, W), jnp.float32) for ch in hidden_list]
    c = [jnp.zeros((B, ch, H, W), jnp.float32) for ch in hidden_list]
    ws = [_taps_to_oihw(params["cells"][i]["wx"], params["cells"][i]["wh"],
                        kernel_list[i]) for i in range(L)]
    for s in range(S):
        x = inputs[:, s]
        h[0], c[0] = _ref_cell(x, h[0], c[0], ws[0], params["cells"][0]["b"],
                               forget_bias)
        for i in range(1, L):
            h[i], c[i] = _ref_cell(h[i - 1], h[i], c[i], ws[i],
                                   params["cells"][i]["b"], forget_bias)
    return h, c


# --------------------------------------------------------------------------
# Deterministic parameter init (synthetic, not a checkpoint load)
# --------------------------------------------------------------------------
def init_params(key, in_channels, hidden_list, kernel_list):
    cells = []
    for i, (ch, k) in enumerate(zip(hidden_list, kernel_list)):
        cin = in_channels if i == 0 else hidden_list[i - 1]
        key, k1, k2, k3 = jax.random.split(key, 4)
        # Weights pre-rounded to bf16-representable values so the bf16 MXU
        # path and the f32 reference share identical weights.
        wx = (jax.random.normal(k1, (k * k, 4 * ch, cin), jnp.float32) * 0.05
              ).astype(jnp.bfloat16).astype(jnp.float32)
        wh = (jax.random.normal(k2, (k * k, 4 * ch, ch), jnp.float32) * 0.05
              ).astype(jnp.bfloat16).astype(jnp.float32)
        b = (jax.random.normal(k3, (4 * ch, 1), jnp.float32) * 0.05
             ).astype(jnp.bfloat16).astype(jnp.float32)
        cells.append({"wx": wx, "wh": wh, "b": b})
    return {"cells": cells}


# --------------------------------------------------------------------------
if __name__ == "__main__":
    B, S = 2, 8
    in_channels = 4
    hidden = [16, 32]
    kernels = [3, 3]
    H = W = 16
    forget_bias = 0.01

    key = jax.random.PRNGKey(0)
    key, kp, kx = jax.random.split(key, 3)
    params = init_params(kp, in_channels, hidden, kernels)
    inputs = jax.random.normal(kx, (B, S, in_channels, H, W), jnp.float32) * 0.1

    h_list, c_list = encoder_forward(inputs, params, hidden, kernels,
                                     forget_bias)
    h_list = [jax.block_until_ready(h) for h in h_list]
    c_list = [jax.block_until_ready(c) for c in c_list]

    for i, ch in enumerate(hidden):
        assert h_list[i].shape == (B, ch, H, W), h_list[i].shape
        assert c_list[i].shape == (B, ch, H, W), c_list[i].shape

    h_ref, c_ref = encoder_forward_ref(inputs, params, hidden, kernels,
                                       forget_bias)
    # bf16 MXU operands (f32 accumulation) -> slightly looser tolerance than
    # the all-f32 reference.
    tol = 2e-2
    for i in range(len(hidden)):
        err_h = float(jnp.max(jnp.abs(h_list[i] - h_ref[i])))
        err_c = float(jnp.max(jnp.abs(c_list[i] - c_ref[i])))
        assert err_h < tol and err_c < tol, (i, err_h, err_c)

    print("KERNEL_OK")
</pallas_src>

<mosaic_0001>
module attributes {stable_mosaic.version = 11 : i64} {
  func.func @_encoder_kernel(%arg0: i32, %arg1: i32, %arg2: memref<1x4x4x256xf32, #tpu.memory_space<vmem>>, %arg3: memref<64x217xbf16, #tpu.memory_space<vmem>>, %arg4: memref<9x256xf32, #tpu.memory_space<vmem>>, %arg5: memref<128x433xbf16, #tpu.memory_space<vmem>>, %arg6: memref<9x256xf32, #tpu.memory_space<vmem>>, %arg7: memref<1x16x256xf32, #tpu.memory_space<vmem>>, %arg8: memref<1x32x256xf32, #tpu.memory_space<vmem>>, %arg9: memref<1x16x256xf32, #tpu.memory_space<vmem>>, %arg10: memref<1x32x256xf32, #tpu.memory_space<vmem>>) attributes {dimension_semantics = [#tpu.dimension_semantics<parallel>, #tpu.dimension_semantics<arbitrary>], iteration_bounds = array<i64: 2, 2>, scalar_prefetch = 0 : i64, scratch_operands = 0 : i64, tpu.core_type = #tpu.core_type<tc>, window_params = [{transform_indices = @transform_0, window_bounds = array<i64: 1, 4, 4, 256>}, {pipeline_mode = #tpu.pipeline_mode<synchronous>, transform_indices = @transform_1, window_bounds = array<i64: 64, 217>}, {pipeline_mode = #tpu.pipeline_mode<synchronous>, transform_indices = @transform_2, window_bounds = array<i64: 9, 256>}, {pipeline_mode = #tpu.pipeline_mode<synchronous>, transform_indices = @transform_3, window_bounds = array<i64: 128, 433>}, {pipeline_mode = #tpu.pipeline_mode<synchronous>, transform_indices = @transform_4, window_bounds = array<i64: 9, 256>}, {transform_indices = @transform_5, window_bounds = array<i64: 1, 16, 256>}, {transform_indices = @transform_6, window_bounds = array<i64: 1, 32, 256>}, {transform_indices = @transform_7, window_bounds = array<i64: 1, 16, 256>}, {transform_indices = @transform_8, window_bounds = array<i64: 1, 32, 256>}]} {
    %c0_i32 = arith.constant 0 : i32
    %0 = arith.cmpi eq, %arg1, %c0_i32 : i32
    %1 = arith.extui %0 : i1 to i32
    %c0_i32_0 = arith.constant 0 : i32
    %2 = arith.cmpi ne, %1, %c0_i32_0 : i32
    scf.if %2 {
      %cst_397 = arith.constant 0.000000e+00 : f32
      %656 = vector.broadcast %cst_397 : f32 to vector<16x256xf32>
      %c0_398 = arith.constant 0 : index
      %c0_399 = arith.constant 0 : index
      %c0_400 = arith.constant 0 : index
      %657 = vector.load %arg7[%c0_398, %c0_399, %c0_400] : memref<1x16x256xf32, #tpu.memory_space<vmem>>, vector<1x16x256xf32>
      %658 = vector.shape_cast %657 : vector<1x16x256xf32> to vector<16x256xf32>
      %659 = vector.shape_cast %656 : vector<16x256xf32> to vector<1x16x256xf32>
      tpu.vector_store %arg7[%c0_398, %c0_399, %c0_400], %659 {strides = array<i32>} : memref<1x16x256xf32, #tpu.memory_space<vmem>>, vector<1x16x256xf32>,
      %cst_401 = arith.constant 0.000000e+00 : f32
      %660 = vector.broadcast %cst_401 : f32 to vector<16x256xf32>
      %c0_402 = arith.constant 0 : index
      %c0_403 = arith.constant 0 : index
      %c0_404 = arith.constant 0 : index
      %661 = vector.load %arg9[%c0_402, %c0_403, %c0_404] : memref<1x16x256xf32, #tpu.memory_space<vmem>>, vector<1x16x256xf32>
      %662 = vector.shape_cast %661 : vector<1x16x256xf32> to vector<16x256xf32>
      %663 = vector.shape_cast %660 : vector<16x256xf32> to vector<1x16x256xf32>
      tpu.vector_store %arg9[%c0_402, %c0_403, %c0_404], %663 {strides = array<i32>} : memref<1x16x256xf32, #tpu.memory_space<vmem>>, vector<1x16x256xf32>,
      %cst_405 = arith.constant 0.000000e+00 : f32
      %664 = vector.broadcast %cst_405 : f32 to vector<32x256xf32>
      %c0_406 = arith.constant 0 : index
      %c0_407 = arith.constant 0 : index
      %c0_408 = arith.constant 0 : index
      %665 = vector.load %arg8[%c0_406, %c0_407, %c0_408] : memref<1x32x256xf32, #tpu.memory_space<vmem>>, vector<1x32x256xf32>
      %666 = vector.shape_cast %665 : vector<1x32x256xf32> to vector<32x256xf32>
      %667 = vector.shape_cast %664 : vector<32x256xf32> to vector<1x32x256xf32>
      tpu.vector_store %arg8[%c0_406, %c0_407, %c0_408], %667 {strides = array<i32>} : memref<1x32x256xf32, #tpu.memory_space<vmem>>, vector<1x32x256xf32>,
      %cst_409 = arith.constant 0.000000e+00 : f32
      %668 = vector.broadcast %cst_409 : f32 to vector<32x256xf32>
      %c0_410 = arith.constant 0 : index
      %c0_411 = arith.constant 0 : index
      %c0_412 = arith.constant 0 : index
      %669 = vector.load %arg10[%c0_410, %c0_411, %c0_412] : memref<1x32x256xf32, #tpu.memory_space<vmem>>, vector<1x32x256xf32>
      %670 = vector.shape_cast %669 : vector<1x32x256xf32> to vector<32x256xf32>
      %671 = vector.shape_cast %668 : vector<32x256xf32> to vector<1x32x256xf32>
      tpu.vector_store %arg10[%c0_410, %c0_411, %c0_412], %671 {strides = array<i32>} : memref<1x32x256xf32, #tpu.memory_space<vmem>>, vector<1x32x256xf32>,
    } else {
    }
    %cst = arith.constant 1.000000e+00 : f32
    %3 = vector.broadcast %cst : f32 to vector<1x256xf32>
    %c0 = arith.constant 0 : index
    %c0_1 = arith.constant 0 : index
    %c0_2 = arith.constant 0 : index
    %c0_3 = arith.constant 0 : index
    %4 = vector.load %arg2[%c0, %c0_1, %c0_2, %c0_3] : memref<1x4x4x256xf32, #tpu.memory_space<vmem>>, vector<1x1x4x256xf32>
    %5 = vector.shape_cast %4 : vector<1x1x4x256xf32> to vector<4x256xf32>
    %c0_4 = arith.constant 0 : index
    %c0_5 = arith.constant 0 : index
    %c0_6 = arith.constant 0 : index
    %6 = vector.load %arg7[%c0_4, %c0_5, %c0_6] : memref<1x16x256xf32, #tpu.memory_space<vmem>>, vector<1x16x256xf32>
    %7 = vector.shape_cast %6 : vector<1x16x256xf32> to vector<16x256xf32>
    %c0_7 = arith.constant 0 : index
    %c0_8 = arith.constant 0 : index
    %c0_9 = arith.constant 0 : index
    %8 = vector.load %arg9[%c0_7, %c0_8, %c0_9] : memref<1x16x256xf32, #tpu.memory_space<vmem>>, vector<1x16x256xf32>
    %9 = vector.shape_cast %8 : vector<1x16x256xf32> to vector<16x256xf32>
    %cst_10 = arith.constant 0.000000e+00 : f32
    %10 = vector.broadcast %cst_10 : f32 to vector<4x256xf32>
    %11 = tpu.concatenate %5, %7, %10 in 0 : vector<4x256xf32>, vector<16x256xf32>, vector<4x256xf32> -> vector<24x256xf32>
    %c0_11 = arith.constant 0 : index
    %c0_12 = arith.constant 0 : index
    %12 = vector.load %arg4[%c0_11, %c0_12] : memref<9x256xf32, #tpu.memory_space<vmem>>, vector<1x256xf32>
    %c17_i32 = arith.constant 17 : i32
    %13 = tpu.dynamic_rotate %11 by %c17_i32 dim 1 : vector<24x256xf32>, i32 -> vector<24x256xf32>
    %14 = vector.broadcast %12 : vector<1x256xf32> to vector<24x256xf32>
    %15 = arith.mulf %13, %14 : vector<24x256xf32>
    %c1 = arith.constant 1 : index
    %c0_13 = arith.constant 0 : index
    %16 = vector.load %arg4[%c1, %c0_13] : memref<9x256xf32, #tpu.memory_space<vmem>>, vector<1x256xf32>
    %c16_i32 = arith.constant 16 : i32
    %17 = tpu.dynamic_rotate %11 by %c16_i32 dim 1 : vector<24x256xf32>, i32 -> vector<24x256xf32>
    %18 = vector.broadcast %16 : vector<1x256xf32> to vector<24x256xf32>
    %19 = arith.mulf %17, %18 : vector<24x256xf32>
    %c2 = arith.constant 2 : index
    %c0_14 = arith.constant 0 : index
    %20 = vector.load %arg4[%c2, %c0_14] : memref<9x256xf32, #tpu.memory_space<vmem>>, vector<1x256xf32>
    %c15_i32 = arith.constant 15 : i32
    %21 = tpu.dynamic_rotate %11 by %c15_i32 dim 1 : vector<24x256xf32>, i32 -> vector<24x256xf32>
    %22 = vector.broadcast %20 : vector<1x256xf32> to vector<24x256xf32>
    %23 = arith.mulf %21, %22 : vector<24x256xf32>
    %c3 = arith.constant 3 : index
    %c0_15 = arith.constant 0 : index
    %24 = vector.load %arg4[%c3, %c0_15] : memref<9x256xf32, #tpu.memory_space<vmem>>, vector<1x256xf32>
    %c1_i32 = arith.constant 1 : i32
    %25 = tpu.dynamic_rotate %11 by %c1_i32 dim 1 : vector<24x256xf32>, i32 -> vector<24x256xf32>
    %26 = vector.broadcast %24 : vector<1x256xf32> to vector<24x256xf32>
    %27 = arith.mulf %25, %26 : vector<24x256xf32>
    %c5 = arith.constant 5 : index
    %c0_16 = arith.constant 0 : index
    %28 = vector.load %arg4[%c5, %c0_16] : memref<9x256xf32, #tpu.memory_space<vmem>>, vector<1x256xf32>
    %c255_i32 = arith.constant 255 : i32
    %29 = tpu.dynamic_rotate %11 by %c255_i32 dim 1 : vector<24x256xf32>, i32 -> vector<24x256xf32>
    %30 = vector.broadcast %28 : vector<1x256xf32> to vector<24x256xf32>
    %31 = arith.mulf %29, %30 : vector<24x256xf32>
    %c6 = arith.constant 6 : index
    %c0_17 = arith.constant 0 : index
    %32 = vector.load %arg4[%c6, %c0_17] : memref<9x256xf32, #tpu.memory_space<vmem>>, vector<1x256xf32>
    %c241_i32 = arith.constant 241 : i32
    %33 = tpu.dynamic_rotate %11 by %c241_i32 dim 1 : vector<24x256xf32>, i32 -> vector<24x256xf32>
    %34 = vector.broadcast %32 : vector<1x256xf32> to vector<24x256xf32>
    %35 = arith.mulf %33, %34 : vector<24x256xf32>
    %c7 = arith.constant 7 : index
    %c0_18 = arith.constant 0 : index
    %36 = vector.load %arg4[%c7, %c0_18] : memref<9x256xf32, #tpu.memory_space<vmem>>, vector<1x256xf32>
    %c240_i32 = arith.constant 240 : i32
    %37 = tpu.dynamic_rotate %11 by %c240_i32 dim 1 : vector<24x256xf32>, i32 -> vector<24x256xf32>
    %38 = vector.broadcast %36 : vector<1x256xf32> to vector<24x256xf32>
    %39 = arith.mulf %37, %38 : vector<24x256xf32>
    %c8 = arith.constant 8 : index
    %c0_19 = arith.constant 0 : index
    %40 = vector.load %arg4[%c8, %c0_19] : memref<9x256xf32, #tpu.memory_space<vmem>>, vector<1x256xf32>
    %c239_i32 = arith.constant 239 : i32
    %41 = tpu.dynamic_rotate %11 by %c239_i32 dim 1 : vector<24x256xf32>, i32 -> vector<24x256xf32>
    %42 = vector.broadcast %40 : vector<1x256xf32> to vector<24x256xf32>
    %43 = arith.mulf %41, %42 : vector<24x256xf32>
    %44 = tpu.concatenate %15, %19, %23, %27, %11, %31, %35, %39, %43, %3 in 0 : vector<24x256xf32>, vector<24x256xf32>, vector<24x256xf32>, vector<24x256xf32>, vector<24x256xf32>, vector<24x256xf32>, vector<24x256xf32>, vector<24x256xf32>, vector<24x256xf32>, vector<1x256xf32> -> vector<217x256xf32>
    %45 = arith.truncf %44 : vector<217x256xf32> to vector<217x256xbf16>
    %c0_20 = arith.constant 0 : index
    %c0_21 = arith.constant 0 : index
    %46 = vector.load %arg3[%c0_20, %c0_21] : memref<64x217xbf16, #tpu.memory_space<vmem>>, vector<64x217xbf16>
    %cst_22 = arith.constant dense<0.000000e+00> : vector<64x256xf32>
    %47 = tpu.matmul %46, %45, %cst_22 {dimension_numbers = #tpu.dot_dimension_numbers<[1], [0], [0], [1], [0, 0, 1, 1], [], []>} : vector<64x217xbf16>, vector<217x256xbf16>, vector<64x256xf32> -> vector<64x256xf32>
    %48 = vector.extract_strided_slice %47 {offsets = [0, 0], sizes = [16, 256], strides = [1, 1]} : vector<64x256xf32> to vector<16x256xf32>
    %cst_23 = arith.constant 5.000000e-01 : f32
    %49 = vector.broadcast %cst_23 : f32 to vector<16x256xf32>
    %50 = arith.mulf %49, %48 : vector<16x256xf32>
    %51 = math.tanh %50 : vector<16x256xf32>
    %cst_24 = arith.constant 5.000000e-01 : f32
    %52 = vector.broadcast %cst_24 : f32 to vector<16x256xf32>
    %53 = arith.mulf %52, %51 : vector<16x256xf32>
    %cst_25 = arith.constant 5.000000e-01 : f32
    %54 = vector.broadcast %cst_25 : f32 to vector<16x256xf32>
    %55 = arith.addf %53, %54 : vector<16x256xf32>
    %56 = vector.extract_strided_slice %47 {offsets = [16, 0], sizes = [16, 256], strides = [1, 1]} : vector<64x256xf32> to vector<16x256xf32>
    %cst_26 = arith.constant 0.00999999977 : f32
    %57 = vector.broadcast %cst_26 : f32 to vector<16x256xf32>
    %58 = arith.addf %56, %57 : vector<16x256xf32>
    %cst_27 = arith.constant 5.000000e-01 : f32
    %59 = vector.broadcast %cst_27 : f32 to vector<16x256xf32>
    %60 = arith.mulf %59, %58 : vector<16x256xf32>
    %61 = math.tanh %60 : vector<16x256xf32>
    %cst_28 = arith.constant 5.000000e-01 : f32
    %62 = vector.broadcast %cst_28 : f32 to vector<16x256xf32>
    %63 = arith.mulf %62, %61 : vector<16x256xf32>
    %cst_29 = arith.constant 5.000000e-01 : f32
    %64 = vector.broadcast %cst_29 : f32 to vector<16x256xf32>
    %65 = arith.addf %63, %64 : vector<16x256xf32>
    %66 = vector.extract_strided_slice %47 {offsets = [32, 0], sizes = [16, 256], strides = [1, 1]} : vector<64x256xf32> to vector<16x256xf32>
    %67 = math.tanh %66 : vector<16x256xf32>
    %68 = vector.extract_strided_slice %47 {offsets = [48, 0], sizes = [16, 256], strides = [1, 1]} : vector<64x256xf32> to vector<16x256xf32>
    %cst_30 = arith.constant 5.000000e-01 : f32
    %69 = vector.broadcast %cst_30 : f32 to vector<16x256xf32>
    %70 = arith.mulf %69, %68 : vector<16x256xf32>
    %71 = math.tanh %70 : vector<16x256xf32>
    %cst_31 = arith.constant 5.000000e-01 : f32
    %72 = vector.broadcast %cst_31 : f32 to vector<16x256xf32>
    %73 = arith.mulf %72, %71 : vector<16x256xf32>
    %cst_32 = arith.constant 5.000000e-01 : f32
    %74 = vector.broadcast %cst_32 : f32 to vector<16x256xf32>
    %75 = arith.addf %73, %74 : vector<16x256xf32>
    %76 = arith.mulf %65, %9 : vector<16x256xf32>
    %77 = arith.mulf %55, %67 : vector<16x256xf32>
    %78 = arith.addf %76, %77 : vector<16x256xf32>
    %79 = math.tanh %78 : vector<16x256xf32>
    %80 = arith.mulf %75, %79 : vector<16x256xf32>
    %c0_33 = arith.constant 0 : index
    %c0_34 = arith.constant 0 : index
    %c0_35 = arith.constant 0 : index
    %81 = vector.load %arg9[%c0_33, %c0_34, %c0_35] : memref<1x16x256xf32, #tpu.memory_space<vmem>>, vector<1x16x256xf32>
    %82 = vector.shape_cast %81 : vector<1x16x256xf32> to vector<16x256xf32>
    %83 = vector.shape_cast %78 : vector<16x256xf32> to vector<1x16x256xf32>
    tpu.vector_store %arg9[%c0_33, %c0_34, %c0_35], %83 {strides = array<i32>} : memref<1x16x256xf32, #tpu.memory_space<vmem>>, vector<1x16x256xf32>,
    %c0_36 = arith.constant 0 : index
    %c0_37 = arith.constant 0 : index
    %c0_38 = arith.constant 0 : index
    %84 = vector.load %arg7[%c0_36, %c0_37, %c0_38] : memref<1x16x256xf32, #tpu.memory_space<vmem>>, vector<1x16x256xf32>
    %85 = vector.shape_cast %84 : vector<1x16x256xf32> to vector<16x256xf32>
    %86 = vector.shape_cast %80 : vector<16x256xf32> to vector<1x16x256xf32>
    tpu.vector_store %arg7[%c0_36, %c0_37, %c0_38], %86 {strides = array<i32>} : memref<1x16x256xf32, #tpu.memory_space<vmem>>, vector<1x16x256xf32>,
    %c0_39 = arith.constant 0 : index
    %c0_40 = arith.constant 0 : index
    %c0_41 = arith.constant 0 : index
    %87 = vector.load %arg8[%c0_39, %c0_40, %c0_41] : memref<1x32x256xf32, #tpu.memory_space<vmem>>, vector<1x32x256xf32>
    %88 = vector.shape_cast %87 : vector<1x32x256xf32> to vector<32x256xf32>
    %c0_42 = arith.constant 0 : index
    %c0_43 = arith.constant 0 : index
    %c0_44 = arith.constant 0 : index
    %89 = vector.load %arg10[%c0_42, %c0_43, %c0_44] : memref<1x32x256xf32, #tpu.memory_space<vmem>>, vector<1x32x256xf32>
    %90 = vector.shape_cast %89 : vector<1x32x256xf32> to vector<32x256xf32>
    %91 = tpu.concatenate %80, %88 in 0 : vector<16x256xf32>, vector<32x256xf32> -> vector<48x256xf32>
    %c0_45 = arith.constant 0 : index
    %c0_46 = arith.constant 0 : index
    %92 = vector.load %arg6[%c0_45, %c0_46] : memref<9x256xf32, #tpu.memory_space<vmem>>, vector<1x256xf32>
    %c17_i32_47 = arith.constant 17 : i32
    %93 = tpu.dynamic_rotate %91 by %c17_i32_47 dim 1 : vector<48x256xf32>, i32 -> vector<48x256xf32>
    %94 = vector.broadcast %92 : vector<1x256xf32> to vector<48x256xf32>
    %95 = arith.mulf %93, %94 : vector<48x256xf32>
    %c1_48 = arith.constant 1 : index
    %c0_49 = arith.constant 0 : index
    %96 = vector.load %arg6[%c1_48, %c0_49] : memref<9x256xf32, #tpu.memory_space<vmem>>, vector<1x256xf32>
    %c16_i32_50 = arith.constant 16 : i32
    %97 = tpu.dynamic_rotate %91 by %c16_i32_50 dim 1 : vector<48x256xf32>, i32 -> vector<48x256xf32>
    %98 = vector.broadcast %96 : vector<1x256xf32> to vector<48x256xf32>
    %99 = arith.mulf %97, %98 : vector<48x256xf32>
    %c2_51 = arith.constant 2 : index
    %c0_52 = arith.constant 0 : index
    %100 = vector.load %arg6[%c2_51, %c0_52] : memref<9x256xf32, #tpu.memory_space<vmem>>, vector<1x256xf32>
    %c15_i32_53 = arith.constant 15 : i32
    %101 = tpu.dynamic_rotate %91 by %c15_i32_53 dim 1 : vector<48x256xf32>, i32 -> vector<48x256xf32>
    %102 = vector.broadcast %100 : vector<1x256xf32> to vector<48x256xf32>
    %103 = arith.mulf %101, %102 : vector<48x256xf32>
    %c3_54 = arith.constant 3 : index
    %c0_55 = arith.constant 0 : index
    %104 = vector.load %arg6[%c3_54, %c0_55] : memref<9x256xf32, #tpu.memory_space<vmem>>, vector<1x256xf32>
    %c1_i32_56 = arith.constant 1 : i32
    %105 = tpu.dynamic_rotate %91 by %c1_i32_56 dim 1 : vector<48x256xf32>, i32 -> vector<48x256xf32>
    %106 = vector.broadcast %104 : vector<1x256xf32> to vector<48x256xf32>
    %107 = arith.mulf %105, %106 : vector<48x256xf32>
    %c5_57 = arith.constant 5 : index
    %c0_58 = arith.constant 0 : index
    %108 = vector.load %arg6[%c5_57, %c0_58] : memref<9x256xf32, #tpu.memory_space<vmem>>, vector<1x256xf32>
    %c255_i32_59 = arith.constant 255 : i32
    %109 = tpu.dynamic_rotate %91 by %c255_i32_59 dim 1 : vector<48x256xf32>, i32 -> vector<48x256xf32>
    %110 = vector.broadcast %108 : vector<1x256xf32> to vector<48x256xf32>
    %111 = arith.mulf %109, %110 : vector<48x256xf32>
    %c6_60 = arith.constant 6 : index
    %c0_61 = arith.constant 0 : index
    %112 = vector.load %arg6[%c6_60, %c0_61] : memref<9x256xf32, #tpu.memory_space<vmem>>, vector<1x256xf32>
    %c241_i32_62 = arith.constant 241 : i32
    %113 = tpu.dynamic_rotate %91 by %c241_i32_62 dim 1 : vector<48x256xf32>, i32 -> vector<48x256xf32>
    %114 = vector.broadcast %112 : vector<1x256xf32> to vector<48x256xf32>
    %115 = arith.mulf %113, %114 : vector<48x256xf32>
    %c7_63 = arith.constant 7 : index
    %c0_64 = arith.constant 0 : index
    %116 = vector.load %arg6[%c7_63, %c0_64] : memref<9x256xf32, #tpu.memory_space<vmem>>, vector<1x256xf32>
    %c240_i32_65 = arith.constant 240 : i32
    %117 = tpu.dynamic_rotate %91 by %c240_i32_65 dim 1 : vector<48x256xf32>, i32 -> vector<48x256xf32>
    %118 = vector.broadcast %116 : vector<1x256xf32> to vector<48x256xf32>
    %119 = arith.mulf %117, %118 : vector<48x256xf32>
    %c8_66 = arith.constant 8 : index
    %c0_67 = arith.constant 0 : index
    %120 = vector.load %arg6[%c8_66, %c0_67] : memref<9x256xf32, #tpu.memory_space<vmem>>, vector<1x256xf32>
    %c239_i32_68 = arith.constant 239 : i32
    %121 = tpu.dynamic_rotate %91 by %c239_i32_68 dim 1 : vector<48x256xf32>, i32 -> vector<48x256xf32>
    %122 = vector.broadcast %120 : vector<1x256xf32> to vector<48x256xf32>
    %123 = arith.mulf %121, %122 : vector<48x256xf32>
    %124 = tpu.concatenate %95, %99, %103, %107, %91, %111, %115, %119, %123, %3 in 0 : vector<48x256xf32>, vector<48x256xf32>, vector<48x256xf32>, vector<48x256xf32>, vector<48x256xf32>, vector<48x256xf32>, vector<48x256xf32>, vector<48x256xf32>, vector<48x256xf32>, vector<1x256xf32> -> vector<433x256xf32>
    %125 = arith.truncf %124 : vector<433x256xf32> to vector<433x256xbf16>
    %c0_69 = arith.constant 0 : index
    %c0_70 = arith.constant 0 : index
    %126 = vector.load %arg5[%c0_69, %c0_70] : memref<128x433xbf16, #tpu.memory_space<vmem>>, vector<128x433xbf16>
    %cst_71 = arith.constant dense<0.000000e+00> : vector<128x256xf32>
    %127 = tpu.matmul %126, %125, %cst_71 {dimension_numbers = #tpu.dot_dimension_numbers<[1], [0], [0], [1], [0, 0, 1, 1], [], []>} : vector<128x433xbf16>, vector<433x256xbf16>, vector<128x256xf32> -> vector<128x256xf32>
    %128 = vector.extract_strided_slice %127 {offsets = [0, 0], sizes = [32, 256], strides = [1, 1]} : vector<128x256xf32> to vector<32x256xf32>
    %cst_72 = arith.constant 5.000000e-01 : f32
    %129 = vector.broadcast %cst_72 : f32 to vector<32x256xf32>
    %130 = arith.mulf %129, %128 : vector<32x256xf32>
    %131 = math.tanh %130 : vector<32x256xf32>
    %cst_73 = arith.constant 5.000000e-01 : f32
    %132 = vector.broadcast %cst_73 : f32 to vector<32x256xf32>
    %133 = arith.mulf %132, %131 : vector<32x256xf32>
    %cst_74 = arith.constant 5.000000e-01 : f32
    %134 = vector.broadcast %cst_74 : f32 to vector<32x256xf32>
    %135 = arith.addf %133, %134 : vector<32x256xf32>
    %136 = vector.extract_strided_slice %127 {offsets = [32, 0], sizes = [32, 256], strides = [1, 1]} : vector<128x256xf32> to vector<32x256xf32>
    %cst_75 = arith.constant 0.00999999977 : f32
    %137 = vector.broadcast %cst_75 : f32 to vector<32x256xf32>
    %138 = arith.addf %136, %137 : vector<32x256xf32>
    %cst_76 = arith.constant 5.000000e-01 : f32
    %139 = vector.broadcast %cst_76 : f32 to vector<32x256xf32>
    %140 = arith.mulf %139, %138 : vector<32x256xf32>
    %141 = math.tanh %140 : vector<32x256xf32>
    %cst_77 = arith.constant 5.000000e-01 : f32
    %142 = vector.broadcast %cst_77 : f32 to vector<32x256xf32>
    %143 = arith.mulf %142, %141 : vector<32x256xf32>
    %cst_78 = arith.constant 5.000000e-01 : f32
    %144 = vector.broadcast %cst_78 : f32 to vector<32x256xf32>
    %145 = arith.addf %143, %144 : vector<32x256xf32>
    %146 = vector.extract_strided_slice %127 {offsets = [64, 0], sizes = [32, 256], strides = [1, 1]} : vector<128x256xf32> to vector<32x256xf32>
    %147 = math.tanh %146 : vector<32x256xf32>
    %148 = vector.extract_strided_slice %127 {offsets = [96, 0], sizes = [32, 256], strides = [1, 1]} : vector<128x256xf32> to vector<32x256xf32>
    %cst_79 = arith.constant 5.000000e-01 : f32
    %149 = vector.broadcast %cst_79 : f32 to vector<32x256xf32>
    %150 = arith.mulf %149, %148 : vector<32x256xf32>
    %151 = math.tanh %150 : vector<32x256xf32>
    %cst_80 = arith.constant 5.000000e-01 : f32
    %152 = vector.broadcast %cst_80 : f32 to vector<32x256xf32>
    %153 = arith.mulf %152, %151 : vector<32x256xf32>
    %cst_81 = arith.constant 5.000000e-01 : f32
    %154 = vector.broadcast %cst_81 : f32 to vector<32x256xf32>
    %155 = arith.addf %153, %154 : vector<32x256xf32>
    %156 = arith.mulf %145, %90 : vector<32x256xf32>
    %157 = arith.mulf %135, %147 : vector<32x256xf32>
    %158 = arith.addf %156, %157 : vector<32x256xf32>
    %159 = math.tanh %158 : vector<32x256xf32>
    %160 = arith.mulf %155, %159 : vector<32x256xf32>
    %c0_82 = arith.constant 0 : index
    %c0_83 = arith.constant 0 : index
    %c0_84 = arith.constant 0 : index
    %161 = vector.load %arg10[%c0_82, %c0_83, %c0_84] : memref<1x32x256xf32, #tpu.memory_space<vmem>>, vector<1x32x256xf32>
    %162 = vector.shape_cast %161 : vector<1x32x256xf32> to vector<32x256xf32>
    %163 = vector.shape_cast %158 : vector<32x256xf32> to vector<1x32x256xf32>
    tpu.vector_store %arg10[%c0_82, %c0_83, %c0_84], %163 {strides = array<i32>} : memref<1x32x256xf32, #tpu.memory_space<vmem>>, vector<1x32x256xf32>,
    %c0_85 = arith.constant 0 : index
    %c0_86 = arith.constant 0 : index
    %c0_87 = arith.constant 0 : index
    %164 = vector.load %arg8[%c0_85, %c0_86, %c0_87] : memref<1x32x256xf32, #tpu.memory_space<vmem>>, vector<1x32x256xf32>
    %165 = vector.shape_cast %164 : vector<1x32x256xf32> to vector<32x256xf32>
    %166 = vector.shape_cast %160 : vector<32x256xf32> to vector<1x32x256xf32>
    tpu.vector_store %arg8[%c0_85, %c0_86, %c0_87], %166 {strides = array<i32>} : memref<1x32x256xf32, #tpu.memory_space<vmem>>, vector<1x32x256xf32>,
    %c0_88 = arith.constant 0 : index
    %c1_89 = arith.constant 1 : index
    %c0_90 = arith.constant 0 : index
    %c0_91 = arith.constant 0 : index
    %167 = vector.load %arg2[%c0_88, %c1_89, %c0_90, %c0_91] : memref<1x4x4x256xf32, #tpu.memory_space<vmem>>, vector<1x1x4x256xf32>
    %168 = vector.shape_cast %167 : vector<1x1x4x256xf32> to vector<4x256xf32>
    %c0_92 = arith.constant 0 : index
    %c0_93 = arith.constant 0 : index
    %c0_94 = arith.constant 0 : index
    %169 = vector.load %arg7[%c0_92, %c0_93, %c0_94] : memref<1x16x256xf32, #tpu.memory_space<vmem>>, vector<1x16x256xf32>
    %170 = vector.shape_cast %169 : vector<1x16x256xf32> to vector<16x256xf32>
    %c0_95 = arith.constant 0 : index
    %c0_96 = arith.constant 0 : index
    %c0_97 = arith.constant 0 : index
    %171 = vector.load %arg9[%c0_95, %c0_96, %c0_97] : memref<1x16x256xf32, #tpu.memory_space<vmem>>, vector<1x16x256xf32>
    %172 = vector.shape_cast %171 : vector<1x16x256xf32> to vector<16x256xf32>
    %cst_98 = arith.constant 0.000000e+00 : f32
    %173 = vector.broadcast %cst_98 : f32 to vector<4x256xf32>
    %174 = tpu.concatenate %168, %170, %173 in 0 : vector<4x256xf32>, vector<16x256xf32>, vector<4x256xf32> -> vector<24x256xf32>
    %c0_99 = arith.constant 0 : index
    %c0_100 = arith.constant 0 : index
    %175 = vector.load %arg4[%c0_99, %c0_100] : memref<9x256xf32, #tpu.memory_space<vmem>>, vector<1x256xf32>
    %c17_i32_101 = arith.constant 17 : i32
    %176 = tpu.dynamic_rotate %174 by %c17_i32_101 dim 1 : vector<24x256xf32>, i32 -> vector<24x256xf32>
    %177 = vector.broadcast %175 : vector<1x256xf32> to vector<24x256xf32>
    %178 = arith.mulf %176, %177 : vector<24x256xf32>
    %c1_102 = arith.constant 1 : index
    %c0_103 = arith.constant 0 : index
    %179 = vector.load %arg4[%c1_102, %c0_103] : memref<9x256xf32, #tpu.memory_space<vmem>>, vector<1x256xf32>
    %c16_i32_104 = arith.constant 16 : i32
    %180 = tpu.dynamic_rotate %174 by %c16_i32_104 dim 1 : vector<24x256xf32>, i32 -> vector<24x256xf32>
    %181 = vector.broadcast %179 : vector<1x256xf32> to vector<24x256xf32>
    %182 = arith.mulf %180, %181 : vector<24x256xf32>
    %c2_105 = arith.constant 2 : index
    %c0_106 = arith.constant 0 : index
    %183 = vector.load %arg4[%c2_105, %c0_106] : memref<9x256xf32, #tpu.memory_space<vmem>>, vector<1x256xf32>
    %c15_i32_107 = arith.constant 15 : i32
    %184 = tpu.dynamic_rotate %174 by %c15_i32_107 dim 1 : vector<24x256xf32>, i32 -> vector<24x256xf32>
    %185 = vector.broadcast %183 : vector<1x256xf32> to vector<24x256xf32>
    %186 = arith.mulf %184, %185 : vector<24x256xf32>
    %c3_108 = arith.constant 3 : index
    %c0_109 = arith.constant 0 : index
    %187 = vector.load %arg4[%c3_108, %c0_109] : memref<9x256xf32, #tpu.memory_space<vmem>>, vector<1x256xf32>
    %c1_i32_110 = arith.constant 1 : i32
    %188 = tpu.dynamic_rotate %174 by %c1_i32_110 dim 1 : vector<24x256xf32>, i32 -> vector<24x256xf32>
    %189 = vector.broadcast %187 : vector<1x256xf32> to vector<24x256xf32>
    %190 = arith.mulf %188, %189 : vector<24x256xf32>
    %c5_111 = arith.constant 5 : index
    %c0_112 = arith.constant 0 : index
    %191 = vector.load %arg4[%c5_111, %c0_112] : memref<9x256xf32, #tpu.memory_space<vmem>>, vector<1x256xf32>
    %c255_i32_113 = arith.constant 255 : i32
    %192 = tpu.dynamic_rotate %174 by %c255_i32_113 dim 1 : vector<24x256xf32>, i32 -> vector<24x256xf32>
    %193 = vector.broadcast %191 : vector<1x256xf32> to vector<24x256xf32>
    %194 = arith.mulf %192, %193 : vector<24x256xf32>
    %c6_114 = arith.constant 6 : index
    %c0_115 = arith.constant 0 : index
    %195 = vector.load %arg4[%c6_114, %c0_115] : memref<9x256xf32, #tpu.memory_space<vmem>>, vector<1x256xf32>
    %c241_i32_116 = arith.constant 241 : i32
    %196 = tpu.dynamic_rotate %174 by %c241_i32_116 dim 1 : vector<24x256xf32>, i32 -> vector<24x256xf32>
    %197 = vector.broadcast %195 : vector<1x256xf32> to vector<24x256xf32>
    %198 = arith.mulf %196, %197 : vector<24x256xf32>
    %c7_117 = arith.constant 7 : index
    %c0_118 = arith.constant 0 : index
    %199 = vector.load %arg4[%c7_117, %c0_118] : memref<9x256xf32, #tpu.memory_space<vmem>>, vector<1x256xf32>
    %c240_i32_119 = arith.constant 240 : i32
    %200 = tpu.dynamic_rotate %174 by %c240_i32_119 dim 1 : vector<24x256xf32>, i32 -> vector<24x256xf32>
    %201 = vector.broadcast %199 : vector<1x256xf32> to vector<24x256xf32>
    %202 = arith.mulf %200, %201 : vector<24x256xf32>
    %c8_120 = arith.constant 8 : index
    %c0_121 = arith.constant 0 : index
    %203 = vector.load %arg4[%c8_120, %c0_121] : memref<9x256xf32, #tpu.memory_space<vmem>>, vector<1x256xf32>
    %c239_i32_122 = arith.constant 239 : i32
    %204 = tpu.dynamic_rotate %174 by %c239_i32_122 dim 1 : vector<24x256xf32>, i32 -> vector<24x256xf32>
    %205 = vector.broadcast %203 : vector<1x256xf32> to vector<24x256xf32>
    %206 = arith.mulf %204, %205 : vector<24x256xf32>
    %207 = tpu.concatenate %178, %182, %186, %190, %174, %194, %198, %202, %206, %3 in 0 : vector<24x256xf32>, vector<24x256xf32>, vector<24x256xf32>, vector<24x256xf32>, vector<24x256xf32>, vector<24x256xf32>, vector<24x256xf32>, vector<24x256xf32>, vector<24x256xf32>, vector<1x256xf32> -> vector<217x256xf32>
    %208 = arith.truncf %207 : vector<217x256xf32> to vector<217x256xbf16>
    %c0_123 = arith.constant 0 : index
    %c0_124 = arith.constant 0 : index
    %209 = vector.load %arg3[%c0_123, %c0_124] : memref<64x217xbf16, #tpu.memory_space<vmem>>, vector<64x217xbf16>
    %cst_125 = arith.constant dense<0.000000e+00> : vector<64x256xf32>
    %210 = tpu.matmul %209, %208, %cst_125 {dimension_numbers = #tpu.dot_dimension_numbers<[1], [0], [0], [1], [0, 0, 1, 1], [], []>} : vector<64x217xbf16>, vector<217x256xbf16>, vector<64x256xf32> -> vector<64x256xf32>
    %211 = vector.extract_strided_slice %210 {offsets = [0, 0], sizes = [16, 256], strides = [1, 1]} : vector<64x256xf32> to vector<16x256xf32>
    %cst_126 = arith.constant 5.000000e-01 : f32
    %212 = vector.broadcast %cst_126 : f32 to vector<16x256xf32>
    %213 = arith.mulf %212, %211 : vector<16x256xf32>
    %214 = math.tanh %213 : vector<16x256xf32>
    %cst_127 = arith.constant 5.000000e-01 : f32
    %215 = vector.broadcast %cst_127 : f32 to vector<16x256xf32>
    %216 = arith.mulf %215, %214 : vector<16x256xf32>
    %cst_128 = arith.constant 5.000000e-01 : f32
    %217 = vector.broadcast %cst_128 : f32 to vector<16x256xf32>
    %218 = arith.addf %216, %217 : vector<16x256xf32>
    %219 = vector.extract_strided_slice %210 {offsets = [16, 0], sizes = [16, 256], strides = [1, 1]} : vector<64x256xf32> to vector<16x256xf32>
    %cst_129 = arith.constant 0.00999999977 : f32
    %220 = vector.broadcast %cst_129 : f32 to vector<16x256xf32>
    %221 = arith.addf %219, %220 : vector<16x256xf32>
    %cst_130 = arith.constant 5.000000e-01 : f32
    %222 = vector.broadcast %cst_130 : f32 to vector<16x256xf32>
    %223 = arith.mulf %222, %221 : vector<16x256xf32>
    %224 = math.tanh %223 : vector<16x256xf32>
    %cst_131 = arith.constant 5.000000e-01 : f32
    %225 = vector.broadcast %cst_131 : f32 to vector<16x256xf32>
    %226 = arith.mulf %225, %224 : vector<16x256xf32>
    %cst_132 = arith.constant 5.000000e-01 : f32
    %227 = vector.broadcast %cst_132 : f32 to vector<16x256xf32>
    %228 = arith.addf %226, %227 : vector<16x256xf32>
    %229 = vector.extract_strided_slice %210 {offsets = [32, 0], sizes = [16, 256], strides = [1, 1]} : vector<64x256xf32> to vector<16x256xf32>
    %230 = math.tanh %229 : vector<16x256xf32>
    %231 = vector.extract_strided_slice %210 {offsets = [48, 0], sizes = [16, 256], strides = [1, 1]} : vector<64x256xf32> to vector<16x256xf32>
    %cst_133 = arith.constant 5.000000e-01 : f32
    %232 = vector.broadcast %cst_133 : f32 to vector<16x256xf32>
    %233 = arith.mulf %232, %231 : vector<16x256xf32>
    %234 = math.tanh %233 : vector<16x256xf32>
    %cst_134 = arith.constant 5.000000e-01 : f32
    %235 = vector.broadcast %cst_134 : f32 to vector<16x256xf32>
    %236 = arith.mulf %235, %234 : vector<16x256xf32>
    %cst_135 = arith.constant 5.000000e-01 : f32
    %237 = vector.broadcast %cst_135 : f32 to vector<16x256xf32>
    %238 = arith.addf %236, %237 : vector<16x256xf32>
    %239 = arith.mulf %228, %172 : vector<16x256xf32>
    %240 = arith.mulf %218, %230 : vector<16x256xf32>
    %241 = arith.addf %239, %240 : vector<16x256xf32>
    %242 = math.tanh %241 : vector<16x256xf32>
    %243 = arith.mulf %238, %242 : vector<16x256xf32>
    %c0_136 = arith.constant 0 : index
    %c0_137 = arith.constant 0 : index
    %c0_138 = arith.constant 0 : index
    %244 = vector.load %arg9[%c0_136, %c0_137, %c0_138] : memref<1x16x256xf32, #tpu.memory_space<vmem>>, vector<1x16x256xf32>
    %245 = vector.shape_cast %244 : vector<1x16x256xf32> to vector<16x256xf32>
    %246 = vector.shape_cast %241 : vector<16x256xf32> to vector<1x16x256xf32>
    tpu.vector_store %arg9[%c0_136, %c0_137, %c0_138], %246 {strides = array<i32>} : memref<1x16x256xf32, #tpu.memory_space<vmem>>, vector<1x16x256xf32>,
    %c0_139 = arith.constant 0 : index
    %c0_140 = arith.constant 0 : index
    %c0_141 = arith.constant 0 : index
    %247 = vector.load %arg7[%c0_139, %c0_140, %c0_141] : memref<1x16x256xf32, #tpu.memory_space<vmem>>, vector<1x16x256xf32>
    %248 = vector.shape_cast %247 : vector<1x16x256xf32> to vector<16x256xf32>
    %249 = vector.shape_cast %243 : vector<16x256xf32> to vector<1x16x256xf32>
    tpu.vector_store %arg7[%c0_139, %c0_140, %c0_141], %249 {strides = array<i32>} : memref<1x16x256xf32, #tpu.memory_space<vmem>>, vector<1x16x256xf32>,
    %c0_142 = arith.constant 0 : index
    %c0_143 = arith.constant 0 : index
    %c0_144 = arith.constant 0 : index
    %250 = vector.load %arg8[%c0_142, %c0_143, %c0_144] : memref<1x32x256xf32, #tpu.memory_space<vmem>>, vector<1x32x256xf32>
    %251 = vector.shape_cast %250 : vector<1x32x256xf32> to vector<32x256xf32>
    %c0_145 = arith.constant 0 : index
    %c0_146 = arith.constant 0 : index
    %c0_147 = arith.constant 0 : index
    %252 = vector.load %arg10[%c0_145, %c0_146, %c0_147] : memref<1x32x256xf32, #tpu.memory_space<vmem>>, vector<1x32x256xf32>
    %253 = vector.shape_cast %252 : vector<1x32x256xf32> to vector<32x256xf32>
    %254 = tpu.concatenate %243, %251 in 0 : vector<16x256xf32>, vector<32x256xf32> -> vector<48x256xf32>
    %c0_148 = arith.constant 0 : index
    %c0_149 = arith.constant 0 : index
    %255 = vector.load %arg6[%c0_148, %c0_149] : memref<9x256xf32, #tpu.memory_space<vmem>>, vector<1x256xf32>
    %c17_i32_150 = arith.constant 17 : i32
    %256 = tpu.dynamic_rotate %254 by %c17_i32_150 dim 1 : vector<48x256xf32>, i32 -> vector<48x256xf32>
    %257 = vector.broadcast %255 : vector<1x256xf32> to vector<48x256xf32>
    %258 = arith.mulf %256, %257 : vector<48x256xf32>
    %c1_151 = arith.constant 1 : index
    %c0_152 = arith.constant 0 : index
    %259 = vector.load %arg6[%c1_151, %c0_152] : memref<9x256xf32, #tpu.memory_space<vmem>>, vector<1x256xf32>
    %c16_i32_153 = arith.constant 16 : i32
    %260 = tpu.dynamic_rotate %254 by %c16_i32_153 dim 1 : vector<48x256xf32>, i32 -> vector<48x256xf32>
    %261 = vector.broadcast %259 : vector<1x256xf32> to vector<48x256xf32>
    %262 = arith.mulf %260, %261 : vector<48x256xf32>
    %c2_154 = arith.constant 2 : index
    %c0_155 = arith.constant 0 : index
    %263 = vector.load %arg6[%c2_154, %c0_155] : memref<9x256xf32, #tpu.memory_space<vmem>>, vector<1x256xf32>
    %c15_i32_156 = arith.constant 15 : i32
    %264 = tpu.dynamic_rotate %254 by %c15_i32_156 dim 1 : vector<48x256xf32>, i32 -> vector<48x256xf32>
    %265 = vector.broadcast %263 : vector<1x256xf32> to vector<48x256xf32>
    %266 = arith.mulf %264, %265 : vector<48x256xf32>
    %c3_157 = arith.constant 3 : index
    %c0_158 = arith.constant 0 : index
    %267 = vector.load %arg6[%c3_157, %c0_158] : memref<9x256xf32, #tpu.memory_space<vmem>>, vector<1x256xf32>
    %c1_i32_159 = arith.constant 1 : i32
    %268 = tpu.dynamic_rotate %254 by %c1_i32_159 dim 1 : vector<48x256xf32>, i32 -> vector<48x256xf32>
    %269 = vector.broadcast %267 : vector<1x256xf32> to vector<48x256xf32>
    %270 = arith.mulf %268, %269 : vector<48x256xf32>
    %c5_160 = arith.constant 5 : index
    %c0_161 = arith.constant 0 : index
    %271 = vector.load %arg6[%c5_160, %c0_161] : memref<9x256xf32, #tpu.memory_space<vmem>>, vector<1x256xf32>
    %c255_i32_162 = arith.constant 255 : i32
    %272 = tpu.dynamic_rotate %254 by %c255_i32_162 dim 1 : vector<48x256xf32>, i32 -> vector<48x256xf32>
    %273 = vector.broadcast %271 : vector<1x256xf32> to vector<48x256xf32>
    %274 = arith.mulf %272, %273 : vector<48x256xf32>
    %c6_163 = arith.constant 6 : index
    %c0_164 = arith.constant 0 : index
    %275 = vector.load %arg6[%c6_163, %c0_164] : memref<9x256xf32, #tpu.memory_space<vmem>>, vector<1x256xf32>
    %c241_i32_165 = arith.constant 241 : i32
    %276 = tpu.dynamic_rotate %254 by %c241_i32_165 dim 1 : vector<48x256xf32>, i32 -> vector<48x256xf32>
    %277 = vector.broadcast %275 : vector<1x256xf32> to vector<48x256xf32>
    %278 = arith.mulf %276, %277 : vector<48x256xf32>
    %c7_166 = arith.constant 7 : index
    %c0_167 = arith.constant 0 : index
    %279 = vector.load %arg6[%c7_166, %c0_167] : memref<9x256xf32, #tpu.memory_space<vmem>>, vector<1x256xf32>
    %c240_i32_168 = arith.constant 240 : i32
    %280 = tpu.dynamic_rotate %254 by %c240_i32_168 dim 1 : vector<48x256xf32>, i32 -> vector<48x256xf32>
    %281 = vector.broadcast %279 : vector<1x256xf32> to vector<48x256xf32>
    %282 = arith.mulf %280, %281 : vector<48x256xf32>
    %c8_169 = arith.constant 8 : index
    %c0_170 = arith.constant 0 : index
    %283 = vector.load %arg6[%c8_169, %c0_170] : memref<9x256xf32, #tpu.memory_space<vmem>>, vector<1x256xf32>
    %c239_i32_171 = arith.constant 239 : i32
    %284 = tpu.dynamic_rotate %254 by %c239_i32_171 dim 1 : vector<48x256xf32>, i32 -> vector<48x256xf32>
    %285 = vector.broadcast %283 : vector<1x256xf32> to vector<48x256xf32>
    %286 = arith.mulf %284, %285 : vector<48x256xf32>
    %287 = tpu.concatenate %258, %262, %266, %270, %254, %274, %278, %282, %286, %3 in 0 : vector<48x256xf32>, vector<48x256xf32>, vector<48x256xf32>, vector<48x256xf32>, vector<48x256xf32>, vector<48x256xf32>, vector<48x256xf32>, vector<48x256xf32>, vector<48x256xf32>, vector<1x256xf32> -> vector<433x256xf32>
    %288 = arith.truncf %287 : vector<433x256xf32> to vector<433x256xbf16>
    %c0_172 = arith.constant 0 : index
    %c0_173 = arith.constant 0 : index
    %289 = vector.load %arg5[%c0_172, %c0_173] : memref<128x433xbf16, #tpu.memory_space<vmem>>, vector<128x433xbf16>
    %cst_174 = arith.constant dense<0.000000e+00> : vector<128x256xf32>
    %290 = tpu.matmul %289, %288, %cst_174 {dimension_numbers = #tpu.dot_dimension_numbers<[1], [0], [0], [1], [0, 0, 1, 1], [], []>} : vector<128x433xbf16>, vector<433x256xbf16>, vector<128x256xf32> -> vector<128x256xf32>
    %291 = vector.extract_strided_slice %290 {offsets = [0, 0], sizes = [32, 256], strides = [1, 1]} : vector<128x256xf32> to vector<32x256xf32>
    %cst_175 = arith.constant 5.000000e-01 : f32
    %292 = vector.broadcast %cst_175 : f32 to vector<32x256xf32>
    %293 = arith.mulf %292, %291 : vector<32x256xf32>
    %294 = math.tanh %293 : vector<32x256xf32>
    %cst_176 = arith.constant 5.000000e-01 : f32
    %295 = vector.broadcast %cst_176 : f32 to vector<32x256xf32>
    %296 = arith.mulf %295, %294 : vector<32x256xf32>
    %cst_177 = arith.constant 5.000000e-01 : f32
    %297 = vector.broadcast %cst_177 : f32 to vector<32x256xf32>
    %298 = arith.addf %296, %297 : vector<32x256xf32>
    %299 = vector.extract_strided_slice %290 {offsets = [32, 0], sizes = [32, 256], strides = [1, 1]} : vector<128x256xf32> to vector<32x256xf32>
    %cst_178 = arith.constant 0.00999999977 : f32
    %300 = vector.broadcast %cst_178 : f32 to vector<32x256xf32>
    %301 = arith.addf %299, %300 : vector<32x256xf32>
    %cst_179 = arith.constant 5.000000e-01 : f32
    %302 = vector.broadcast %cst_179 : f32 to vector<32x256xf32>
    %303 = arith.mulf %302, %301 : vector<32x256xf32>
    %304 = math.tanh %303 : vector<32x256xf32>
    %cst_180 = arith.constant 5.000000e-01 : f32
    %305 = vector.broadcast %cst_180 : f32 to vector<32x256xf32>
    %306 = arith.mulf %305, %304 : vector<32x256xf32>
    %cst_181 = arith.constant 5.000000e-01 : f32
    %307 = vector.broadcast %cst_181 : f32 to vector<32x256xf32>
    %308 = arith.addf %306, %307 : vector<32x256xf32>
    %309 = vector.extract_strided_slice %290 {offsets = [64, 0], sizes = [32, 256], strides = [1, 1]} : vector<128x256xf32> to vector<32x256xf32>
    %310 = math.tanh %309 : vector<32x256xf32>
    %311 = vector.extract_strided_slice %290 {offsets = [96, 0], sizes = [32, 256], strides = [1, 1]} : vector<128x256xf32> to vector<32x256xf32>
    %cst_182 = arith.constant 5.000000e-01 : f32
    %312 = vector.broadcast %cst_182 : f32 to vector<32x256xf32>
    %313 = arith.mulf %312, %311 : vector<32x256xf32>
    %314 = math.tanh %313 : vector<32x256xf32>
    %cst_183 = arith.constant 5.000000e-01 : f32
    %315 = vector.broadcast %cst_183 : f32 to vector<32x256xf32>
    %316 = arith.mulf %315, %314 : vector<32x256xf32>
    %cst_184 = arith.constant 5.000000e-01 : f32
    %317 = vector.broadcast %cst_184 : f32 to vector<32x256xf32>
    %318 = arith.addf %316, %317 : vector<32x256xf32>
    %319 = arith.mulf %308, %253 : vector<32x256xf32>
    %320 = arith.mulf %298, %310 : vector<32x256xf32>
    %321 = arith.addf %319, %320 : vector<32x256xf32>
    %322 = math.tanh %321 : vector<32x256xf32>
    %323 = arith.mulf %318, %322 : vector<32x256xf32>
    %c0_185 = arith.constant 0 : index
    %c0_186 = arith.constant 0 : index
    %c0_187 = arith.constant 0 : index
    %324 = vector.load %arg10[%c0_185, %c0_186, %c0_187] : memref<1x32x256xf32, #tpu.memory_space<vmem>>, vector<1x32x256xf32>
    %325 = vector.shape_cast %324 : vector<1x32x256xf32> to vector<32x256xf32>
    %326 = vector.shape_cast %321 : vector<32x256xf32> to vector<1x32x256xf32>
    tpu.vector_store %arg10[%c0_185, %c0_186, %c0_187], %326 {strides = array<i32>} : memref<1x32x256xf32, #tpu.memory_space<vmem>>, vector<1x32x256xf32>,
    %c0_188 = arith.constant 0 : index
    %c0_189 = arith.constant 0 : index
    %c0_190 = arith.constant 0 : index
    %327 = vector.load %arg8[%c0_188, %c0_189, %c0_190] : memref<1x32x256xf32, #tpu.memory_space<vmem>>, vector<1x32x256xf32>
    %328 = vector.shape_cast %327 : vector<1x32x256xf32> to vector<32x256xf32>
    %329 = vector.shape_cast %323 : vector<32x256xf32> to vector<1x32x256xf32>
    tpu.vector_store %arg8[%c0_188, %c0_189, %c0_190], %329 {strides = array<i32>} : memref<1x32x256xf32, #tpu.memory_space<vmem>>, vector<1x32x256xf32>,
    %c0_191 = arith.constant 0 : index
    %c2_192 = arith.constant 2 : index
    %c0_193 = arith.constant 0 : index
    %c0_194 = arith.constant 0 : index
    %330 = vector.load %arg2[%c0_191, %c2_192, %c0_193, %c0_194] : memref<1x4x4x256xf32, #tpu.memory_space<vmem>>, vector<1x1x4x256xf32>
    %331 = vector.shape_cast %330 : vector<1x1x4x256xf32> to vector<4x256xf32>
    %c0_195 = arith.constant 0 : index
    %c0_196 = arith.constant 0 : index
    %c0_197 = arith.constant 0 : index
    %332 = vector.load %arg7[%c0_195, %c0_196, %c0_197] : memref<1x16x256xf32, #tpu.memory_space<vmem>>, vector<1x16x256xf32>
    %333 = vector.shape_cast %332 : vector<1x16x256xf32> to vector<16x256xf32>
    %c0_198 = arith.constant 0 : index
    %c0_199 = arith.constant 0 : index
    %c0_200 = arith.constant 0 : index
    %334 = vector.load %arg9[%c0_198, %c0_199, %c0_200] : memref<1x16x256xf32, #tpu.memory_space<vmem>>, vector<1x16x256xf32>
    %335 = vector.shape_cast %334 : vector<1x16x256xf32> to vector<16x256xf32>
    %cst_201 = arith.constant 0.000000e+00 : f32
    %336 = vector.broadcast %cst_201 : f32 to vector<4x256xf32>
    %337 = tpu.concatenate %331, %333, %336 in 0 : vector<4x256xf32>, vector<16x256xf32>, vector<4x256xf32> -> vector<24x256xf32>
    %c0_202 = arith.constant 0 : index
    %c0_203 = arith.constant 0 : index
    %338 = vector.load %arg4[%c0_202, %c0_203] : memref<9x256xf32, #tpu.memory_space<vmem>>, vector<1x256xf32>
    %c17_i32_204 = arith.constant 17 : i32
    %339 = tpu.dynamic_rotate %337 by %c17_i32_204 dim 1 : vector<24x256xf32>, i32 -> vector<24x256xf32>
    %340 = vector.broadcast %338 : vector<1x256xf32> to vector<24x256xf32>
    %341 = arith.mulf %339, %340 : vector<24x256xf32>
    %c1_205 = arith.constant 1 : index
    %c0_206 = arith.constant 0 : index
    %342 = vector.load %arg4[%c1_205, %c0_206] : memref<9x256xf32, #tpu.memory_space<vmem>>, vector<1x256xf32>
    %c16_i32_207 = arith.constant 16 : i32
    %343 = tpu.dynamic_rotate %337 by %c16_i32_207 dim 1 : vector<24x256xf32>, i32 -> vector<24x256xf32>
    %344 = vector.broadcast %342 : vector<1x256xf32> to vector<24x256xf32>
    %345 = arith.mulf %343, %344 : vector<24x256xf32>
    %c2_208 = arith.constant 2 : index
    %c0_209 = arith.constant 0 : index
    %346 = vector.load %arg4[%c2_208, %c0_209] : memref<9x256xf32, #tpu.memory_space<vmem>>, vector<1x256xf32>
    %c15_i32_210 = arith.constant 15 : i32
    %347 = tpu.dynamic_rotate %337 by %c15_i32_210 dim 1 : vector<24x256xf32>, i32 -> vector<24x256xf32>
    %348 = vector.broadcast %346 : vector<1x256xf32> to vector<24x256xf32>
    %349 = arith.mulf %347, %348 : vector<24x256xf32>
    %c3_211 = arith.constant 3 : index
    %c0_212 = arith.constant 0 : index
    %350 = vector.load %arg4[%c3_211, %c0_212] : memref<9x256xf32, #tpu.memory_space<vmem>>, vector<1x256xf32>
    %c1_i32_213 = arith.constant 1 : i32
    %351 = tpu.dynamic_rotate %337 by %c1_i32_213 dim 1 : vector<24x256xf32>, i32 -> vector<24x256xf32>
    %352 = vector.broadcast %350 : vector<1x256xf32> to vector<24x256xf32>
    %353 = arith.mulf %351, %352 : vector<24x256xf32>
    %c5_214 = arith.constant 5 : index
    %c0_215 = arith.constant 0 : index
    %354 = vector.load %arg4[%c5_214, %c0_215] : memref<9x256xf32, #tpu.memory_space<vmem>>, vector<1x256xf32>
    %c255_i32_216 = arith.constant 255 : i32
    %355 = tpu.dynamic_rotate %337 by %c255_i32_216 dim 1 : vector<24x256xf32>, i32 -> vector<24x256xf32>
    %356 = vector.broadcast %354 : vector<1x256xf32> to vector<24x256xf32>
    %357 = arith.mulf %355, %356 : vector<24x256xf32>
    %c6_217 = arith.constant 6 : index
    %c0_218 = arith.constant 0 : index
    %358 = vector.load %arg4[%c6_217, %c0_218] : memref<9x256xf32, #tpu.memory_space<vmem>>, vector<1x256xf32>
    %c241_i32_219 = arith.constant 241 : i32
    %359 = tpu.dynamic_rotate %337 by %c241_i32_219 dim 1 : vector<24x256xf32>, i32 -> vector<24x256xf32>
    %360 = vector.broadcast %358 : vector<1x256xf32> to vector<24x256xf32>
    %361 = arith.mulf %359, %360 : vector<24x256xf32>
    %c7_220 = arith.constant 7 : index
    %c0_221 = arith.constant 0 : index
    %362 = vector.load %arg4[%c7_220, %c0_221] : memref<9x256xf32, #tpu.memory_space<vmem>>, vector<1x256xf32>
    %c240_i32_222 = arith.constant 240 : i32
    %363 = tpu.dynamic_rotate %337 by %c240_i32_222 dim 1 : vector<24x256xf32>, i32 -> vector<24x256xf32>
    %364 = vector.broadcast %362 : vector<1x256xf32> to vector<24x256xf32>
    %365 = arith.mulf %363, %364 : vector<24x256xf32>
    %c8_223 = arith.constant 8 : index
    %c0_224 = arith.constant 0 : index
    %366 = vector.load %arg4[%c8_223, %c0_224] : memref<9x256xf32, #tpu.memory_space<vmem>>, vector<1x256xf32>
    %c239_i32_225 = arith.constant 239 : i32
    %367 = tpu.dynamic_rotate %337 by %c239_i32_225 dim 1 : vector<24x256xf32>, i32 -> vector<24x256xf32>
    %368 = vector.broadcast %366 : vector<1x256xf32> to vector<24x256xf32>
    %369 = arith.mulf %367, %368 : vector<24x256xf32>
    %370 = tpu.concatenate %341, %345, %349, %353, %337, %357, %361, %365, %369, %3 in 0 : vector<24x256xf32>, vector<24x256xf32>, vector<24x256xf32>, vector<24x256xf32>, vector<24x256xf32>, vector<24x256xf32>, vector<24x256xf32>, vector<24x256xf32>, vector<24x256xf32>, vector<1x256xf32> -> vector<217x256xf32>
    %371 = arith.truncf %370 : vector<217x256xf32> to vector<217x256xbf16>
    %c0_226 = arith.constant 0 : index
    %c0_227 = arith.constant 0 : index
    %372 = vector.load %arg3[%c0_226, %c0_227] : memref<64x217xbf16, #tpu.memory_space<vmem>>, vector<64x217xbf16>
    %cst_228 = arith.constant dense<0.000000e+00> : vector<64x256xf32>
    %373 = tpu.matmul %372, %371, %cst_228 {dimension_numbers = #tpu.dot_dimension_numbers<[1], [0], [0], [1], [0, 0, 1, 1], [], []>} : vector<64x217xbf16>, vector<217x256xbf16>, vector<64x256xf32> -> vector<64x256xf32>
    %374 = vector.extract_strided_slice %373 {offsets = [0, 0], sizes = [16, 256], strides = [1, 1]} : vector<64x256xf32> to vector<16x256xf32>
    %cst_229 = arith.constant 5.000000e-01 : f32
    %375 = vector.broadcast %cst_229 : f32 to vector<16x256xf32>
    %376 = arith.mulf %375, %374 : vector<16x256xf32>
    %377 = math.tanh %376 : vector<16x256xf32>
    %cst_230 = arith.constant 5.000000e-01 : f32
    %378 = vector.broadcast %cst_230 : f32 to vector<16x256xf32>
    %379 = arith.mulf %378, %377 : vector<16x256xf32>
    %cst_231 = arith.constant 5.000000e-01 : f32
    %380 = vector.broadcast %cst_231 : f32 to vector<16x256xf32>
    %381 = arith.addf %379, %380 : vector<16x256xf32>
    %382 = vector.extract_strided_slice %373 {offsets = [16, 0], sizes = [16, 256], strides = [1, 1]} : vector<64x256xf32> to vector<16x256xf32>
    %cst_232 = arith.constant 0.00999999977 : f32
    %383 = vector.broadcast %cst_232 : f32 to vector<16x256xf32>
    %384 = arith.addf %382, %383 : vector<16x256xf32>
    %cst_233 = arith.constant 5.000000e-01 : f32
    %385 = vector.broadcast %cst_233 : f32 to vector<16x256xf32>
    %386 = arith.mulf %385, %384 : vector<16x256xf32>
    %387 = math.tanh %386 : vector<16x256xf32>
    %cst_234 = arith.constant 5.000000e-01 : f32
    %388 = vector.broadcast %cst_234 : f32 to vector<16x256xf32>
    %389 = arith.mulf %388, %387 : vector<16x256xf32>
    %cst_235 = arith.constant 5.000000e-01 : f32
    %390 = vector.broadcast %cst_235 : f32 to vector<16x256xf32>
    %391 = arith.addf %389, %390 : vector<16x256xf32>
    %392 = vector.extract_strided_slice %373 {offsets = [32, 0], sizes = [16, 256], strides = [1, 1]} : vector<64x256xf32> to vector<16x256xf32>
    %393 = math.tanh %392 : vector<16x256xf32>
    %394 = vector.extract_strided_slice %373 {offsets = [48, 0], sizes = [16, 256], strides = [1, 1]} : vector<64x256xf32> to vector<16x256xf32>
    %cst_236 = arith.constant 5.000000e-01 : f32
    %395 = vector.broadcast %cst_236 : f32 to vector<16x256xf32>
    %396 = arith.mulf %395, %394 : vector<16x256xf32>
    %397 = math.tanh %396 : vector<16x256xf32>
    %cst_237 = arith.constant 5.000000e-01 : f32
    %398 = vector.broadcast %cst_237 : f32 to vector<16x256xf32>
    %399 = arith.mulf %398, %397 : vector<16x256xf32>
    %cst_238 = arith.constant 5.000000e-01 : f32
    %400 = vector.broadcast %cst_238 : f32 to vector<16x256xf32>
    %401 = arith.addf %399, %400 : vector<16x256xf32>
    %402 = arith.mulf %391, %335 : vector<16x256xf32>
    %403 = arith.mulf %381, %393 : vector<16x256xf32>
    %404 = arith.addf %402, %403 : vector<16x256xf32>
    %405 = math.tanh %404 : vector<16x256xf32>
    %406 = arith.mulf %401, %405 : vector<16x256xf32>
    %c0_239 = arith.constant 0 : index
    %c0_240 = arith.constant 0 : index
    %c0_241 = arith.constant 0 : index
    %407 = vector.load %arg9[%c0_239, %c0_240, %c0_241] : memref<1x16x256xf32, #tpu.memory_space<vmem>>, vector<1x16x256xf32>
    %408 = vector.shape_cast %407 : vector<1x16x256xf32> to vector<16x256xf32>
    %409 = vector.shape_cast %404 : vector<16x256xf32> to vector<1x16x256xf32>
    tpu.vector_store %arg9[%c0_239, %c0_240, %c0_241], %409 {strides = array<i32>} : memref<1x16x256xf32, #tpu.memory_space<vmem>>, vector<1x16x256xf32>,
    %c0_242 = arith.constant 0 : index
    %c0_243 = arith.constant 0 : index
    %c0_244 = arith.constant 0 : index
    %410 = vector.load %arg7[%c0_242, %c0_243, %c0_244] : memref<1x16x256xf32, #tpu.memory_space<vmem>>, vector<1x16x256xf32>
    %411 = vector.shape_cast %410 : vector<1x16x256xf32> to vector<16x256xf32>
    %412 = vector.shape_cast %406 : vector<16x256xf32> to vector<1x16x256xf32>
    tpu.vector_store %arg7[%c0_242, %c0_243, %c0_244], %412 {strides = array<i32>} : memref<1x16x256xf32, #tpu.memory_space<vmem>>, vector<1x16x256xf32>,
    %c0_245 = arith.constant 0 : index
    %c0_246 = arith.constant 0 : index
    %c0_247 = arith.constant 0 : index
    %413 = vector.load %arg8[%c0_245, %c0_246, %c0_247] : memref<1x32x256xf32, #tpu.memory_space<vmem>>, vector<1x32x256xf32>
    %414 = vector.shape_cast %413 : vector<1x32x256xf32> to vector<32x256xf32>
    %c0_248 = arith.constant 0 : index
    %c0_249 = arith.constant 0 : index
    %c0_250 = arith.constant 0 : index
    %415 = vector.load %arg10[%c0_248, %c0_249, %c0_250] : memref<1x32x256xf32, #tpu.memory_space<vmem>>, vector<1x32x256xf32>
    %416 = vector.shape_cast %415 : vector<1x32x256xf32> to vector<32x256xf32>
    %417 = tpu.concatenate %406, %414 in 0 : vector<16x256xf32>, vector<32x256xf32> -> vector<48x256xf32>
    %c0_251 = arith.constant 0 : index
    %c0_252 = arith.constant 0 : index
    %418 = vector.load %arg6[%c0_251, %c0_252] : memref<9x256xf32, #tpu.memory_space<vmem>>, vector<1x256xf32>
    %c17_i32_253 = arith.constant 17 : i32
    %419 = tpu.dynamic_rotate %417 by %c17_i32_253 dim 1 : vector<48x256xf32>, i32 -> vector<48x256xf32>
    %420 = vector.broadcast %418 : vector<1x256xf32> to vector<48x256xf32>
    %421 = arith.mulf %419, %420 : vector<48x256xf32>
    %c1_254 = arith.constant 1 : index
    %c0_255 = arith.constant 0 : index
    %422 = vector.load %arg6[%c1_254, %c0_255] : memref<9x256xf32, #tpu.memory_space<vmem>>, vector<1x256xf32>
    %c16_i32_256 = arith.constant 16 : i32
    %423 = tpu.dynamic_rotate %417 by %c16_i32_256 dim 1 : vector<48x256xf32>, i32 -> vector<48x256xf32>
    %424 = vector.broadcast %422 : vector<1x256xf32> to vector<48x256xf32>
    %425 = arith.mulf %423, %424 : vector<48x256xf32>
    %c2_257 = arith.constant 2 : index
    %c0_258 = arith.constant 0 : index
    %426 = vector.load %arg6[%c2_257, %c0_258] : memref<9x256xf32, #tpu.memory_space<vmem>>, vector<1x256xf32>
    %c15_i32_259 = arith.constant 15 : i32
    %427 = tpu.dynamic_rotate %417 by %c15_i32_259 dim 1 : vector<48x256xf32>, i32 -> vector<48x256xf32>
    %428 = vector.broadcast %426 : vector<1x256xf32> to vector<48x256xf32>
    %429 = arith.mulf %427, %428 : vector<48x256xf32>
    %c3_260 = arith.constant 3 : index
    %c0_261 = arith.constant 0 : index
    %430 = vector.load %arg6[%c3_260, %c0_261] : memref<9x256xf32, #tpu.memory_space<vmem>>, vector<1x256xf32>
    %c1_i32_262 = arith.constant 1 : i32
    %431 = tpu.dynamic_rotate %417 by %c1_i32_262 dim 1 : vector<48x256xf32>, i32 -> vector<48x256xf32>
    %432 = vector.broadcast %430 : vector<1x256xf32> to vector<48x256xf32>
    %433 = arith.mulf %431, %432 : vector<48x256xf32>
    %c5_263 = arith.constant 5 : index
    %c0_264 = arith.constant 0 : index
    %434 = vector.load %arg6[%c5_263, %c0_264] : memref<9x256xf32, #tpu.memory_space<vmem>>, vector<1x256xf32>
    %c255_i32_265 = arith.constant 255 : i32
    %435 = tpu.dynamic_rotate %417 by %c255_i32_265 dim 1 : vector<48x256xf32>, i32 -> vector<48x256xf32>
    %436 = vector.broadcast %434 : vector<1x256xf32> to vector<48x256xf32>
    %437 = arith.mulf %435, %436 : vector<48x256xf32>
    %c6_266 = arith.constant 6 : index
    %c0_267 = arith.constant 0 : index
    %438 = vector.load %arg6[%c6_266, %c0_267] : memref<9x256xf32, #tpu.memory_space<vmem>>, vector<1x256xf32>
    %c241_i32_268 = arith.constant 241 : i32
    %439 = tpu.dynamic_rotate %417 by %c241_i32_268 dim 1 : vector<48x256xf32>, i32 -> vector<48x256xf32>
    %440 = vector.broadcast %438 : vector<1x256xf32> to vector<48x256xf32>
    %441 = arith.mulf %439, %440 : vector<48x256xf32>
    %c7_269 = arith.constant 7 : index
    %c0_270 = arith.constant 0 : index
    %442 = vector.load %arg6[%c7_269, %c0_270] : memref<9x256xf32, #tpu.memory_space<vmem>>, vector<1x256xf32>
    %c240_i32_271 = arith.constant 240 : i32
    %443 = tpu.dynamic_rotate %417 by %c240_i32_271 dim 1 : vector<48x256xf32>, i32 -> vector<48x256xf32>
    %444 = vector.broadcast %442 : vector<1x256xf32> to vector<48x256xf32>
    %445 = arith.mulf %443, %444 : vector<48x256xf32>
    %c8_272 = arith.constant 8 : index
    %c0_273 = arith.constant 0 : index
    %446 = vector.load %arg6[%c8_272, %c0_273] : memref<9x256xf32, #tpu.memory_space<vmem>>, vector<1x256xf32>
    %c239_i32_274 = arith.constant 239 : i32
    %447 = tpu.dynamic_rotate %417 by %c239_i32_274 dim 1 : vector<48x256xf32>, i32 -> vector<48x256xf32>
    %448 = vector.broadcast %446 : vector<1x256xf32> to vector<48x256xf32>
    %449 = arith.mulf %447, %448 : vector<48x256xf32>
    %450 = tpu.concatenate %421, %425, %429, %433, %417, %437, %441, %445, %449, %3 in 0 : vector<48x256xf32>, vector<48x256xf32>, vector<48x256xf32>, vector<48x256xf32>, vector<48x256xf32>, vector<48x256xf32>, vector<48x256xf32>, vector<48x256xf32>, vector<48x256xf32>, vector<1x256xf32> -> vector<433x256xf32>
    %451 = arith.truncf %450 : vector<433x256xf32> to vector<433x256xbf16>
    %c0_275 = arith.constant 0 : index
    %c0_276 = arith.constant 0 : index
    %452 = vector.load %arg5[%c0_275, %c0_276] : memref<128x433xbf16, #tpu.memory_space<vmem>>, vector<128x433xbf16>
    %cst_277 = arith.constant dense<0.000000e+00> : vector<128x256xf32>
    %453 = tpu.matmul %452, %451, %cst_277 {dimension_numbers = #tpu.dot_dimension_numbers<[1], [0], [0], [1], [0, 0, 1, 1], [], []>} : vector<128x433xbf16>, vector<433x256xbf16>, vector<128x256xf32> -> vector<128x256xf32>
    %454 = vector.extract_strided_slice %453 {offsets = [0, 0], sizes = [32, 256], strides = [1, 1]} : vector<128x256xf32> to vector<32x256xf32>
    %cst_278 = arith.constant 5.000000e-01 : f32
    %455 = vector.broadcast %cst_278 : f32 to vector<32x256xf32>
    %456 = arith.mulf %455, %454 : vector<32x256xf32>
    %457 = math.tanh %456 : vector<32x256xf32>
    %cst_279 = arith.constant 5.000000e-01 : f32
    %458 = vector.broadcast %cst_279 : f32 to vector<32x256xf32>
    %459 = arith.mulf %458, %457 : vector<32x256xf32>
    %cst_280 = arith.constant 5.000000e-01 : f32
    %460 = vector.broadcast %cst_280 : f32 to vector<32x256xf32>
    %461 = arith.addf %459, %460 : vector<32x256xf32>
    %462 = vector.extract_strided_slice %453 {offsets = [32, 0], sizes = [32, 256], strides = [1, 1]} : vector<128x256xf32> to vector<32x256xf32>
    %cst_281 = arith.constant 0.00999999977 : f32
    %463 = vector.broadcast %cst_281 : f32 to vector<32x256xf32>
    %464 = arith.addf %462, %463 : vector<32x256xf32>
    %cst_282 = arith.constant 5.000000e-01 : f32
    %465 = vector.broadcast %cst_282 : f32 to vector<32x256xf32>
    %466 = arith.mulf %465, %464 : vector<32x256xf32>
    %467 = math.tanh %466 : vector<32x256xf32>
    %cst_283 = arith.constant 5.000000e-01 : f32
    %468 = vector.broadcast %cst_283 : f32 to vector<32x256xf32>
    %469 = arith.mulf %468, %467 : vector<32x256xf32>
    %cst_284 = arith.constant 5.000000e-01 : f32
    %470 = vector.broadcast %cst_284 : f32 to vector<32x256xf32>
    %471 = arith.addf %469, %470 : vector<32x256xf32>
    %472 = vector.extract_strided_slice %453 {offsets = [64, 0], sizes = [32, 256], strides = [1, 1]} : vector<128x256xf32> to vector<32x256xf32>
    %473 = math.tanh %472 : vector<32x256xf32>
    %474 = vector.extract_strided_slice %453 {offsets = [96, 0], sizes = [32, 256], strides = [1, 1]} : vector<128x256xf32> to vector<32x256xf32>
    %cst_285 = arith.constant 5.000000e-01 : f32
    %475 = vector.broadcast %cst_285 : f32 to vector<32x256xf32>
    %476 = arith.mulf %475, %474 : vector<32x256xf32>
    %477 = math.tanh %476 : vector<32x256xf32>
    %cst_286 = arith.constant 5.000000e-01 : f32
    %478 = vector.broadcast %cst_286 : f32 to vector<32x256xf32>
    %479 = arith.mulf %478, %477 : vector<32x256xf32>
    %cst_287 = arith.constant 5.000000e-01 : f32
    %480 = vector.broadcast %cst_287 : f32 to vector<32x256xf32>
    %481 = arith.addf %479, %480 : vector<32x256xf32>
    %482 = arith.mulf %471, %416 : vector<32x256xf32>
    %483 = arith.mulf %461, %473 : vector<32x256xf32>
    %484 = arith.addf %482, %483 : vector<32x256xf32>
    %485 = math.tanh %484 : vector<32x256xf32>
    %486 = arith.mulf %481, %485 : vector<32x256xf32>
    %c0_288 = arith.constant 0 : index
    %c0_289 = arith.constant 0 : index
    %c0_290 = arith.constant 0 : index
    %487 = vector.load %arg10[%c0_288, %c0_289, %c0_290] : memref<1x32x256xf32, #tpu.memory_space<vmem>>, vector<1x32x256xf32>
    %488 = vector.shape_cast %487 : vector<1x32x256xf32> to vector<32x256xf32>
    %489 = vector.shape_cast %484 : vector<32x256xf32> to vector<1x32x256xf32>
    tpu.vector_store %arg10[%c0_288, %c0_289, %c0_290], %489 {strides = array<i32>} : memref<1x32x256xf32, #tpu.memory_space<vmem>>, vector<1x32x256xf32>,
    %c0_291 = arith.constant 0 : index
    %c0_292 = arith.constant 0 : index
    %c0_293 = arith.constant 0 : index
    %490 = vector.load %arg8[%c0_291, %c0_292, %c0_293] : memref<1x32x256xf32, #tpu.memory_space<vmem>>, vector<1x32x256xf32>
    %491 = vector.shape_cast %490 : vector<1x32x256xf32> to vector<32x256xf32>
    %492 = vector.shape_cast %486 : vector<32x256xf32> to vector<1x32x256xf32>
    tpu.vector_store %arg8[%c0_291, %c0_292, %c0_293], %492 {strides = array<i32>} : memref<1x32x256xf32, #tpu.memory_space<vmem>>, vector<1x32x256xf32>,
    %c0_294 = arith.constant 0 : index
    %c3_295 = arith.constant 3 : index
    %c0_296 = arith.constant 0 : index
    %c0_297 = arith.constant 0 : index
    %493 = vector.load %arg2[%c0_294, %c3_295, %c0_296, %c0_297] : memref<1x4x4x256xf32, #tpu.memory_space<vmem>>, vector<1x1x4x256xf32>
    %494 = vector.shape_cast %493 : vector<1x1x4x256xf32> to vector<4x256xf32>
    %c0_298 = arith.constant 0 : index
    %c0_299 = arith.constant 0 : index
    %c0_300 = arith.constant 0 : index
    %495 = vector.load %arg7[%c0_298, %c0_299, %c0_300] : memref<1x16x256xf32, #tpu.memory_space<vmem>>, vector<1x16x256xf32>
    %496 = vector.shape_cast %495 : vector<1x16x256xf32> to vector<16x256xf32>
    %c0_301 = arith.constant 0 : index
    %c0_302 = arith.constant 0 : index
    %c0_303 = arith.constant 0 : index
    %497 = vector.load %arg9[%c0_301, %c0_302, %c0_303] : memref<1x16x256xf32, #tpu.memory_space<vmem>>, vector<1x16x256xf32>
    %498 = vector.shape_cast %497 : vector<1x16x256xf32> to vector<16x256xf32>
    %cst_304 = arith.constant 0.000000e+00 : f32
    %499 = vector.broadcast %cst_304 : f32 to vector<4x256xf32>
    %500 = tpu.concatenate %494, %496, %499 in 0 : vector<4x256xf32>, vector<16x256xf32>, vector<4x256xf32> -> vector<24x256xf32>
    %c0_305 = arith.constant 0 : index
    %c0_306 = arith.constant 0 : index
    %501 = vector.load %arg4[%c0_305, %c0_306] : memref<9x256xf32, #tpu.memory_space<vmem>>, vector<1x256xf32>
    %c17_i32_307 = arith.constant 17 : i32
    %502 = tpu.dynamic_rotate %500 by %c17_i32_307 dim 1 : vector<24x256xf32>, i32 -> vector<24x256xf32>
    %503 = vector.broadcast %501 : vector<1x256xf32> to vector<24x256xf32>
    %504 = arith.mulf %502, %503 : vector<24x256xf32>
    %c1_308 = arith.constant 1 : index
    %c0_309 = arith.constant 0 : index
    %505 = vector.load %arg4[%c1_308, %c0_309] : memref<9x256xf32, #tpu.memory_space<vmem>>, vector<1x256xf32>
    %c16_i32_310 = arith.constant 16 : i32
    %506 = tpu.dynamic_rotate %500 by %c16_i32_310 dim 1 : vector<24x256xf32>, i32 -> vector<24x256xf32>
    %507 = vector.broadcast %505 : vector<1x256xf32> to vector<24x256xf32>
    %508 = arith.mulf %506, %507 : vector<24x256xf32>
    %c2_311 = arith.constant 2 : index
    %c0_312 = arith.constant 0 : index
    %509 = vector.load %arg4[%c2_311, %c0_312] : memref<9x256xf32, #tpu.memory_space<vmem>>, vector<1x256xf32>
    %c15_i32_313 = arith.constant 15 : i32
    %510 = tpu.dynamic_rotate %500 by %c15_i32_313 dim 1 : vector<24x256xf32>, i32 -> vector<24x256xf32>
    %511 = vector.broadcast %509 : vector<1x256xf32> to vector<24x256xf32>
    %512 = arith.mulf %510, %511 : vector<24x256xf32>
    %c3_314 = arith.constant 3 : index
    %c0_315 = arith.constant 0 : index
    %513 = vector.load %arg4[%c3_314, %c0_315] : memref<9x256xf32, #tpu.memory_space<vmem>>, vector<1x256xf32>
    %c1_i32_316 = arith.constant 1 : i32
    %514 = tpu.dynamic_rotate %500 by %c1_i32_316 dim 1 : vector<24x256xf32>, i32 -> vector<24x256xf32>
    %515 = vector.broadcast %513 : vector<1x256xf32> to vector<24x256xf32>
    %516 = arith.mulf %514, %515 : vector<24x256xf32>
    %c5_317 = arith.constant 5 : index
    %c0_318 = arith.constant 0 : index
    %517 = vector.load %arg4[%c5_317, %c0_318] : memref<9x256xf32, #tpu.memory_space<vmem>>, vector<1x256xf32>
    %c255_i32_319 = arith.constant 255 : i32
    %518 = tpu.dynamic_rotate %500 by %c255_i32_319 dim 1 : vector<24x256xf32>, i32 -> vector<24x256xf32>
    %519 = vector.broadcast %517 : vector<1x256xf32> to vector<24x256xf32>
    %520 = arith.mulf %518, %519 : vector<24x256xf32>
    %c6_320 = arith.constant 6 : index
    %c0_321 = arith.constant 0 : index
    %521 = vector.load %arg4[%c6_320, %c0_321] : memref<9x256xf32, #tpu.memory_space<vmem>>, vector<1x256xf32>
    %c241_i32_322 = arith.constant 241 : i32
    %522 = tpu.dynamic_rotate %500 by %c241_i32_322 dim 1 : vector<24x256xf32>, i32 -> vector<24x256xf32>
    %523 = vector.broadcast %521 : vector<1x256xf32> to vector<24x256xf32>
    %524 = arith.mulf %522, %523 : vector<24x256xf32>
    %c7_323 = arith.constant 7 : index
    %c0_324 = arith.constant 0 : index
    %525 = vector.load %arg4[%c7_323, %c0_324] : memref<9x256xf32, #tpu.memory_space<vmem>>, vector<1x256xf32>
    %c240_i32_325 = arith.constant 240 : i32
    %526 = tpu.dynamic_rotate %500 by %c240_i32_325 dim 1 : vector<24x256xf32>, i32 -> vector<24x256xf32>
    %527 = vector.broadcast %525 : vector<1x256xf32> to vector<24x256xf32>
    %528 = arith.mulf %526, %527 : vector<24x256xf32>
    %c8_326 = arith.constant 8 : index
    %c0_327 = arith.constant 0 : index
    %529 = vector.load %arg4[%c8_326, %c0_327] : memref<9x256xf32, #tpu.memory_space<vmem>>, vector<1x256xf32>
    %c239_i32_328 = arith.constant 239 : i32
    %530 = tpu.dynamic_rotate %500 by %c239_i32_328 dim 1 : vector<24x256xf32>, i32 -> vector<24x256xf32>
    %531 = vector.broadcast %529 : vector<1x256xf32> to vector<24x256xf32>
    %532 = arith.mulf %530, %531 : vector<24x256xf32>
    %533 = tpu.concatenate %504, %508, %512, %516, %500, %520, %524, %528, %532, %3 in 0 : vector<24x256xf32>, vector<24x256xf32>, vector<24x256xf32>, vector<24x256xf32>, vector<24x256xf32>, vector<24x256xf32>, vector<24x256xf32>, vector<24x256xf32>, vector<24x256xf32>, vector<1x256xf32> -> vector<217x256xf32>
    %534 = arith.truncf %533 : vector<217x256xf32> to vector<217x256xbf16>
    %c0_329 = arith.constant 0 : index
    %c0_330 = arith.constant 0 : index
    %535 = vector.load %arg3[%c0_329, %c0_330] : memref<64x217xbf16, #tpu.memory_space<vmem>>, vector<64x217xbf16>
    %cst_331 = arith.constant dense<0.000000e+00> : vector<64x256xf32>
    %536 = tpu.matmul %535, %534, %cst_331 {dimension_numbers = #tpu.dot_dimension_numbers<[1], [0], [0], [1], [0, 0, 1, 1], [], []>} : vector<64x217xbf16>, vector<217x256xbf16>, vector<64x256xf32> -> vector<64x256xf32>
    %537 = vector.extract_strided_slice %536 {offsets = [0, 0], sizes = [16, 256], strides = [1, 1]} : vector<64x256xf32> to vector<16x256xf32>
    %cst_332 = arith.constant 5.000000e-01 : f32
    %538 = vector.broadcast %cst_332 : f32 to vector<16x256xf32>
    %539 = arith.mulf %538, %537 : vector<16x256xf32>
    %540 = math.tanh %539 : vector<16x256xf32>
    %cst_333 = arith.constant 5.000000e-01 : f32
    %541 = vector.broadcast %cst_333 : f32 to vector<16x256xf32>
    %542 = arith.mulf %541, %540 : vector<16x256xf32>
    %cst_334 = arith.constant 5.000000e-01 : f32
    %543 = vector.broadcast %cst_334 : f32 to vector<16x256xf32>
    %544 = arith.addf %542, %543 : vector<16x256xf32>
    %545 = vector.extract_strided_slice %536 {offsets = [16, 0], sizes = [16, 256], strides = [1, 1]} : vector<64x256xf32> to vector<16x256xf32>
    %cst_335 = arith.constant 0.00999999977 : f32
    %546 = vector.broadcast %cst_335 : f32 to vector<16x256xf32>
    %547 = arith.addf %545, %546 : vector<16x256xf32>
    %cst_336 = arith.constant 5.000000e-01 : f32
    %548 = vector.broadcast %cst_336 : f32 to vector<16x256xf32>
    %549 = arith.mulf %548, %547 : vector<16x256xf32>
    %550 = math.tanh %549 : vector<16x256xf32>
    %cst_337 = arith.constant 5.000000e-01 : f32
    %551 = vector.broadcast %cst_337 : f32 to vector<16x256xf32>
    %552 = arith.mulf %551, %550 : vector<16x256xf32>
    %cst_338 = arith.constant 5.000000e-01 : f32
    %553 = vector.broadcast %cst_338 : f32 to vector<16x256xf32>
    %554 = arith.addf %552, %553 : vector<16x256xf32>
    %555 = vector.extract_strided_slice %536 {offsets = [32, 0], sizes = [16, 256], strides = [1, 1]} : vector<64x256xf32> to vector<16x256xf32>
    %556 = math.tanh %555 : vector<16x256xf32>
    %557 = vector.extract_strided_slice %536 {offsets = [48, 0], sizes = [16, 256], strides = [1, 1]} : vector<64x256xf32> to vector<16x256xf32>
    %cst_339 = arith.constant 5.000000e-01 : f32
    %558 = vector.broadcast %cst_339 : f32 to vector<16x256xf32>
    %559 = arith.mulf %558, %557 : vector<16x256xf32>
    %560 = math.tanh %559 : vector<16x256xf32>
    %cst_340 = arith.constant 5.000000e-01 : f32
    %561 = vector.broadcast %cst_340 : f32 to vector<16x256xf32>
    %562 = arith.mulf %561, %560 : vector<16x256xf32>
    %cst_341 = arith.constant 5.000000e-01 : f32
    %563 = vector.broadcast %cst_341 : f32 to vector<16x256xf32>
    %564 = arith.addf %562, %563 : vector<16x256xf32>
    %565 = arith.mulf %554, %498 : vector<16x256xf32>
    %566 = arith.mulf %544, %556 : vector<16x256xf32>
    %567 = arith.addf %565, %566 : vector<16x256xf32>
    %568 = math.tanh %567 : vector<16x256xf32>
    %569 = arith.mulf %564, %568 : vector<16x256xf32>
    %c0_342 = arith.constant 0 : index
    %c0_343 = arith.constant 0 : index
    %c0_344 = arith.constant 0 : index
    %570 = vector.load %arg9[%c0_342, %c0_343, %c0_344] : memref<1x16x256xf32, #tpu.memory_space<vmem>>, vector<1x16x256xf32>
    %571 = vector.shape_cast %570 : vector<1x16x256xf32> to vector<16x256xf32>
    %572 = vector.shape_cast %567 : vector<16x256xf32> to vector<1x16x256xf32>
    tpu.vector_store %arg9[%c0_342, %c0_343, %c0_344], %572 {strides = array<i32>} : memref<1x16x256xf32, #tpu.memory_space<vmem>>, vector<1x16x256xf32>,
    %c0_345 = arith.constant 0 : index
    %c0_346 = arith.constant 0 : index
    %c0_347 = arith.constant 0 : index
    %573 = vector.load %arg7[%c0_345, %c0_346, %c0_347] : memref<1x16x256xf32, #tpu.memory_space<vmem>>, vector<1x16x256xf32>
    %574 = vector.shape_cast %573 : vector<1x16x256xf32> to vector<16x256xf32>
    %575 = vector.shape_cast %569 : vector<16x256xf32> to vector<1x16x256xf32>
    tpu.vector_store %arg7[%c0_345, %c0_346, %c0_347], %575 {strides = array<i32>} : memref<1x16x256xf32, #tpu.memory_space<vmem>>, vector<1x16x256xf32>,
    %c0_348 = arith.constant 0 : index
    %c0_349 = arith.constant 0 : index
    %c0_350 = arith.constant 0 : index
    %576 = vector.load %arg8[%c0_348, %c0_349, %c0_350] : memref<1x32x256xf32, #tpu.memory_space<vmem>>, vector<1x32x256xf32>
    %577 = vector.shape_cast %576 : vector<1x32x256xf32> to vector<32x256xf32>
    %c0_351 = arith.constant 0 : index
    %c0_352 = arith.constant 0 : index
    %c0_353 = arith.constant 0 : index
    %578 = vector.load %arg10[%c0_351, %c0_352, %c0_353] : memref<1x32x256xf32, #tpu.memory_space<vmem>>, vector<1x32x256xf32>
    %579 = vector.shape_cast %578 : vector<1x32x256xf32> to vector<32x256xf32>
    %580 = tpu.concatenate %569, %577 in 0 : vector<16x256xf32>, vector<32x256xf32> -> vector<48x256xf32>
    %c0_354 = arith.constant 0 : index
    %c0_355 = arith.constant 0 : index
    %581 = vector.load %arg6[%c0_354, %c0_355] : memref<9x256xf32, #tpu.memory_space<vmem>>, vector<1x256xf32>
    %c17_i32_356 = arith.constant 17 : i32
    %582 = tpu.dynamic_rotate %580 by %c17_i32_356 dim 1 : vector<48x256xf32>, i32 -> vector<48x256xf32>
    %583 = vector.broadcast %581 : vector<1x256xf32> to vector<48x256xf32>
    %584 = arith.mulf %582, %583 : vector<48x256xf32>
    %c1_357 = arith.constant 1 : index
    %c0_358 = arith.constant 0 : index
    %585 = vector.load %arg6[%c1_357, %c0_358] : memref<9x256xf32, #tpu.memory_space<vmem>>, vector<1x256xf32>
    %c16_i32_359 = arith.constant 16 : i32
    %586 = tpu.dynamic_rotate %580 by %c16_i32_359 dim 1 : vector<48x256xf32>, i32 -> vector<48x256xf32>
    %587 = vector.broadcast %585 : vector<1x256xf32> to vector<48x256xf32>
    %588 = arith.mulf %586, %587 : vector<48x256xf32>
    %c2_360 = arith.constant 2 : index
    %c0_361 = arith.constant 0 : index
    %589 = vector.load %arg6[%c2_360, %c0_361] : memref<9x256xf32, #tpu.memory_space<vmem>>, vector<1x256xf32>
    %c15_i32_362 = arith.constant 15 : i32
    %590 = tpu.dynamic_rotate %580 by %c15_i32_362 dim 1 : vector<48x256xf32>, i32 -> vector<48x256xf32>
    %591 = vector.broadcast %589 : vector<1x256xf32> to vector<48x256xf32>
    %592 = arith.mulf %590, %591 : vector<48x256xf32>
    %c3_363 = arith.constant 3 : index
    %c0_364 = arith.constant 0 : index
    %593 = vector.load %arg6[%c3_363, %c0_364] : memref<9x256xf32, #tpu.memory_space<vmem>>, vector<1x256xf32>
    %c1_i32_365 = arith.constant 1 : i32
    %594 = tpu.dynamic_rotate %580 by %c1_i32_365 dim 1 : vector<48x256xf32>, i32 -> vector<48x256xf32>
    %595 = vector.broadcast %593 : vector<1x256xf32> to vector<48x256xf32>
    %596 = arith.mulf %594, %595 : vector<48x256xf32>
    %c5_366 = arith.constant 5 : index
    %c0_367 = arith.constant 0 : index
    %597 = vector.load %arg6[%c5_366, %c0_367] : memref<9x256xf32, #tpu.memory_space<vmem>>, vector<1x256xf32>
    %c255_i32_368 = arith.constant 255 : i32
    %598 = tpu.dynamic_rotate %580 by %c255_i32_368 dim 1 : vector<48x256xf32>, i32 -> vector<48x256xf32>
    %599 = vector.broadcast %597 : vector<1x256xf32> to vector<48x256xf32>
    %600 = arith.mulf %598, %599 : vector<48x256xf32>
    %c6_369 = arith.constant 6 : index
    %c0_370 = arith.constant 0 : index
    %601 = vector.load %arg6[%c6_369, %c0_370] : memref<9x256xf32, #tpu.memory_space<vmem>>, vector<1x256xf32>
    %c241_i32_371 = arith.constant 241 : i32
    %602 = tpu.dynamic_rotate %580 by %c241_i32_371 dim 1 : vector<48x256xf32>, i32 -> vector<48x256xf32>
    %603 = vector.broadcast %601 : vector<1x256xf32> to vector<48x256xf32>
    %604 = arith.mulf %602, %603 : vector<48x256xf32>
    %c7_372 = arith.constant 7 : index
    %c0_373 = arith.constant 0 : index
    %605 = vector.load %arg6[%c7_372, %c0_373] : memref<9x256xf32, #tpu.memory_space<vmem>>, vector<1x256xf32>
    %c240_i32_374 = arith.constant 240 : i32
    %606 = tpu.dynamic_rotate %580 by %c240_i32_374 dim 1 : vector<48x256xf32>, i32 -> vector<48x256xf32>
    %607 = vector.broadcast %605 : vector<1x256xf32> to vector<48x256xf32>
    %608 = arith.mulf %606, %607 : vector<48x256xf32>
    %c8_375 = arith.constant 8 : index
    %c0_376 = arith.constant 0 : index
    %609 = vector.load %arg6[%c8_375, %c0_376] : memref<9x256xf32, #tpu.memory_space<vmem>>, vector<1x256xf32>
    %c239_i32_377 = arith.constant 239 : i32
    %610 = tpu.dynamic_rotate %580 by %c239_i32_377 dim 1 : vector<48x256xf32>, i32 -> vector<48x256xf32>
    %611 = vector.broadcast %609 : vector<1x256xf32> to vector<48x256xf32>
    %612 = arith.mulf %610, %611 : vector<48x256xf32>
    %613 = tpu.concatenate %584, %588, %592, %596, %580, %600, %604, %608, %612, %3 in 0 : vector<48x256xf32>, vector<48x256xf32>, vector<48x256xf32>, vector<48x256xf32>, vector<48x256xf32>, vector<48x256xf32>, vector<48x256xf32>, vector<48x256xf32>, vector<48x256xf32>, vector<1x256xf32> -> vector<433x256xf32>
    %614 = arith.truncf %613 : vector<433x256xf32> to vector<433x256xbf16>
    %c0_378 = arith.constant 0 : index
    %c0_379 = arith.constant 0 : index
    %615 = vector.load %arg5[%c0_378, %c0_379] : memref<128x433xbf16, #tpu.memory_space<vmem>>, vector<128x433xbf16>
    %cst_380 = arith.constant dense<0.000000e+00> : vector<128x256xf32>
    %616 = tpu.matmul %615, %614, %cst_380 {dimension_numbers = #tpu.dot_dimension_numbers<[1], [0], [0], [1], [0, 0, 1, 1], [], []>} : vector<128x433xbf16>, vector<433x256xbf16>, vector<128x256xf32> -> vector<128x256xf32>
    %617 = vector.extract_strided_slice %616 {offsets = [0, 0], sizes = [32, 256], strides = [1, 1]} : vector<128x256xf32> to vector<32x256xf32>
    %cst_381 = arith.constant 5.000000e-01 : f32
    %618 = vector.broadcast %cst_381 : f32 to vector<32x256xf32>
    %619 = arith.mulf %618, %617 : vector<32x256xf32>
    %620 = math.tanh %619 : vector<32x256xf32>
    %cst_382 = arith.constant 5.000000e-01 : f32
    %621 = vector.broadcast %cst_382 : f32 to vector<32x256xf32>
    %622 = arith.mulf %621, %620 : vector<32x256xf32>
    %cst_383 = arith.constant 5.000000e-01 : f32
    %623 = vector.broadcast %cst_383 : f32 to vector<32x256xf32>
    %624 = arith.addf %622, %623 : vector<32x256xf32>
    %625 = vector.extract_strided_slice %616 {offsets = [32, 0], sizes = [32, 256], strides = [1, 1]} : vector<128x256xf32> to vector<32x256xf32>
    %cst_384 = arith.constant 0.00999999977 : f32
    %626 = vector.broadcast %cst_384 : f32 to vector<32x256xf32>
    %627 = arith.addf %625, %626 : vector<32x256xf32>
    %cst_385 = arith.constant 5.000000e-01 : f32
    %628 = vector.broadcast %cst_385 : f32 to vector<32x256xf32>
    %629 = arith.mulf %628, %627 : vector<32x256xf32>
    %630 = math.tanh %629 : vector<32x256xf32>
    %cst_386 = arith.constant 5.000000e-01 : f32
    %631 = vector.broadcast %cst_386 : f32 to vector<32x256xf32>
    %632 = arith.mulf %631, %630 : vector<32x256xf32>
    %cst_387 = arith.constant 5.000000e-01 : f32
    %633 = vector.broadcast %cst_387 : f32 to vector<32x256xf32>
    %634 = arith.addf %632, %633 : vector<32x256xf32>
    %635 = vector.extract_strided_slice %616 {offsets = [64, 0], sizes = [32, 256], strides = [1, 1]} : vector<128x256xf32> to vector<32x256xf32>
    %636 = math.tanh %635 : vector<32x256xf32>
    %637 = vector.extract_strided_slice %616 {offsets = [96, 0], sizes = [32, 256], strides = [1, 1]} : vector<128x256xf32> to vector<32x256xf32>
    %cst_388 = arith.constant 5.000000e-01 : f32
    %638 = vector.broadcast %cst_388 : f32 to vector<32x256xf32>
    %639 = arith.mulf %638, %637 : vector<32x256xf32>
    %640 = math.tanh %639 : vector<32x256xf32>
    %cst_389 = arith.constant 5.000000e-01 : f32
    %641 = vector.broadcast %cst_389 : f32 to vector<32x256xf32>
    %642 = arith.mulf %641, %640 : vector<32x256xf32>
    %cst_390 = arith.constant 5.000000e-01 : f32
    %643 = vector.broadcast %cst_390 : f32 to vector<32x256xf32>
    %644 = arith.addf %642, %643 : vector<32x256xf32>
    %645 = arith.mulf %634, %579 : vector<32x256xf32>
    %646 = arith.mulf %624, %636 : vector<32x256xf32>
    %647 = arith.addf %645, %646 : vector<32x256xf32>
    %648 = math.tanh %647 : vector<32x256xf32>
    %649 = arith.mulf %644, %648 : vector<32x256xf32>
    %c0_391 = arith.constant 0 : index
    %c0_392 = arith.constant 0 : index
    %c0_393 = arith.constant 0 : index
    %650 = vector.load %arg10[%c0_391, %c0_392, %c0_393] : memref<1x32x256xf32, #tpu.memory_space<vmem>>, vector<1x32x256xf32>
    %651 = vector.shape_cast %650 : vector<1x32x256xf32> to vector<32x256xf32>
    %652 = vector.shape_cast %647 : vector<32x256xf32> to vector<1x32x256xf32>
    tpu.vector_store %arg10[%c0_391, %c0_392, %c0_393], %652 {strides = array<i32>} : memref<1x32x256xf32, #tpu.memory_space<vmem>>, vector<1x32x256xf32>,
    %c0_394 = arith.constant 0 : index
    %c0_395 = arith.constant 0 : index
    %c0_396 = arith.constant 0 : index
    %653 = vector.load %arg8[%c0_394, %c0_395, %c0_396] : memref<1x32x256xf32, #tpu.memory_space<vmem>>, vector<1x32x256xf32>
    %654 = vector.shape_cast %653 : vector<1x32x256xf32> to vector<32x256xf32>
    %655 = vector.shape_cast %649 : vector<32x256xf32> to vector<1x32x256xf32>
    tpu.vector_store %arg8[%c0_394, %c0_395, %c0_396], %655 {strides = array<i32>} : memref<1x32x256xf32, #tpu.memory_space<vmem>>, vector<1x32x256xf32>,
    return
  }
  func.func @transform_0(%arg0: i32, %arg1: i32) -> (i32, i32, i32, i32) {
    %c0_i32 = arith.constant 0 : i32
    %c0_i32_0 = arith.constant 0 : i32
    %c0_i32_1 = arith.constant 0 : i32
    return %arg0, %arg1, %c0_i32, %c0_i32_0 : i32, i32, i32, i32
  }
  func.func @transform_1(%arg0: i32, %arg1: i32) -> (i32, i32) {
    %c0_i32 = arith.constant 0 : i32
    %c0_i32_0 = arith.constant 0 : i32
    %c0_i32_1 = arith.constant 0 : i32
    return %c0_i32, %c0_i32_0 : i32, i32
  }
  func.func @transform_2(%arg0: i32, %arg1: i32) -> (i32, i32) {
    %c0_i32 = arith.constant 0 : i32
    %c0_i32_0 = arith.constant 0 : i32
    %c0_i32_1 = arith.constant 0 : i32
    return %c0_i32, %c0_i32_0 : i32, i32
  }
  func.func @transform_3(%arg0: i32, %arg1: i32) -> (i32, i32) {
    %c0_i32 = arith.constant 0 : i32
    %c0_i32_0 = arith.constant 0 : i32
    %c0_i32_1 = arith.constant 0 : i32
    return %c0_i32, %c0_i32_0 : i32, i32
  }
  func.func @transform_4(%arg0: i32, %arg1: i32) -> (i32, i32) {
    %c0_i32 = arith.constant 0 : i32
    %c0_i32_0 = arith.constant 0 : i32
    %c0_i32_1 = arith.constant 0 : i32
    return %c0_i32, %c0_i32_0 : i32, i32
  }
  func.func @transform_5(%arg0: i32, %arg1: i32) -> (i32, i32, i32) {
    %c0_i32 = arith.constant 0 : i32
    %c0_i32_0 = arith.constant 0 : i32
    %c0_i32_1 = arith.constant 0 : i32
    return %arg0, %c0_i32, %c0_i32_0 : i32, i32, i32
  }
  func.func @transform_6(%arg0: i32, %arg1: i32) -> (i32, i32, i32) {
    %c0_i32 = arith.constant 0 : i32
    %c0_i32_0 = arith.constant 0 : i32
    %c0_i32_1 = arith.constant 0 : i32
    return %arg0, %c0_i32, %c0_i32_0 : i32, i32, i32
  }
  func.func @transform_7(%arg0: i32, %arg1: i32) -> (i32, i32, i32) {
    %c0_i32 = arith.constant 0 : i32
    %c0_i32_0 = arith.constant 0 : i32
    %c0_i32_1 = arith.constant 0 : i32
    return %arg0, %c0_i32, %c0_i32_0 : i32, i32, i32
  }
  func.func @transform_8(%arg0: i32, %arg1: i32) -> (i32, i32, i32) {
    %c0_i32 = arith.constant 0 : i32
    %c0_i32_0 = arith.constant 0 : i32
    %c0_i32_1 = arith.constant 0 : i32
    return %arg0, %c0_i32, %c0_i32_0 : i32, i32, i32
  }
}

</mosaic_0001>

<bundles_post_ra>
// kernel: tpu_custom_call.1
= control target key start
LH: loop header
LB: loop body
LE: loop exit
PB: predicated region body
PF: predicated region fallthrough
CT: control target
= control target key end

     0   :  { %s15250_s0 = inlined_call_operand.vmem [shape: f32[2,8,4,256], index: 0, kind: input, shape index: {}]   ;;  %s15251_s1 = inlined_call_operand.vmem [shape: bf16[64,217], index: 1, kind: input, shape index: {}]   ;;  %s15252_s2 = inlined_call_operand.vmem [shape: f32[9,256], index: 2, kind: input, shape index: {}]   ;;  %s15253_s3 = inlined_call_operand.vmem [shape: bf16[128,433], index: 3, kind: input, shape index: {}]   ;;  %s15254_s4 = inlined_call_operand.vmem [shape: f32[9,256], index: 4, kind: input, shape index: {}]   ;;  %s15255_s5 = inlined_call_operand.hbm [shape: f32[2,16,256], index: 5, kind: output, shape index: {0}]   ;;  %s15256_s6 = inlined_call_operand.hbm [shape: f32[2,32,256], index: 6, kind: output, shape index: {1}]   ;;  %s15257_s7 = inlined_call_operand.hbm [shape: f32[2,16,256], index: 7, kind: output, shape index: {2}]   ;;  %s15258_s8 = inlined_call_operand.hbm [shape: f32[2,32,256], index: 8, kind: output, shape index: {3}]  }
   0x1   :  { %15485 = sst [smem:[#allocation76_spill]] %s15250_s0 }
   0x2   :  { %15486 = sst [smem:[#allocation77_spill]] %s15256_s6 }
   0x3   :  { %15487 = sst [smem:[#allocation78_spill]] %s15257_s7 }
   0x4   :  { %14 = vsyncpa [#allocation3], 0 }
   0x5   :  { %16 = vsyncpa [#allocation3 + $0x1], 0 }
   0x6   :  { %17 = vsyncpa [#allocation5], 0 }
   0x7   :  { %19 = vsyncpa [#allocation5 + $0x1], 0 }
   0x8   :  { %20 = vsyncpa [#allocation8], 0 }
   0x9   :  { %22 = vsyncpa [#allocation8 + $0x1], 0  ;;  %s8958_s27 = smov 0   ;;  %s8960_s28 = smov 0  }
   0xa   :  { %s8962_s29 = smov 0   ;;  %s8964_s30 = smov 0  }
   0xb   :  { %s8966_s9 = smov 0   ;;  %s8968_s10 = smov 0  }
   0xc   :  { %s8970_s11 = smov 0   ;;  %s8972_s12 = smov 0  }
   0xd LB: > { %15488 = sst [smem:[#allocation12_spill]] %s8865_s27  ;;  %s15260_s13 = sadd.s32 4294967295, %s8893_s12   ;;  %s8893_s12 = sphi %s8972_s12, %s28_s12   ;;  %s8889_s11 = sphi %s8970_s11, %s15918_s11   ;;  %s8885_s10 = sphi %s8968_s10, %s15917_s10   ;;  %s8881_s9 = sphi %s8966_s9, %s15916_s9   ;;  %s8877_s30 = sphi %s8964_s30, %s15915_s30   ;;  %s8873_s29 = sphi %s8962_s29, %s15914_s29   ;;  %s8869_s28 = sphi %s8960_s28, %s15913_s28   ;;  %s8865_s27 = sphi %s8958_s27, %s15912_s27  }
   0xe   : > { %15489 = sst [smem:[#allocation13_spill]] %s8869_s28  ;;  %s15259_s14 = sadd.s32 4294967294, %s8893_s12  }
   0xf   : > { %15490 = sst [smem:[#allocation14_spill]] %s8873_s29  ;;  %s37_s15 = sadd.s32 1, %s8885_s10 }
  0x10   : > { %15491 = sst [smem:[#allocation15_spill]] %s8885_s10  ;;  %p38_p0 = scmp.ge.s32.totalorder %s37_s15, 2 }
  0x11   : > { %15492 = sst [smem:[#allocation16_spill]] %s8889_s11  ;;  %s40_s16 = sadd.s32 1, %s8889_s11 }
  0x12   : > { %p169_p1 = scmp.ne.s32.totalorder %s8873_s29, %s8869_s28  ;;  %p170_p2 = scmp.eq.s32.totalorder %s15260_s13, 3 }
  0x13   : > { %s15920_s15 = smov (%p38_p0, %s37_s15), 0  ;;  %s15922_s16 = smov (!%p38_p0, %s40_s16), %s8889_s11 }
  0x14   : > { %15493 = sst [smem:[#allocation17_spill]] %s15920_s15  ;;  %p9009_p3 = por %p170_p2, %p169_p1 }
  0x15   : > { %p175_p4 = scmp.ne.s32.totalorder %s8869_s28, %s8865_s27  ;;  %p42_p5 = scmp.ge.s32.totalorder %s15922_s16, 2 }
  0x16   : > { %p176_p6 = scmp.eq.s32.totalorder %s15259_s14, 3  ;;  %p7564_p7 = scmp.ge.s32.totalorder %s8893_s12, 1 }
  0x17   : > { %p298_p8 = scmp.lt.s32.totalorder %s8893_s12, 5  ;;  %s15924_s16 = smov (%p42_p5, %s15922_s16), 0 }
  0x18   : > { %15495 = sst [smem:[#allocation18_spill]] %s15924_s16  ;;  %p9021_p9 = por %p176_p6, %p175_p4 }
  0x19   : > { %p299_p10 = pnand %p7564_p7, %p298_p8  ;;  %s156_s19 = ssub.s32 %s8889_s11, %s15924_s16 }
  0x1a   : > { %s15496_s18 = scalar_select %p9021_p9, 1, 0 }
  0x1b   : > { %s159_s20 = sadd.s32 1, %s8873_s29  ;;  %p157_p11 = scmp.eq.s32.totalorder %s156_s19, 0 }
  0x1c   : > { %15497 = sst [smem:[#allocation19_spill]] %s15496_s18  ;;  %302 = sbr.rel (%p299_p10) target bundleno = 2872 (0xb38), region = 40 }
  0x1d   : > { %s9029_s21 = scalar_select %p157_p11, %s8873_s29, %s159_s20  }
  0x1f   : > { %15498 = sst [smem:[#allocation20_spill]] %s9029_s21 }
  0x21   : > { %s9032_s22 = sand.u32 1, %s8869_s28   ;;  %s7569_s23 = sshll.u32 %s8877_s30, 2 }
  0x22   : > { %s7565_s24 = sshll.u32 %s9032_s22, 5  ;;  %s7566_s25 = sshll.u32 %s9032_s22, 6 }
  0x23   : > { %p353_p12 = scmp.lt.s32.totalorder %s8881_s9, 1  ;;  %p355_p13 = scmp.lt.s32.totalorder %s7569_s23, 7 }
  0x24   : > { %s15499_s0 = sld [smem:[#allocation76_spill]]  ;;  %s9044_s10 = scalar_lea.vmem [#allocation2], %s7565_s24 }
  0x25   : > { %s354_s26 = scalar_select %p353_p12, %s8881_s9, 1 }
  0x26   : > { %s15926_s23 = smov (!%p355_p13, %s7569_s23), 7  ;;  %s9046_s21 = scalar_lea.vmem [#allocation4], %s7566_s25 }
  0x27   : > { %s7571_s14 = sshll.u32 %s354_s26, 4  ;;  %s7570_s19 = sshll.u32 %s15926_s23, 1 }
  0x28   : > { %s359_s20 = sadd.s32 %s7571_s14, %s7570_s19  ;;  %s9048_s29 = scalar_lea.vmem [#allocation6], %s7565_s24 }
  0x29   : > { %s7572_s13 = sshll.u32 %s359_s20, 2  ;;  %s9050_s28 = scalar_lea.vmem [#allocation7], %s7566_s25 }
  0x2a   : > { %s9042_s11 = scalar_lea.vmem %s15499_s0, %s7572_s13  ;;  %p7573_p0 = scmp.ne.s32.totalorder %s8877_s30, 0 }
  0x2c   : > { %367 = sbr.rel (%p7573_p0) target bundleno = 62 (0x3e), region = 44 }
  0x31   : > { %v8895_v0 = vmov 0.0  }
  0x32   : > { %368 = vst [vmem:[%s9044_s10] sm:$0xff] %v8895_v0  ;;  %369 = vst [vmem:[%s9044_s10 + $0x8] sm:$0xff] %v8895_v0 }
  0x33   : > { %370 = vst [vmem:[%s9044_s10 + $0x10] sm:$0xff] %v8895_v0  ;;  %371 = vst [vmem:[%s9044_s10 + $0x18] sm:$0xff] %v8895_v0 }
  0x34   : > { %372 = vst [vmem:[%s9048_s29] sm:$0xff] %v8895_v0  ;;  %373 = vst [vmem:[%s9048_s29 + $0x8] sm:$0xff] %v8895_v0 }
  0x35   : > { %374 = vst [vmem:[%s9048_s29 + $0x10] sm:$0xff] %v8895_v0  ;;  %375 = vst [vmem:[%s9048_s29 + $0x18] sm:$0xff] %v8895_v0 }
  0x36   : > { %376 = vst [vmem:[%s9046_s21] sm:$0xff] %v8895_v0  ;;  %377 = vst [vmem:[%s9046_s21 + $0x8] sm:$0xff] %v8895_v0 }
  0x37   : > { %378 = vst [vmem:[%s9046_s21 + $0x10] sm:$0xff] %v8895_v0  ;;  %379 = vst [vmem:[%s9046_s21 + $0x18] sm:$0xff] %v8895_v0 }
  0x38   : > { %380 = vst [vmem:[%s9046_s21 + $0x20] sm:$0xff] %v8895_v0  ;;  %381 = vst [vmem:[%s9046_s21 + $0x28] sm:$0xff] %v8895_v0 }
  0x39   : > { %382 = vst [vmem:[%s9046_s21 + $0x30] sm:$0xff] %v8895_v0  ;;  %383 = vst [vmem:[%s9046_s21 + $0x38] sm:$0xff] %v8895_v0 }
  0x3a   : > { %384 = vst [vmem:[%s9050_s28] sm:$0xff] %v8895_v0  ;;  %385 = vst [vmem:[%s9050_s28 + $0x8] sm:$0xff] %v8895_v0 }
  0x3b   : > { %386 = vst [vmem:[%s9050_s28 + $0x10] sm:$0xff] %v8895_v0  ;;  %387 = vst [vmem:[%s9050_s28 + $0x18] sm:$0xff] %v8895_v0 }
  0x3c   : > { %388 = vst [vmem:[%s9050_s28 + $0x20] sm:$0xff] %v8895_v0  ;;  %389 = vst [vmem:[%s9050_s28 + $0x28] sm:$0xff] %v8895_v0 }
  0x3d   : > { %390 = vst [vmem:[%s9050_s28 + $0x30] sm:$0xff] %v8895_v0  ;;  %391 = vst [vmem:[%s9050_s28 + $0x38] sm:$0xff] %v8895_v0 }
  0x3e PF: > { %v393_v1 = vld [vmem:[%s9044_s10] sm:$0xff]  ;;  %v395_v2 = vld [vmem:[%s9044_s10 + $0x10] sm:$0xff]  ;;  %vm408_vm0 = vcmask 1043456   ;;  %v394_v7 = vld [vmem:[%s9044_s10 + $0x8] sm:$0xff]  ;;  %s15316_s30 = smov 1   ;;  %s15314_s13 = smov 127   ;;  %v438_v18 = vlaneseq }
  0x3f   : > { %v392_v3 = vld [vmem:[%s9042_s11] sm:$0xff]  ;;  %v409_v4 = vrot.slane %v393_v1, 4  ;;  %v9080_v5 = vrot.slane %v395_v2, 4  ;;  %v410_v8 = vrot.slane %v394_v7, 4  ;;  %v396_v9 = vld [vmem:[%s9044_s10 + $0x18] sm:$0xff]  ;;  %s15339_s14 = smov 15  }
  0x40   : > { %v402_v6 = vcombine.high %v392_v3, %v392_v3  ;;  %v9100_v14 = vrot.slane %v396_v9, 4  ;;  %s15335_s15 = smov 16   ;;  %s15320_s16 = smov 17   ;;  %v7986_v17 = vld [vmem:[%s15251_s1 + $0x4] ss:$8 sps:$4 sm:$0xff]   ;;  %vm802_vm1 = vcmask 728064  }
  0x41   : > { %v9086_v10 = vsel %vm408_vm0, %v409_v4, %v9080_v5  ;;  %v9089_v11 = vsel %vm408_vm0, %v392_v3, %v409_v4  ;;  %v423_v12 = vsel %vm408_vm0, %v9080_v5, 0.0  ;;  %s15312_s23 = smov 111   ;;  %s15318_s24 = smov 112   ;;  %7595 = vmatprep.mubr.msk.bf16.mxu0 %vm802_vm1, %v7986_v17  ;;  %v449_v19 = vshrl.u32 %v438_v18, 7  ;;  %v9195_v23 = vld [vmem:[%s9046_s21 + $0x10] sm:$0xff]  ;;  %v9198_v24 = vld [vmem:[%s9046_s21] sm:$0xff] }
  0x42   : > { %544 = vrot.lane.b32.xlu1 %v9086_v10, %s15316_s30  ;;  %580 = vrot.lane.b32.xlu0 %v9089_v11, %s15314_s13  ;;  %v9098_v13 = vsel %vm408_vm0, %v402_v6, %v410_v8  ;;  %v424_v15 = vsel %vm408_vm0, %v9100_v14, 0.0  ;;  %v9109_v16 = vsel %vm408_vm0, %v410_v8, %v9100_v14  ;;  %s15266_s25 = smov 113   ;;  %v9188_v20 = vand.u32 127, %v438_v18  ;;  %v7577_v25 = vld [vmem:[%s15252_s2 + $0x5] ss:$8 sm:$0x3] }
  0x43   : > { %v9190_v21 = vsub.s32 0, %v449_v19  ;;  %v9192_v22 = vsub.s32 1, %v449_v19  ;;  %v9208_v28 = vld [vmem:[%s9046_s21 + $0x18] sm:$0xff]  ;;  %v9211_v29 = vld [vmem:[%s9046_s21 + $0x8] sm:$0xff]  ;;  %v9228_v35 = vld [vmem:[%s9046_s21 + $0x30] sm:$0xff]  ;;  %vm8904_vm4 = vmmov 1   ;;  %v743_v47 = vpack.c.bf16 %v9109_v16, %v9098_v13 }
  0x44   : > { %vm592_vm2 = vcmp.lt.s32.totalorder %v9188_v20, 127  ;;  %v7576_v32 = vld [vmem:[%s15252_s2 + $0x3] ss:$8 sm:$0x3]  ;;  %vm554_vm3 = vcmp.lt.s32.totalorder %v9188_v20, 1  ;;  %vm9242_vm5 = vmpackc.low %vm8904_vm4, %vm408_vm0  ;;  %v15500_v42 = vmov 0  ;;  %v742_v58 = vpack.c.bf16 %v9086_v10, %v9089_v11 }
  0x45   : > { %v9215_v30 = vrot.slane %v7577_v25, %v9190_v21  ;;  %v9218_v31 = vrot.slane %v7577_v25, %v9192_v22  ;;  %v9231_v36 = vld [vmem:[%s9046_s21 + $0x20] sm:$0xff]  ;;  %v569_v40 = vrot.slane %v7576_v32, %v9192_v22  ;;  %v15501_v42 = vsel %vm9242_vm5, 4294967295, %v15500_v42  ;;  %v9255_v48 = vld [vmem:[%s9046_s21 + $0x38] sm:$0xff]  ;;  %v9263_v52 = vld [vmem:[%s9046_s21 + $0x28] sm:$0xff]  ;;  %s15592_s20 = smov 17   ;;  %s15593_s26 = smov 112  }
  0x46   : > { %546 = vrot.lane.b32.xlu1 %v423_v12, %s15316_s30  ;;  %586 = vrot.lane.b32.xlu0 %v9098_v13, %s15314_s13  ;;  %15502 = vst [vmem:[#allocation21_spill] sm:$0xff] %v15501_v42  ;;  %v565_v49 = vrot.slane %v7576_v32, %v9190_v21  ;;  %v7575_v57 = vld [vmem:[%s15252_s2 + $0x2] ss:$8 sm:$0x3]  ;;  %vm516_vm6 = vcmp.lt.s32.totalorder %v9188_v20, 15  ;;  %vm478_vm7 = vcmp.lt.s32.totalorder %v9188_v20, 16 }
  0x47   : > { %v527_v63 = vrot.slane %v7575_v57, %v9190_v21  ;;  %v531_v0 = vrot.slane %v7575_v57, %v9192_v22  ;;  %vm440_vm8 = vcmp.lt.s32.totalorder %v9188_v20, 17  ;;  %vm706_vm9 = vcmp.lt.s32.totalorder %v9188_v20, 111  ;;  %s7879_s6 = sshll.u32 %s8881_s9, 9  ;;  %s7337_s7 = sshll.u32 %s9044_s10, 4  ;;  %s15052_s7 = int_to_ptr.vmem [resolvable:$true] %s7337_s7 }
  0x48   : > { %vm815_vm10 = vcmask 1044480   ;;  %vm668_vm11 = vcmp.lt.s32.totalorder %v9188_v20, 112  ;;  %vm630_vm12 = vcmp.lt.s32.totalorder %v9188_v20, 113  ;;  %vm1723_vm13 = vcmask 400384   ;;  %v8179_v20 = vld [vmem:[%s15253_s3] ss:$16 sps:$4 sm:$0xff]  }
  0x49   : > { %vm1748_vm14 = vcmask 1040384   ;;  %s7309_s0 = scalar_lea.sflag [#allocation3], %s9032_s22  ;;  %s8715_s27 = scalar_lea.vmem %s15052_s7, 512 }
  0x4a   : > { %552 = vrot.lane.b32.xlu1 %v424_v15, %s15316_s30  ;;  %550 = vrot.lane.b32.xlu0 %v9109_v16, %s15316_s30  ;;  %p8716_p1 = scmp.ne.s32.totalorder %s15052_s7, %s8715_s27 }
  0x4c   : > { %p8717_p2 = pnand %p8716_p1, %p9009_p3 }
  0x4e   : > { %514 = vrot.lane.b32.xlu1 %v424_v15, %s15339_s14  ;;  %508 = vrot.lane.b32.xlu0 %v423_v12, %s15339_s14  ;;  %p8718_p4 = pneg %p8717_p2 }
  0x52   : > { %548 = vrot.lane.b32.xlu1 %v9098_v13, %s15316_s30  ;;  %542 = vrot.lane.b32.xlu0 %v9089_v11, %s15316_s30 }
  0x56   : > { %506 = vrot.lane.b32.xlu1 %v9086_v10, %s15339_s14  ;;  %504 = vrot.lane.b32.xlu0 %v9089_v11, %s15339_s14 }
  0x5a   : > { %512 = vrot.lane.b32.xlu1 %v9109_v16, %s15339_s14  ;;  %510 = vrot.lane.b32.xlu0 %v9098_v13, %s15339_s14 }
  0x5e   : > { %470 = vrot.lane.b32.xlu1 %v423_v12, %s15335_s15  ;;  %468 = vrot.lane.b32.xlu0 %v9086_v10, %s15335_s15 }
  0x62   : > { %476 = vrot.lane.b32.xlu1 %v424_v15, %s15335_s15  ;;  %474 = vrot.lane.b32.xlu0 %v9109_v16, %s15335_s15 }
  0x66   : > { %436 = vrot.lane.b32.xlu1 %v424_v15, %s15320_s16  ;;  %430 = vrot.lane.b32.xlu0 %v423_v12, %s15320_s16 }
  0x6a   : > { %472 = vrot.lane.b32.xlu1 %v9098_v13, %s15335_s15  ;;  %466 = vrot.lane.b32.xlu0 %v9089_v11, %s15335_s15 }
  0x6e   : > { %428 = vrot.lane.b32.xlu1 %v9086_v10, %s15320_s16  ;;  %426 = vrot.lane.b32.xlu0 %v9089_v11, %s15320_s16 }
  0x72   : > { %434 = vrot.lane.b32.xlu1 %v9109_v16, %s15320_s16  ;;  %432 = vrot.lane.b32.xlu0 %v9098_v13, %s15320_s16 }
  0x76   : > { %704 = vrot.lane.b32.xlu1 %v424_v15, %s15312_s23  ;;  %698 = vrot.lane.b32.xlu0 %v423_v12, %s15312_s23 }
  0x7a   : > { %696 = vrot.lane.b32.xlu1 %v9086_v10, %s15312_s23  ;;  %694 = vrot.lane.b32.xlu0 %v9089_v11, %s15312_s23 }
  0x7e   : > { %702 = vrot.lane.b32.xlu1 %v9109_v16, %s15312_s23  ;;  %700 = vrot.lane.b32.xlu0 %v9098_v13, %s15312_s23 }
  0x82   : > { %660 = vrot.lane.b32.xlu1 %v423_v12, %s15318_s24  ;;  %658 = vrot.lane.b32.xlu0 %v9086_v10, %s15318_s24 }
  0x86   : > { %666 = vrot.lane.b32.xlu1 %v424_v15, %s15318_s24  ;;  %664 = vrot.lane.b32.xlu0 %v9109_v16, %s15318_s24 }
  0x8a   : > { %628 = vrot.lane.b32.xlu1 %v424_v15, %s15266_s25  ;;  %622 = vrot.lane.b32.xlu0 %v423_v12, %s15266_s25 }
  0x8e   : > { %662 = vrot.lane.b32.xlu1 %v9098_v13, %s15318_s24  ;;  %656 = vrot.lane.b32.xlu0 %v9089_v11, %s15318_s24 }
  0x92   : > { %620 = vrot.lane.b32.xlu1 %v9086_v10, %s15266_s25  ;;  %618 = vrot.lane.b32.xlu0 %v9089_v11, %s15266_s25 }
  0x96   : > { %626 = vrot.lane.b32.xlu1 %v9109_v16, %s15266_s25  ;;  %624 = vrot.lane.b32.xlu0 %v9098_v13, %s15266_s25 }
  0x9a   : > { %584 = vrot.lane.b32.xlu1 %v423_v12, %s15314_s13  ;;  %582 = vrot.lane.b32.xlu0 %v9086_v10, %s15314_s13 }
  0x9e   : > { %590 = vrot.lane.b32.xlu1 %v424_v15, %s15314_s13  ;;  %588 = vrot.lane.b32.xlu0 %v9109_v16, %s15314_s13 }
  0xa2   : > { %1126 = vrot.lane.b32.xlu1 %v9195_v23, %s15339_s14  ;;  %1124 = vrot.lane.b32.xlu0 %v9198_v24, %s15339_s14 }
  0xa6   : > { %1138 = vrot.lane.b32.xlu1 %v9208_v28, %s15339_s14  ;;  %1136 = vrot.lane.b32.xlu0 %v9211_v29, %s15339_s14 }
  0xaa   : > { %1069 = vrot.lane.b32.xlu1 %v9228_v35, %s15335_s15  ;;  %1067 = vrot.lane.b32.xlu0 %v9231_v36, %s15335_s15 }
  0xae   : > { %1081 = vrot.lane.b32.xlu1 %v9255_v48, %s15335_s15  ;;  %1079 = vrot.lane.b32.xlu0 %v9263_v52, %s15335_s15 }
  0xb2   : > { %1065 = vrot.lane.b32.xlu1 %v9195_v23, %s15335_s15  ;;  %1063 = vrot.lane.b32.xlu0 %v9198_v24, %s15335_s15 }
  0xb4   : > { %v545_v26 = vpop.permute.xlu1 %544  ;;  %v581_v27 = vpop.permute.xlu0 %580 }
  0xb6   : > { %1077 = vrot.lane.b32.xlu1 %v9208_v28, %s15335_s15  ;;  %1075 = vrot.lane.b32.xlu0 %v9211_v29, %s15335_s15 }
  0xb8   : > { %v547_v33 = vpop.permute.xlu1 %546  ;;  %v587_v34 = vpop.permute.xlu0 %586 }
  0xb9   : > { %v593_v37 = vsel %vm592_vm2, %v581_v27, %v587_v34  ;;  %v596_v38 = vsel %vm592_vm2, %v587_v34, %v581_v27 }
  0xba   : > { %v610_v39 = vmul.f32 %v9215_v30, %v593_v37  ;;  %v611_v41 = vmul.f32 %v9218_v31, %v596_v38  ;;  %1008 = vrot.lane.b32.xlu1 %v9228_v35, %s15320_s16  ;;  %1006 = vrot.lane.b32.xlu0 %v9231_v36, %s15320_s16  ;;  %v7574_v38 = vld [vmem:[%s15252_s2 + $0x1] ss:$8 sm:$0x3] }
  0xbc   : > { %v553_v43 = vpop.permute.xlu1 %552  ;;  %v551_v44 = vpop.permute.xlu0 %550  ;;  %v7590_v45 = vpack.c.bf16 %v611_v41, %v9100_v14  ;;  %v7593_v46 = vpack.c.bf16 %v610_v39, %v9080_v5 }
  0xbd   : > { %v557_v50 = vsel %vm554_vm3, %v547_v33, %v553_v43  ;;  %v556_v51 = vsel %vm554_vm3, %v545_v26, %v551_v44  ;;  %v560_v53 = vsel %vm554_vm3, %v553_v43, %v547_v33  ;;  %v559_v55 = vsel %vm554_vm3, %v551_v44, %v545_v26 }
  0xbe   : > { %v577_v54 = vmul.f32 %v569_v40, %v557_v50  ;;  %v575_v56 = vmul.f32 %v569_v40, %v556_v51  ;;  %7591 = vmatprep.subr.msk.bf16.mxu0 %vm9242_vm5, %v7590_v45  ;;  %v576_v61 = vmul.f32 %v565_v49, %v560_v53  ;;  %v574_v62 = vmul.f32 %v565_v49, %v559_v55 }
  0xbf   : > { %7594 = vmatpush1.bf16.msk.msra.mxu0 %vm9242_vm5, %v7593_v46  ;;  %1020 = vrot.lane.b32.xlu1 %v9255_v48, %s15320_s16  ;;  %v489_v44 = vrot.slane %v7574_v38, %v9190_v21  ;;  %v493_v45 = vrot.slane %v7574_v38, %v9192_v22 }
  0xc0   : > { %v515_v59 = vpop.permute.xlu1 %514  ;;  %v509_v60 = vpop.permute.xlu0 %508  ;;  %826 = vmatprep.subr.bf16.mxu0 %v743_v47  ;;  %v741_v1 = vpack.c.bf16 %v577_v54, %v575_v56  ;;  %v740_v8 = vpack.c.bf16 %v576_v61, %v574_v62  ;;  %1018 = vrot.lane.b32.xlu0 %v9263_v52, %s15320_s16 }
  0xc1   : > { %v519_v2 = vsel %vm516_vm6, %v509_v60, %v515_v59  ;;  %v522_v3 = vsel %vm516_vm6, %v515_v59, %v509_v60 }
  0xc2   : > { %v538_v9 = vmul.f32 %v527_v63, %v522_v3  ;;  %v539_v10 = vmul.f32 %v531_v0, %v519_v2 }
  0xc3   : > { %827 = vmatpush1.bf16.msra.mxu0 %v742_v58  ;;  %1004 = vrot.lane.b32.xlu1 %v9195_v23, %s15320_s16  ;;  %v425_v58 = vld [vmem:[%s15252_s2] ss:$8 sm:$0x3] }
  0xc4   : > { %v549_v4 = vpop.permute.xlu1 %548  ;;  %v543_v5 = vpop.permute.xlu0 %542  ;;  %828 = vmatprep.subr.bf16.mxu0 %v741_v1  ;;  %1002 = vrot.lane.b32.xlu0 %v9198_v24, %s15320_s16 }
  0xc5   : > { %v555_v6 = vsel %vm554_vm3, %v543_v5, %v549_v4  ;;  %v558_v7 = vsel %vm554_vm3, %v549_v4, %v543_v5 }
  0xc6   : > { %v572_v11 = vmul.f32 %v565_v49, %v558_v7  ;;  %v573_v12 = vmul.f32 %v569_v40, %v555_v6 }
  0xc7   : > { %829 = vmatpush1.bf16.msra.mxu0 %v740_v8  ;;  %1016 = vrot.lane.b32.xlu1 %v9208_v28, %s15320_s16 }
  0xc8   : > { %v507_v13 = vpop.permute.xlu1 %506  ;;  %v505_v14 = vpop.permute.xlu0 %504  ;;  %v739_v15 = vpack.c.bf16 %v573_v12, %v539_v10  ;;  %v738_v16 = vpack.c.bf16 %v572_v11, %v538_v9  ;;  %1014 = vrot.lane.b32.xlu0 %v9211_v29, %s15320_s16 }
  0xca   : > { %830 = vmatprep.subr.bf16.mxu0 %v739_v15  ;;  %v7580_v15 = vld [vmem:[%s15252_s2 + $0x10] ss:$8 sm:$0x3] }
  0xcb   : > { %831 = vmatpush1.bf16.msra.mxu0 %v738_v16  ;;  %1374 = vrot.lane.b32.xlu1 %v9228_v35, %s15318_s24 }
  0xcc   : > { %v513_v17 = vpop.permute.xlu1 %512  ;;  %v511_v18 = vpop.permute.xlu0 %510  ;;  %1372 = vrot.lane.b32.xlu0 %v9231_v36, %s15318_s24 }
  0xcd   : > { %v518_v19 = vsel %vm516_vm6, %v507_v13, %v513_v17  ;;  %v521_v25 = vsel %vm516_vm6, %v513_v17, %v507_v13  ;;  %v517_v26 = vsel %vm516_vm6, %v505_v14, %v511_v18  ;;  %v520_v27 = vsel %vm516_vm6, %v511_v18, %v505_v14 }
  0xce   : > { %v536_v32 = vmul.f32 %v527_v63, %v521_v25  ;;  %v537_v33 = vmul.f32 %v531_v0, %v518_v19  ;;  %v534_v34 = vmul.f32 %v527_v63, %v520_v27  ;;  %v535_v37 = vmul.f32 %v531_v0, %v517_v26 }
  0xcf   : > { %v451_v63 = vrot.slane %v425_v58, %v9190_v21  ;;  %v455_v0 = vrot.slane %v425_v58, %v9192_v22  ;;  %1386 = vrot.lane.b32.xlu1 %v9255_v48, %s15318_s24  ;;  %v717_v18 = vrot.slane %v7580_v15, %v9190_v21  ;;  %v721_v19 = vrot.slane %v7580_v15, %v9192_v22 }
  0xd0   : > { %v471_v39 = vpop.permute.xlu1 %470  ;;  %v469_v40 = vpop.permute.xlu0 %468  ;;  %v737_v41 = vpack.c.bf16 %v537_v33, %v535_v37  ;;  %v736_v43 = vpack.c.bf16 %v536_v32, %v534_v34  ;;  %1384 = vrot.lane.b32.xlu0 %v9263_v52, %s15318_s24 }
  0xd2   : > { %832 = vmatprep.subr.bf16.mxu0 %v737_v41 }
  0xd3   : > { %833 = vmatpush1.bf16.msra.mxu0 %v736_v43  ;;  %1191 = vrot.lane.b32.xlu1 %v9228_v35, %s15316_s30 }
  0xd4   : > { %v477_v46 = vpop.permute.xlu1 %476  ;;  %v475_v47 = vpop.permute.xlu0 %474  ;;  %1189 = vrot.lane.b32.xlu0 %v9231_v36, %s15316_s30 }
  0xd5   : > { %v481_v49 = vsel %vm478_vm7, %v471_v39, %v477_v46  ;;  %v484_v50 = vsel %vm478_vm7, %v477_v46, %v471_v39  ;;  %v480_v51 = vsel %vm478_vm7, %v469_v40, %v475_v47  ;;  %v483_v53 = vsel %vm478_vm7, %v475_v47, %v469_v40 }
  0xd6   : > { %v500_v54 = vmul.f32 %v489_v44, %v484_v50  ;;  %v501_v55 = vmul.f32 %v493_v45, %v481_v49  ;;  %v498_v56 = vmul.f32 %v489_v44, %v483_v53  ;;  %v499_v57 = vmul.f32 %v493_v45, %v480_v51 }
  0xd7   : > { %1203 = vrot.lane.b32.xlu1 %v9255_v48, %s15316_s30 }
  0xd8   : > { %v437_v59 = vpop.permute.xlu1 %436  ;;  %v431_v60 = vpop.permute.xlu0 %430  ;;  %v735_v61 = vpack.c.bf16 %v501_v55, %v499_v57  ;;  %v734_v62 = vpack.c.bf16 %v500_v54, %v498_v56  ;;  %1201 = vrot.lane.b32.xlu0 %v9263_v52, %s15316_s30  ;;  %v15268_v55 = vmov 1.0  }
  0xd9   : > { %v443_v1 = vsel %vm440_vm8, %v431_v60, %v437_v59  ;;  %v446_v2 = vsel %vm440_vm8, %v437_v59, %v431_v60 }
  0xda   : > { %834 = vmatprep.subr.bf16.mxu0 %v735_v61  ;;  %v462_v7 = vmul.f32 %v451_v63, %v446_v2  ;;  %v463_v8 = vmul.f32 %v455_v0, %v443_v1 }
  0xdb   : > { %835 = vmatpush1.bf16.msra.mxu0 %v734_v62  ;;  %1370 = vrot.lane.b32.xlu1 %v9195_v23, %s15318_s24 }
  0xdc   : > { %v473_v3 = vpop.permute.xlu1 %472  ;;  %v467_v4 = vpop.permute.xlu0 %466  ;;  %1368 = vrot.lane.b32.xlu0 %v9198_v24, %s15318_s24 }
  0xdd   : > { %v479_v5 = vsel %vm478_vm7, %v467_v4, %v473_v3  ;;  %v482_v6 = vsel %vm478_vm7, %v473_v3, %v467_v4 }
  0xde   : > { %v496_v9 = vmul.f32 %v489_v44, %v482_v6  ;;  %v497_v10 = vmul.f32 %v493_v45, %v479_v5  ;;  %v8905_v44 = vmov 65535   ;;  %v7579_v6 = vld [vmem:[%s15252_s2 + $0x7] ss:$8 sm:$0x3] }
  0xdf   : > { %v816_v45 = vsel %vm408_vm0, 4294967295, %v8905_v44  ;;  %1382 = vrot.lane.b32.xlu1 %v9208_v28, %s15318_s24 }
  0xe0   : > { %v429_v11 = vpop.permute.xlu1 %428  ;;  %v427_v12 = vpop.permute.xlu0 %426  ;;  %v733_v13 = vpack.c.bf16 %v497_v10, %v463_v8  ;;  %v732_v14 = vpack.c.bf16 %v496_v9, %v462_v7  ;;  %v9388_v51 = vsel %vm815_vm10, %v816_v45, 0  ;;  %1380 = vrot.lane.b32.xlu0 %v9211_v29, %s15318_s24 }
  0xe1   : > { %15503 = vst [vmem:[#allocation22_spill] sm:$0xff] %v9388_v51 }
  0xe2   : > { %836 = vmatprep.subr.bf16.mxu0 %v733_v13 }
  0xe3   : > { %837 = vmatpush1.bf16.msra.mxu0 %v732_v14  ;;  %1187 = vrot.lane.b32.xlu1 %v9195_v23, %s15316_s30 }
  0xe4   : > { %v435_v16 = vpop.permute.xlu1 %434  ;;  %v433_v17 = vpop.permute.xlu0 %432  ;;  %1185 = vrot.lane.b32.xlu0 %v9198_v24, %s15316_s30 }
  0xe5   : > { %v442_v25 = vsel %vm440_vm8, %v429_v11, %v435_v16  ;;  %v445_v26 = vsel %vm440_vm8, %v435_v16, %v429_v11  ;;  %v441_v27 = vsel %vm440_vm8, %v427_v12, %v433_v17  ;;  %v444_v32 = vsel %vm440_vm8, %v433_v17, %v427_v12 }
  0xe6   : > { %v460_v33 = vmul.f32 %v451_v63, %v445_v26  ;;  %v461_v34 = vmul.f32 %v455_v0, %v442_v25  ;;  %v458_v37 = vmul.f32 %v451_v63, %v444_v32  ;;  %v459_v38 = vmul.f32 %v455_v0, %v441_v27  ;;  %v7578_v32 = vld [vmem:[%s15252_s2 + $0x6] ss:$8 sm:$0x3] }
  0xe7   : > { %v679_v11 = vrot.slane %v7579_v6, %v9190_v21  ;;  %v683_v12 = vrot.slane %v7579_v6, %v9192_v22  ;;  %1199 = vrot.lane.b32.xlu1 %v9208_v28, %s15316_s30 }
  0xe8   : > { %v705_v39 = vpop.permute.xlu1 %704  ;;  %v699_v40 = vpop.permute.xlu0 %698  ;;  %v731_v41 = vpack.c.bf16 %v461_v34, %v459_v38  ;;  %v730_v43 = vpack.c.bf16 %v460_v33, %v458_v37  ;;  %1197 = vrot.lane.b32.xlu0 %v9211_v29, %s15316_s30 }
  0xe9   : > { %v709_v46 = vsel %vm706_vm9, %v699_v40, %v705_v39  ;;  %v712_v47 = vsel %vm706_vm9, %v705_v39, %v699_v40  ;;  %v641_v39 = vrot.slane %v7578_v32, %v9190_v21  ;;  %v645_v40 = vrot.slane %v7578_v32, %v9192_v22  ;;  %v7990_v32 = vld [vmem:[%s15251_s1 + $0x24] ss:$8 sps:$4 sm:$0xff]  }
  0xea   : > { %v728_v49 = vmul.f32 %v717_v18, %v709_v46  ;;  %v729_v50 = vmul.f32 %v721_v19, %v712_v47  ;;  %838 = vmatprep.subr.bf16.mxu0 %v731_v41 }
  0xeb   : > { %839 = vmatpush1.bf16.msra.mxu0 %v730_v43  ;;  %1313 = vrot.lane.b32.xlu1 %v9228_v35, %s15266_s25 }
  0xec   : > { %v697_v53 = vpop.permute.xlu1 %696  ;;  %v695_v54 = vpop.permute.xlu0 %694  ;;  %v757_v56 = vpack.c.bf16 %v15268_v55, %v729_v50  ;;  %v756_v57 = vpack.c.bf16 %v15268_v55, %v728_v49  ;;  %1311 = vrot.lane.b32.xlu0 %v9231_v36, %s15266_s25 }
  0xee   : > { %v822_v58 = vand.u32 %v9388_v51, %v757_v56  ;;  %v819_v59 = vand.u32 %v9388_v51, %v756_v57  ;;  %v8002_v51 = vld [vmem:[%s15253_s3 + $0x4] ss:$16 sps:$4 sm:$0xff]  }
  0xef   : > { %1325 = vrot.lane.b32.xlu1 %v9255_v48, %s15266_s25  ;;  %1786 = vmatprep.mubr.bf16.mxu1 %v8002_v51 }
  0xf0   : > { %v703_v60 = vpop.permute.xlu1 %702  ;;  %v701_v61 = vpop.permute.xlu0 %700  ;;  %844 = vmatprep.subr.bf16.mxu0 %v822_v58  ;;  %1323 = vrot.lane.b32.xlu0 %v9263_v52, %s15266_s25 }
  0xf1   : > { %v708_v62 = vsel %vm706_vm9, %v697_v53, %v703_v60  ;;  %v711_v63 = vsel %vm706_vm9, %v703_v60, %v697_v53  ;;  %v707_v0 = vsel %vm706_vm9, %v695_v54, %v701_v61  ;;  %v710_v1 = vsel %vm706_vm9, %v701_v61, %v695_v54  ;;  %845 = vmatpush2.bf16.msra.mxu0 %v819_v59 }
  0xf2   : > { %v726_v2 = vmul.f32 %v717_v18, %v708_v62  ;;  %v727_v3 = vmul.f32 %v721_v19, %v711_v63  ;;  %v724_v4 = vmul.f32 %v717_v18, %v707_v0  ;;  %v725_v5 = vmul.f32 %v721_v19, %v710_v1 }
  0xf3   : > { %1130 = vrot.lane.b32.xlu1 %v9228_v35, %s15339_s14 }
  0xf4   : > { %v661_v7 = vpop.permute.xlu1 %660  ;;  %v659_v8 = vpop.permute.xlu0 %658  ;;  %v755_v9 = vpack.c.bf16 %v727_v3, %v725_v5  ;;  %v754_v10 = vpack.c.bf16 %v726_v2, %v724_v4  ;;  %1128 = vrot.lane.b32.xlu0 %v9231_v36, %s15339_s14 }
  0xf6   : > { %846 = vmatprep.subr.bf16.mxu0 %v755_v9 }
  0xf7   : > { %847 = vmatpush2.bf16.msra.mxu0 %v754_v10  ;;  %1142 = vrot.lane.b32.xlu1 %v9255_v48, %s15339_s14 }
  0xf8   : > { %v667_v13 = vpop.permute.xlu1 %666  ;;  %v665_v14 = vpop.permute.xlu0 %664  ;;  %1140 = vrot.lane.b32.xlu0 %v9263_v52, %s15339_s14 }
  0xf9   : > { %v671_v15 = vsel %vm668_vm11, %v661_v7, %v667_v13  ;;  %v674_v16 = vsel %vm668_vm11, %v667_v13, %v661_v7  ;;  %v670_v17 = vsel %vm668_vm11, %v659_v8, %v665_v14  ;;  %v673_v18 = vsel %vm668_vm11, %v665_v14, %v659_v8 }
  0xfa   : > { %v690_v19 = vmul.f32 %v679_v11, %v671_v15  ;;  %v691_v25 = vmul.f32 %v683_v12, %v674_v16  ;;  %v688_v26 = vmul.f32 %v679_v11, %v670_v17  ;;  %v689_v27 = vmul.f32 %v683_v12, %v673_v18 }
  0xfb   : > { %1309 = vrot.lane.b32.xlu1 %v9195_v23, %s15266_s25 }
  0xfc   : > { %v629_v33 = vpop.permute.xlu1 %628  ;;  %v623_v34 = vpop.permute.xlu0 %622  ;;  %v753_v37 = vpack.c.bf16 %v691_v25, %v689_v27  ;;  %v752_v38 = vpack.c.bf16 %v690_v19, %v688_v26  ;;  %1307 = vrot.lane.b32.xlu0 %v9198_v24, %s15266_s25  ;;  %v7984_v27 = vld [vmem:[%s15251_s1] ss:$8 sps:$4 sm:$0xff]  }
  0xfd   : > { %v633_v41 = vsel %vm630_vm12, %v623_v34, %v629_v33  ;;  %v636_v43 = vsel %vm630_vm12, %v629_v33, %v623_v34  ;;  %v7992_v33 = vld [vmem:[%s15251_s1 + $0x20] ss:$8 sps:$4 sm:$0xff]   ;;  %v7993_v34 = vld [vmem:[%s15251_s1 + $0x34] ss:$8 sps:$4 sm:$0xff]  }
  0xfe   : > { %848 = vmatprep.subr.bf16.mxu0 %v753_v37  ;;  %v652_v49 = vmul.f32 %v641_v39, %v633_v41  ;;  %v653_v50 = vmul.f32 %v645_v40, %v636_v43 }
  0xff   : > { %849 = vmatpush2.bf16.msra.mxu0 %v752_v38  ;;  %1321 = vrot.lane.b32.xlu1 %v9208_v28, %s15266_s25 }
 0x100   : > { %v663_v44 = vpop.permute.xlu1 %662  ;;  %v657_v45 = vpop.permute.xlu0 %656  ;;  %1319 = vrot.lane.b32.xlu0 %v9211_v29, %s15266_s25  ;;  %s15514_s25 = smov 113  }
 0x101   : > { %v669_v46 = vsel %vm668_vm11, %v657_v45, %v663_v44  ;;  %v672_v47 = vsel %vm668_vm11, %v663_v44, %v657_v45 }
 0x102   : > { %v686_v53 = vmul.f32 %v679_v11, %v669_v46  ;;  %v687_v54 = vmul.f32 %v683_v12, %v672_v47 }
 0x103   : > { %1252 = vrot.lane.b32.xlu1 %v9228_v35, %s15314_s13 }
 0x104   : > { %v621_v56 = vpop.permute.xlu1 %620  ;;  %v619_v57 = vpop.permute.xlu0 %618  ;;  %v751_v58 = vpack.c.bf16 %v687_v54, %v653_v50  ;;  %v750_v59 = vpack.c.bf16 %v686_v53, %v652_v49  ;;  %1250 = vrot.lane.b32.xlu0 %v9231_v36, %s15314_s13 }
 0x106   : > { %850 = vmatprep.subr.bf16.mxu0 %v751_v58 }
 0x107   : > { %851 = vmatpush2.bf16.msra.mxu0 %v750_v59  ;;  %1264 = vrot.lane.b32.xlu1 %v9255_v48, %s15314_s13 }
 0x108   : > { %v627_v60 = vpop.permute.xlu1 %626  ;;  %v625_v61 = vpop.permute.xlu0 %624  ;;  %1262 = vrot.lane.b32.xlu0 %v9263_v52, %s15314_s13 }
 0x109   : > { %v632_v62 = vsel %vm630_vm12, %v621_v56, %v627_v60  ;;  %v635_v63 = vsel %vm630_vm12, %v627_v60, %v621_v56  ;;  %v631_v0 = vsel %vm630_vm12, %v619_v57, %v625_v61  ;;  %v634_v1 = vsel %vm630_vm12, %v625_v61, %v619_v57 }
 0x10a   : > { %v650_v2 = vmul.f32 %v641_v39, %v632_v62  ;;  %v651_v3 = vmul.f32 %v645_v40, %v635_v63  ;;  %v648_v4 = vmul.f32 %v641_v39, %v631_v0  ;;  %v649_v5 = vmul.f32 %v645_v40, %v634_v1 }
 0x10b   : > { %1248 = vrot.lane.b32.xlu1 %v9195_v23, %s15314_s13 }
 0x10c   : > { %v585_v6 = vpop.permute.xlu1 %584  ;;  %v583_v7 = vpop.permute.xlu0 %582  ;;  %v749_v8 = vpack.c.bf16 %v651_v3, %v649_v5  ;;  %v748_v9 = vpack.c.bf16 %v650_v2, %v648_v4  ;;  %1246 = vrot.lane.b32.xlu0 %v9198_v24, %s15314_s13 }
 0x10e   : > { %852 = vmatprep.subr.bf16.mxu0 %v749_v8 }
 0x10f   : > { %853 = vmatpush2.bf16.msra.mxu0 %v748_v9  ;;  %1260 = vrot.lane.b32.xlu1 %v9208_v28, %s15314_s13 }
 0x110   : > { %v591_v10 = vpop.permute.xlu1 %590  ;;  %v589_v11 = vpop.permute.xlu0 %588  ;;  %1258 = vrot.lane.b32.xlu0 %v9211_v29, %s15314_s13 }
 0x111   : > { %v595_v12 = vsel %vm592_vm2, %v585_v6, %v591_v10  ;;  %v598_v13 = vsel %vm592_vm2, %v591_v10, %v585_v6  ;;  %v594_v14 = vsel %vm592_vm2, %v583_v7, %v589_v11  ;;  %v597_v15 = vsel %vm592_vm2, %v589_v11, %v583_v7  ;;  %v7604_v6 = vld [vmem:[%s15254_s4 + $0x7] ss:$8 sm:$0x3] }
 0x112   : > { %v614_v16 = vmul.f32 %v9215_v30, %v595_v12  ;;  %v615_v17 = vmul.f32 %v9218_v31, %v598_v13  ;;  %v612_v18 = vmul.f32 %v9215_v30, %v594_v14  ;;  %v613_v19 = vmul.f32 %v9218_v31, %v597_v15  ;;  %v7987_v30 = vld [vmem:[%s15251_s1 + $0x14] ss:$8 sps:$4 sm:$0xff]   ;;  %v7989_v31 = vld [vmem:[%s15251_s1 + $0x10] ss:$8 sps:$4 sm:$0xff]  }
 0x113   : > { %1435 = vrot.lane.b32.xlu1 %v9228_v35, %s15312_s23  ;;  %v7995_v35 = vld [vmem:[%s15251_s1 + $0x30] ss:$8 sps:$4 sm:$0xff]   ;;  %v9603_v7 = vrot.slane %v7604_v6, %v9190_v21  ;;  %v9606_v8 = vrot.slane %v7604_v6, %v9192_v22 }
 0x114   : > { %v747_v25 = vpack.c.bf16 %v615_v17, %v613_v19  ;;  %v746_v26 = vpack.c.bf16 %v614_v16, %v612_v18  ;;  %1433 = vrot.lane.b32.xlu0 %v9231_v36, %s15312_s23  ;;  %v1127_v36 = vpop.permute.xlu1 %1126 }
 0x116   : > { %854 = vmatprep.subr.bf16.mxu0 %v747_v25 }
 0x117   : > { %855 = vmatpush2.bf16.msra.mxu0 %v746_v26  ;;  %1447 = vrot.lane.b32.xlu1 %v9255_v48, %s15312_s23  ;;  %v1125_v48 = vpop.permute.xlu0 %1124 }
 0x118   : > { %1445 = vrot.lane.b32.xlu0 %v9263_v52, %s15312_s23  ;;  %v1139_v52 = vpop.permute.xlu1 %1138 }
 0x119   : > { %v1153_v39 = vsel %vm516_vm6, %v1139_v52, %v1127_v36 }
 0x11a   : > { %857 = vmatmul.mubr.bf16.vlgmr.msra.gmra.mxu0 %v7984_v27 }
 0x11b   : > { %7596 = vmatprep.mubr.msk.bf16.mxu0 %vm802_vm1, %v7987_v30  ;;  %1431 = vrot.lane.b32.xlu1 %v9195_v23, %s15312_s23  ;;  %v7600_v23 = vld [vmem:[%s15254_s4 + $0x2] ss:$8 sm:$0x3]  ;;  %v1137_v37 = vpop.permute.xlu0 %1136 }
 0x11c   : > { %1429 = vrot.lane.b32.xlu0 %v9198_v24, %s15312_s23  ;;  %v9550_v24 = vrot.slane %v7600_v23, %v9192_v22  ;;  %v1146_v38 = vsel %vm516_vm6, %v1125_v48, %v1137_v37  ;;  %v1152_v40 = vsel %vm516_vm6, %v1137_v37, %v1125_v48  ;;  %v9567_v46 = vpop.permute.xlu1 %1069 }
 0x11e   : > { %v1172_v41 = vmul.f32 %v9550_v24, %v1146_v38 }
 0x11f   : > { %1443 = vrot.lane.b32.xlu1 %v9208_v28, %s15312_s23  ;;  %v1147_v28 = vsel %vm516_vm6, %v1127_v36, %v1139_v52  ;;  %v9569_v47 = vpop.permute.xlu0 %1067 }
 0x120   : > { %1441 = vrot.lane.b32.xlu0 %v9211_v29, %s15312_s23  ;;  %v9557_v29 = vrot.slane %v7600_v23, %v9190_v21  ;;  %v1174_v43 = vmul.f32 %v9550_v24, %v1147_v28  ;;  %v9571_v53 = vpop.permute.xlu1 %1081 }
 0x122   : > { %867 = vmatmul.mubr.bf16.gmra.mxu0 %v7989_v31  ;;  %v1171_v44 = vmul.f32 %v9557_v29, %v1152_v40  ;;  %v1173_v45 = vmul.f32 %v9557_v29, %v1153_v39  ;;  %v1499_v49 = vpack.c.bf16 %v1174_v43, %v1172_v41 }
 0x123   : > { %7597 = vmatprep.mubr.msk.bf16.mxu0 %vm802_vm1, %v7990_v32  ;;  %v9573_v54 = vpop.permute.xlu0 %1079 }
 0x124   : > { %v1498_v50 = vpack.c.bf16 %v1173_v45, %v1171_v44  ;;  %1754 = vmatprep.subr.bf16.mxu1 %v1499_v49  ;;  %v9575_v56 = vpop.permute.xlu1 %1065 }
 0x126   : > { %1755 = vmatpush1.bf16.msra.mxu1 %v1498_v50 }
 0x127   : > { %v9577_v57 = vpop.permute.xlu0 %1063 }
 0x128   : > { %v9579_v58 = vpop.permute.xlu1 %1077 }
 0x12a   : > { %877 = vmatmul.mubr.bf16.gmra.mxu0 %v7992_v33 }
 0x12b   : > { %7598 = vmatprep.mubr.msk.bf16.mxu0 %vm802_vm1, %v7993_v34  ;;  %v9581_v59 = vpop.permute.xlu0 %1075 }
 0x12c   : > { %v9583_v60 = vpop.permute.xlu1 %1008 }
 0x12f   : > { %v9585_v61 = vpop.permute.xlu0 %1006 }
 0x131   : > { %v9587_v62 = vpop.permute.xlu1 %1020 }
 0x132   : > { %887 = vmatmul.mubr.bf16.gmra.mxu0 %v7995_v35 }
 0x133   : > { %v9589_v63 = vpop.permute.xlu0 %1018 }
 0x135   : > { %v9591_v0 = vpop.permute.xlu1 %1004 }
 0x137   : > { %v9593_v1 = vpop.permute.xlu0 %1002 }
 0x139   : > { %v9595_v2 = vpop.permute.xlu1 %1016 }
 0x13b   : > { %v9597_v3 = vpop.permute.xlu0 %1014 }
 0x13d   : > { %v1375_v4 = vpop.permute.xlu1 %1374 }
 0x13f   : > { %v1373_v5 = vpop.permute.xlu0 %1372 }
 0x141   : > { %v1387_v9 = vpop.permute.xlu1 %1386 }
 0x142   : > { %v1393_v11 = vsel %vm668_vm11, %v1375_v4, %v1387_v9  ;;  %v1399_v12 = vsel %vm668_vm11, %v1387_v9, %v1375_v4 }
 0x143   : > { %v1385_v10 = vpop.permute.xlu0 %1384  ;;  %v1421_v15 = vmul.f32 %v9603_v7, %v1393_v11  ;;  %v1422_v16 = vmul.f32 %v9606_v8, %v1399_v12 }
 0x144   : > { %v1392_v13 = vsel %vm668_vm11, %v1373_v5, %v1385_v10  ;;  %v1398_v14 = vsel %vm668_vm11, %v1385_v10, %v1373_v5 }
 0x145   : > { %v1419_v17 = vmul.f32 %v9603_v7, %v1392_v13  ;;  %v1420_v18 = vmul.f32 %v9606_v8, %v1398_v14  ;;  %v9620_v25 = vpop.permute.xlu1 %1191 }
 0x146   : > { %15504 = vst [vmem:[#allocation23_spill] sm:$0xff] %v9620_v25  ;;  %v1087_v25 = vsel %vm478_vm7, %v9569_v47, %v9573_v54 }
 0x147   : > { %v1530_v19 = vpack.c.bf16 %v1421_v15, %v1419_v17  ;;  %v9622_v26 = vpop.permute.xlu0 %1189  ;;  %v1531_v27 = vpack.c.bf16 %v1422_v16, %v1420_v18 }
 0x148   : > { %15505 = vst [vmem:[#allocation24_spill] sm:$0xff] %v9622_v26 }
 0x149   : > { %1867 = vmatprep.subr.bf16.mxu0 %v1531_v27  ;;  %v9624_v30 = vpop.permute.xlu1 %1203 }
 0x14a   : > { %1868 = vmatpush1.bf16.msra.mxu0 %v1530_v19  ;;  %15506 = vst [vmem:[#allocation25_spill] sm:$0xff] %v9624_v30  ;;  %v1092_v30 = vsel %vm478_vm7, %v9579_v58, %v9575_v56 }
 0x14b   : > { %v9626_v31 = vpop.permute.xlu0 %1201 }
 0x14c   : > { %15507 = vst [vmem:[#allocation26_spill] sm:$0xff] %v9626_v31 }
 0x14d   : > { %v1371_v32 = vpop.permute.xlu1 %1370 }
 0x14f   : > { %v1369_v33 = vpop.permute.xlu0 %1368 }
 0x151   : > { %v1383_v34 = vpop.permute.xlu1 %1382 }
 0x152   : > { %v1391_v36 = vsel %vm668_vm11, %v1371_v32, %v1383_v34  ;;  %v1397_v48 = vsel %vm668_vm11, %v1383_v34, %v1371_v32 }
 0x153   : > { %v1381_v35 = vpop.permute.xlu0 %1380  ;;  %v1417_v37 = vmul.f32 %v9603_v7, %v1391_v36  ;;  %v1418_v38 = vmul.f32 %v9606_v8, %v1397_v48 }
 0x154   : > { %v1390_v23 = vsel %vm668_vm11, %v1369_v33, %v1381_v35  ;;  %v1396_v52 = vsel %vm668_vm11, %v1381_v35, %v1369_v33 }
 0x155   : > { %v1415_v28 = vmul.f32 %v9603_v7, %v1390_v23  ;;  %v1416_v39 = vmul.f32 %v9606_v8, %v1396_v52 }
 0x157   : > { %v1528_v40 = vpack.c.bf16 %v1417_v37, %v1415_v28  ;;  %v1529_v41 = vpack.c.bf16 %v1418_v38, %v1416_v39 }
 0x159   : > { %1869 = vmatprep.subr.bf16.mxu0 %v1529_v41 }
 0x15a   : > { %1870 = vmatpush1.bf16.msra.mxu0 %v1528_v40 }
 0x1da   : > { %v858_v43 = vpop.f32.mrf.mxu0 }
 0x1db   : > { %v897_v49 = vmul.f32 0.5, %v858_v43 }
 0x1dc   : > { %v860_v44 = vpop.f32.mrf.mxu0 }
 0x1dd   : > { %v898_v4 = vmul.f32 0.5, %v860_v44  ;;  %8227 = vtanh.f32 %v897_v49  ;;  %v397_v49 = vld [vmem:[%s9048_s29] sm:$0xff] }
 0x1de   : > { %v862_v45 = vpop.f32.mrf.mxu0 }
 0x1df   : > { %v899_v5 = vmul.f32 0.5, %v862_v45  ;;  %8229 = vtanh.f32 %v898_v4 }
 0x1e0   : > { %v864_v50 = vpop.f32.mrf.mxu0 }
 0x1e1   : > { %v900_v10 = vmul.f32 0.5, %v864_v50  ;;  %8231 = vtanh.f32 %v899_v5 }
 0x1e2   : > { %v868_v6 = vpop.f32.mrf.mxu0 }
 0x1e3   : > { %v913_v9 = vadd.f32 0.01, %v868_v6 }
 0x1e4   : > { %v870_v11 = vpop.f32.mrf.mxu0 }
 0x1e5   : > { %v917_v12 = vmul.f32 0.5, %v913_v9  ;;  %v914_v13 = vadd.f32 0.01, %v870_v11 }
 0x1e6   : > { %v872_v14 = vpop.f32.mrf.mxu0 }
 0x1e7   : > { %8233 = vtanh.f32 %v917_v12  ;;  %v918_v15 = vmul.f32 0.5, %v914_v13  ;;  %v915_v16 = vadd.f32 0.01, %v872_v14  ;;  %v398_v13 = vld [vmem:[%s9048_s29 + $0x8] sm:$0xff] }
 0x1e8   : > { %8235 = vtanh.f32 %v900_v10  ;;  %v874_v17 = vpop.f32.mrf.mxu0 }
 0x1e9   : > { %8237 = vtanh.f32 %v918_v15  ;;  %v919_v18 = vmul.f32 0.5, %v915_v16  ;;  %v916_v19 = vadd.f32 0.01, %v874_v17 }
 0x1ea   : > { %v878_v27 = vpop.f32.mrf.mxu0  ;;  %v8228_v36 = vpop.eup %8227 }
 0x1eb   : > { %8239 = vtanh.f32 %v919_v18  ;;  %v920_v32 = vmul.f32 0.5, %v916_v19  ;;  %v905_v28 = vmul.f32 0.5, %v8228_v36 }
 0x1ec   : > { %8241 = vtanh.f32 %v878_v27  ;;  %v880_v33 = vpop.f32.mrf.mxu0  ;;  %v8230_v48 = vpop.eup %8229 }
 0x1ed   : > { %8243 = vtanh.f32 %v920_v32  ;;  %v906_v44 = vmul.f32 0.5, %v8230_v48  ;;  %v909_v11 = vadd.f32 0.5, %v905_v28 }
 0x1ee   : > { %8245 = vtanh.f32 %v880_v33  ;;  %v882_v34 = vpop.f32.mrf.mxu0  ;;  %v8232_v52 = vpop.eup %8231  ;;  %v399_v33 = vld [vmem:[%s9048_s29 + $0x10] sm:$0xff] }
 0x1ef   : > { %8247 = vtanh.f32 %v882_v34  ;;  %v907_v45 = vmul.f32 0.5, %v8232_v52  ;;  %v910_v27 = vadd.f32 0.5, %v906_v44 }
 0x1f0   : > { %v884_v35 = vpop.f32.mrf.mxu0 }
 0x1f1   : > { %8249 = vtanh.f32 %v884_v35  ;;  %v911_v32 = vadd.f32 0.5, %v907_v45 }
 0x1f2   : > { %v888_v23 = vpop.f32.mrf.mxu0 }
 0x1f3   : > { %v937_v37 = vmul.f32 0.5, %v888_v23 }
 0x1f4   : > { %v8234_v38 = vpop.eup %8233  ;;  %v890_v39 = vpop.f32.mrf.mxu0 }
 0x1f5   : > { %v8236_v40 = vpop.eup %8235  ;;  %v925_v41 = vmul.f32 0.5, %v8234_v38  ;;  %8251 = vtanh.f32 %v937_v37  ;;  %v938_v6 = vmul.f32 0.5, %v890_v39  ;;  %v400_v38 = vld [vmem:[%s9048_s29 + $0x18] sm:$0xff] }
 0x1f6   : > { %v8238_v43 = vpop.eup %8237  ;;  %v892_v50 = vpop.f32.mrf.mxu0  ;;  %v908_v12 = vmul.f32 0.5, %v8236_v40 }
 0x1f7   : > { %v929_v4 = vadd.f32 0.5, %v925_v41  ;;  %v926_v5 = vmul.f32 0.5, %v8238_v43  ;;  %v939_v9 = vmul.f32 0.5, %v892_v50 }
 0x1f8   : > { %v8240_v10 = vpop.eup %8239  ;;  %v894_v14 = vpop.f32.mrf.mxu0  ;;  %v912_v40 = vadd.f32 0.5, %v908_v12 }
 0x1f9   : > { %v8242_v15 = vpop.eup %8241  ;;  %v953_v16 = vmul.f32 %v929_v4, %v397_v49  ;;  %v930_v17 = vadd.f32 0.5, %v926_v5  ;;  %v927_v18 = vmul.f32 0.5, %v8240_v10  ;;  %8253 = vtanh.f32 %v939_v9 }
 0x1fa   : > { %v8244_v19 = vpop.eup %8243  ;;  %v957_v34 = vmul.f32 %v8242_v15, %v909_v11  ;;  %v940_v35 = vmul.f32 0.5, %v894_v14  ;;  %8255 = vtanh.f32 %v938_v6 }
 0x1fb   : > { %v8246_v36 = vpop.eup %8245  ;;  %v954_v48 = vmul.f32 %v930_v17, %v398_v13  ;;  %v931_v23 = vadd.f32 0.5, %v927_v18  ;;  %v928_v52 = vmul.f32 0.5, %v8244_v19 }
 0x1fc   : > { %v8248_v37 = vpop.eup %8247  ;;  %v961_v28 = vadd.f32 %v957_v34, %v953_v16  ;;  %v958_v39 = vmul.f32 %v8246_v36, %v910_v27  ;;  %8257 = vtanh.f32 %v940_v35 }
 0x1fd   : > { %v955_v41 = vmul.f32 %v931_v23, %v399_v33  ;;  %v932_v43 = vadd.f32 0.5, %v928_v52  ;;  %v959_v44 = vmul.f32 %v8248_v37, %v911_v32 }
 0x1fe   : > { %v8250_v45 = vpop.eup %8249  ;;  %8259 = vtanh.f32 %v961_v28  ;;  %973 = vst [vmem:[%s9048_s29] sm:$0xff] %v961_v28  ;;  %v962_v49 = vadd.f32 %v958_v39, %v954_v48  ;;  %v9678_v28 = vpop.permute.xlu0 %1185 }
 0x1ff   : > { %v956_v50 = vmul.f32 %v932_v43, %v400_v38  ;;  %v963_v4 = vadd.f32 %v959_v44, %v955_v41  ;;  %v960_v5 = vmul.f32 %v8250_v45, %v912_v40  ;;  %15512 = vst [vmem:[#allocation31_spill] sm:$0xff] %v9678_v28  ;;  %v9686_v39 = vpop.permute.xlu1 %1187 }
 0x200   : > { %8261 = vtanh.f32 %v962_v49  ;;  %974 = vst [vmem:[%s9048_s29 + $0x8] sm:$0xff] %v962_v49  ;;  %15513 = vst [vmem:[#allocation32_spill] sm:$0xff] %v9686_v39 }
 0x201   : > { %8263 = vtanh.f32 %v963_v4  ;;  %975 = vst [vmem:[%s9048_s29 + $0x10] sm:$0xff] %v963_v4  ;;  %v964_v6 = vadd.f32 %v960_v5, %v956_v50 }
 0x202   : > { %v8252_v9 = vpop.eup %8251  ;;  %v9690_v40 = vpop.permute.xlu0 %1197 }
 0x203   : > { %8265 = vtanh.f32 %v964_v6  ;;  %976 = vst [vmem:[%s9048_s29 + $0x18] sm:$0xff] %v964_v6  ;;  %v945_v10 = vmul.f32 0.5, %v8252_v9  ;;  %15515 = vst [vmem:[#allocation33_spill] sm:$0xff] %v9690_v40  ;;  %v9696_v41 = vpop.permute.xlu1 %1199 }
 0x204   : > { %15516 = vst [vmem:[#allocation34_spill] sm:$0xff] %v9696_v41 }
 0x205   : > { %v949_v13 = vadd.f32 0.5, %v945_v10  ;;  %v7646_v10 = vld [vmem:[%s9042_s11 + $0x8] sm:$0xff] }
 0x206   : > { %v8254_v11 = vpop.eup %8253  ;;  %v9698_v43 = vpop.permute.xlu0 %1311 }
 0x207   : > { %v8256_v12 = vpop.eup %8255  ;;  %v947_v15 = vmul.f32 0.5, %v8254_v11  ;;  %v9706_v44 = vpop.permute.xlu1 %1313 }
 0x208   : > { %v946_v17 = vmul.f32 0.5, %v8256_v12 }
 0x209   : > { %v8258_v14 = vpop.eup %8257  ;;  %v951_v32 = vadd.f32 0.5, %v947_v15 }
 0x20a   : > { %v948_v18 = vmul.f32 0.5, %v8258_v14  ;;  %v950_v34 = vadd.f32 0.5, %v946_v17  ;;  %v9710_v45 = vpop.permute.xlu0 %1323  ;;  %v2159_v14 = vcombine.high %v7646_v10, %v7646_v10 }
 0x20b   : > { %v8260_v16 = vpop.eup %8259  ;;  %v9716_v49 = vpop.permute.xlu1 %1325 }
 0x20c   : > { %v9648_v19 = vmul.f32 %v8260_v16, %v949_v13  ;;  %v952_v36 = vadd.f32 0.5, %v948_v18 }
 0x20d   : > { %v8262_v27 = vpop.eup %8261 }
 0x20e   : > { %15508 = vst [vmem:[#allocation27_spill] sm:$0xff] %v9648_v19  ;;  %v8264_v33 = vpop.eup %8263  ;;  %1120 = vrot.lane.b32.xlu0 %v9648_v19, %s15339_s14  ;;  %v9654_v23 = vmul.f32 %v8262_v27, %v950_v34  ;;  %v9718_v50 = vpop.permute.xlu0 %1128  ;;  %v2165_v11 = vrot.slane %v9648_v19, 4 }
 0x20f   : > { %v9652_v35 = vmul.f32 %v8264_v33, %v951_v32  ;;  %15517 = vst [vmem:[#allocation35_spill] sm:$0xff] %v9718_v50  ;;  %v9726_v4 = vpop.permute.xlu1 %1130 }
 0x210   : > { %v8266_v48 = vpop.eup %8265  ;;  %15510 = vst [vmem:[#allocation29_spill] sm:$0xff] %v9654_v23  ;;  %15518 = vst [vmem:[#allocation36_spill] sm:$0xff] %v9726_v4  ;;  %v2166_v15 = vrot.slane %v9654_v23, 4  ;;  %v9756_v16 = vsel %vm408_vm0, %v7646_v10, %v2165_v11 }
 0x211   : > { %15509 = vst [vmem:[#allocation28_spill] sm:$0xff] %v9652_v35  ;;  %v9656_v52 = vmul.f32 %v8266_v48, %v952_v36  ;;  %1122 = vrot.lane.b32.xlu1 %v9652_v35, %s15339_s14  ;;  %15521 = vst [vmem:[#allocation39_spill] sm:$0xff] %v9756_v16  ;;  %v9782_v34 = vrot.slane %v9652_v35, 4 }
 0x212   : > { %1059 = vrot.lane.b32.xlu0 %v9648_v19, %s15335_s15  ;;  %v9730_v5 = vpop.permute.xlu0 %1140  ;;  %v9765_v18 = vsel %vm408_vm0, %v2159_v14, %v2166_v15  ;;  %v7999_v14 = vld [vmem:[%s15253_s3 + $0xc] ss:$16 sps:$4 sm:$0xff]  }
 0x213   : > { %15511 = vst [vmem:[#allocation30_spill] sm:$0xff] %v9656_v52  ;;  %15519 = vst [vmem:[#allocation37_spill] sm:$0xff] %v9730_v5  ;;  %v9736_v6 = vpop.permute.xlu1 %1142  ;;  %v9792_v48 = vsel %vm408_vm0, %v9782_v34, 0.0  ;;  %v9805_v55 = vsel %vm408_vm0, %v2165_v11, %v9782_v34  ;;  %7638 = vmatprep.mubr.msk.bf16.mxu0 %vm1723_vm13, %v7999_v14  ;;  %v9832_v14 = vrot.slane %v9656_v52, 4 }
 0x214   : > { %15520 = vst [vmem:[#allocation38_spill] sm:$0xff] %v9736_v6  ;;  %15522 = vst [vmem:[#allocation40_spill] sm:$0xff] %v9765_v18 }
 0x215   : > { %1061 = vrot.lane.b32.xlu1 %v9652_v35, %s15335_s15  ;;  %15523 = vst [vmem:[#allocation41_spill] sm:$0xff] %v9782_v34  ;;  %15525 = vst [vmem:[#allocation43_spill] sm:$0xff] %v9805_v55  ;;  %v9844_v50 = vsel %vm408_vm0, %v9832_v14, 0.0  ;;  %v9860_v6 = vsel %vm408_vm0, %v2166_v15, %v9832_v14 }
 0x216   : > { %998 = vrot.lane.b32.xlu0 %v9648_v19, %s15320_s16  ;;  %v9738_v9 = vpop.permute.xlu0 %1307  ;;  %15530 = vst [vmem:[#allocation48_spill] sm:$0xff] %v9832_v14 }
 0x217   : > { %v9748_v12 = vpop.permute.xlu1 %1309 }
 0x219   : > { %1000 = vrot.lane.b32.xlu1 %v9652_v35, %s15320_s16 }
 0x21a   : > { %1242 = vrot.lane.b32.xlu0 %v9648_v19, %s15314_s13  ;;  %v9752_v13 = vpop.permute.xlu0 %1319 }
 0x21b   : > { %v9762_v17 = vpop.permute.xlu1 %1321 }
 0x21d   : > { %1244 = vrot.lane.b32.xlu1 %v9652_v35, %s15314_s13 }
 0x21e   : > { %1364 = vrot.lane.b32.xlu0 %v9648_v19, %s15318_s24  ;;  %v9767_v27 = vpop.permute.xlu0 %1250 }
 0x21f   : > { %v9775_v32 = vpop.permute.xlu1 %1252 }
 0x221   : > { %1366 = vrot.lane.b32.xlu1 %v9652_v35, %s15318_s24 }
 0x222   : > { %1181 = vrot.lane.b32.xlu0 %v9648_v19, %s15316_s30  ;;  %v9779_v33 = vpop.permute.xlu0 %1262 }
 0x223   : > { %v9788_v36 = vpop.permute.xlu1 %1264 }
 0x225   : > { %1183 = vrot.lane.b32.xlu1 %v9652_v35, %s15316_s30 }
 0x226   : > { %1303 = vrot.lane.b32.xlu0 %v9648_v19, %s15514_s25  ;;  %v9794_v10 = vpop.permute.xlu0 %1246 }
 0x227   : > { %15524 = vst [vmem:[#allocation42_spill] sm:$0xff] %v9794_v10  ;;  %v9809_v37 = vpop.permute.xlu1 %1248 }
 0x228   : > { %15526 = vst [vmem:[#allocation44_spill] sm:$0xff] %v9809_v37 }
 0x229   : > { %1305 = vrot.lane.b32.xlu1 %v9652_v35, %s15514_s25 }
 0x22a   : > { %1425 = vrot.lane.b32.xlu0 %v9648_v19, %s15312_s23  ;;  %v9814_v38 = vpop.permute.xlu0 %1258 }
 0x22b   : > { %15527 = vst [vmem:[#allocation45_spill] sm:$0xff] %v9814_v38  ;;  %v9823_v11 = vpop.permute.xlu1 %1260 }
 0x22c   : > { %15528 = vst [vmem:[#allocation46_spill] sm:$0xff] %v9823_v11 }
 0x22d   : > { %1427 = vrot.lane.b32.xlu1 %v9652_v35, %s15312_s23 }
 0x22e   : > { %1132 = vrot.lane.b32.xlu0 %v9654_v23, %s15339_s14  ;;  %v9825_v34 = vpop.permute.xlu0 %1433 }
 0x22f   : > { %15529 = vst [vmem:[#allocation47_spill] sm:$0xff] %v9825_v34  ;;  %v9836_v51 = vpop.permute.xlu1 %1435 }
 0x230   : > { %15531 = vst [vmem:[#allocation49_spill] sm:$0xff] %v9836_v51 }
 0x231   : > { %1134 = vrot.lane.b32.xlu1 %v9656_v52, %s15339_s14 }
 0x232   : > { %1071 = vrot.lane.b32.xlu0 %v9654_v23, %s15335_s15  ;;  %v9840_v42 = vpop.permute.xlu0 %1445 }
 0x233   : > { %15532 = vst [vmem:[#allocation50_spill] sm:$0xff] %v9840_v42  ;;  %v9850_v5 = vpop.permute.xlu1 %1447 }
 0x234   : > { %15533 = vst [vmem:[#allocation51_spill] sm:$0xff] %v9850_v5 }
 0x235   : > { %1073 = vrot.lane.b32.xlu1 %v9656_v52, %s15335_s15 }
 0x236   : > { %1010 = vrot.lane.b32.xlu0 %v9654_v23, %s15320_s16  ;;  %v9852_v4 = vpop.permute.xlu0 %1429 }
 0x237   : > { %15534 = vst [vmem:[#allocation52_spill] sm:$0xff] %v9852_v4  ;;  %v9862_v19 = vpop.permute.xlu1 %1431 }
 0x238   : > { %15535 = vst [vmem:[#allocation53_spill] sm:$0xff] %v9862_v19 }
 0x239   : > { %1012 = vrot.lane.b32.xlu1 %v9656_v52, %s15320_s16 }
 0x23a   : > { %1254 = vrot.lane.b32.xlu0 %v9654_v23, %s15314_s13  ;;  %v9868_v35 = vpop.permute.xlu0 %1441 }
 0x23b   : > { %15536 = vst [vmem:[#allocation54_spill] sm:$0xff] %v9868_v35 }
 0x23d   : > { %1256 = vrot.lane.b32.xlu1 %v9656_v52, %s15314_s13 }
 0x23e   : > { %1376 = vrot.lane.b32.xlu0 %v9654_v23, %s15318_s24 }
 0x241   : > { %1378 = vrot.lane.b32.xlu1 %v9656_v52, %s15318_s24 }
 0x242   : > { %1193 = vrot.lane.b32.xlu0 %v9654_v23, %s15316_s30 }
 0x245   : > { %1195 = vrot.lane.b32.xlu1 %v9656_v52, %s15316_s30 }
 0x246   : > { %1315 = vrot.lane.b32.xlu0 %v9654_v23, %s15514_s25 }
 0x249   : > { %1317 = vrot.lane.b32.xlu1 %v9656_v52, %s15514_s25 }
 0x24a   : > { %1437 = vrot.lane.b32.xlu0 %v9654_v23, %s15312_s23  ;;  %v9874_v23 = vpop.permute.xlu1 %1443 }
 0x24b   : > { %15537 = vst [vmem:[#allocation55_spill] sm:$0xff] %v9874_v23 }
 0x24d   : > { %1439 = vrot.lane.b32.xlu1 %v9656_v52, %s15312_s23 }
 0x24e   : > { %2326 = vrot.lane.b32.xlu0 %v9756_v16, %s15314_s13 }
 0x251   : > { %2332 = vrot.lane.b32.xlu1 %v9765_v18, %s15314_s13 }
 0x252   : > { %2290 = vrot.lane.b32.xlu0 %v9756_v16, %s15316_s30 }
 0x255   : > { %2296 = vrot.lane.b32.xlu1 %v9765_v18, %s15316_s30 }
 0x256   : > { %2254 = vrot.lane.b32.xlu0 %v9756_v16, %s15339_s14 }
 0x259   : > { %2224 = vrot.lane.b32.xlu1 %v9765_v18, %s15335_s15 }
 0x25a   : > { %2218 = vrot.lane.b32.xlu0 %v9756_v16, %s15335_s15 }
 0x25d   : > { %2294 = vrot.lane.b32.xlu1 %v9792_v48, %s15316_s30 }
 0x25e   : > { %2182 = vrot.lane.b32.xlu0 %v9756_v16, %s15320_s16 }
 0x261   : > { %2256 = vrot.lane.b32.xlu1 %v9805_v55, %s15339_s14 }
 0x262   : > { %2260 = vrot.lane.b32.xlu0 %v9765_v18, %s15339_s14 }
 0x265   : > { %2222 = vrot.lane.b32.xlu1 %v9792_v48, %s15335_s15 }
 0x266   : > { %2188 = vrot.lane.b32.xlu0 %v9765_v18, %s15320_s16 }
 0x269   : > { %2184 = vrot.lane.b32.xlu1 %v9805_v55, %s15320_s16 }
 0x26a   : > { %2292 = vrot.lane.b32.xlu0 %v9805_v55, %s15316_s30 }
 0x26d   : > { %2436 = vrot.lane.b32.xlu1 %v9805_v55, %s15312_s23 }
 0x26e   : > { %2258 = vrot.lane.b32.xlu0 %v9792_v48, %s15339_s14 }
 0x271   : > { %2300 = vrot.lane.b32.xlu1 %v9844_v50, %s15316_s30 }
 0x272   : > { %2220 = vrot.lane.b32.xlu0 %v9805_v55, %s15335_s15 }
 0x275   : > { %2264 = vrot.lane.b32.xlu1 %v9844_v50, %s15339_s14 }
 0x276   : > { %2186 = vrot.lane.b32.xlu0 %v9792_v48, %s15320_s16 }
 0x279   : > { %2262 = vrot.lane.b32.xlu1 %v9860_v6, %s15339_s14 }
 0x27a   : > { %2438 = vrot.lane.b32.xlu0 %v9792_v48, %s15312_s23 }
 0x27d   : > { %2402 = vrot.lane.b32.xlu1 %v9792_v48, %s15318_s24 }
 0x27e   : > { %2298 = vrot.lane.b32.xlu0 %v9860_v6, %s15316_s30  ;;  %s15594_s30 = smov 1  }
 0x280   : > { %v1121_v15 = vpop.permute.xlu0 %1120 }
 0x281   : > { %2404 = vrot.lane.b32.xlu1 %v9765_v18, %s15318_s24 }
 0x282   : > { %2434 = vrot.lane.b32.xlu0 %v9756_v16, %s15312_s23 }
 0x283   : > { %v1123_v14 = vpop.permute.xlu1 %1122 }
 0x284   : > { %v9880_v52 = vpop.permute.xlu0 %1059 }
 0x285   : > { %2364 = vrot.lane.b32.xlu1 %v9805_v55, %s15514_s25 }
 0x286   : > { %2440 = vrot.lane.b32.xlu0 %v9765_v18, %s15312_s23 }
 0x287   : > { %v9886_v35 = vpop.permute.xlu1 %1061 }
 0x288   : > { %v9888_v4 = vpop.permute.xlu0 %998 }
 0x289   : > { %2228 = vrot.lane.b32.xlu1 %v9844_v50, %s15335_s15 }
 0x28a   : > { %2226 = vrot.lane.b32.xlu0 %v9860_v6, %s15335_s15 }
 0x28b   : > { %v9894_v23 = vpop.permute.xlu1 %1000 }
 0x28c   : > { %v9896_v19 = vpop.permute.xlu0 %1242 }
 0x28d   : > { %15538 = vst [vmem:[#allocation56_spill] sm:$0xff] %v9896_v19  ;;  %2192 = vrot.lane.b32.xlu1 %v9844_v50, %s15320_s16 }
 0x28e   : > { %2400 = vrot.lane.b32.xlu0 %v9805_v55, %s15318_s24 }
 0x28f   : > { %v9902_v28 = vpop.permute.xlu1 %1244 }
 0x290   : > { %v9904_v40 = vpop.permute.xlu0 %1364 }
 0x291   : > { %2190 = vrot.lane.b32.xlu1 %v9860_v6, %s15320_s16 }
 0x292   : > { %2366 = vrot.lane.b32.xlu0 %v9792_v48, %s15514_s25 }
 0x293   : > { %v9910_v39 = vpop.permute.xlu1 %1366 }
 0x294   : > { %v9912_v41 = vpop.permute.xlu0 %1181 }
 0x295   : > { %15539 = vst [vmem:[#allocation57_spill] sm:$0xff] %v9912_v41  ;;  %2444 = vrot.lane.b32.xlu1 %v9844_v50, %s15312_s23  ;;  %v7599_v41 = vld [vmem:[%s15254_s4 + $0x1] ss:$8 sm:$0x3] }
 0x296   : > { %2398 = vrot.lane.b32.xlu0 %v9756_v16, %s15318_s24  ;;  %v9939_v26 = vrot.slane %v7599_v41, %v9192_v22 }
 0x297   : > { %v9918_v42 = vpop.permute.xlu1 %1183 }
 0x298   : > { %15540 = vst [vmem:[#allocation58_spill] sm:$0xff] %v9918_v42  ;;  %v9920_v34 = vpop.permute.xlu0 %1303  ;;  %v9936_v42 = vrot.slane %v7599_v41, %v9190_v21  ;;  %v1093_v41 = vsel %vm478_vm7, %v9573_v54, %v9569_v47  ;;  %v1086_v54 = vsel %vm478_vm7, %v9575_v56, %v9579_v58 }
 0x299   : > { %2442 = vrot.lane.b32.xlu1 %v9860_v6, %s15312_s23  ;;  %s15596_s23 = smov 111  }
 0x29a   : > { %2362 = vrot.lane.b32.xlu0 %v9756_v16, %s15514_s25  ;;  %v1088_v16 = vsel %vm478_vm7, %v9567_v46, %v9571_v53  ;;  %v9978_v47 = vmul.f32 %v9936_v42, %v1093_v41  ;;  %v1115_v41 = vmul.f32 %v9939_v26, %v1087_v25  ;;  %v1113_v25 = vmul.f32 %v9939_v26, %v1086_v54 }
 0x29b   : > { %v9929_v5 = vpop.permute.xlu1 %1305 }
 0x29c   : > { %v9931_v51 = vpop.permute.xlu0 %1425 }
 0x29d   : > { %15541 = vst [vmem:[#allocation59_spill] sm:$0xff] %v9931_v51  ;;  %2330 = vrot.lane.b32.xlu1 %v9792_v48, %s15314_s13  ;;  %v1094_v51 = vsel %vm478_vm7, %v9571_v53, %v9567_v46  ;;  %v1117_v53 = vmul.f32 %v9939_v26, %v1088_v16  ;;  %v1085_v16 = vsel %vm478_vm7, %v9577_v57, %v9581_v59 }
 0x29e   : > { %2406 = vrot.lane.b32.xlu0 %v9860_v6, %s15318_s24  ;;  %v9968_v46 = vmul.f32 %v9936_v42, %v1094_v51  ;;  %v997_v51 = vld [vmem:[%s15254_s4] ss:$8 sm:$0x3]  ;;  %v1111_v19 = vmul.f32 %v9939_v26, %v1085_v16  ;;  %v1027_v16 = vsel %vm440_vm8, %v9583_v60, %v9587_v62 }
 0x29f   : > { %v9951_v48 = vpop.permute.xlu1 %1427 }
 0x2a0   : > { %15542 = vst [vmem:[#allocation60_spill] sm:$0xff] %v9951_v48  ;;  %v1133_v31 = vpop.permute.xlu0 %1132 }
 0x2a1   : > { %2408 = vrot.lane.b32.xlu1 %v9844_v50, %s15318_s24  ;;  %v1144_v48 = vsel %vm516_vm6, %v1121_v15, %v1133_v31  ;;  %v1150_v38 = vsel %vm516_vm6, %v1133_v31, %v1121_v15  ;;  %v1091_v31 = vsel %vm478_vm7, %v9581_v59, %v9577_v57  ;;  %s15628_s24 = smov 16  }
 0x2a2   : > { %2368 = vrot.lane.b32.xlu0 %v9765_v18, %s15514_s25  ;;  %v9997_v18 = vmul.f32 %v9936_v42, %v1092_v30  ;;  %v1167_v11 = vmul.f32 %v9557_v29, %v1150_v38  ;;  %v1168_v57 = vmul.f32 %v9550_v24, %v1144_v48  ;;  %v10011_v30 = vmul.f32 %v9936_v42, %v1091_v31 }
 0x2a3   : > { %v1135_v15 = vpop.permute.xlu1 %1134  ;;  %v10020_v38 = vrot.slane %v997_v51, %v9192_v22 }
 0x2a4   : > { %v1072_v56 = vpop.permute.xlu0 %1071  ;;  %v1145_v58 = vsel %vm516_vm6, %v1123_v14, %v1135_v15  ;;  %v1151_v10 = vsel %vm516_vm6, %v1135_v15, %v1123_v14  ;;  %v10015_v14 = vrot.slane %v997_v51, %v9190_v21  ;;  %v1026_v15 = vsel %vm440_vm8, %v9585_v61, %v9589_v63 }
 0x2a5   : > { %v1169_v59 = vmul.f32 %v9557_v29, %v1151_v10  ;;  %v1170_v37 = vmul.f32 %v9550_v24, %v1145_v58  ;;  %2372 = vrot.lane.b32.xlu1 %v9844_v50, %s15514_s25  ;;  %v1033_v10 = vsel %vm440_vm8, %v9587_v62, %v9583_v60  ;;  %v1032_v51 = vsel %vm440_vm8, %v9589_v63, %v9585_v61 }
 0x2a6   : > { %2328 = vrot.lane.b32.xlu0 %v9805_v55, %s15314_s13  ;;  %v1495_v55 = vpack.c.bf16 %v1117_v53, %v1115_v41  ;;  %v1031_v60 = vsel %vm440_vm8, %v9595_v2, %v9591_v0  ;;  %v1030_v62 = vsel %vm440_vm8, %v9597_v3, %v9593_v1  ;;  %v1494_v61 = vpack.c.bf16 %v9968_v46, %v9978_v47 }
 0x2a7   : > { %v1074_v48 = vpop.permute.xlu1 %1073  ;;  %v1497_v54 = vpack.c.bf16 %v1170_v37, %v1168_v57  ;;  %v1496_v31 = vpack.c.bf16 %v1169_v59, %v1167_v11  ;;  %v1025_v37 = vsel %vm440_vm8, %v9591_v0, %v9595_v2  ;;  %v10055_v63 = vmul.f32 %v10015_v14, %v1033_v10  ;;  %v7603_v11 = vld [vmem:[%s15254_s4 + $0x6] ss:$8 sm:$0x3] }
 0x2a8   : > { %v10038_v58 = vpop.permute.xlu0 %1010  ;;  %v1493_v0 = vpack.c.bf16 %v1113_v25, %v1111_v19  ;;  %v1492_v2 = vpack.c.bf16 %v9997_v18, %v10011_v30  ;;  %v10067_v53 = vmul.f32 %v10020_v38, %v1027_v16  ;;  %v10070_v46 = vmul.f32 %v10015_v14, %v1032_v51 }
 0x2a9   : > { %1756 = vmatprep.subr.bf16.mxu1 %v1497_v54  ;;  %2370 = vrot.lane.b32.xlu1 %v9860_v6, %s15514_s25  ;;  %v10073_v47 = vmul.f32 %v10020_v38, %v1026_v15  ;;  %v1084_v41 = vsel %vm478_vm7, %v9886_v35, %v1074_v48  ;;  %v10081_v19 = vmul.f32 %v10015_v14, %v1031_v60 }
 0x2aa   : > { %2334 = vrot.lane.b32.xlu0 %v9860_v6, %s15314_s13  ;;  %1757 = vmatpush1.bf16.msra.mxu1 %v1496_v31  ;;  %v10084_v18 = vmul.f32 %v10020_v38, %v1025_v37  ;;  %v1024_v59 = vsel %vm440_vm8, %v9593_v1, %v9597_v3  ;;  %v10091_v25 = vmul.f32 %v10015_v14, %v1030_v62 }
 0x2ab   : > { %v10078_v57 = vpop.permute.xlu1 %1012  ;;  %1758 = vmatprep.subr.bf16.mxu1 %v1495_v55  ;;  %v10096_v10 = vrot.slane %v7603_v11, %v9190_v21  ;;  %v10099_v54 = vrot.slane %v7603_v11, %v9192_v22  ;;  %v1083_v31 = vsel %vm478_vm7, %v9880_v52, %v1072_v56  ;;  %v1090_v1 = vsel %vm478_vm7, %v1074_v48, %v9886_v35 }
 0x2ac   : > { %v10093_v30 = vpop.permute.xlu0 %1254  ;;  %v1332_v3 = vsel %vm630_vm12, %v9706_v44, %v9716_v49  ;;  %v1338_v55 = vsel %vm630_vm12, %v9716_v49, %v9706_v44  ;;  %v1331_v16 = vsel %vm630_vm12, %v9698_v43, %v9710_v45  ;;  %v1109_v15 = vmul.f32 %v9939_v26, %v1084_v41 }
 0x2ad   : > { %2336 = vrot.lane.b32.xlu1 %v9844_v50, %s15314_s13  ;;  %v10123_v35 = vmul.f32 %v10020_v38, %v1024_v59  ;;  %v1337_v48 = vsel %vm630_vm12, %v9710_v45, %v9698_v43  ;;  %v1330_v44 = vsel %vm630_vm12, %v9748_v12, %v9762_v17  ;;  %v1089_v49 = vsel %vm478_vm7, %v1072_v56, %v9880_v52  ;;  %s15595_s13 = smov 127  }
 0x2ae   : > { %1759 = vmatpush1.bf16.msra.mxu1 %v1494_v61  ;;  %v1336_v50 = vsel %vm630_vm12, %v9762_v17, %v9748_v12  ;;  %v1329_v43 = vsel %vm630_vm12, %v9738_v9, %v9752_v13  ;;  %v1107_v45 = vmul.f32 %v9939_v26, %v1083_v31  ;;  %v1108_v37 = vmul.f32 %v9936_v42, %v1090_v1 }
 0x2af   : > { %v10136_v51 = vpop.permute.xlu1 %1256  ;;  %1760 = vmatprep.subr.bf16.mxu1 %v1493_v0  ;;  %v10149_v52 = vmul.f32 %v10096_v10, %v1332_v3  ;;  %v1361_v56 = vmul.f32 %v10099_v54, %v1338_v55  ;;  %v10153_v62 = vmul.f32 %v10096_v10, %v1331_v16  ;;  %v1335_v12 = vsel %vm630_vm12, %v9752_v13, %v9738_v9 }
 0x2b0   : > { %v1377_v60 = vpop.permute.xlu0 %1376  ;;  %v1106_v17 = vmul.f32 %v9936_v42, %v1089_v49  ;;  %v1491_v11 = vpack.c.bf16 %v1109_v15, %v1107_v45  ;;  %v1359_v0 = vmul.f32 %v10099_v54, %v1337_v48  ;;  %v10168_v41 = vmul.f32 %v10096_v10, %v1330_v44 }
 0x2b1   : > { %v1388_v26 = vsel %vm668_vm11, %v9904_v40, %v1377_v60  ;;  %v1394_v61 = vsel %vm668_vm11, %v1377_v60, %v9904_v40  ;;  %v10171_v59 = vmul.f32 %v10099_v54, %v1336_v50  ;;  %v10174_v9 = vmul.f32 %v10096_v10, %v1329_v43  ;;  %v7602_v40 = vld [vmem:[%s15254_s4 + $0x5] ss:$8 sm:$0x3] }
 0x2b2   : > { %1761 = vmatpush1.bf16.msra.mxu1 %v1492_v2  ;;  %v1355_v13 = vmul.f32 %v10099_v54, %v1335_v12  ;;  %v1490_v55 = vpack.c.bf16 %v1108_v37, %v1106_v17  ;;  %v1411_v2 = vmul.f32 %v9603_v7, %v1388_v26  ;;  %v1412_v16 = vmul.f32 %v9606_v8, %v1394_v61  ;;  %v15543_v61 = vld [vmem:[#allocation56_spill] sm:$0xff] }
 0x2b3   : > { %v1379_v42 = vpop.permute.xlu1 %1378  ;;  %1762 = vmatprep.subr.bf16.mxu1 %v1491_v11  ;;  %v1489_v44 = vpack.c.bf16 %v10067_v53, %v10073_v47  ;;  %v1488_v49 = vpack.c.bf16 %v10055_v63, %v10070_v46  ;;  %v1487_v50 = vpack.c.bf16 %v10084_v18, %v10123_v35  ;;  %v1023_v43 = vsel %vm440_vm8, %v9894_v23, %v10078_v57 }
 0x2b4   : > { %v10180_v31 = vpop.permute.xlu0 %1193  ;;  %v1389_v1 = vsel %vm668_vm11, %v9910_v39, %v1379_v42  ;;  %v1395_v3 = vsel %vm668_vm11, %v1379_v42, %v9910_v39  ;;  %v10199_v39 = vrot.slane %v7602_v40, %v9192_v22  ;;  %v1524_v53 = vpack.c.bf16 %v10149_v52, %v10153_v62 }
 0x2b5   : > { %v1413_v15 = vmul.f32 %v9603_v7, %v1389_v1  ;;  %v1414_v48 = vmul.f32 %v9606_v8, %v1395_v3  ;;  %v1277_v63 = vsel %vm592_vm2, %v9788_v36, %v9775_v32  ;;  %v1525_v47 = vpack.c.bf16 %v1361_v56, %v1359_v0 }
 0x2b6   : > { %1763 = vmatpush1.bf16.msra.mxu1 %v1490_v55  ;;  %v1486_v18 = vpack.c.bf16 %v10081_v19, %v10091_v25  ;;  %v1522_v35 = vpack.c.bf16 %v10168_v41, %v10174_v9  ;;  %v10218_v37 = vrot.slane %v7602_v40, %v9190_v21  ;;  %v1022_v60 = vsel %vm440_vm8, %v9888_v4, %v10038_v58 }
 0x2b7   : > { %v1526_v7 = vpack.c.bf16 %v1413_v15, %v1411_v2  ;;  %v10205_v8 = vpop.permute.xlu1 %1195  ;;  %v1527_v45 = vpack.c.bf16 %v1414_v48, %v1412_v16  ;;  %1764 = vmatprep.subr.bf16.mxu1 %v1489_v44  ;;  %v1523_v52 = vpack.c.bf16 %v10171_v59, %v1355_v13  ;;  %v1271_v56 = vsel %vm592_vm2, %v9775_v32, %v9788_v36  ;;  %v15546_v44 = vld [vmem:[#allocation42_spill] sm:$0xff] }
 0x2b8   : > { %v1316_v46 = vpop.permute.xlu0 %1315  ;;  %v1270_v19 = vsel %vm592_vm2, %v9767_v27, %v9779_v33  ;;  %v1029_v25 = vsel %vm440_vm8, %v10078_v57, %v9894_v23  ;;  %v1048_v62 = vmul.f32 %v10020_v38, %v1023_v43  ;;  %v10239_v12 = vmul.f32 %v10199_v39, %v1277_v63 }
 0x2b9   : > { %1871 = vmatprep.subr.bf16.mxu0 %v1527_v45  ;;  %v1276_v32 = vsel %vm592_vm2, %v9779_v33, %v9767_v27  ;;  %v1273_v36 = vsel %vm592_vm2, %v10136_v51, %v9902_v28  ;;  %v1028_v23 = vsel %vm440_vm8, %v10038_v58, %v9888_v4  ;;  %v1046_v57 = vmul.f32 %v10020_v38, %v1022_v60  ;;  %v8707_v60 = vld [vmem:[%s9046_s21 + $0x38] sm:$0xff] }
 0x2ba   : > { %1872 = vmatpush1.bf16.msra.mxu0 %v1526_v7  ;;  %1765 = vmatpush1.bf16.msra.mxu1 %v1488_v49  ;;  %v1333_v26 = vsel %vm630_vm12, %v1316_v46, %v9920_v34  ;;  %v1272_v11 = vsel %vm592_vm2, %v10093_v30, %v15543_v61  ;;  %v1047_v4 = vmul.f32 %v10015_v14, %v1029_v25  ;;  %v7601_v7 = vld [vmem:[%s15254_s4 + $0x3] ss:$8 sm:$0x3]  ;;  %v7605_v25 = vld [vmem:[%s15254_s4 + $0x10] ss:$8 sm:$0x3] }
 0x2bb   : > { %1873 = vmatprep.subr.bf16.mxu0 %v1525_v47  ;;  %v1318_v17 = vpop.permute.xlu1 %1317  ;;  %1766 = vmatprep.subr.bf16.mxu1 %v1487_v50  ;;  %v1298_v0 = vmul.f32 %v10199_v39, %v1276_v32  ;;  %v1267_v41 = vsel %vm592_vm2, %v9902_v28, %v10136_v51  ;;  %v1292_v59 = vmul.f32 %v10199_v39, %v1273_v36  ;;  %v15548_v36 = vld [vmem:[#allocation25_spill] sm:$0xff] }
 0x2bc   : > { %v10257_v27 = vpop.permute.xlu0 %1437  ;;  %v1334_v33 = vsel %vm630_vm12, %v1318_v17, %v9929_v5  ;;  %v1328_v38 = vsel %vm630_vm12, %v9929_v5, %v1318_v17  ;;  %v1485_v9 = vpack.c.bf16 %v1048_v62, %v1046_v57  ;;  %v1045_v42 = vmul.f32 %v10015_v14, %v1028_v23  ;;  %v15549_v17 = vld [vmem:[#allocation23_spill] sm:$0xff] }
 0x2bd   : > { %v1353_v58 = vmul.f32 %v10099_v54, %v1334_v33  ;;  %v1327_v13 = vsel %vm630_vm12, %v9920_v34, %v1316_v46  ;;  %v1351_v5 = vmul.f32 %v10099_v54, %v1333_v26  ;;  %v10285_v1 = vmul.f32 %v10218_v37, %v1271_v56  ;;  %v15544_v34 = vld [vmem:[#allocation44_spill] sm:$0xff]  ;;  %v15545_v54 = vld [vmem:[#allocation46_spill] sm:$0xff] }
 0x2be   : > { %1874 = vmatpush1.bf16.msra.mxu0 %v1524_v53  ;;  %1767 = vmatpush1.bf16.msra.mxu1 %v1486_v18  ;;  %v1266_v28 = vsel %vm592_vm2, %v15543_v61, %v10093_v30  ;;  %v1290_v14 = vmul.f32 %v10199_v39, %v1272_v11  ;;  %v1352_v51 = vmul.f32 %v10096_v10, %v1328_v38  ;;  %v15547_v30 = vld [vmem:[#allocation45_spill] sm:$0xff]  ;;  %v8709_v61 = vld [vmem:[%s9046_s21 + $0x30] sm:$0xff] }
 0x2bf   : > { %1875 = vmatprep.subr.bf16.mxu0 %v1523_v52  ;;  %v10282_v40 = vpop.permute.xlu1 %1439  ;;  %1768 = vmatprep.subr.bf16.mxu1 %v1485_v9  ;;  %v1275_v55 = vsel %vm592_vm2, %v15545_v54, %v15544_v34  ;;  %v1291_v2 = vmul.f32 %v10218_v37, %v1267_v41  ;;  %v1484_v16 = vpack.c.bf16 %v1047_v4, %v1045_v42  ;;  %v8708_v52 = vld [vmem:[%s9046_s21 + $0x28] sm:$0xff]  ;;  %v8710_v11 = vld [vmem:[%s9046_s21 + $0x20] sm:$0xff]  ;;  %v8711_v41 = vld [vmem:[%s9046_s21 + $0x18] sm:$0xff]  ;;  %v8907_v42 = vmov 0  }
 0x2c0   : > { %v10293_v3 = vpop.permute.xlu0 %2326  ;;  %v1521_v15 = vpack.c.bf16 %v1353_v58, %v1351_v5  ;;  %v1297_v48 = vmul.f32 %v10218_v37, %v1270_v19  ;;  %v1274_v49 = vsel %vm592_vm2, %v15547_v30, %v15546_v44  ;;  %v1350_v50 = vmul.f32 %v10096_v10, %v1327_v13  ;;  %v15550_v5 = vld [vmem:[#allocation26_spill] sm:$0xff] }
 0x2c1   : > { %v1515_v43 = vpack.c.bf16 %v1292_v59, %v1290_v14  ;;  %v1269_v45 = vsel %vm592_vm2, %v15544_v34, %v15545_v54  ;;  %v1289_v53 = vmul.f32 %v10218_v37, %v1266_v28  ;;  %v1519_v10 = vpack.c.bf16 %v10239_v12, %v1298_v0  ;;  %v8712_v59 = vld [vmem:[%s9046_s21 + $0x8] sm:$0xff]  ;;  %v15553_v14 = vld [vmem:[#allocation51_spill] sm:$0xff] }
 0x2c2   : > { %1876 = vmatpush1.bf16.msra.mxu0 %v1522_v35  ;;  %1769 = vmatpush1.bf16.msra.mxu1 %v1484_v16  ;;  %v1296_v46 = vmul.f32 %v10199_v39, %v1275_v55  ;;  %v1268_v47 = vsel %vm592_vm2, %v15546_v44, %v15547_v30  ;;  %v1520_v18 = vpack.c.bf16 %v1352_v51, %v1350_v50  ;;  %v1750_v13 = vsel %vm1748_vm14, 65535, %v8907_v42  ;;  %v15554_v34 = vld [vmem:[#allocation47_spill] sm:$0xff]  ;;  %v15555_v54 = vld [vmem:[#allocation50_spill] sm:$0xff]  ;;  %v15557_v44 = vld [vmem:[#allocation32_spill] sm:$0xff] }
 0x2c3   : > { %1877 = vmatprep.subr.bf16.mxu0 %v1521_v15  ;;  %v10314_v63 = vpop.permute.xlu1 %2332  ;;  %1770 = vmatprep.subr.bf16.mxu1 %v1515_v43  ;;  %v1513_v56 = vpack.c.bf16 %v8707_v60, %v8708_v52  ;;  %v1294_v19 = vmul.f32 %v10199_v39, %v1274_v49  ;;  %v1514_v62 = vpack.c.bf16 %v1291_v2, %v1289_v53  ;;  %v15558_v50 = vld [vmem:[#allocation33_spill] sm:$0xff]  ;;  %v15559_v43 = vld [vmem:[#allocation31_spill] sm:$0xff] }
 0x2c4   : > { %v10322_v35 = vpop.permute.xlu0 %2290  ;;  %v10331_v12 = vrot.slane %v7601_v7, %v9190_v21  ;;  %v10334_v32 = vrot.slane %v7601_v7, %v9192_v22  ;;  %v1210_v23 = vsel %vm554_vm3, %v15549_v17, %v15548_v36  ;;  %v1216_v39 = vsel %vm554_vm3, %v15548_v36, %v15549_v17 }
 0x2c5   : > { %v1518_v57 = vpack.c.bf16 %v10285_v1, %v1297_v48  ;;  %v1295_v26 = vmul.f32 %v10218_v37, %v1269_v45  ;;  %v1512_v4 = vpack.c.bf16 %v8709_v61, %v8710_v11  ;;  %v1293_v38 = vmul.f32 %v10218_v37, %v1268_v47  ;;  %v15551_v1 = vld [vmem:[#allocation24_spill] sm:$0xff]  ;;  %v15552_v37 = vld [vmem:[#allocation49_spill] sm:$0xff]  ;;  %v15556_v48 = vld [vmem:[#allocation34_spill] sm:$0xff] }
 0x2c6   : > { %1878 = vmatpush1.bf16.msra.mxu0 %v1520_v18  ;;  %1771 = vmatpush2.bf16.msra.mxu1 %v1514_v62  ;;  %v10352_v58 = vrot.slane %v7605_v25, %v9192_v22  ;;  %v1511_v9 = vpack.c.bf16 %v8711_v41, %v8712_v59  ;;  %v1209_v28 = vsel %vm554_vm3, %v15551_v1, %v15550_v5  ;;  %v10398_v18 = vand.u32 1.0|1.0, %v1750_v13  ;;  %v15561_v61 = vld [vmem:[#allocation53_spill] sm:$0xff]  ;;  %v15562_v11 = vld [vmem:[#allocation55_spill] sm:$0xff] }
 0x2c7   : > { %1879 = vmatprep.subr.bf16.mxu0 %v1519_v10  ;;  %v10346_v33 = vpop.permute.xlu1 %2296  ;;  %1772 = vmatprep.subr.bf16.mxu1 %v1513_v56  ;;  %v1460_v51 = vsel %vm706_vm9, %v15553_v14, %v15552_v37  ;;  %v1459_v55 = vsel %vm706_vm9, %v15555_v54, %v15554_v34  ;;  %v1517_v2 = vpack.c.bf16 %v1296_v46, %v1294_v19  ;;  %v8713_v10 = vld [vmem:[%s9046_s21 + $0x10] sm:$0xff]  ;;  %v8714_v46 = vld [vmem:[%s9046_s21] sm:$0xff] }
 0x2c8   : > { %v10354_v0 = vpop.permute.xlu0 %2254  ;;  %v10372_v16 = vmul.f32 %v10331_v12, %v1216_v39  ;;  %v1215_v15 = vsel %vm554_vm3, %v15550_v5, %v15551_v1  ;;  %v1208_v30 = vsel %vm554_vm3, %v15557_v44, %v15556_v48  ;;  %v1214_v49 = vsel %vm554_vm3, %v15556_v48, %v15557_v44  ;;  %15560 = vst [vmem:[#allocation56_spill] sm:$0xff] %v10398_v18  ;;  %v15568_v48 = vld [vmem:[#allocation60_spill] sm:$0xff] }
 0x2c9   : > { %v1207_v7 = vsel %vm554_vm3, %v15559_v43, %v15558_v50  ;;  %v1213_v45 = vsel %vm554_vm3, %v15558_v50, %v15559_v43  ;;  %v1510_v47 = vpack.c.bf16 %v8713_v10, %v8714_v46  ;;  %v1516_v60 = vpack.c.bf16 %v1295_v26, %v1293_v38  ;;  %v15564_v38 = vld [vmem:[#allocation54_spill] sm:$0xff] }
 0x2ca   : > { %1880 = vmatpush1.bf16.msra.mxu0 %v1518_v57  ;;  %1773 = vmatpush2.bf16.msra.mxu1 %v1512_v4  ;;  %v10401_v52 = vrot.slane %v7605_v25, %v9190_v21  ;;  %v1483_v56 = vmul.f32 %v10352_v58, %v1460_v51  ;;  %v1481_v19 = vmul.f32 %v10352_v58, %v1459_v55  ;;  %v15563_v4 = vld [vmem:[#allocation52_spill] sm:$0xff]  ;;  %v15569_v50 = vld [vmem:[#allocation58_spill] sm:$0xff] }
 0x2cb   : > { %1881 = vmatprep.subr.bf16.mxu0 %v1517_v2  ;;  %v10394_v53 = vpop.permute.xlu1 %2224  ;;  %1774 = vmatprep.subr.bf16.mxu1 %v1511_v9  ;;  %v1239_v36 = vmul.f32 %v10334_v32, %v1210_v23  ;;  %v1236_v17 = vmul.f32 %v10331_v12, %v1215_v15  ;;  %v1454_v39 = vsel %vm706_vm9, %v15552_v37, %v15553_v14  ;;  %v15565_v37 = vld [vmem:[#allocation30_spill] sm:$0xff]  ;;  %v15566_v14 = vld [vmem:[#allocation29_spill] sm:$0xff] }
 0x2cc   : > { %v10405_v62 = vpop.permute.xlu0 %2218  ;;  %v1453_v25 = vsel %vm706_vm9, %v15554_v34, %v15555_v54  ;;  %v1237_v57 = vmul.f32 %v10334_v32, %v1209_v28  ;;  %v10419_v26 = vmul.f32 %v10331_v12, %v1214_v49  ;;  %v1458_v23 = vsel %vm706_vm9, %v15562_v11, %v15561_v61 }
 0x2cd   : > { %v1457_v41 = vsel %vm706_vm9, %v15564_v38, %v15563_v4  ;;  %v1235_v59 = vmul.f32 %v10334_v32, %v1208_v30  ;;  %v10431_v9 = vmul.f32 %v10331_v12, %v1213_v45  ;;  %v1233_v42 = vmul.f32 %v10334_v32, %v1207_v7  ;;  %v15570_v7 = vld [vmem:[#allocation28_spill] sm:$0xff]  ;;  %v15571_v45 = vld [vmem:[#allocation27_spill] sm:$0xff] }
 0x2ce   : > { %1882 = vmatpush1.bf16.msra.mxu0 %v1516_v60  ;;  %1775 = vmatpush2.bf16.msra.mxu1 %v1510_v47  ;;  %v1482_v5 = vmul.f32 %v10401_v52, %v1454_v39  ;;  %v1480_v1 = vmul.f32 %v10401_v52, %v1453_v25  ;;  %v15567_v51 = vpack.c.bf16 %v15565_v37, %v15566_v14  ;;  %v15574_v25 = vld [vmem:[#allocation57_spill] sm:$0xff] }
 0x2cf   : > { %v10434_v13 = vpop.permute.xlu1 %2294  ;;  %1891 = vmatprep.subr.bf16.mxu0 %v10398_v18  ;;  %v1537_v34 = vpack.c.bf16 %v1483_v56, %v1481_v19  ;;  %v1452_v54 = vsel %vm706_vm9, %v15561_v61, %v15562_v11  ;;  %v1479_v55 = vmul.f32 %v10352_v58, %v1458_v23  ;;  %v1451_v2 = vsel %vm706_vm9, %v15563_v4, %v15564_v38  ;;  %v15575_v23 = vld [vmem:[#allocation38_spill] sm:$0xff]  ;;  %v15576_v4 = vld [vmem:[#allocation36_spill] sm:$0xff] }
 0x2d0   : > { %v10439_v28 = vpop.permute.xlu0 %2182  ;;  %1776 = vmatprep.subr.bf16.mxu1 %v15567_v51  ;;  %v1477_v15 = vmul.f32 %v10352_v58, %v1457_v41  ;;  %v1456_v44 = vsel %vm706_vm9, %v10282_v40, %v15568_v48  ;;  %v1507_v30 = vpack.c.bf16 %v1239_v36, %v1237_v57  ;;  %v1506_v49 = vpack.c.bf16 %v10372_v16, %v1236_v17  ;;  %v15573_v36 = vld [vmem:[#allocation59_spill] sm:$0xff]  ;;  %v7650_v14 = vld [vmem:[%s15252_s2 + $0x5] ss:$8 sm:$0x3] }
 0x2d1   : > { %v1206_v43 = vsel %vm554_vm3, %v15569_v50, %v10205_v8  ;;  %v15572_v10 = vpack.c.bf16 %v15570_v7, %v15571_v45  ;;  %v1505_v47 = vpack.c.bf16 %v1235_v59, %v1233_v42  ;;  %v1504_v60 = vpack.c.bf16 %v10419_v26, %v10431_v9  ;;  %v15577_v9 = vld [vmem:[#allocation37_spill] sm:$0xff]  ;;  %v15578_v42 = vld [vmem:[#allocation35_spill] sm:$0xff] }
 0x2d2   : > { %1892 = vmatpush2.bf16.msra.mxu0 %v10398_v18  ;;  %v1536_v56 = vpack.c.bf16 %v1482_v5, %v1480_v1  ;;  %v1478_v19 = vmul.f32 %v10401_v52, %v1452_v54  ;;  %v1476_v16 = vmul.f32 %v10401_v52, %v1451_v2  ;;  %v1455_v17 = vsel %vm706_vm9, %v10257_v27, %v15573_v36 }
 0x2d3   : > { %1777 = vmatpush2.bf16.msra.mxu1 %v15572_v10  ;;  %1893 = vmatprep.subr.bf16.mxu0 %v1537_v34  ;;  %v10467_v46 = vpop.permute.xlu1 %2256  ;;  %v1205_v57 = vsel %vm554_vm3, %v15574_v25, %v10180_v31  ;;  %v1450_v26 = vsel %vm706_vm9, %v15568_v48, %v10282_v40  ;;  %v1475_v61 = vmul.f32 %v10352_v58, %v1456_v44 }
 0x2d4   : > { %v10477_v39 = vpop.permute.xlu0 %2260  ;;  %1778 = vmatprep.subr.bf16.mxu1 %v1507_v30  ;;  %v1535_v11 = vpack.c.bf16 %v1479_v55, %v1477_v15  ;;  %v1149_v38 = vsel %vm516_vm6, %v15576_v4, %v15575_v23  ;;  %v1155_v41 = vsel %vm516_vm6, %v15575_v23, %v15576_v4  ;;  %v1212_v59 = vsel %vm554_vm3, %v10205_v8, %v15569_v50  ;;  %v15581_v4 = vld [vmem:[#allocation41_spill] sm:$0xff] }
 0x2d5   : > { %v1231_v40 = vmul.f32 %v10334_v32, %v1206_v43  ;;  %v1148_v5 = vsel %vm516_vm6, %v15578_v42, %v15577_v9  ;;  %v1449_v1 = vsel %vm706_vm9, %v15573_v36, %v10257_v27  ;;  %v1473_v37 = vmul.f32 %v10352_v58, %v1455_v17 }
 0x2d6   : > { %1894 = vmatpush2.bf16.msra.mxu0 %v1536_v56  ;;  %v1534_v51 = vpack.c.bf16 %v1478_v19, %v1476_v16  ;;  %v1211_v34 = vsel %vm554_vm3, %v10180_v31, %v15574_v25  ;;  %v1229_v54 = vmul.f32 %v10334_v32, %v1205_v57  ;;  %v1474_v27 = vmul.f32 %v10401_v52, %v1450_v26  ;;  %v15579_v57 = vld [vmem:[#allocation48_spill] sm:$0xff] }
 0x2d7   : > { %1779 = vmatpush2.bf16.msra.mxu1 %v1506_v49  ;;  %1895 = vmatprep.subr.bf16.mxu0 %v1535_v11  ;;  %v10513_v8 = vpop.permute.xlu1 %2222  ;;  %v1178_v58 = vmul.f32 %v9550_v24, %v1149_v38  ;;  %v1154_v2 = vsel %vm516_vm6, %v15577_v9, %v15578_v42  ;;  %v1230_v15 = vmul.f32 %v10331_v12, %v1212_v59  ;;  %v15582_v59 = vld [vmem:[#allocation40_spill] sm:$0xff] }
 0x2d8   : > { %v10521_v55 = vpop.permute.xlu0 %2188  ;;  %1780 = vmatprep.subr.bf16.mxu1 %v1505_v47  ;;  %v1533_v48 = vpack.c.bf16 %v1475_v61, %v1473_v37  ;;  %v1176_v44 = vmul.f32 %v9550_v24, %v1148_v5  ;;  %v1472_v31 = vmul.f32 %v10401_v52, %v1449_v1  ;;  %v10532_v32 = vrot.slane %v7650_v14, %v9192_v22  ;;  %v7997_v47 = vld [vmem:[%s15253_s3 + $0x8] ss:$16 sps:$4 sm:$0xff]   ;;  %v8006_v61 = vld [vmem:[%s15253_s3 + $0x24] ss:$16 sps:$4 sm:$0xff]   ;;  %v8009_v9 = vld [vmem:[%s15253_s3 + $0x4c] ss:$16 sps:$4 sm:$0xff]  }
 0x2d9   : > { %v1503_v30 = vpack.c.bf16 %v1231_v40, %v1229_v54  ;;  %v1228_v49 = vmul.f32 %v10331_v12, %v1211_v34  ;;  %v2341_v50 = vsel %vm592_vm2, %v10314_v63, %v10293_v3  ;;  %v1177_v52 = vmul.f32 %v9557_v29, %v1155_v41  ;;  %v8005_v41 = vld [vmem:[%s15253_s3 + $0x28] ss:$16 sps:$4 sm:$0xff]   ;;  %v15583_v1 = vld [vmem:[#allocation39_spill] sm:$0xff] }
 0x2da   : > { %1896 = vmatpush2.bf16.msra.mxu0 %v1534_v51  ;;  %v1532_v7 = vpack.c.bf16 %v1474_v27, %v1472_v31  ;;  %v1175_v45 = vmul.f32 %v9557_v29, %v1154_v2  ;;  %v10546_v10 = vrot.slane %v7650_v14, %v9190_v21  ;;  %v2356_v56 = vmul.f32 %v10532_v32, %v2341_v50  ;;  %v8003_v29 = vld [vmem:[%s15253_s3 + $0x2c] ss:$16 sps:$4 sm:$0xff]   ;;  %v15584_v37 = vld [vmem:[#allocation43_spill] sm:$0xff]  ;;  %v7649_v54 = vld [vmem:[%s15252_s2 + $0x3] ss:$8 sm:$0x3] }
 0x2db   : > { %1781 = vmatpush2.bf16.msra.mxu1 %v1504_v60  ;;  %1897 = vmatprep.subr.bf16.mxu0 %v1533_v48  ;;  %v10539_v43 = vpop.permute.xlu1 %2184  ;;  %v1502_v12 = vpack.c.bf16 %v1230_v15, %v1228_v49  ;;  %v2338_v60 = vsel %vm592_vm2, %v10293_v3, %v10314_v63  ;;  %v1501_v19 = vpack.c.bf16 %v1178_v58, %v1176_v44  ;;  %v8000_v3 = vld [vmem:[%s15253_s3] ss:$16 sps:$4 sm:$0xff]   ;;  %v8012_v34 = vld [vmem:[%s15253_s3 + $0x44] ss:$16 sps:$4 sm:$0xff]   ;;  %v8011_v2 = vld [vmem:[%s15253_s3 + $0x48] ss:$16 sps:$4 sm:$0xff]  }
 0x2dc   : > { %v10541_v24 = vpop.permute.xlu0 %2292  ;;  %1782 = vmatprep.subr.bf16.mxu1 %v1503_v30  ;;  %v2355_v17 = vmul.f32 %v10546_v10, %v2338_v60  ;;  %v1500_v25 = vpack.c.bf16 %v1177_v52, %v1175_v45  ;;  %v7663_v26 = vpack.c.bf16 %v2356_v56, %v15579_v57  ;;  %v2482_v40 = vpack.c.bf16 %v9860_v6, %v15582_v59  ;;  %v8008_v6 = vld [vmem:[%s15253_s3 + $0x20] ss:$16 sps:$4 sm:$0xff]   ;;  %v8015_v44 = vld [vmem:[%s15253_s3 + $0x6c] ss:$16 sps:$4 sm:$0xff]  }
 0x2dd   : > { %v2481_v14 = vpack.c.bf16 %v15584_v37, %v15583_v1  ;;  %v7648_v58 = vld [vmem:[%s15252_s2 + $0x2] ss:$8 sm:$0x3]  ;;  %v2312_v31 = vrot.slane %v7649_v54, %v9190_v21  ;;  %v2316_v30 = vrot.slane %v7649_v54, %v9192_v22  ;;  %v2269_v37 = vsel %vm516_vm6, %v10477_v39, %v10354_v0 }
 0x2de   : > { %1898 = vmatpush2.bf16.msra.mxu0 %v1532_v7  ;;  %v7666_v38 = vpack.c.bf16 %v2355_v17, %v15581_v4  ;;  %v2280_v7 = vrot.slane %v7648_v58, %v9192_v22  ;;  %v2276_v57 = vrot.slane %v7648_v58, %v9190_v21 }
 0x2df   : > { %1783 = vmatpush2.bf16.msra.mxu1 %v1502_v12  ;;  %v10559_v16 = vpop.permute.xlu1 %2436 }
 0x2e0   : > { %v2259_v36 = vpop.permute.xlu0 %2258  ;;  %1784 = vmatprep.subr.bf16.mxu1 %v1501_v19  ;;  %v2283_v58 = vmul.f32 %v2276_v57, %v2269_v37 }
 0x2e1   : > { %1900 = vmatmul.mubr.bf16.vlgmr.msra.gmra.mxu0 %v7997_v47 }
 0x2e2   : > { %7639 = vmatprep.mubr.msk.bf16.mxu0 %vm1723_vm13, %v8003_v29 }
 0x2e3   : > { %1785 = vmatpush2.bf16.msra.mxu1 %v1500_v25  ;;  %v2301_v63 = vpop.permute.xlu1 %2300  ;;  %v8014_v25 = vld [vmem:[%s15253_s3 + $0x40] ss:$16 sps:$4 sm:$0xff]  }
 0x2e4   : > { %v10570_v11 = vpop.permute.xlu0 %2220  ;;  %7664 = vmatprep.subr.msk.bf16.mxu1 %vm9242_vm5, %v7663_v26  ;;  %v2304_v15 = vsel %vm554_vm3, %v10434_v13, %v2301_v63  ;;  %v2307_v48 = vsel %vm554_vm3, %v2301_v63, %v10434_v13  ;;  %v2302_v13 = vsel %vm554_vm3, %v10322_v35, %v10346_v33 }
 0x2e5   : > { %v2323_v45 = vmul.f32 %v2312_v31, %v2307_v48  ;;  %v2324_v12 = vmul.f32 %v2316_v30, %v2304_v15  ;;  %v2320_v63 = vmul.f32 %v2316_v30, %v2302_v13 }
 0x2e6   : > { %1787 = vmatmul.mubr.bf16.vlgmr.msra.gmra.mxu1 %v8000_v3  ;;  %v2305_v3 = vsel %vm554_vm3, %v10346_v33, %v10322_v35 }
 0x2e7   : > { %7667 = vmatpush1.bf16.msk.msra.mxu1 %vm9242_vm5, %v7666_v38  ;;  %v2265_v42 = vpop.permute.xlu1 %2264  ;;  %1796 = vmatprep.mubr.bf16.mxu1 %v8006_v61  ;;  %v2319_v1 = vmul.f32 %v2312_v31, %v2305_v3 }
 0x2e8   : > { %v10585_v5 = vpop.permute.xlu0 %2186  ;;  %2561 = vmatprep.subr.bf16.mxu1 %v2482_v40  ;;  %v2268_v49 = vsel %vm516_vm6, %v2259_v36, %v2265_v42  ;;  %v2271_v56 = vsel %vm516_vm6, %v2265_v42, %v2259_v36  ;;  %v8018_v36 = vld [vmem:[%s15253_s3 + $0x64] ss:$16 sps:$4 sm:$0xff]   ;;  %v8021_v42 = vld [vmem:[%s15253_s3 + $0x8c] ss:$16 sps:$4 sm:$0xff]  }
 0x2e9   : > { %1910 = vmatmul.mubr.bf16.gmra.mxu0 %v8005_v41  ;;  %v2288_v19 = vmul.f32 %v2280_v7, %v2268_v49  ;;  %v2266_v41 = vsel %vm516_vm6, %v10354_v0, %v10477_v39  ;;  %v2287_v59 = vmul.f32 %v2276_v57, %v2271_v56  ;;  %v8020_v0 = vld [vmem:[%s15253_s3 + $0x60] ss:$16 sps:$4 sm:$0xff]   ;;  %v2233_v56 = vsel %vm478_vm7, %v10394_v53, %v10405_v62 }
 0x2ea   : > { %7640 = vmatprep.mubr.msk.bf16.mxu0 %vm1723_vm13, %v8009_v9  ;;  %v8017_v9 = vld [vmem:[%s15253_s3 + $0x68] ss:$16 sps:$4 sm:$0xff]  }
 0x2eb   : > { %2562 = vmatpush1.bf16.msra.mxu1 %v2481_v14  ;;  %v2263_v51 = vpop.permute.xlu1 %2262  ;;  %v2478_v33 = vpack.c.bf16 %v2320_v63, %v2288_v19  ;;  %v7647_v14 = vld [vmem:[%s15252_s2 + $0x1] ss:$8 sm:$0x3]  ;;  %v2477_v54 = vpack.c.bf16 %v2319_v1, %v2287_v59  ;;  %v2194_v59 = vsel %vm440_vm8, %v10439_v28, %v10521_v55  ;;  %v8030_v1 = vld [vmem:[%s15253_s3 + $0xa4] ss:$16 sps:$4 sm:$0xff]  }
 0x2ec   : > { %v10599_v27 = vpop.permute.xlu0 %2438  ;;  %v2267_v26 = vsel %vm516_vm6, %v10467_v46, %v2263_v51  ;;  %v2270_v40 = vsel %vm516_vm6, %v2263_v51, %v10467_v46  ;;  %v2240_v39 = vrot.slane %v7647_v14, %v9190_v21  ;;  %v2244_v15 = vrot.slane %v7647_v14, %v9192_v22 }
 0x2ed   : > { %v2286_v35 = vmul.f32 %v2280_v7, %v2267_v26  ;;  %v2285_v51 = vmul.f32 %v2276_v57, %v2270_v40  ;;  %v2197_v40 = vsel %vm440_vm8, %v10521_v55, %v10439_v28 }
 0x2ee   : > { %1797 = vmatmul.mubr.bf16.gmra.mxu1 %v8008_v6  ;;  %v2284_v6 = vmul.f32 %v2280_v7, %v2266_v41  ;;  %v2247_v63 = vmul.f32 %v2240_v39, %v2233_v56 }
 0x2ef   : > { %v10620_v50 = vpop.permute.xlu1 %2402  ;;  %1806 = vmatprep.mubr.bf16.mxu1 %v8012_v34 }
 0x2f0   : > { %v2299_v52 = vpop.permute.xlu0 %2298 }
 0x2f1   : > { %v2303_v47 = vsel %vm554_vm3, %v10541_v24, %v2299_v52  ;;  %v2306_v60 = vsel %vm554_vm3, %v2299_v52, %v10541_v24  ;;  %1920 = vmatmul.mubr.bf16.gmra.mxu0 %v8011_v2  ;;  %v2476_v2 = vpack.c.bf16 %v2286_v35, %v2284_v6 }
 0x2f2   : > { %v2321_v29 = vmul.f32 %v2312_v31, %v2306_v60  ;;  %v2322_v17 = vmul.f32 %v2316_v30, %v2303_v47  ;;  %7641 = vmatprep.mubr.msk.bf16.mxu0 %vm1723_vm13, %v8015_v44  ;;  %v8024_v44 = vld [vmem:[%s15253_s3 + $0x84] ss:$16 sps:$4 sm:$0xff]   ;;  %v2181_v31 = vld [vmem:[%s15252_s2] ss:$8 sm:$0x3]  ;;  %v2475_v30 = vpack.c.bf16 %v2285_v51, %v2283_v58 }
 0x2f3   : > { %v10643_v24 = vpop.permute.xlu1 %2404  ;;  %v8023_v60 = vld [vmem:[%s15253_s3 + $0x88] ss:$16 sps:$4 sm:$0xff]  }
 0x2f4   : > { %v2479_v61 = vpack.c.bf16 %v2323_v45, %v2321_v29  ;;  %v10652_v4 = vpop.permute.xlu0 %2434  ;;  %v2480_v38 = vpack.c.bf16 %v2324_v12, %v2322_v17  ;;  %v2204_v17 = vrot.slane %v2181_v31, %v9190_v21  ;;  %v8029_v58 = vld [vmem:[%s15253_s3 + $0xa8] ss:$16 sps:$4 sm:$0xff]  }
 0x2f6   : > { %1807 = vmatmul.mubr.bf16.gmra.mxu1 %v8014_v25  ;;  %2563 = vmatprep.subr.bf16.mxu1 %v2480_v38  ;;  %v2208_v25 = vrot.slane %v2181_v31, %v9192_v22  ;;  %v2211_v14 = vmul.f32 %v2204_v17, %v2197_v40  ;;  %v8038_v40 = vld [vmem:[%s15253_s3 + $0xc0] ss:$16 sps:$4 sm:$0xff]  }
 0x2f7   : > { %2564 = vmatpush1.bf16.msra.mxu1 %v2479_v61  ;;  %v10671_v46 = vpop.permute.xlu1 %2364  ;;  %1816 = vmatprep.mubr.bf16.mxu1 %v8018_v36 }
 0x2f8   : > { %v10676_v34 = vpop.permute.xlu0 %2440  ;;  %2565 = vmatprep.subr.bf16.mxu1 %v2478_v33  ;;  %v2212_v6 = vmul.f32 %v2208_v25, %v2194_v59 }
 0x2f9   : > { %1930 = vmatmul.mubr.bf16.gmra.mxu0 %v8017_v9  ;;  %v7653_v9 = vld [vmem:[%s15252_s2 + $0x10] ss:$8 sm:$0x3] }
 0x2fa   : > { %7642 = vmatprep.mubr.msk.bf16.mxu0 %vm1723_vm13, %v8021_v42 }
 0x2fb   : > { %2566 = vmatpush1.bf16.msra.mxu1 %v2477_v54  ;;  %v2229_v48 = vpop.permute.xlu1 %2228 }
 0x2fc   : > { %v2232_v49 = vsel %vm478_vm7, %v10513_v8, %v2229_v48  ;;  %v2235_v13 = vsel %vm478_vm7, %v2229_v48, %v10513_v8  ;;  %v2227_v7 = vpop.permute.xlu0 %2226  ;;  %2567 = vmatprep.subr.bf16.mxu1 %v2476_v2  ;;  %v2230_v8 = vsel %vm478_vm7, %v10405_v62, %v10394_v53  ;;  %v2456_v2 = vrot.slane %v7653_v9, %v9190_v21 }
 0x2fd   : > { %v2251_v52 = vmul.f32 %v2240_v39, %v2235_v13  ;;  %v2252_v45 = vmul.f32 %v2244_v15, %v2232_v49  ;;  %v2231_v12 = vsel %vm478_vm7, %v10570_v11, %v2227_v7  ;;  %v2234_v47 = vsel %vm478_vm7, %v2227_v7, %v10570_v11  ;;  %v8027_v11 = vld [vmem:[%s15253_s3 + $0xac] ss:$16 sps:$4 sm:$0xff]  }
 0x2fe   : > { %v2249_v19 = vmul.f32 %v2240_v39, %v2234_v47  ;;  %v2250_v29 = vmul.f32 %v2244_v15, %v2231_v12  ;;  %1817 = vmatmul.mubr.bf16.gmra.mxu1 %v8020_v0  ;;  %v2248_v61 = vmul.f32 %v2244_v15, %v2230_v8  ;;  %v8033_v0 = vld [vmem:[%s15253_s3 + $0xcc] ss:$16 sps:$4 sm:$0xff]   ;;  %v2449_v7 = vsel %vm706_vm9, %v10676_v34, %v10652_v4 }
 0x2ff   : > { %2568 = vmatpush1.bf16.msra.mxu1 %v2475_v30  ;;  %v2193_v57 = vpop.permute.xlu1 %2192  ;;  %1826 = vmatprep.mubr.bf16.mxu1 %v8024_v44  ;;  %v2446_v8 = vsel %vm706_vm9, %v10652_v4, %v10676_v34  ;;  %v8041_v34 = vld [vmem:[%s15253_s3 + $0xec] ss:$16 sps:$4 sm:$0xff]  }
 0x300   : > { %v2473_v26 = vpack.c.bf16 %v2251_v52, %v2249_v19  ;;  %v2196_v36 = vsel %vm440_vm8, %v10585_v5, %v2193_v57  ;;  %v2199_v53 = vsel %vm440_vm8, %v2193_v57, %v10585_v5  ;;  %v10724_v62 = vpop.permute.xlu0 %2400  ;;  %v2474_v3 = vpack.c.bf16 %v2252_v45, %v2250_v29  ;;  %v8026_v5 = vld [vmem:[%s15253_s3 + $0x80] ss:$16 sps:$4 sm:$0xff]  }
 0x301   : > { %v2215_v38 = vmul.f32 %v2204_v17, %v2199_v53  ;;  %v2216_v41 = vmul.f32 %v2208_v25, %v2196_v36  ;;  %1940 = vmatmul.mubr.bf16.gmra.mxu0 %v8023_v60  ;;  %v8032_v52 = vld [vmem:[%s15253_s3 + $0xa0] ss:$16 sps:$4 sm:$0xff]   ;;  %v15585_v45 = vmov 1.0   ;;  %v8036_v60 = vld [vmem:[%s15253_s3 + $0xc4] ss:$16 sps:$4 sm:$0xff]  }
 0x302   : > { %2569 = vmatprep.subr.bf16.mxu1 %v2474_v3  ;;  %7643 = vmatprep.mubr.msk.bf16.mxu0 %vm1723_vm13, %v8027_v11  ;;  %v8035_v36 = vld [vmem:[%s15253_s3 + $0xc8] ss:$16 sps:$4 sm:$0xff]   ;;  %v2463_v3 = vmul.f32 %v2456_v2, %v2446_v8 }
 0x303   : > { %v2471_v35 = vpack.c.bf16 %v2247_v63, %v2215_v38  ;;  %2570 = vmatpush1.bf16.msra.mxu1 %v2473_v26  ;;  %v2191_v33 = vpop.permute.xlu1 %2190  ;;  %v2472_v42 = vpack.c.bf16 %v2248_v61, %v2216_v41  ;;  %v7652_v63 = vld [vmem:[%s15252_s2 + $0x7] ss:$8 sm:$0x3] }
 0x304   : > { %v2195_v28 = vsel %vm440_vm8, %v10539_v43, %v2191_v33  ;;  %v2198_v55 = vsel %vm440_vm8, %v2191_v33, %v10539_v43  ;;  %v10750_v37 = vpop.permute.xlu0 %2366  ;;  %v2460_v43 = vrot.slane %v7653_v9, %v9192_v22  ;;  %v2424_v9 = vrot.slane %v7652_v63, %v9192_v22  ;;  %v8039_v33 = vld [vmem:[%s15253_s3 + $0xe4] ss:$16 sps:$4 sm:$0xff]  }
 0x305   : > { %v2213_v51 = vmul.f32 %v2204_v17, %v2198_v55  ;;  %v2214_v54 = vmul.f32 %v2208_v25, %v2195_v28  ;;  %2571 = vmatprep.subr.bf16.mxu1 %v2472_v42  ;;  %v15586_v25 = vld [vmem:[#allocation22_spill] sm:$0xff] }
 0x306   : > { %1827 = vmatmul.mubr.bf16.gmra.mxu1 %v8026_v5  ;;  %v2464_v11 = vmul.f32 %v2460_v43, %v2449_v7  ;;  %v2420_v5 = vrot.slane %v7652_v63, %v9190_v21  ;;  %v7651_v28 = vld [vmem:[%s15252_s2 + $0x6] ss:$8 sm:$0x3]  ;;  %v8043_v7 = vld [vmem:[%s15253_s3 + $0xe0] ss:$16 sps:$4 sm:$0xff]  }
 0x307   : > { %v2469_v39 = vpack.c.bf16 %v2213_v51, %v2211_v14  ;;  %2572 = vmatpush1.bf16.msra.mxu1 %v2471_v35  ;;  %v2445_v15 = vpop.permute.xlu1 %2444  ;;  %v2470_v48 = vpack.c.bf16 %v2214_v54, %v2212_v6  ;;  %1836 = vmatprep.mubr.bf16.mxu1 %v8030_v1 }
 0x308   : > { %v2448_v44 = vsel %vm706_vm9, %v10599_v27, %v2445_v15  ;;  %v2451_v31 = vsel %vm706_vm9, %v2445_v15, %v10599_v27  ;;  %v2399_v30 = vpop.permute.xlu0 %2398 }
 0x309   : > { %v2467_v49 = vmul.f32 %v2456_v2, %v2448_v44  ;;  %v2468_v13 = vmul.f32 %v2460_v43, %v2451_v31  ;;  %1950 = vmatmul.mubr.bf16.gmra.mxu0 %v8029_v58  ;;  %2573 = vmatprep.subr.bf16.mxu1 %v2470_v48  ;;  %v2410_v42 = vsel %vm668_vm11, %v2399_v30, %v10643_v24  ;;  %v8044_v58 = vld [vmem:[%s15253_s3 + $0xe8] ss:$16 sps:$4 sm:$0xff]  }
 0x30a   : > { %7644 = vmatprep.mubr.msk.bf16.mxu0 %vm1723_vm13, %v8033_v0  ;;  %v2384_v0 = vrot.slane %v7651_v28, %v9190_v21  ;;  %v2427_v48 = vmul.f32 %v2420_v5, %v2410_v42 }
 0x30b   : > { %v2495_v12 = vpack.c.bf16 %v15585_v45, %v2467_v49  ;;  %2574 = vmatpush1.bf16.msra.mxu1 %v2469_v39  ;;  %v2443_v27 = vpop.permute.xlu1 %2442  ;;  %v2496_v47 = vpack.c.bf16 %v15585_v45, %v2468_v13 }
 0x30c   : > { %v2447_v56 = vsel %vm706_vm9, %v10559_v16, %v2443_v27  ;;  %v2450_v19 = vsel %vm706_vm9, %v2443_v27, %v10559_v16  ;;  %v2363_v29 = vpop.permute.xlu0 %2362 }
 0x30d   : > { %v2466_v17 = vmul.f32 %v2460_v43, %v2450_v19  ;;  %v2557_v57 = vand.u32 %v2496_v47, %v15586_v25  ;;  %v2554_v26 = vand.u32 %v2495_v12, %v15586_v25  ;;  %v2465_v4 = vmul.f32 %v2456_v2, %v2447_v56 }
 0x30e   : > { %1837 = vmatmul.mubr.bf16.gmra.mxu1 %v8032_v52  ;;  %v2413_v2 = vsel %vm668_vm11, %v10643_v24, %v2399_v30  ;;  %v2388_v43 = vrot.slane %v7651_v28, %v9192_v22 }
 0x30f   : > { %v10797_v53 = vpop.permute.xlu1 %2330  ;;  %2579 = vmatprep.subr.bf16.mxu1 %v2557_v57  ;;  %v2494_v16 = vpack.c.bf16 %v2466_v17, %v2464_v11  ;;  %1846 = vmatprep.mubr.bf16.mxu1 %v8036_v60  ;;  %v2493_v38 = vpack.c.bf16 %v2465_v4, %v2463_v3  ;;  %v2428_v24 = vmul.f32 %v2424_v9, %v2413_v2 }
 0x310   : > { %v2407_v61 = vpop.permute.xlu0 %2406  ;;  %2580 = vmatpush2.bf16.msra.mxu1 %v2554_v26 }
 0x311   : > { %1960 = vmatmul.mubr.bf16.gmra.mxu0 %v8035_v36  ;;  %2581 = vmatprep.subr.bf16.mxu1 %v2494_v16  ;;  %v2411_v41 = vsel %vm668_vm11, %v10724_v62, %v2407_v61  ;;  %v2414_v59 = vsel %vm668_vm11, %v2407_v61, %v10724_v62 }
 0x312   : > { %7645 = vmatprep.mubr.msk.bf16.mxu0 %vm1723_vm13, %v8041_v34  ;;  %v2429_v14 = vmul.f32 %v2420_v5, %v2411_v41  ;;  %v2430_v6 = vmul.f32 %v2424_v9, %v2414_v59 }
 0x313   : > { %v2409_v35 = vpop.permute.xlu1 %2408 }
 0x314   : > { %v2412_v62 = vsel %vm668_vm11, %v10620_v50, %v2409_v35  ;;  %v2415_v1 = vsel %vm668_vm11, %v2409_v35, %v10620_v50  ;;  %v2369_v55 = vpop.permute.xlu0 %2368  ;;  %2582 = vmatpush2.bf16.msra.mxu1 %v2493_v38  ;;  %v8054_v35 = vld [vmem:[%s15251_s1 + $0x34] ss:$8 sps:$4 sm:$0xff]  }
 0x315   : > { %v2431_v51 = vmul.f32 %v2420_v5, %v2412_v62  ;;  %v2432_v54 = vmul.f32 %v2424_v9, %v2415_v1  ;;  %v2374_v52 = vsel %vm630_vm12, %v2363_v29, %v2369_v55  ;;  %v2377_v12 = vsel %vm630_vm12, %v2369_v55, %v2363_v29  ;;  %v8045_v5 = vld [vmem:[%s15251_s1] ss:$8 sps:$4 sm:$0xff]  }
 0x316   : > { %1847 = vmatmul.mubr.bf16.gmra.mxu1 %v8038_v40  ;;  %v2391_v11 = vmul.f32 %v2384_v0, %v2374_v52  ;;  %v2392_v17 = vmul.f32 %v2388_v43, %v2377_v12  ;;  %v8053_v9 = vld [vmem:[%s15251_s1 + $0x20] ss:$8 sps:$4 sm:$0xff]  }
 0x317   : > { %v2491_v50 = vpack.c.bf16 %v2431_v51, %v2429_v14  ;;  %v2373_v39 = vpop.permute.xlu1 %2372  ;;  %v2492_v15 = vpack.c.bf16 %v2432_v54, %v2430_v6  ;;  %1856 = vmatprep.mubr.bf16.mxu1 %v8039_v33  ;;  %v8056_v33 = vld [vmem:[%s15251_s1 + $0x30] ss:$8 sps:$4 sm:$0xff]  }
 0x318   : > { %v2376_v44 = vsel %vm630_vm12, %v10750_v37, %v2373_v39  ;;  %v2379_v31 = vsel %vm630_vm12, %v2373_v39, %v10750_v37  ;;  %v2329_v49 = vpop.permute.xlu0 %2328  ;;  %v8047_v37 = vld [vmem:[%s15251_s1 + $0x4] ss:$8 sps:$4 sm:$0xff]  }
 0x319   : > { %v2395_v30 = vmul.f32 %v2384_v0, %v2376_v44  ;;  %v2396_v13 = vmul.f32 %v2388_v43, %v2379_v31  ;;  %2583 = vmatprep.subr.bf16.mxu1 %v2492_v15  ;;  %1970 = vmatmul.mubr.bf16.gmra.mxu0 %v8044_v58 }
 0x31a   : > { %2584 = vmatpush2.bf16.msra.mxu1 %v2491_v50 }
 0x31b   : > { %v2489_v27 = vpack.c.bf16 %v2427_v48, %v2395_v30  ;;  %v2490_v47 = vpack.c.bf16 %v2428_v24, %v2396_v13  ;;  %v2371_v60 = vpop.permute.xlu1 %2370 }
 0x31c   : > { %v2335_v8 = vpop.permute.xlu0 %2334  ;;  %v2375_v56 = vsel %vm630_vm12, %v10671_v46, %v2371_v60  ;;  %v2378_v19 = vsel %vm630_vm12, %v2371_v60, %v10671_v46 }
 0x31d   : > { %2585 = vmatprep.subr.bf16.mxu1 %v2490_v47  ;;  %v2393_v29 = vmul.f32 %v2384_v0, %v2375_v56  ;;  %v2394_v57 = vmul.f32 %v2388_v43, %v2378_v19  ;;  %v2339_v26 = vsel %vm592_vm2, %v2329_v49, %v2335_v8  ;;  %v2342_v36 = vsel %vm592_vm2, %v2335_v8, %v2329_v49 }
 0x31e   : > { %1857 = vmatmul.mubr.bf16.gmra.mxu1 %v8043_v7  ;;  %v2357_v63 = vmul.f32 %v10546_v10, %v2339_v26  ;;  %v2358_v61 = vmul.f32 %v10532_v32, %v2342_v36 }
 0x31f   : > { %2586 = vmatpush2.bf16.msra.mxu1 %v2489_v27  ;;  %7668 = vmatprep.mubr.msk.bf16.mxu1 %vm802_vm1, %v8047_v37  ;;  %v2487_v4 = vpack.c.bf16 %v2393_v29, %v2391_v11  ;;  %v2337_v34 = vpop.permute.xlu1 %2336  ;;  %v2488_v16 = vpack.c.bf16 %v2394_v57, %v2392_v17 }
 0x320   : > { %v2340_v46 = vsel %vm592_vm2, %v10797_v53, %v2337_v34  ;;  %v2343_v3 = vsel %vm592_vm2, %v2337_v34, %v10797_v53  ;;  %v8048_v53 = vld [vmem:[%s15251_s1 + $0x14] ss:$8 sps:$4 sm:$0xff]  }
 0x321   : > { %v2359_v38 = vmul.f32 %v10546_v10, %v2340_v46  ;;  %v2360_v41 = vmul.f32 %v10532_v32, %v2343_v3  ;;  %2587 = vmatprep.subr.bf16.mxu1 %v2488_v16  ;;  %v8050_v32 = vld [vmem:[%s15251_s1 + $0x10] ss:$8 sps:$4 sm:$0xff]   ;;  %v8051_v10 = vld [vmem:[%s15251_s1 + $0x24] ss:$8 sps:$4 sm:$0xff]  }
 0x323   : > { %2588 = vmatpush2.bf16.msra.mxu1 %v2487_v4  ;;  %v2485_v59 = vpack.c.bf16 %v2359_v38, %v2357_v63  ;;  %v2486_v40 = vpack.c.bf16 %v2360_v41, %v2358_v61 }
 0x325   : > { %2589 = vmatprep.subr.bf16.mxu1 %v2486_v40 }
 0x327   : > { %2590 = vmatpush2.bf16.msra.mxu1 %v2485_v59 }
 0x32a   : > { %2592 = vmatmul.mubr.bf16.vlgmr.msra.gmra.mxu1 %v8045_v5 }
 0x32b   : > { %7669 = vmatprep.mubr.msk.bf16.mxu1 %vm802_vm1, %v8048_v53 }
 0x332   : > { %2602 = vmatmul.mubr.bf16.gmra.mxu1 %v8050_v32 }
 0x333   : > { %7670 = vmatprep.mubr.msk.bf16.mxu1 %vm802_vm1, %v8051_v10 }
 0x33a   : > { %2612 = vmatmul.mubr.bf16.gmra.mxu1 %v8053_v9 }
 0x33b   : > { %7671 = vmatprep.mubr.msk.bf16.mxu1 %vm802_vm1, %v8054_v35 }
 0x342   : > { %2622 = vmatmul.mubr.bf16.gmra.mxu1 %v8056_v33 }
 0x3a1   : > { %v1901_v42 = vpop.f32.mrf.mxu0 }
 0x3a3   : > { %v1903_v62 = vpop.f32.mrf.mxu0 }
 0x3a5   : > { %v1905_v1 = vpop.f32.mrf.mxu0 }
 0x3a6   : > { %v1788_v28 = vpop.f32.mrf.mxu1 }
 0x3a7   : > { %v1907_v55 = vpop.f32.mrf.mxu0  ;;  %v1902_v48 = vadd.f32 %v1901_v42, %v1788_v28 }
 0x3a8   : > { %v1790_v14 = vpop.f32.mrf.mxu1 }
 0x3a9   : > { %v1911_v6 = vpop.f32.mrf.mxu0  ;;  %v1904_v31 = vadd.f32 %v1903_v62, %v1790_v14  ;;  %v1980_v52 = vmul.f32 0.5, %v1902_v48 }
 0x3aa   : > { %v1792_v51 = vpop.f32.mrf.mxu1 }
 0x3ab   : > { %v1913_v54 = vpop.f32.mrf.mxu0  ;;  %v1906_v24 = vadd.f32 %v1905_v1, %v1792_v51  ;;  %v1981_v47 = vmul.f32 0.5, %v1904_v31  ;;  %8267 = vtanh.f32 %v1980_v52 }
 0x3ac   : > { %v1794_v58 = vpop.f32.mrf.mxu1 }
 0x3ad   : > { %v1915_v2 = vpop.f32.mrf.mxu0  ;;  %v1908_v13 = vadd.f32 %v1907_v55, %v1794_v58  ;;  %v1982_v8 = vmul.f32 0.5, %v1906_v24  ;;  %8269 = vtanh.f32 %v1981_v47 }
 0x3ae   : > { %v1798_v50 = vpop.f32.mrf.mxu1 }
 0x3af   : > { %v1917_v0 = vpop.f32.mrf.mxu0  ;;  %v1912_v37 = vadd.f32 %v1911_v6, %v1798_v50  ;;  %v1983_v17 = vmul.f32 0.5, %v1908_v13  ;;  %8271 = vtanh.f32 %v1982_v8 }
 0x3b0   : > { %v1800_v43 = vpop.f32.mrf.mxu1 }
 0x3b1   : > { %v1921_v39 = vpop.f32.mrf.mxu0  ;;  %v1914_v29 = vadd.f32 %v1913_v54, %v1800_v43  ;;  %v1984_v34 = vmul.f32 0.5, %v1912_v37  ;;  %8273 = vtanh.f32 %v1983_v17 }
 0x3b2   : > { %v1802_v15 = vpop.f32.mrf.mxu1 }
 0x3b3   : > { %v1923_v44 = vpop.f32.mrf.mxu0  ;;  %v1916_v3 = vadd.f32 %v1915_v2, %v1802_v15  ;;  %v1985_v38 = vmul.f32 0.5, %v1914_v29 }
 0x3b4   : > { %v1804_v49 = vpop.f32.mrf.mxu1 }
 0x3b5   : > { %v1925_v30 = vpop.f32.mrf.mxu0  ;;  %v1918_v5 = vadd.f32 %v1917_v0, %v1804_v49  ;;  %v1986_v33 = vmul.f32 0.5, %v1916_v3 }
 0x3b6   : > { %v1808_v7 = vpop.f32.mrf.mxu1 }
 0x3b7   : > { %v1922_v12 = vadd.f32 %v1921_v39, %v1808_v7  ;;  %v1927_v27 = vpop.f32.mrf.mxu0  ;;  %v1987_v14 = vmul.f32 0.5, %v1918_v5 }
 0x3b8   : > { %v1810_v60 = vpop.f32.mrf.mxu1  ;;  %v8268_v31 = vpop.eup %8267 }
 0x3b9   : > { %v2012_v56 = vadd.f32 0.01, %v1922_v12  ;;  %v1924_v19 = vadd.f32 %v1923_v44, %v1810_v60  ;;  %v1931_v11 = vpop.f32.mrf.mxu0  ;;  %v1996_v3 = vmul.f32 0.5, %v8268_v31 }
 0x3ba   : > { %v1812_v57 = vpop.f32.mrf.mxu1  ;;  %v8270_v13 = vpop.eup %8269 }
 0x3bb   : > { %v2020_v26 = vmul.f32 0.5, %v2012_v56  ;;  %v2013_v36 = vadd.f32 0.01, %v1924_v19  ;;  %v1933_v4 = vpop.f32.mrf.mxu0  ;;  %v1926_v16 = vadd.f32 %v1925_v30, %v1812_v57 }
 0x3bc   : > { %v1814_v46 = vpop.f32.mrf.mxu1  ;;  %v8272_v12 = vpop.eup %8271 }
 0x3bd   : > { %v2021_v63 = vmul.f32 0.5, %v2013_v36  ;;  %v1935_v61 = vpop.f32.mrf.mxu0  ;;  %v2014_v41 = vadd.f32 0.01, %v1926_v16  ;;  %v1928_v59 = vadd.f32 %v1927_v27, %v1814_v46  ;;  %8275 = vtanh.f32 %v2020_v26 }
 0x3be   : > { %v1818_v40 = vpop.f32.mrf.mxu1  ;;  %8277 = vtanh.f32 %v1984_v34  ;;  %v8274_v37 = vpop.eup %8273 }
 0x3bf   : > { %v1932_v53 = vadd.f32 %v1931_v11, %v1818_v40  ;;  %v1937_v32 = vpop.f32.mrf.mxu0  ;;  %v2022_v10 = vmul.f32 0.5, %v2014_v41  ;;  %v2015_v9 = vadd.f32 0.01, %v1928_v59  ;;  %8279 = vtanh.f32 %v2021_v63 }
 0x3c0   : > { %v1820_v35 = vpop.f32.mrf.mxu1  ;;  %8281 = vtanh.f32 %v1985_v38  ;;  %v1997_v63 = vmul.f32 0.5, %v8270_v13  ;;  %v1998_v41 = vmul.f32 0.5, %v8272_v12 }
 0x3c1   : > { %v2016_v42 = vadd.f32 0.01, %v1932_v53  ;;  %v1934_v62 = vadd.f32 %v1933_v4, %v1820_v35  ;;  %v1941_v1 = vpop.f32.mrf.mxu0  ;;  %v2023_v28 = vmul.f32 0.5, %v2015_v9  ;;  %8283 = vtanh.f32 %v2022_v10 }
 0x3c2   : > { %v1822_v55 = vpop.f32.mrf.mxu1 }
 0x3c3   : > { %v2024_v6 = vmul.f32 0.5, %v2016_v42  ;;  %v2017_v51 = vadd.f32 0.01, %v1934_v62  ;;  %v1943_v54 = vpop.f32.mrf.mxu0  ;;  %8285 = vtanh.f32 %v2023_v28  ;;  %v1936_v58 = vadd.f32 %v1935_v61, %v1822_v55 }
 0x3c4   : > { %v1824_v2 = vpop.f32.mrf.mxu1  ;;  %8287 = vtanh.f32 %v1986_v33 }
 0x3c5   : > { %v2025_v50 = vmul.f32 0.5, %v2017_v51  ;;  %v1945_v0 = vpop.f32.mrf.mxu0  ;;  %8289 = vtanh.f32 %v2024_v6  ;;  %v2018_v43 = vadd.f32 0.01, %v1936_v58  ;;  %v1938_v39 = vadd.f32 %v1937_v32, %v1824_v2  ;;  %v989_v51 = vld [vmem:[%s9050_s28] sm:$0xff] }
 0x3c6   : > { %v1828_v15 = vpop.f32.mrf.mxu1  ;;  %8291 = vtanh.f32 %v1987_v14  ;;  %v1999_v32 = vmul.f32 0.5, %v8274_v37  ;;  %v2004_v14 = vadd.f32 0.5, %v1996_v3  ;;  %v2005_v6 = vadd.f32 0.5, %v1997_v63  ;;  %v991_v37 = vld [vmem:[%s9050_s28 + $0x10] sm:$0xff] }
 0x3c7   : > { %v1942_v48 = vadd.f32 %v1941_v1, %v1828_v15  ;;  %v1947_v44 = vpop.f32.mrf.mxu0  ;;  %8293 = vtanh.f32 %v2025_v50  ;;  %v2026_v49 = vmul.f32 0.5, %v2018_v43  ;;  %v2019_v24 = vadd.f32 0.01, %v1938_v39 }
 0x3c8   : > { %v1830_v30 = vpop.f32.mrf.mxu1  ;;  %v2006_v50 = vadd.f32 0.5, %v1998_v41 }
 0x3c9   : > { %8295 = vtanh.f32 %v1942_v48  ;;  %v1944_v7 = vadd.f32 %v1943_v54, %v1830_v30  ;;  %v1951_v52 = vpop.f32.mrf.mxu0  ;;  %v2027_v27 = vmul.f32 0.5, %v2019_v24  ;;  %v2007_v48 = vadd.f32 0.5, %v1999_v32 }
 0x3ca   : > { %8297 = vtanh.f32 %v2026_v49  ;;  %v1832_v47 = vpop.f32.mrf.mxu1  ;;  %v8276_v56 = vpop.eup %8275  ;;  %v990_v49 = vld [vmem:[%s9050_s28 + $0x8] sm:$0xff] }
 0x3cb   : > { %8299 = vtanh.f32 %v1944_v7  ;;  %v1946_v60 = vadd.f32 %v1945_v0, %v1832_v47  ;;  %v1953_v8 = vpop.f32.mrf.mxu0  ;;  %v8278_v11 = vpop.eup %8277  ;;  %v2036_v4 = vmul.f32 0.5, %v8276_v56 }
 0x3cc   : > { %8301 = vtanh.f32 %v2027_v27  ;;  %v1834_v19 = vpop.f32.mrf.mxu1  ;;  %v8280_v57 = vpop.eup %8279  ;;  %v2000_v10 = vmul.f32 0.5, %v8278_v11 }
 0x3cd   : > { %8303 = vtanh.f32 %v1946_v60  ;;  %v1948_v17 = vadd.f32 %v1947_v44, %v1834_v19  ;;  %v1955_v29 = vpop.f32.mrf.mxu0  ;;  %v8282_v36 = vpop.eup %8281  ;;  %v2037_v59 = vmul.f32 0.5, %v8280_v57  ;;  %v2044_v42 = vadd.f32 0.5, %v2036_v4  ;;  %v992_v57 = vld [vmem:[%s9050_s28 + $0x18] sm:$0xff] }
 0x3ce   : > { %v1838_v26 = vpop.f32.mrf.mxu1  ;;  %v8284_v46 = vpop.eup %8283  ;;  %v2001_v9 = vmul.f32 0.5, %v8282_v36  ;;  %v2008_v44 = vadd.f32 0.5, %v2000_v10 }
 0x3cf   : > { %8305 = vtanh.f32 %v1948_v17  ;;  %v1952_v34 = vadd.f32 %v1951_v52, %v1838_v26  ;;  %v1957_v16 = vpop.f32.mrf.mxu0  ;;  %v2038_v62 = vmul.f32 0.5, %v8284_v46  ;;  %v2045_v0 = vadd.f32 0.5, %v2037_v59  ;;  %v993_v59 = vld [vmem:[%s9050_s28 + $0x20] sm:$0xff] }
 0x3d0   : > { %v1840_v61 = vpop.f32.mrf.mxu1  ;;  %v8286_v38 = vpop.eup %8285  ;;  %v10899_v31 = vadd.f32 0.5, %v2001_v9  ;;  %v2092_v7 = vmul.f32 %v2044_v42, %v989_v51  ;;  %v994_v42 = vld [vmem:[%s9050_s28 + $0x28] sm:$0xff] }
 0x3d1   : > { %8307 = vtanh.f32 %v1952_v34  ;;  %v1954_v40 = vadd.f32 %v1953_v8, %v1840_v61  ;;  %v1961_v5 = vpop.f32.mrf.mxu0  ;;  %v8288_v53 = vpop.eup %8287  ;;  %v2039_v54 = vmul.f32 0.5, %v8286_v38  ;;  %v2046_v52 = vadd.f32 0.5, %v2038_v62 }
 0x3d2   : > { %v1842_v35 = vpop.f32.mrf.mxu1  ;;  %v8290_v33 = vpop.eup %8289  ;;  %v2002_v47 = vmul.f32 0.5, %v8288_v53 }
 0x3d3   : > { %8309 = vtanh.f32 %v1954_v40  ;;  %v1956_v1 = vadd.f32 %v1955_v29, %v1842_v35  ;;  %v1963_v28 = vpop.f32.mrf.mxu0  ;;  %v8292_v55 = vpop.eup %8291  ;;  %v2040_v24 = vmul.f32 0.5, %v8290_v33  ;;  %v2047_v60 = vadd.f32 0.5, %v2039_v54 }
 0x3d4   : > { %v1844_v58 = vpop.f32.mrf.mxu1  ;;  %v8294_v2 = vpop.eup %8293  ;;  %v2093_v29 = vmul.f32 %v2045_v0, %v990_v49  ;;  %v2094_v41 = vmul.f32 %v2046_v52, %v991_v37 }
 0x3d5   : > { %8311 = vtanh.f32 %v1956_v1  ;;  %v1958_v43 = vadd.f32 %v1957_v16, %v1844_v58  ;;  %v1965_v39 = vpop.f32.mrf.mxu0  ;;  %v2041_v8 = vmul.f32 0.5, %v8294_v2  ;;  %v2003_v16 = vmul.f32 0.5, %v8292_v55 }
 0x3d6   : > { %v8296_v15 = vpop.eup %8295  ;;  %v1848_v30 = vpop.f32.mrf.mxu1  ;;  %v2048_v46 = vadd.f32 0.5, %v2040_v24  ;;  %v2095_v10 = vmul.f32 %v2047_v60, %v992_v57  ;;  %v996_v60 = vld [vmem:[%s9050_s28 + $0x38] sm:$0xff] }
 0x3d7   : > { %v8298_v13 = vpop.eup %8297  ;;  %v2100_v12 = vmul.f32 %v8296_v15, %v2004_v14  ;;  %8313 = vtanh.f32 %v1958_v43  ;;  %v1962_v56 = vadd.f32 %v1961_v5, %v1848_v30  ;;  %v1967_v11 = vpop.f32.mrf.mxu0  ;;  %v2049_v9 = vadd.f32 0.5, %v2041_v8 }
 0x3d8   : > { %v8300_v27 = vpop.eup %8299  ;;  %v1850_v19 = vpop.f32.mrf.mxu1  ;;  %v2042_v3 = vmul.f32 0.5, %v8298_v13 }
 0x3d9   : > { %v8302_v17 = vpop.eup %8301  ;;  %v2108_v26 = vadd.f32 %v2100_v12, %v2092_v7  ;;  %v2101_v36 = vmul.f32 %v8300_v27, %v2005_v6  ;;  %v1964_v4 = vadd.f32 %v1963_v28, %v1850_v19  ;;  %v2060_v63 = vmul.f32 0.5, %v1962_v56  ;;  %v10904_v38 = vpop.f32.mrf.mxu0 }
 0x3da   : > { %v8304_v34 = vpop.eup %8303  ;;  %v1852_v61 = vpop.f32.mrf.mxu1  ;;  %v2043_v62 = vmul.f32 0.5, %v8302_v17  ;;  %v2096_v6 = vmul.f32 %v2048_v46, %v993_v59  ;;  %v2050_v51 = vadd.f32 0.5, %v2042_v3  ;;  %v2097_v49 = vmul.f32 %v2049_v9, %v994_v42 }
 0x3db   : > { %2132 = vst [vmem:[%s9050_s28] sm:$0xff] %v2108_v26  ;;  %v2109_v40 = vadd.f32 %v2101_v36, %v2093_v29  ;;  %v2102_v5 = vmul.f32 %v8304_v34, %v2006_v50  ;;  %v2061_v53 = vmul.f32 0.5, %v1964_v4  ;;  %8315 = vtanh.f32 %v2060_v63  ;;  %v1973_v2 = vpop.f32.mrf.mxu0  ;;  %v995_v50 = vld [vmem:[%s9050_s28 + $0x30] sm:$0xff] }
 0x3dc   : > { %v8306_v32 = vpop.eup %8305  ;;  %v1966_v35 = vadd.f32 %v1965_v39, %v1852_v61  ;;  %v1854_v33 = vpop.f32.mrf.mxu1  ;;  %v2051_v30 = vadd.f32 0.5, %v2043_v62  ;;  %v2011_v27 = vadd.f32 0.5, %v2003_v16  ;;  %v2098_v37 = vmul.f32 %v2050_v51, %v995_v50 }
 0x3dd   : > { %2133 = vst [vmem:[%s9050_s28 + $0x8] sm:$0xff] %v2109_v40  ;;  %v2110_v1 = vadd.f32 %v2102_v5, %v2094_v41  ;;  %v2103_v28 = vmul.f32 %v8306_v32, %v2007_v48  ;;  %v1968_v55 = vadd.f32 %v1967_v11, %v1854_v33  ;;  %8317 = vtanh.f32 %v2061_v53 }
 0x3de   : > { %v8308_v14 = vpop.eup %8307  ;;  %v2062_v54 = vmul.f32 0.5, %v1966_v35  ;;  %v10910_v58 = vpop.f32.mrf.mxu1  ;;  %8319 = vtanh.f32 %v2108_v26  ;;  %v2010_v48 = vadd.f32 0.5, %v2002_v47 }
 0x3df   : > { %2134 = vst [vmem:[%s9050_s28 + $0x10] sm:$0xff] %v2110_v1  ;;  %v2111_v0 = vadd.f32 %v2103_v28, %v2095_v10  ;;  %v2104_v43 = vmul.f32 %v8308_v14, %v2008_v44  ;;  %v2063_v39 = vmul.f32 0.5, %v1968_v55 }
 0x3e0   : > { %v8310_v15 = vpop.eup %8309  ;;  %8321 = vtanh.f32 %v2062_v54  ;;  %v1860_v24 = vpop.f32.mrf.mxu1 }
 0x3e1   : > { %2135 = vst [vmem:[%s9050_s28 + $0x18] sm:$0xff] %v2111_v0  ;;  %v10915_v13 = vadd.f32 %v2104_v43, %v2096_v6  ;;  %v2105_v7 = vmul.f32 %v8310_v15, %v10899_v31  ;;  %v1974_v52 = vadd.f32 %v1973_v2, %v1860_v24  ;;  %8323 = vtanh.f32 %v2063_v39 }
 0x3e2   : > { %v8312_v12 = vpop.eup %8311  ;;  %8325 = vtanh.f32 %v2109_v40  ;;  %v10921_v19 = vpop.f32.mrf.mxu1  ;;  %v2099_v31 = vmul.f32 %v2051_v30, %v996_v60 }
 0x3e3   : > { %2136 = vst [vmem:[%s9050_s28 + $0x20] sm:$0xff] %v10915_v13  ;;  %v2113_v44 = vadd.f32 %v2105_v7, %v2097_v49  ;;  %v2106_v47 = vmul.f32 %v8312_v12, %v2010_v48  ;;  %v2065_v8 = vmul.f32 0.5, %v1974_v52  ;;  %8327 = vtanh.f32 %v2110_v1 }
 0x3e4   : > { %v8314_v56 = vpop.eup %8313  ;;  %8329 = vtanh.f32 %v2111_v0  ;;  %v10930_v57 = vpop.f32.mrf.mxu1 }
 0x3e5   : > { %2137 = vst [vmem:[%s9050_s28 + $0x28] sm:$0xff] %v2113_v44  ;;  %v10924_v11 = vadd.f32 %v2106_v47, %v2098_v37  ;;  %v2107_v17 = vmul.f32 %v8314_v56, %v2011_v27  ;;  %8331 = vtanh.f32 %v2065_v8 }
 0x3e6   : > { %8333 = vtanh.f32 %v2113_v44 }
 0x3e7   : > { %2138 = vst [vmem:[%s9050_s28 + $0x30] sm:$0xff] %v10924_v11  ;;  %v10928_v29 = vadd.f32 %v2107_v17, %v2099_v31 }
 0x3e8   : > { %v8316_v26 = vpop.eup %8315 }
 0x3e9   : > { %2139 = vst [vmem:[%s9050_s28 + $0x38] sm:$0xff] %v10928_v29  ;;  %v2076_v36 = vmul.f32 0.5, %v8316_v26 }
 0x3ea   : > { %v2593_v4 = vpop.f32.mrf.mxu1  ;;  %v8318_v34 = vpop.eup %8317 }
 0x3eb   : > { %v8320_v16 = vpop.eup %8319  ;;  %v2084_v46 = vadd.f32 0.5, %v2076_v36  ;;  %v2077_v3 = vmul.f32 0.5, %v8318_v34  ;;  %v2632_v40 = vmul.f32 0.5, %v2593_v4 }
 0x3ec   : > { %v2595_v63 = vpop.f32.mrf.mxu1 }
 0x3ed   : > { %v8322_v61 = vpop.eup %8321  ;;  %v10934_v41 = vmul.f32 %v8320_v16, %v2084_v46  ;;  %v2633_v32 = vmul.f32 0.5, %v2595_v63  ;;  %v2085_v9 = vadd.f32 0.5, %v2077_v3  ;;  %8335 = vtanh.f32 %v2632_v40 }
 0x3ee   : > { %v2078_v59 = vmul.f32 0.5, %v8322_v61  ;;  %v2597_v5 = vpop.f32.mrf.mxu1  ;;  %v8324_v53 = vpop.eup %8323 }
 0x3ef   : > { %15587 = vst [vmem:[#allocation44_spill] sm:$0xff] %v10934_v41  ;;  %v8326_v10 = vpop.eup %8325  ;;  %v2079_v33 = vmul.f32 0.5, %v8324_v53  ;;  %2857 = vrot.lane.b32.xlu0 %v10934_v41, %s15339_s14  ;;  %v2634_v1 = vmul.f32 0.5, %v2597_v5  ;;  %8337 = vtanh.f32 %v2633_v32 }
 0x3f0   : > { %v2086_v35 = vadd.f32 0.5, %v2078_v59  ;;  %v2599_v42 = vpop.f32.mrf.mxu1  ;;  %v8328_v62 = vpop.eup %8327  ;;  %v10940_v50 = vmul.f32 %v8326_v10, %v2085_v9 }
 0x3f1   : > { %v8330_v28 = vpop.eup %8329  ;;  %v2087_v14 = vadd.f32 0.5, %v2079_v33  ;;  %v2635_v6 = vmul.f32 0.5, %v2599_v42  ;;  %8339 = vtanh.f32 %v2634_v1  ;;  %v2154_v33 = vld [vmem:[%s9048_s29] sm:$0xff] }
 0x3f2   : > { %v10938_v55 = vmul.f32 %v8328_v62, %v2086_v35  ;;  %v2603_v51 = vpop.f32.mrf.mxu1  ;;  %v8332_v54 = vpop.eup %8331  ;;  %15589 = vst [vmem:[#allocation42_spill] sm:$0xff] %v10940_v50 }
 0x3f3   : > { %v2648_v2 = vadd.f32 0.01, %v2603_v51  ;;  %v10942_v0 = vmul.f32 %v8330_v28, %v2087_v14  ;;  %v2081_v43 = vmul.f32 0.5, %v8332_v54  ;;  %2797 = vrot.lane.b32.xlu0 %v10934_v41, %s15335_s15  ;;  %8341 = vtanh.f32 %v2635_v6  ;;  %v8334_v52 = vpop.eup %8333  ;;  %v2155_v51 = vld [vmem:[%s9048_s29 + $0x8] sm:$0xff] }
 0x3f4   : > { %15588 = vst [vmem:[#allocation46_spill] sm:$0xff] %v10938_v55  ;;  %v2605_v39 = vpop.f32.mrf.mxu1  ;;  %2859 = vrot.lane.b32.xlu1 %v10938_v55, %s15339_s14 }
 0x3f5   : > { %15590 = vst [vmem:[#allocation45_spill] sm:$0xff] %v10942_v0  ;;  %v2652_v48 = vmul.f32 0.5, %v2648_v2  ;;  %v2649_v49 = vadd.f32 0.01, %v2605_v39  ;;  %v2089_v24 = vadd.f32 0.5, %v2081_v43 }
 0x3f6   : > { %v2607_v30 = vpop.f32.mrf.mxu1 }
 0x3f7   : > { %8343 = vtanh.f32 %v2652_v48  ;;  %v2653_v12 = vmul.f32 0.5, %v2649_v49  ;;  %v2650_v27 = vadd.f32 0.01, %v2607_v30  ;;  %v10952_v37 = vmul.f32 %v8334_v52, %v2089_v24  ;;  %2737 = vrot.lane.b32.xlu0 %v10934_v41, %s15592_s20  ;;  %v2156_v30 = vld [vmem:[%s9048_s29 + $0x10] sm:$0xff] }
 0x3f8   : > { %v2609_v60 = vpop.f32.mrf.mxu1  ;;  %2799 = vrot.lane.b32.xlu1 %v10938_v55, %s15335_s15 }
 0x3f9   : > { %15591 = vst [vmem:[#allocation25_spill] sm:$0xff] %v10952_v37  ;;  %8345 = vtanh.f32 %v2653_v12  ;;  %v2654_v44 = vmul.f32 0.5, %v2650_v27  ;;  %v2651_v47 = vadd.f32 0.01, %v2609_v60 }
 0x3fa   : > { %v2613_v8 = vpop.f32.mrf.mxu1  ;;  %v8336_v26 = vpop.eup %8335 }
 0x3fb   : > { %8347 = vtanh.f32 %v2654_v44  ;;  %v2655_v56 = vmul.f32 0.5, %v2651_v47  ;;  %3097 = vrot.lane.b32.xlu0 %v10934_v41, %s15593_s26  ;;  %v2640_v16 = vmul.f32 0.5, %v8336_v26 }
 0x3fc   : > { %8349 = vtanh.f32 %v2613_v8  ;;  %v2615_v31 = vpop.f32.mrf.mxu1  ;;  %2739 = vrot.lane.b32.xlu1 %v10938_v55, %s15592_s20  ;;  %v8338_v36 = vpop.eup %8337  ;;  %v1972_v8 = vadd.f32 %v10904_v38, %v10910_v58 }
 0x3fd   : > { %8351 = vtanh.f32 %v2655_v56  ;;  %v2641_v63 = vmul.f32 0.5, %v8338_v36  ;;  %v2644_v5 = vadd.f32 0.5, %v2640_v16  ;;  %v2157_v56 = vld [vmem:[%s9048_s29 + $0x18] sm:$0xff] }
 0x3fe   : > { %8353 = vtanh.f32 %v2615_v31  ;;  %v2617_v17 = vpop.f32.mrf.mxu1  ;;  %v8340_v34 = vpop.eup %8339  ;;  %v2064_v58 = vmul.f32 0.5, %v1972_v8 }
 0x3ff   : > { %8355 = vtanh.f32 %v2617_v17  ;;  %2917 = vrot.lane.b32.xlu0 %v10934_v41, %s15594_s30  ;;  %v2642_v61 = vmul.f32 0.5, %v8340_v34  ;;  %v2645_v35 = vadd.f32 0.5, %v2641_v63  ;;  %v1975_v17 = vpop.f32.mrf.mxu0 }
 0x400   : > { %v2619_v4 = vpop.f32.mrf.mxu1  ;;  %3099 = vrot.lane.b32.xlu1 %v10938_v55, %s15593_s26  ;;  %v8342_v46 = vpop.eup %8341  ;;  %v1976_v34 = vadd.f32 %v1975_v17, %v10921_v19 }
 0x401   : > { %8357 = vtanh.f32 %v2619_v4  ;;  %v2643_v53 = vmul.f32 0.5, %v8342_v46  ;;  %v2646_v62 = vadd.f32 0.5, %v2642_v61 }
 0x402   : > { %8359 = vtanh.f32 %v2064_v58  ;;  %v2066_v16 = vmul.f32 0.5, %v1976_v34 }
 0x403   : > { %3037 = vrot.lane.b32.xlu0 %v10934_v41, %s15514_s25  ;;  %v2647_v43 = vadd.f32 0.5, %v2643_v53 }
 0x404   : > { %v8344_v3 = vpop.eup %8343  ;;  %2919 = vrot.lane.b32.xlu1 %v10938_v55, %s15594_s30  ;;  %8361 = vtanh.f32 %v2066_v16 }
 0x405   : > { %v2660_v59 = vmul.f32 0.5, %v8344_v3  ;;  %8363 = vtanh.f32 %v10915_v13 }
 0x406   : > { %v8346_v40 = vpop.eup %8345  ;;  %8365 = vtanh.f32 %v10924_v11 }
 0x407   : > { %v2664_v32 = vadd.f32 0.5, %v2660_v59  ;;  %v2661_v10 = vmul.f32 0.5, %v8346_v40  ;;  %2977 = vrot.lane.b32.xlu0 %v10934_v41, %s15595_s13  ;;  %v1977_v40 = vpop.f32.mrf.mxu0 }
 0x408   : > { %v8348_v9 = vpop.eup %8347  ;;  %3039 = vrot.lane.b32.xlu1 %v10938_v55, %s15514_s25 }
 0x409   : > { %v8350_v42 = vpop.eup %8349  ;;  %v2688_v1 = vmul.f32 %v2664_v32, %v2154_v33  ;;  %v2665_v28 = vadd.f32 0.5, %v2661_v10  ;;  %v2662_v14 = vmul.f32 0.5, %v8348_v9  ;;  %v1978_v32 = vadd.f32 %v1977_v40, %v10930_v57 }
 0x40a   : > { %v8352_v6 = vpop.eup %8351  ;;  %v2692_v54 = vmul.f32 %v8350_v42, %v2644_v5 }
 0x40b   : > { %v8354_v2 = vpop.eup %8353  ;;  %v2689_v39 = vmul.f32 %v2665_v28, %v2155_v51  ;;  %v2666_v48 = vadd.f32 0.5, %v2662_v14  ;;  %v2663_v49 = vmul.f32 0.5, %v8352_v6  ;;  %3157 = vrot.lane.b32.xlu0 %v10934_v41, %s15596_s23  ;;  %v2067_v10 = vmul.f32 0.5, %v1978_v32 }
 0x40c   : > { %v8356_v24 = vpop.eup %8355  ;;  %v10977_v52 = vadd.f32 %v2692_v54, %v2688_v1  ;;  %v2693_v12 = vmul.f32 %v8354_v2, %v2645_v35  ;;  %2979 = vrot.lane.b32.xlu1 %v10938_v55, %s15595_s13  ;;  %v2623_v35 = vpop.f32.mrf.mxu1 }
 0x40d   : > { %v2690_v27 = vmul.f32 %v2666_v48, %v2156_v30  ;;  %v2667_v60 = vadd.f32 0.5, %v2663_v49  ;;  %v2694_v44 = vmul.f32 %v8356_v24, %v2646_v62  ;;  %8367 = vtanh.f32 %v2067_v10 }
 0x40e   : > { %v8358_v47 = vpop.eup %8357  ;;  %2708 = vst [vmem:[%s9048_s29] sm:$0xff] %v10977_v52  ;;  %v10988_v31 = vadd.f32 %v2693_v12, %v2689_v39  ;;  %8369 = vtanh.f32 %v10928_v29  ;;  %v2625_v33 = vpop.f32.mrf.mxu1  ;;  %v2672_v1 = vmul.f32 0.5, %v2623_v35 }
 0x40f   : > { %v2691_v26 = vmul.f32 %v2667_v60, %v2157_v56  ;;  %v10990_v36 = vadd.f32 %v2694_v44, %v2690_v27  ;;  %v2695_v4 = vmul.f32 %v8358_v47, %v2647_v43  ;;  %2869 = vrot.lane.b32.xlu0 %v10940_v50, %s15339_s14  ;;  %v8360_v19 = vpop.eup %8359 }
 0x410   : > { %2709 = vst [vmem:[%s9048_s29 + $0x8] sm:$0xff] %v10988_v31  ;;  %3159 = vrot.lane.b32.xlu1 %v10938_v55, %s15596_s23  ;;  %v2080_v46 = vmul.f32 0.5, %v8360_v19  ;;  %v2627_v28 = vpop.f32.mrf.mxu1  ;;  %8371 = vtanh.f32 %v2672_v1  ;;  %v8060_v55 = vld [vmem:[%s15253_s3 + $0xc] ss:$16 sps:$4 sm:$0xff]  }
 0x411   : > { %2710 = vst [vmem:[%s9048_s29 + $0x10] sm:$0xff] %v10990_v36  ;;  %v11000_v38 = vadd.f32 %v2695_v4, %v2691_v26  ;;  %v8362_v3 = vpop.eup %8361  ;;  %v2674_v14 = vmul.f32 0.5, %v2627_v28  ;;  %v2673_v26 = vmul.f32 0.5, %v2625_v33  ;;  %7711 = vmatprep.mubr.msk.bf16.mxu1 %vm1723_vm13, %v8060_v55 }
 0x412   : > { %v2088_v13 = vadd.f32 0.5, %v2080_v46  ;;  %v2082_v63 = vmul.f32 0.5, %v8362_v3  ;;  %v8364_v11 = vpop.eup %8363 }
 0x413   : > { %2711 = vst [vmem:[%s9048_s29 + $0x18] sm:$0xff] %v11000_v38  ;;  %2809 = vrot.lane.b32.xlu0 %v10940_v50, %s15335_s15  ;;  %v8366_v5 = vpop.eup %8365  ;;  %8373 = vtanh.f32 %v2674_v14 }
 0x414   : > { %2871 = vrot.lane.b32.xlu1 %v10942_v0, %s15339_s14  ;;  %v11035_v61 = vmul.f32 %v8364_v11, %v2088_v13  ;;  %v2090_v59 = vadd.f32 0.5, %v2082_v63  ;;  %8375 = vtanh.f32 %v10977_v52  ;;  %v7673_v13 = vld [vmem:[%s15254_s4 + $0x2] ss:$8 sm:$0x3] }
 0x415   : > { %8377 = vtanh.f32 %v10990_v36  ;;  %v2629_v36 = vpop.f32.mrf.mxu1  ;;  %v11167_v40 = vrot.slane %v7673_v13, %v9190_v21 }
 0x416   : > { %15597 = vst [vmem:[#allocation23_spill] sm:$0xff] %v11035_v61  ;;  %v11041_v53 = vmul.f32 %v8366_v5, %v2090_v59  ;;  %8379 = vtanh.f32 %v2673_v26  ;;  %v2675_v34 = vmul.f32 0.5, %v2629_v36 }
 0x417   : > { %2749 = vrot.lane.b32.xlu0 %v10940_v50, %s15592_s20  ;;  %15608 = vst [vmem:[#allocation53_spill] sm:$0xff] %v11167_v40 }
 0x418   : > { %2811 = vrot.lane.b32.xlu1 %v10942_v0, %s15335_s15  ;;  %15598 = vst [vmem:[#allocation26_spill] sm:$0xff] %v11041_v53  ;;  %8381 = vtanh.f32 %v2675_v34 }
 0x419   : > { %8383 = vtanh.f32 %v10988_v31  ;;  %v11170_v31 = vrot.slane %v7673_v13, %v9192_v22 }
 0x41a   : > { %v8368_v57 = vpop.eup %8367  ;;  %8385 = vtanh.f32 %v11000_v38 }
 0x41b   : > { %3109 = vrot.lane.b32.xlu0 %v10940_v50, %s15593_s26  ;;  %v2083_v9 = vmul.f32 0.5, %v8368_v57  ;;  %v8370_v42 = vpop.eup %8369 }
 0x41c   : > { %2751 = vrot.lane.b32.xlu1 %v10942_v0, %s15592_s20 }
 0x41d   : > { %v2091_v29 = vadd.f32 0.5, %v2083_v9  ;;  %v8372_v51 = vpop.eup %8371 }
 0x41e   : > { %v2680_v54 = vmul.f32 0.5, %v8372_v51 }
 0x41f   : > { %2929 = vrot.lane.b32.xlu0 %v10940_v50, %s15594_s30  ;;  %v11077_v62 = vmul.f32 %v8370_v42, %v2091_v29 }
 0x420   : > { %3111 = vrot.lane.b32.xlu1 %v10942_v0, %s15593_s26  ;;  %v8374_v39 = vpop.eup %8373  ;;  %v2684_v48 = vadd.f32 0.5, %v2680_v54 }
 0x421   : > { %15599 = vst [vmem:[#allocation24_spill] sm:$0xff] %v11077_v62  ;;  %v2682_v49 = vmul.f32 0.5, %v8374_v39  ;;  %v8376_v52 = vpop.eup %8375 }
 0x422   : > { %v11115_v12 = vmul.f32 %v8376_v52, %v2684_v48  ;;  %v8378_v47 = vpop.eup %8377 }
 0x423   : > { %3049 = vrot.lane.b32.xlu0 %v10940_v50, %s15514_s25  ;;  %v2686_v27 = vadd.f32 0.5, %v2682_v49  ;;  %v8380_v59 = vpop.eup %8379 }
 0x424   : > { %2931 = vrot.lane.b32.xlu1 %v10942_v0, %s15594_s30  ;;  %15600 = vst [vmem:[#allocation49_spill] sm:$0xff] %v11115_v12  ;;  %v2681_v57 = vmul.f32 0.5, %v8380_v59 }
 0x425   : > { %v11125_v8 = vmul.f32 %v8378_v47, %v2686_v27  ;;  %v8382_v29 = vpop.eup %8381 }
 0x426   : > { %v2683_v39 = vmul.f32 0.5, %v8382_v29  ;;  %v8384_v48 = vpop.eup %8383 }
 0x427   : > { %2989 = vrot.lane.b32.xlu0 %v10940_v50, %s15595_s13  ;;  %15601 = vst [vmem:[#allocation51_spill] sm:$0xff] %v11125_v8  ;;  %v8386_v26 = vpop.eup %8385 }
 0x428   : > { %3051 = vrot.lane.b32.xlu1 %v10942_v0, %s15514_s25  ;;  %v2687_v47 = vadd.f32 0.5, %v2683_v39 }
 0x42a   : > { %v11216_v13 = vmul.f32 %v8386_v26, %v2687_v47 }
 0x42b   : > { %3169 = vrot.lane.b32.xlu0 %v10940_v50, %s15596_s23 }
 0x42c   : > { %2991 = vrot.lane.b32.xlu1 %v10942_v0, %s15595_s13  ;;  %15611 = vst [vmem:[#allocation54_spill] sm:$0xff] %v11216_v13 }
 0x42f   : > { %2801 = vrot.lane.b32.xlu0 %v11035_v61, %s15335_s15 }
 0x430   : > { %3171 = vrot.lane.b32.xlu1 %v10942_v0, %s15596_s23 }
 0x433   : > { %2741 = vrot.lane.b32.xlu0 %v11035_v61, %s15592_s20 }
 0x434   : > { %2803 = vrot.lane.b32.xlu1 %v11041_v53, %s15335_s15 }
 0x437   : > { %3101 = vrot.lane.b32.xlu0 %v11035_v61, %s15593_s26 }
 0x438   : > { %2743 = vrot.lane.b32.xlu1 %v11041_v53, %s15592_s20 }
 0x43b   : > { %2921 = vrot.lane.b32.xlu0 %v11035_v61, %s15594_s30 }
 0x43c   : > { %3103 = vrot.lane.b32.xlu1 %v11041_v53, %s15593_s26 }
 0x43f   : > { %3041 = vrot.lane.b32.xlu0 %v11035_v61, %s15514_s25 }
 0x440   : > { %2923 = vrot.lane.b32.xlu1 %v11041_v53, %s15594_s30 }
 0x443   : > { %2861 = vrot.lane.b32.xlu0 %v11035_v61, %s15339_s14 }
 0x444   : > { %3043 = vrot.lane.b32.xlu1 %v11041_v53, %s15514_s25 }
 0x447   : > { %2981 = vrot.lane.b32.xlu0 %v11035_v61, %s15595_s13 }
 0x448   : > { %2863 = vrot.lane.b32.xlu1 %v11041_v53, %s15339_s14 }
 0x44b   : > { %3161 = vrot.lane.b32.xlu0 %v11035_v61, %s15596_s23 }
 0x44c   : > { %2983 = vrot.lane.b32.xlu1 %v11041_v53, %s15595_s13 }
 0x44f   : > { %2813 = vrot.lane.b32.xlu0 %v10952_v37, %s15335_s15 }
 0x450   : > { %3163 = vrot.lane.b32.xlu1 %v11041_v53, %s15596_s23 }
 0x453   : > { %2753 = vrot.lane.b32.xlu0 %v10952_v37, %s15592_s20 }
 0x454   : > { %2815 = vrot.lane.b32.xlu1 %v11077_v62, %s15335_s15 }
 0x457   : > { %3113 = vrot.lane.b32.xlu0 %v10952_v37, %s15593_s26 }
 0x458   : > { %2755 = vrot.lane.b32.xlu1 %v11077_v62, %s15592_s20 }
 0x45b   : > { %2933 = vrot.lane.b32.xlu0 %v10952_v37, %s15594_s30 }
 0x45c   : > { %3115 = vrot.lane.b32.xlu1 %v11077_v62, %s15593_s26 }
 0x45f   : > { %3053 = vrot.lane.b32.xlu0 %v10952_v37, %s15514_s25 }
 0x460   : > { %2935 = vrot.lane.b32.xlu1 %v11077_v62, %s15594_s30 }
 0x461   : > { %v2858_v6 = vpop.permute.xlu0 %2857 }
 0x463   : > { %2873 = vrot.lane.b32.xlu0 %v10952_v37, %s15339_s14 }
 0x464   : > { %3055 = vrot.lane.b32.xlu1 %v11077_v62, %s15514_s25 }
 0x465   : > { %v11101_v43 = vpop.permute.xlu0 %2797 }
 0x466   : > { %v2860_v2 = vpop.permute.xlu1 %2859 }
 0x467   : > { %2993 = vrot.lane.b32.xlu0 %v10952_v37, %s15595_s13 }
 0x468   : > { %2875 = vrot.lane.b32.xlu1 %v11077_v62, %s15339_s14 }
 0x469   : > { %v11109_v30 = vpop.permute.xlu0 %2737 }
 0x46a   : > { %v11107_v24 = vpop.permute.xlu1 %2799 }
 0x46b   : > { %3173 = vrot.lane.b32.xlu0 %v10952_v37, %s15596_s23 }
 0x46c   : > { %2995 = vrot.lane.b32.xlu1 %v11077_v62, %s15595_s13 }
 0x46d   : > { %v11119_v44 = vpop.permute.xlu0 %3097 }
 0x46e   : > { %v11117_v60 = vpop.permute.xlu1 %2739 }
 0x46f   : > { %2853 = vrot.lane.b32.xlu0 %v11115_v12, %s15339_s14 }
 0x470   : > { %3175 = vrot.lane.b32.xlu1 %v11077_v62, %s15596_s23 }
 0x471   : > { %v11129_v17 = vpop.permute.xlu0 %2917 }
 0x472   : > { %v11127_v56 = vpop.permute.xlu1 %3099  ;;  %15602 = vst [vmem:[#allocation47_spill] sm:$0xff] %v11129_v17 }
 0x473   : > { %2793 = vrot.lane.b32.xlu0 %v11115_v12, %s15335_s15 }
 0x474   : > { %2855 = vrot.lane.b32.xlu1 %v11125_v8, %s15339_s14 }
 0x475   : > { %v11137_v58 = vpop.permute.xlu0 %3037 }
 0x476   : > { %v11135_v4 = vpop.permute.xlu1 %2919 }
 0x477   : > { %15603 = vst [vmem:[#allocation50_spill] sm:$0xff] %v11135_v4  ;;  %2733 = vrot.lane.b32.xlu0 %v11115_v12, %s15592_s20 }
 0x478   : > { %2795 = vrot.lane.b32.xlu1 %v11125_v8, %s15335_s15 }
 0x479   : > { %v11145_v19 = vpop.permute.xlu0 %2977 }
 0x47a   : > { %v11143_v16 = vpop.permute.xlu1 %3039  ;;  %15604 = vst [vmem:[#allocation34_spill] sm:$0xff] %v11145_v19 }
 0x47b   : > { %2973 = vrot.lane.b32.xlu0 %v11115_v12, %s15595_s13 }
 0x47c   : > { %2735 = vrot.lane.b32.xlu1 %v11125_v8, %s15592_s20 }
 0x47d   : > { %v11153_v3 = vpop.permute.xlu0 %3157 }
 0x47e   : > { %v11151_v46 = vpop.permute.xlu1 %2979  ;;  %15606 = vst [vmem:[#allocation33_spill] sm:$0xff] %v11153_v3 }
 0x47f   : > { %15605 = vst [vmem:[#allocation32_spill] sm:$0xff] %v11151_v46  ;;  %3093 = vrot.lane.b32.xlu0 %v11115_v12, %s15593_s26 }
 0x480   : > { %2975 = vrot.lane.b32.xlu1 %v11125_v8, %s15595_s13 }
 0x481   : > { %v2870_v11 = vpop.permute.xlu0 %2869 }
 0x482   : > { %v11163_v63 = vpop.permute.xlu1 %3159  ;;  %v2879_v5 = vsel %vm516_vm6, %v2858_v6, %v2870_v11  ;;  %v2885_v32 = vsel %vm516_vm6, %v2870_v11, %v2858_v6 }
 0x483   : > { %15607 = vst [vmem:[#allocation31_spill] sm:$0xff] %v11163_v63  ;;  %2913 = vrot.lane.b32.xlu0 %v11115_v12, %s15594_s30  ;;  %v2904_v33 = vmul.f32 %v11167_v40, %v2885_v32  ;;  %v2905_v42 = vmul.f32 %v11170_v31, %v2879_v5  ;;  %v7677_v63 = vld [vmem:[%s15254_s4 + $0x7] ss:$8 sm:$0x3] }
 0x484   : > { %3095 = vrot.lane.b32.xlu1 %v11125_v8, %s15593_s26  ;;  %v11365_v0 = vrot.slane %v7677_v63, %v9190_v21 }
 0x485   : > { %v11180_v10 = vpop.permute.xlu0 %2809 }
 0x486   : > { %v2872_v38 = vpop.permute.xlu1 %2871 }
 0x487   : > { %v2880_v9 = vsel %vm516_vm6, %v2860_v2, %v2872_v38  ;;  %v2886_v35 = vsel %vm516_vm6, %v2872_v38, %v2860_v2  ;;  %3033 = vrot.lane.b32.xlu0 %v11115_v12, %s15514_s25  ;;  %v2685_v2 = vadd.f32 0.5, %v2681_v57 }
 0x488   : > { %v2906_v1 = vmul.f32 %v11167_v40, %v2886_v35  ;;  %v2907_v28 = vmul.f32 %v11170_v31, %v2880_v9  ;;  %2915 = vrot.lane.b32.xlu1 %v11125_v8, %s15594_s30 }
 0x489   : > { %v11196_v51 = vpop.permute.xlu0 %2749  ;;  %v11206_v27 = vmul.f32 %v8384_v48, %v2685_v2 }
 0x48a   : > { %v3226_v14 = vpack.c.bf16 %v2906_v1, %v2904_v33  ;;  %v11194_v6 = vpop.permute.xlu1 %2811  ;;  %v3227_v54 = vpack.c.bf16 %v2907_v28, %v2905_v42  ;;  %v3885_v28 = vrot.slane %v11115_v12, 4 }
 0x48b   : > { %3153 = vrot.lane.b32.xlu0 %v11115_v12, %s15596_s23  ;;  %15609 = vst [vmem:[#allocation55_spill] sm:$0xff] %v11206_v27  ;;  %v15324_v47 = vrot.slane %v11206_v27, 4  ;;  %v11385_v12 = vrot.slane %v11216_v13, 4  ;;  %v2826_v46 = vsel %vm478_vm7, %v11194_v6, %v11107_v24 }
 0x48c   : > { %3474 = vmatprep.subr.bf16.mxu0 %v3227_v54  ;;  %3035 = vrot.lane.b32.xlu1 %v11125_v8, %s15514_s25 }
 0x48d   : > { %3475 = vmatpush1.bf16.msra.mxu0 %v3226_v14  ;;  %v11204_v52 = vpop.permute.xlu0 %3109  ;;  %v7719_v14 = vld [vmem:[%s9042_s11 + $0x10] sm:$0xff]  ;;  %15630 = vst [vmem:[#allocation61_spill] sm:$0xff] %v11385_v12 }
 0x48e   : > { %v11202_v49 = vpop.permute.xlu1 %2751  ;;  %v3879_v39 = vcombine.high %v7719_v14, %v7719_v14  ;;  %v11273_v48 = vsel %vm408_vm0, %v7719_v14, %v3885_v28 }
 0x48f   : > { %2865 = vrot.lane.b32.xlu0 %v11206_v27, %s15339_s14  ;;  %15618 = vst [vmem:[#allocation59_spill] sm:$0xff] %v11273_v48 }
 0x490   : > { %3155 = vrot.lane.b32.xlu1 %v11125_v8, %s15596_s23  ;;  %v11287_v7 = vsel %vm408_vm0, %v3879_v39, %v15324_v47  ;;  %v11306_v47 = vrot.slane %v11125_v8, 4 }
 0x491   : > { %v11214_v34 = vpop.permute.xlu0 %2929  ;;  %15620 = vst [vmem:[#allocation38_spill] sm:$0xff] %v11287_v7 }
 0x492   : > { %v11212_v36 = vpop.permute.xlu1 %3111  ;;  %15610 = vst [vmem:[#allocation52_spill] sm:$0xff] %v11214_v34  ;;  %15623 = vst [vmem:[#allocation35_spill] sm:$0xff] %v11306_v47  ;;  %v11318_v18 = vsel %vm408_vm0, %v11306_v47, 0.0 }
 0x493   : > { %2805 = vrot.lane.b32.xlu0 %v11206_v27, %s15335_s15  ;;  %v3120_v34 = vsel %vm668_vm11, %v11127_v56, %v11212_v36 }
 0x494   : > { %2867 = vrot.lane.b32.xlu1 %v11216_v13, %s15339_s14 }
 0x495   : > { %v11224_v59 = vpop.permute.xlu0 %3049 }
 0x496   : > { %v11222_v11 = vpop.permute.xlu1 %2931 }
 0x497   : > { %15612 = vst [vmem:[#allocation30_spill] sm:$0xff] %v11222_v11  ;;  %2745 = vrot.lane.b32.xlu0 %v11206_v27, %s15592_s20 }
 0x498   : > { %2807 = vrot.lane.b32.xlu1 %v11216_v13, %s15335_s15 }
 0x499   : > { %v11232_v32 = vpop.permute.xlu0 %2989 }
 0x49a   : > { %v11230_v5 = vpop.permute.xlu1 %3051  ;;  %15613 = vst [vmem:[#allocation29_spill] sm:$0xff] %v11232_v32 }
 0x49b   : > { %2985 = vrot.lane.b32.xlu0 %v11206_v27, %s15595_s13 }
 0x49c   : > { %2747 = vrot.lane.b32.xlu1 %v11216_v13, %s15592_s20 }
 0x49d   : > { %v11240_v57 = vpop.permute.xlu0 %3169 }
 0x49e   : > { %v11238_v38 = vpop.permute.xlu1 %2991  ;;  %15615 = vst [vmem:[#allocation58_spill] sm:$0xff] %v11240_v57  ;;  %v11333_v57 = vsel %vm408_vm0, %v3885_v28, %v11306_v47 }
 0x49f   : > { %15614 = vst [vmem:[#allocation60_spill] sm:$0xff] %v11238_v38  ;;  %3105 = vrot.lane.b32.xlu0 %v11206_v27, %s15593_s26  ;;  %15627 = vst [vmem:[#allocation39_spill] sm:$0xff] %v11333_v57 }
 0x4a0   : > { %2987 = vrot.lane.b32.xlu1 %v11216_v13, %s15595_s13 }
 0x4a1   : > { %v11248_v35 = vpop.permute.xlu0 %2801 }
 0x4a2   : > { %v11246_v9 = vpop.permute.xlu1 %3171 }
 0x4a3   : > { %15616 = vst [vmem:[#allocation28_spill] sm:$0xff] %v11246_v9  ;;  %2925 = vrot.lane.b32.xlu0 %v11206_v27, %s15594_s30  ;;  %v8063_v9 = vld [vmem:[%s15253_s3 + $0x4] ss:$16 sps:$4 sm:$0xff]  }
 0x4a4   : > { %3107 = vrot.lane.b32.xlu1 %v11216_v13, %s15593_s26  ;;  %3506 = vmatprep.mubr.bf16.mxu0 %v8063_v9  ;;  %v11368_v9 = vrot.slane %v7677_v63, %v9192_v22 }
 0x4a5   : > { %v11256_v33 = vpop.permute.xlu0 %2741 }
 0x4a6   : > { %v11254_v29 = vpop.permute.xlu1 %2803 }
 0x4a7   : > { %3045 = vrot.lane.b32.xlu0 %v11206_v27, %s15514_s25 }
 0x4a8   : > { %2927 = vrot.lane.b32.xlu1 %v11216_v13, %s15594_s30 }
 0x4a9   : > { %v3102_v1 = vpop.permute.xlu0 %3101 }
 0x4aa   : > { %v11262_v42 = vpop.permute.xlu1 %2743 }
 0x4ab   : > { %3165 = vrot.lane.b32.xlu0 %v11206_v27, %s15596_s23 }
 0x4ac   : > { %3047 = vrot.lane.b32.xlu1 %v11216_v13, %s15514_s25 }
 0x4ad   : > { %v11270_v2 = vpop.permute.xlu0 %2921 }
 0x4ae   : > { %v3104_v54 = vpop.permute.xlu1 %3103  ;;  %15617 = vst [vmem:[#allocation27_spill] sm:$0xff] %v11270_v2 }
 0x4af   : > { %4046 = vrot.lane.b32.xlu0 %v11273_v48, %s15595_s13 }
 0x4b0   : > { %3167 = vrot.lane.b32.xlu1 %v11216_v13, %s15596_s23 }
 0x4b1   : > { %v11282_v15 = vpop.permute.xlu0 %3041 }
 0x4b2   : > { %v11280_v26 = vpop.permute.xlu1 %2923 }
 0x4b3   : > { %15619 = vst [vmem:[#allocation57_spill] sm:$0xff] %v11280_v26  ;;  %4010 = vrot.lane.b32.xlu0 %v11273_v48, %s15594_s30 }
 0x4b4   : > { %4052 = vrot.lane.b32.xlu1 %v11287_v7, %s15595_s13 }
 0x4b5   : > { %v11295_v25 = vpop.permute.xlu0 %2861 }
 0x4b6   : > { %v11293_v14 = vpop.permute.xlu1 %3043  ;;  %15621 = vst [vmem:[#allocation36_spill] sm:$0xff] %v11295_v25 }
 0x4b7   : > { %3974 = vrot.lane.b32.xlu0 %v11273_v48, %s15339_s14 }
 0x4b8   : > { %4016 = vrot.lane.b32.xlu1 %v11287_v7, %s15594_s30 }
 0x4b9   : > { %v11303_v39 = vpop.permute.xlu0 %2981 }
 0x4ba   : > { %v11301_v45 = vpop.permute.xlu1 %2863 }
 0x4bb   : > { %15622 = vst [vmem:[#allocation37_spill] sm:$0xff] %v11301_v45  ;;  %3938 = vrot.lane.b32.xlu0 %v11273_v48, %s15335_s15 }
 0x4bc   : > { %3944 = vrot.lane.b32.xlu1 %v11287_v7, %s15335_s15 }
 0x4bd   : > { %v11314_v25 = vpop.permute.xlu0 %3161 }
 0x4be   : > { %v11312_v23 = vpop.permute.xlu1 %2983  ;;  %15625 = vst [vmem:[#allocation41_spill] sm:$0xff] %v11314_v25  ;;  %v3126_v25 = vsel %vm668_vm11, %v11212_v36, %v11127_v56  ;;  %v11412_v36 = vsel %vm408_vm0, %v11385_v12, 0.0 }
 0x4bf   : > { %15624 = vst [vmem:[#allocation48_spill] sm:$0xff] %v11312_v23  ;;  %3902 = vrot.lane.b32.xlu0 %v11273_v48, %s15592_s20  ;;  %v3147_v17 = vmul.f32 %v11368_v9, %v3126_v25  ;;  %v3146_v25 = vmul.f32 %v11365_v0, %v3120_v34 }
 0x4c0   : > { %4014 = vrot.lane.b32.xlu1 %v11318_v18, %s15594_s30 }
 0x4c1   : > { %v11326_v41 = vpop.permute.xlu0 %2813 }
 0x4c2   : > { %v11324_v45 = vpop.permute.xlu1 %3163 }
 0x4c3   : > { %15626 = vst [vmem:[#allocation40_spill] sm:$0xff] %v11324_v45  ;;  %3980 = vrot.lane.b32.xlu0 %v11287_v7, %s15339_s14 }
 0x4c4   : > { %3976 = vrot.lane.b32.xlu1 %v11333_v57, %s15339_s14  ;;  %s15631_s14 = smov 15  }
 0x4c5   : > { %v11341_v2 = vpop.permute.xlu0 %2753 }
 0x4c6   : > { %v11339_v3 = vpop.permute.xlu1 %2815 }
 0x4c7   : > { %3908 = vrot.lane.b32.xlu0 %v11287_v7, %s15592_s20 }
 0x4c8   : > { %3942 = vrot.lane.b32.xlu1 %v11318_v18, %s15628_s24 }
 0x4c9   : > { %v3114_v47 = vpop.permute.xlu0 %3113 }
 0x4ca   : > { %v11351_v28 = vpop.permute.xlu1 %2755  ;;  %v3121_v55 = vsel %vm668_vm11, %v3102_v1, %v3114_v47  ;;  %v3127_v50 = vsel %vm668_vm11, %v3114_v47, %v3102_v1  ;;  %v3125_v1 = vsel %vm668_vm11, %v11204_v52, %v11119_v44 }
 0x4cb   : > { %4012 = vrot.lane.b32.xlu0 %v11333_v57, %s15594_s30  ;;  %v3148_v45 = vmul.f32 %v11365_v0, %v3121_v55  ;;  %v3149_v11 = vmul.f32 %v11368_v9, %v3127_v50  ;;  %v3145_v56 = vmul.f32 %v11368_v9, %v3125_v1 }
 0x4cc   : > { %3904 = vrot.lane.b32.xlu1 %v11333_v57, %s15592_s20 }
 0x4cd   : > { %v11374_v8 = vpop.permute.xlu0 %2933 }
 0x4ce   : > { %v3116_v26 = vpop.permute.xlu1 %3115  ;;  %15629 = vst [vmem:[#allocation43_spill] sm:$0xff] %v11374_v8 }
 0x4cf   : > { %v3122_v47 = vsel %vm668_vm11, %v3104_v54, %v3116_v26  ;;  %v3128_v63 = vsel %vm668_vm11, %v3116_v26, %v3104_v54  ;;  %3978 = vrot.lane.b32.xlu0 %v11318_v18, %s15631_s14 }
 0x4d0   : > { %v3150_v8 = vmul.f32 %v11365_v0, %v3122_v47  ;;  %v3151_v4 = vmul.f32 %v11368_v9, %v3128_v63  ;;  %4156 = vrot.lane.b32.xlu1 %v11333_v57, %s15596_s23  ;;  %v3119_v47 = vsel %vm668_vm11, %v11119_v44, %v11204_v52 }
 0x4d1   : > { %v11402_v50 = vpop.permute.xlu0 %3053 }
 0x4d2   : > { %v3258_v54 = vpack.c.bf16 %v3150_v8, %v3148_v45  ;;  %v11400_v26 = vpop.permute.xlu1 %2935  ;;  %v3259_v55 = vpack.c.bf16 %v3151_v4, %v3149_v11  ;;  %v3257_v45 = vpack.c.bf16 %v3147_v17, %v3145_v56  ;;  %v3144_v8 = vmul.f32 %v11365_v0, %v3119_v47 }
 0x4d3   : > { %15632 = vst [vmem:[#allocation62_spill] sm:$0xff] %v11400_v26  ;;  %3940 = vrot.lane.b32.xlu0 %v11333_v57, %s15628_s24  ;;  %v15635_v17 = vrot.slane %v11206_v27, 4 }
 0x4d4   : > { %3587 = vmatprep.subr.bf16.mxu1 %v3259_v55  ;;  %4020 = vrot.lane.b32.xlu1 %v11412_v36, %s15594_s30  ;;  %v3256_v52 = vpack.c.bf16 %v3146_v25, %v3144_v8 }
 0x4d5   : > { %3588 = vmatpush1.bf16.msra.mxu1 %v3258_v54  ;;  %v11421_v4 = vpop.permute.xlu0 %2873  ;;  %v11435_v1 = vsel %vm408_vm0, %v15635_v17, %v11385_v12 }
 0x4d6   : > { %v11419_v44 = vpop.permute.xlu1 %3055  ;;  %15633 = vst [vmem:[#allocation63_spill] sm:$0xff] %v11421_v4  ;;  %3589 = vmatprep.subr.bf16.mxu1 %v3257_v45 }
 0x4d7   : > { %3906 = vrot.lane.b32.xlu0 %v11318_v18, %s15592_s20 }
 0x4d8   : > { %3984 = vrot.lane.b32.xlu1 %v11412_v36, %s15631_s14 }
 0x4d9   : > { %3590 = vmatpush1.bf16.msra.mxu1 %v3256_v52  ;;  %v11429_v11 = vpop.permute.xlu0 %2993 }
 0x4da   : > { %v11427_v34 = vpop.permute.xlu1 %2875 }
 0x4db   : > { %15634 = vst [vmem:[#allocation64_spill] sm:$0xff] %v11427_v34  ;;  %4158 = vrot.lane.b32.xlu0 %v11318_v18, %s15596_s23 }
 0x4dc   : > { %3982 = vrot.lane.b32.xlu1 %v11435_v1, %s15631_s14 }
 0x4dd   : > { %v11443_v54 = vpop.permute.xlu0 %3173 }
 0x4de   : > { %v11441_v63 = vpop.permute.xlu1 %2995  ;;  %15637 = vst [vmem:[#allocation66_spill] sm:$0xff] %v11443_v54 }
 0x4df   : > { %15636 = vst [vmem:[#allocation65_spill] sm:$0xff] %v11441_v63  ;;  %4018 = vrot.lane.b32.xlu0 %v11435_v1, %s15594_s30 }
 0x4e0   : > { %4122 = vrot.lane.b32.xlu1 %v11318_v18, %s15593_s26 }
 0x4e1   : > { %v2854_v47 = vpop.permute.xlu0 %2853 }
 0x4e2   : > { %v11449_v55 = vpop.permute.xlu1 %3175 }
 0x4e3   : > { %15638 = vst [vmem:[#allocation67_spill] sm:$0xff] %v11449_v55  ;;  %4154 = vrot.lane.b32.xlu0 %v11273_v48, %s15596_s23  ;;  %v2732_v55 = vld [vmem:[%s15254_s4] ss:$8 sm:$0x3] }
 0x4e4   : > { %4124 = vrot.lane.b32.xlu1 %v11287_v7, %s15593_s26  ;;  %v11531_v62 = vrot.slane %v2732_v55, %v9190_v21 }
 0x4e5   : > { %v11455_v56 = vpop.permute.xlu0 %2793 }
 0x4e6   : > { %v2856_v25 = vpop.permute.xlu1 %2855 }
 0x4e7   : > { %4160 = vrot.lane.b32.xlu0 %v11287_v7, %s15596_s23 }
 0x4e8   : > { %4084 = vrot.lane.b32.xlu1 %v11333_v57, %s15514_s25 }
 0x4e9   : > { %v11461_v45 = vpop.permute.xlu0 %2733 }
 0x4ea   : > { %v11463_v8 = vpop.permute.xlu1 %2795 }
 0x4eb   : > { %3946 = vrot.lane.b32.xlu0 %v11435_v1, %s15628_s24 }
 0x4ec   : > { %3948 = vrot.lane.b32.xlu1 %v11412_v36, %s15628_s24 }
 0x4ed   : > { %v11469_v52 = vpop.permute.xlu0 %2973 }
 0x4ee   : > { %15639 = vst [vmem:[#allocation68_spill] sm:$0xff] %v11469_v52  ;;  %v11471_v17 = vpop.permute.xlu1 %2735 }
 0x4ef   : > { %4120 = vrot.lane.b32.xlu0 %v11333_v57, %s15593_s26 }
 0x4f0   : > { %3912 = vrot.lane.b32.xlu1 %v11412_v36, %s15592_s20 }
 0x4f1   : > { %v11477_v12 = vpop.permute.xlu0 %3093 }
 0x4f2   : > { %v11479_v4 = vpop.permute.xlu1 %2975 }
 0x4f3   : > { %15640 = vst [vmem:[#allocation69_spill] sm:$0xff] %v11479_v4  ;;  %4086 = vrot.lane.b32.xlu0 %v11318_v18, %s15514_s25 }
 0x4f4   : > { %3910 = vrot.lane.b32.xlu1 %v11435_v1, %s15592_s20 }
 0x4f5   : > { %v11485_v34 = vpop.permute.xlu0 %2913 }
 0x4f6   : > { %15641 = vst [vmem:[#allocation70_spill] sm:$0xff] %v11485_v34  ;;  %v11487_v54 = vpop.permute.xlu1 %3095 }
 0x4f7   : > { %4118 = vrot.lane.b32.xlu0 %v11273_v48, %s15593_s26 }
 0x4f8   : > { %4164 = vrot.lane.b32.xlu1 %v11412_v36, %s15596_s23 }
 0x4f9   : > { %v11493_v26 = vpop.permute.xlu0 %3033 }
 0x4fa   : > { %15642 = vst [vmem:[#allocation71_spill] sm:$0xff] %v11493_v26  ;;  %v11495_v13 = vpop.permute.xlu1 %2915 }
 0x4fb   : > { %15643 = vst [vmem:[#allocation72_spill] sm:$0xff] %v11495_v13  ;;  %4082 = vrot.lane.b32.xlu0 %v11273_v48, %s15514_s25  ;;  %v7672_v13 = vld [vmem:[%s15254_s4 + $0x1] ss:$8 sm:$0x3] }
 0x4fc   : > { %4162 = vrot.lane.b32.xlu1 %v11435_v1, %s15596_s23  ;;  %v11524_v61 = vrot.slane %v7672_v13, %v9192_v22 }
 0x4fd   : > { %v11501_v27 = vpop.permute.xlu0 %3153 }
 0x4fe   : > { %15644 = vst [vmem:[#allocation73_spill] sm:$0xff] %v11501_v27  ;;  %v11503_v34 = vpop.permute.xlu1 %3035  ;;  %v7676_v27 = vld [vmem:[%s15254_s4 + $0x6] ss:$8 sm:$0x3] }
 0x4ff   : > { %15645 = vst [vmem:[#allocation74_spill] sm:$0xff] %v11503_v34  ;;  %4126 = vrot.lane.b32.xlu0 %v11435_v1, %s15593_s26  ;;  %v11545_v19 = vrot.slane %v7676_v27, %v9190_v21 }
 0x500   : > { %4050 = vrot.lane.b32.xlu1 %v11318_v18, %s15595_s13  ;;  %v11521_v18 = vrot.slane %v7672_v13, %v9190_v21  ;;  %v2820_v13 = vsel %vm478_vm7, %v11107_v24, %v11194_v6  ;;  %v2825_v24 = vsel %vm478_vm7, %v11180_v10, %v11101_v43 }
 0x501   : > { %v2866_v53 = vpop.permute.xlu0 %2865 }
 0x502   : > { %v11515_v48 = vpop.permute.xlu1 %3155  ;;  %v2877_v37 = vsel %vm516_vm6, %v2854_v47, %v2866_v53  ;;  %v2883_v32 = vsel %vm516_vm6, %v2866_v53, %v2854_v47  ;;  %v2822_v53 = vsel %vm478_vm7, %v11254_v29, %v11339_v3 }
 0x503   : > { %15646 = vst [vmem:[#allocation75_spill] sm:$0xff] %v11515_v48  ;;  %4088 = vrot.lane.b32.xlu0 %v11287_v7, %s15514_s25  ;;  %v11534_v48 = vrot.slane %v2732_v55, %v9192_v22  ;;  %v11548_v7 = vrot.slane %v7676_v27, %v9192_v22  ;;  %v7675_v55 = vld [vmem:[%s15254_s4 + $0x5] ss:$8 sm:$0x3]  ;;  %v2821_v27 = vsel %vm478_vm7, %v11248_v35, %v11326_v41 }
 0x504   : > { %4128 = vrot.lane.b32.xlu1 %v11412_v36, %s15593_s26  ;;  %v2900_v52 = vmul.f32 %v11167_v40, %v2883_v32  ;;  %v2901_v34 = vmul.f32 %v11170_v31, %v2877_v37  ;;  %v11580_v6 = vrot.slane %v7675_v55, %v9190_v21  ;;  %v2828_v37 = vsel %vm478_vm7, %v11339_v3, %v11254_v29 }
 0x505   : > { %v2806_v47 = vpop.permute.xlu0 %2805  ;;  %v2819_v32 = vsel %vm478_vm7, %v11101_v43, %v11180_v10  ;;  %v2846_v29 = vmul.f32 %v11521_v18, %v2826_v46  ;;  %v2849_v43 = vmul.f32 %v11524_v61, %v2821_v27  ;;  %v2844_v10 = vmul.f32 %v11521_v18, %v2825_v24 }
 0x506   : > { %v2868_v38 = vpop.permute.xlu1 %2867  ;;  %v2850_v46 = vmul.f32 %v11521_v18, %v2828_v37 }
 0x507   : > { %v2878_v63 = vsel %vm516_vm6, %v2856_v25, %v2868_v38  ;;  %v2884_v23 = vsel %vm516_vm6, %v2868_v38, %v2856_v25  ;;  %4048 = vrot.lane.b32.xlu0 %v11333_v57, %s15595_s13  ;;  %v2765_v38 = vsel %vm440_vm8, %v11196_v51, %v11109_v30  ;;  %v2827_v57 = vsel %vm478_vm7, %v11326_v41, %v11248_v35 }
 0x508   : > { %v2902_v26 = vmul.f32 %v11167_v40, %v2884_v23  ;;  %v2903_v4 = vmul.f32 %v11170_v31, %v2878_v63  ;;  %4092 = vrot.lane.b32.xlu1 %v11412_v36, %s15514_s25  ;;  %v2851_v23 = vmul.f32 %v11524_v61, %v2822_v53  ;;  %v2847_v53 = vmul.f32 %v11524_v61, %v2820_v13 }
 0x509   : > { %v11597_v25 = vpop.permute.xlu0 %2745  ;;  %v2766_v41 = vsel %vm440_vm8, %v11202_v49, %v11117_v60  ;;  %v2760_v35 = vsel %vm440_vm8, %v11117_v60, %v11202_v49  ;;  %v3220_v24 = vpack.c.bf16 %v2846_v29, %v2844_v10  ;;  %v3060_v60 = vsel %vm630_vm12, %v11143_v16, %v11230_v5 }
 0x50a   : > { %v3224_v63 = vpack.c.bf16 %v2902_v26, %v2900_v52  ;;  %v2808_v40 = vpop.permute.xlu1 %2807  ;;  %v3225_v3 = vpack.c.bf16 %v2903_v4, %v2901_v34  ;;  %v2759_v26 = vsel %vm440_vm8, %v11109_v30, %v11196_v51  ;;  %v11612_v4 = vrot.slane %v7675_v55, %v9192_v22 }
 0x50b   : > { %v2845_v34 = vmul.f32 %v11524_v61, %v2819_v32  ;;  %4054 = vrot.lane.b32.xlu0 %v11435_v1, %s15595_s13  ;;  %v3223_v30 = vpack.c.bf16 %v2851_v23, %v2849_v43  ;;  %v11625_v51 = vmul.f32 %v11531_v62, %v2765_v38  ;;  %v2848_v52 = vmul.f32 %v11521_v18, %v2827_v57 }
 0x50c   : > { %3476 = vmatprep.subr.bf16.mxu0 %v3225_v3  ;;  %4090 = vrot.lane.b32.xlu1 %v11435_v1, %s15514_s25  ;;  %v2818_v13 = vsel %vm478_vm7, %v11463_v8, %v2808_v40  ;;  %v11640_v37 = vmul.f32 %v11534_v48, %v2759_v26  ;;  %v11647_v57 = vmul.f32 %v11531_v62, %v2766_v41 }
 0x50d   : > { %3477 = vmatpush1.bf16.msra.mxu0 %v3224_v63  ;;  %v11635_v55 = vpop.permute.xlu0 %2985  ;;  %v3221_v49 = vpack.c.bf16 %v2847_v53, %v2845_v34  ;;  %v3222_v23 = vpack.c.bf16 %v2850_v46, %v2848_v52  ;;  %v2817_v32 = vsel %vm478_vm7, %v11455_v56, %v2806_v47  ;;  %v2824_v38 = vsel %vm478_vm7, %v2808_v40, %v11463_v8 }
 0x50e   : > { %v11637_v27 = vpop.permute.xlu1 %2747  ;;  %3478 = vmatprep.subr.bf16.mxu0 %v3223_v30  ;;  %v11656_v63 = vmul.f32 %v11534_v48, %v2760_v35  ;;  %v3066_v3 = vsel %vm630_vm12, %v11230_v5, %v11143_v16  ;;  %v2762_v29 = vsel %vm440_vm8, %v11262_v42, %v11351_v28  ;;  %v2843_v53 = vmul.f32 %v11524_v61, %v2818_v13 }
 0x50f   : > { %v3059_v40 = vsel %vm630_vm12, %v11137_v58, %v11224_v59  ;;  %v3065_v16 = vsel %vm630_vm12, %v11224_v59, %v11137_v58  ;;  %v11678_v5 = vmul.f32 %v11545_v19, %v3060_v60  ;;  %v2823_v8 = vsel %vm478_vm7, %v2806_v47, %v11455_v56 }
 0x510   : > { %4056 = vrot.lane.b32.xlu1 %v11412_v36, %s15595_s13  ;;  %v2761_v10 = vsel %vm440_vm8, %v11256_v33, %v11341_v2  ;;  %v2768_v58 = vsel %vm440_vm8, %v11351_v28, %v11262_v42  ;;  %v2841_v59 = vmul.f32 %v11524_v61, %v2817_v32  ;;  %v2842_v26 = vmul.f32 %v11521_v18, %v2824_v38 }
 0x511   : > { %3479 = vmatpush1.bf16.msra.mxu0 %v3222_v23  ;;  %v3106_v43 = vpop.permute.xlu0 %3105  ;;  %v11696_v56 = vmul.f32 %v11548_v7, %v3066_v3  ;;  %v2767_v47 = vsel %vm440_vm8, %v11341_v2, %v11256_v33  ;;  %v2791_v46 = vmul.f32 %v11534_v48, %v2762_v29  ;;  %v3068_v42 = vsel %vm630_vm12, %v11419_v44, %v11293_v14 }
 0x512   : > { %v11683_v36 = vpop.permute.xlu1 %2987  ;;  %3480 = vmatprep.subr.bf16.mxu0 %v3221_v49  ;;  %v2840_v61 = vmul.f32 %v11521_v18, %v2823_v8  ;;  %v3117_v28 = vsel %vm668_vm11, %v11477_v12, %v3106_v43  ;;  %v3123_v34 = vsel %vm668_vm11, %v3106_v43, %v11477_v12  ;;  %v3219_v41 = vpack.c.bf16 %v2843_v53, %v2841_v59 }
 0x513   : > { %v2789_v33 = vmul.f32 %v11534_v48, %v2761_v10  ;;  %v2790_v2 = vmul.f32 %v11531_v62, %v2768_v58  ;;  %v3067_v30 = vsel %vm630_vm12, %v11402_v50, %v11282_v15  ;;  %v3062_v18 = vsel %vm630_vm12, %v11293_v14, %v11419_v44 }
 0x514   : > { %v3091_v12 = vmul.f32 %v11548_v7, %v3068_v42  ;;  %v3218_v13 = vpack.c.bf16 %v2842_v26, %v2840_v61  ;;  %v3140_v23 = vmul.f32 %v11365_v0, %v3117_v28  ;;  %v3141_v14 = vmul.f32 %v11368_v9, %v3123_v34  ;;  %v15647_v42 = vld [vmem:[#allocation69_spill] sm:$0xff]  ;;  %v15648_v28 = vld [vmem:[#allocation71_spill] sm:$0xff] }
 0x515   : > { %3481 = vmatpush1.bf16.msra.mxu0 %v3220_v24  ;;  %v11724_v35 = vpop.permute.xlu0 %2925  ;;  %v2788_v32 = vmul.f32 %v11531_v62, %v2767_v47  ;;  %v3061_v38 = vsel %vm630_vm12, %v11282_v15, %v11402_v50  ;;  %v3089_v3 = vmul.f32 %v11548_v7, %v3067_v30  ;;  %v3217_v29 = vpack.c.bf16 %v2791_v46, %v2789_v33 }
 0x516   : > { %v3108_v52 = vpop.permute.xlu1 %3107  ;;  %3482 = vmatprep.subr.bf16.mxu0 %v3219_v41  ;;  %v2758_v53 = vsel %vm440_vm8, %v11471_v17, %v11637_v27  ;;  %v3214_v10 = vpack.c.bf16 %v11647_v57, %v11625_v51  ;;  %v3084_v15 = vmul.f32 %v11545_v19, %v3059_v40  ;;  %v3085_v50 = vmul.f32 %v11548_v7, %v3065_v16  ;;  %v15649_v41 = vld [vmem:[#allocation74_spill] sm:$0xff] }
 0x517   : > { %v3118_v60 = vsel %vm668_vm11, %v11487_v54, %v3108_v52  ;;  %v3124_v49 = vsel %vm668_vm11, %v3108_v52, %v11487_v54  ;;  %v3090_v54 = vmul.f32 %v11545_v19, %v3062_v18  ;;  %v3215_v58 = vpack.c.bf16 %v11656_v63, %v11640_v37  ;;  %v15652_v52 = vld [vmem:[#allocation65_spill] sm:$0xff] }
 0x518   : > { %v3142_v44 = vmul.f32 %v11365_v0, %v3118_v60  ;;  %v3143_v24 = vmul.f32 %v11368_v9, %v3124_v49  ;;  %v3216_v59 = vpack.c.bf16 %v2790_v2, %v2788_v32  ;;  %v3088_v26 = vmul.f32 %v11545_v19, %v3061_v38  ;;  %v15650_v2 = vld [vmem:[#allocation68_spill] sm:$0xff] }
 0x519   : > { %3483 = vmatpush1.bf16.msra.mxu0 %v3218_v13  ;;  %v3046_v9 = vpop.permute.xlu0 %3045  ;;  %v2757_v47 = vsel %vm440_vm8, %v11461_v45, %v11597_v25  ;;  %v3253_v46 = vpack.c.bf16 %v3091_v12, %v3089_v3  ;;  %v3250_v51 = vpack.c.bf16 %v11678_v5, %v3084_v15  ;;  %v2764_v57 = vsel %vm440_vm8, %v11637_v27, %v11471_v17 }
 0x51a   : > { %v3254_v0 = vpack.c.bf16 %v3142_v44, %v3140_v23  ;;  %v11748_v8 = vpop.permute.xlu1 %2927  ;;  %v3255_v43 = vpack.c.bf16 %v3143_v24, %v3141_v14  ;;  %3484 = vmatprep.subr.bf16.mxu0 %v3217_v29  ;;  %v2783_v40 = vmul.f32 %v11534_v48, %v2758_v53  ;;  %v3251_v37 = vpack.c.bf16 %v11696_v56, %v3085_v50 }
 0x51b   : > { %v3252_v63 = vpack.c.bf16 %v3090_v54, %v3088_v26  ;;  %v3007_v16 = vsel %vm592_vm2, %v11429_v11, %v11303_v39  ;;  %v3004_v5 = vsel %vm592_vm2, %v11683_v36, %v15647_v42  ;;  %v2763_v27 = vsel %vm440_vm8, %v11597_v25, %v11461_v45  ;;  %v15651_v25 = vld [vmem:[#allocation48_spill] sm:$0xff] }
 0x51c   : > { %3591 = vmatprep.subr.bf16.mxu1 %v3255_v43  ;;  %v2781_v56 = vmul.f32 %v11534_v48, %v2757_v47  ;;  %v3063_v34 = vsel %vm630_vm12, %v3046_v9, %v15648_v28  ;;  %v3003_v30 = vsel %vm592_vm2, %v11635_v55, %v15650_v2  ;;  %v2782_v18 = vmul.f32 %v11531_v62, %v2764_v57  ;;  %v15655_v47 = vld [vmem:[#allocation34_spill] sm:$0xff] }
 0x51d   : > { %3592 = vmatpush1.bf16.msra.mxu1 %v3254_v0  ;;  %3485 = vmatpush1.bf16.msra.mxu0 %v3216_v59  ;;  %v11776_v61 = vpop.permute.xlu0 %3165  ;;  %v3008_v12 = vsel %vm592_vm2, %v15652_v52, %v15651_v25  ;;  %v2998_v13 = vsel %vm592_vm2, %v15647_v42, %v11683_v36  ;;  %v3023_v60 = vmul.f32 %v11612_v4, %v3004_v5  ;;  %v15653_v0 = vld [vmem:[#allocation32_spill] sm:$0xff]  ;;  %v15657_v5 = vld [vmem:[#allocation25_spill] sm:$0xff] }
 0x51e   : > { %3593 = vmatprep.subr.bf16.mxu1 %v3253_v46  ;;  %v3048_v17 = vpop.permute.xlu1 %3047  ;;  %3486 = vmatprep.subr.bf16.mxu0 %v3215_v58  ;;  %v3213_v49 = vpack.c.bf16 %v2783_v40, %v2781_v56  ;;  %v2780_v23 = vmul.f32 %v11531_v62, %v2763_v27  ;;  %v3057_v14 = vsel %vm630_vm12, %v15648_v28, %v3046_v9  ;;  %v15654_v9 = vld [vmem:[#allocation60_spill] sm:$0xff]  ;;  %v15656_v46 = vld [vmem:[#allocation29_spill] sm:$0xff]  ;;  %v15659_v56 = vld [vmem:[#allocation23_spill] sm:$0xff] }
 0x51f   : > { %v3064_v33 = vsel %vm630_vm12, %v3048_v17, %v15649_v41  ;;  %v3058_v48 = vsel %vm630_vm12, %v15649_v41, %v3048_v17  ;;  %v3081_v44 = vmul.f32 %v11548_v7, %v3063_v34  ;;  %v3002_v36 = vsel %vm592_vm2, %v15651_v25, %v15652_v52  ;;  %v15658_v17 = vld [vmem:[#allocation24_spill] sm:$0xff]  ;;  %v15660_v28 = vld [vmem:[#allocation26_spill] sm:$0xff] }
 0x520   : > { %v3083_v45 = vmul.f32 %v11548_v7, %v3064_v33  ;;  %v2997_v62 = vsel %vm592_vm2, %v15650_v2, %v11635_v55  ;;  %v3021_v38 = vmul.f32 %v11612_v4, %v3003_v30  ;;  %v3082_v7 = vmul.f32 %v11545_v19, %v3058_v48 }
 0x521   : > { %3594 = vmatpush1.bf16.msra.mxu1 %v3252_v63  ;;  %3487 = vmatpush1.bf16.msra.mxu0 %v3214_v10  ;;  %v11812_v24 = vpop.permute.xlu0 %4046  ;;  %v3031_v3 = vmul.f32 %v11612_v4, %v3008_v12  ;;  %v3212_v29 = vpack.c.bf16 %v2782_v18, %v2780_v23  ;;  %v3022_v54 = vmul.f32 %v11580_v6, %v2998_v13  ;;  %v15661_v12 = vld [vmem:[#allocation47_spill] sm:$0xff]  ;;  %v15662_v13 = vld [vmem:[#allocation52_spill] sm:$0xff] }
 0x522   : > { %3595 = vmatprep.subr.bf16.mxu1 %v3251_v37  ;;  %v11814_v32 = vpop.permute.xlu1 %3167  ;;  %3488 = vmatprep.subr.bf16.mxu0 %v3213_v49  ;;  %v3249_v53 = vpack.c.bf16 %v3083_v45, %v3081_v44  ;;  %v3006_v43 = vsel %vm592_vm2, %v15654_v9, %v15653_v0  ;;  %v3080_v10 = vmul.f32 %v11545_v19, %v3057_v14  ;;  %v7674_v19 = vld [vmem:[%s15254_s4 + $0x3] ss:$8 sm:$0x3]  ;;  %v7678_v37 = vld [vmem:[%s15254_s4 + $0x10] ss:$8 sm:$0x3] }
 0x523   : > { %v3243_v55 = vpack.c.bf16 %v3023_v60, %v3021_v38  ;;  %v3001_v15 = vsel %vm592_vm2, %v11303_v39, %v11429_v11  ;;  %v3029_v50 = vmul.f32 %v11612_v4, %v3007_v16  ;;  %v3020_v58 = vmul.f32 %v11580_v6, %v2997_v62  ;;  %v15663_v60 = vld [vmem:[#allocation50_spill] sm:$0xff]  ;;  %v15665_v62 = vld [vmem:[#allocation40_spill] sm:$0xff]  ;;  %v15666_v38 = vld [vmem:[#allocation67_spill] sm:$0xff] }
 0x524   : > { %v3030_v39 = vmul.f32 %v11580_v6, %v3002_v36  ;;  %v3248_v11 = vpack.c.bf16 %v3082_v7, %v3080_v10  ;;  %v3000_v57 = vsel %vm592_vm2, %v15653_v0, %v15654_v9  ;;  %v3027_v40 = vmul.f32 %v11612_v4, %v3006_v43  ;;  %v15664_v49 = vld [vmem:[#allocation30_spill] sm:$0xff]  ;;  %v15670_v0 = vld [vmem:[#allocation51_spill] sm:$0xff] }
 0x525   : > { %3596 = vmatpush1.bf16.msra.mxu1 %v3250_v51  ;;  %3489 = vmatpush1.bf16.msra.mxu0 %v3212_v29  ;;  %v11839_v59 = vpop.permute.xlu0 %4010  ;;  %v3005_v51 = vsel %vm592_vm2, %v15656_v46, %v15655_v47  ;;  %v3242_v63 = vpack.c.bf16 %v3022_v54, %v3020_v58  ;;  %v3247_v16 = vpack.c.bf16 %v3031_v3, %v3029_v50  ;;  %v15667_v3 = vld [vmem:[#allocation55_spill] sm:$0xff]  ;;  %v15668_v29 = vld [vmem:[#allocation54_spill] sm:$0xff] }
 0x526   : > { %3597 = vmatprep.subr.bf16.mxu1 %v3249_v53  ;;  %v11841_v26 = vpop.permute.xlu1 %4052  ;;  %3490 = vmatprep.subr.bf16.mxu0 %v3243_v55  ;;  %v3028_v42 = vmul.f32 %v11580_v6, %v3001_v15  ;;  %v3241_v27 = vpack.c.bf16 %v15658_v17, %v15657_v5  ;;  %v3240_v34 = vpack.c.bf16 %v15660_v28, %v15659_v56  ;;  %v15669_v53 = vld [vmem:[#allocation49_spill] sm:$0xff]  ;;  %v15671_v10 = vld [vmem:[#allocation62_spill] sm:$0xff]  ;;  %v15680_v5 = vld [vmem:[#allocation43_spill] sm:$0xff] }
 0x527   : > { %v11865_v41 = vrot.slane %v7674_v19, %v9190_v21  ;;  %v2999_v33 = vsel %vm592_vm2, %v15655_v47, %v15656_v46  ;;  %v3025_v2 = vmul.f32 %v11612_v4, %v3005_v51  ;;  %v11877_v48 = vrot.slane %v7674_v19, %v9192_v22  ;;  %v15672_v55 = vld [vmem:[#allocation57_spill] sm:$0xff]  ;;  %v15681_v17 = vld [vmem:[#allocation27_spill] sm:$0xff] }
 0x528   : > { %v3026_v45 = vmul.f32 %v11580_v6, %v3000_v57  ;;  %v11881_v25 = vrot.slane %v7678_v37, %v9190_v21  ;;  %v3246_v52 = vpack.c.bf16 %v3030_v39, %v3028_v42  ;;  %v2945_v4 = vsel %vm554_vm3, %v15662_v13, %v15661_v12  ;;  %v15673_v51 = vld [vmem:[#allocation41_spill] sm:$0xff]  ;;  %v15674_v39 = vld [vmem:[#allocation66_spill] sm:$0xff] }
 0x529   : > { %3598 = vmatpush1.bf16.msra.mxu1 %v3248_v11  ;;  %3491 = vmatpush2.bf16.msra.mxu0 %v3242_v63  ;;  %v11872_v30 = vpop.permute.xlu0 %3974  ;;  %v2946_v23 = vsel %vm554_vm3, %v15664_v49, %v15663_v60  ;;  %v11892_v14 = vrot.slane %v7678_v37, %v9192_v22  ;;  %v3245_v44 = vpack.c.bf16 %v3027_v40, %v3025_v2  ;;  %v15675_v57 = vld [vmem:[#allocation45_spill] sm:$0xff]  ;;  %v15676_v40 = vld [vmem:[#allocation42_spill] sm:$0xff]  ;;  %v15678_v63 = vld [vmem:[#allocation31_spill] sm:$0xff] }
 0x52a   : > { %3599 = vmatprep.subr.bf16.mxu1 %v3247_v16  ;;  %v11874_v18 = vpop.permute.xlu1 %4016  ;;  %3492 = vmatprep.subr.bf16.mxu0 %v3241_v27  ;;  %v3024_v36 = vmul.f32 %v11580_v6, %v2999_v33  ;;  %v3188_v7 = vsel %vm706_vm9, %v15666_v38, %v15665_v62  ;;  %v3237_v54 = vpack.c.bf16 %v15668_v29, %v15667_v3  ;;  %v15679_v16 = vld [vmem:[#allocation28_spill] sm:$0xff] }
 0x52b   : > { %v3236_v9 = vpack.c.bf16 %v15670_v0, %v15669_v53  ;;  %v2939_v43 = vsel %vm554_vm3, %v15661_v12, %v15662_v13  ;;  %v2940_v6 = vsel %vm554_vm3, %v15663_v60, %v15664_v49  ;;  %v2942_v15 = vsel %vm554_vm3, %v15672_v55, %v15671_v10  ;;  %v15683_v12 = vld [vmem:[#allocation58_spill] sm:$0xff] }
 0x52c   : > { %v11920_v19 = vmul.f32 %v11865_v41, %v2945_v4  ;;  %v11923_v47 = vmul.f32 %v11865_v41, %v2946_v23  ;;  %v3244_v46 = vpack.c.bf16 %v3026_v45, %v3024_v36  ;;  %v3187_v11 = vsel %vm706_vm9, %v15674_v39, %v15673_v51  ;;  %v15684_v49 = vld [vmem:[#allocation46_spill] sm:$0xff]  ;;  %v15685_v23 = vld [vmem:[#allocation44_spill] sm:$0xff] }
 0x52d   : > { %3600 = vmatpush1.bf16.msra.mxu1 %v3246_v52  ;;  %3493 = vmatpush2.bf16.msra.mxu0 %v3240_v34  ;;  %v11915_v50 = vpop.permute.xlu0 %3938  ;;  %v15677_v37 = vpack.c.bf16 %v15675_v57, %v15676_v40  ;;  %v3186_v42 = vsel %vm706_vm9, %v15679_v16, %v15678_v63  ;;  %v2941_v27 = vsel %vm554_vm3, %v15681_v17, %v15680_v5  ;;  %v15682_v52 = vld [vmem:[#allocation33_spill] sm:$0xff] }
 0x52e   : > { %3601 = vmatprep.subr.bf16.mxu1 %v3245_v44  ;;  %v11917_v58 = vpop.permute.xlu1 %3944  ;;  %v3182_v56 = vsel %vm706_vm9, %v15665_v62, %v15666_v38  ;;  %v3211_v28 = vmul.f32 %v11892_v14, %v3188_v7  ;;  %v2965_v34 = vmul.f32 %v11877_v48, %v2939_v43  ;;  %v2967_v33 = vmul.f32 %v11877_v48, %v2940_v6  ;;  %v15687_v38 = vld [vmem:[#allocation56_spill] sm:$0xff] }
 0x52f   : > { %3494 = vmatprep.subr.bf16.mxu0 %v15677_v37  ;;  %v2948_v2 = vsel %vm554_vm3, %v15671_v10, %v15672_v55  ;;  %v2971_v45 = vmul.f32 %v11877_v48, %v2942_v15  ;;  %v3185_v13 = vsel %vm706_vm9, %v15683_v12, %v15682_v52  ;;  %v3181_v4 = vsel %vm706_vm9, %v15673_v51, %v15674_v39  ;;  %v15689_v39 = vld [vmem:[#allocation72_spill] sm:$0xff] }
 0x530   : > { %v3209_v60 = vmul.f32 %v11892_v14, %v3187_v11  ;;  %v15686_v44 = vpack.c.bf16 %v15684_v49, %v15685_v23  ;;  %v3207_v7 = vmul.f32 %v11892_v14, %v3186_v42  ;;  %v2947_v3 = vsel %vm554_vm3, %v15680_v5, %v15681_v17 }
 0x531   : > { %3602 = vmatpush1.bf16.msra.mxu1 %v3244_v46  ;;  %v11964_v36 = vpop.permute.xlu0 %3902  ;;  %v2969_v29 = vmul.f32 %v11877_v48, %v2941_v27  ;;  %v3210_v53 = vmul.f32 %v11881_v25, %v3182_v56  ;;  %v3232_v0 = vpack.c.bf16 %v11923_v47, %v11920_v19  ;;  %v3180_v43 = vsel %vm706_vm9, %v15678_v63, %v15679_v16  ;;  %v15688_v46 = vld [vmem:[#allocation75_spill] sm:$0xff]  ;;  %v15690_v16 = vld [vmem:[#allocation73_spill] sm:$0xff]  ;;  %v15691_v27 = vld [vmem:[#allocation70_spill] sm:$0xff] }
 0x532   : > { %3495 = vmatpush2.bf16.msra.mxu0 %v15686_v44  ;;  %v11966_v62 = vpop.permute.xlu1 %4014  ;;  %3611 = vmatprep.subr.bf16.mxu1 %v15687_v38  ;;  %v2970_v6 = vmul.f32 %v11865_v41, %v2948_v2  ;;  %v3265_v10 = vpack.c.bf16 %v3211_v28, %v3209_v60  ;;  %v3205_v55 = vmul.f32 %v11892_v14, %v3185_v13  ;;  %v15693_v60 = vld [vmem:[#allocation37_spill] sm:$0xff] }
 0x533   : > { %3496 = vmatprep.subr.bf16.mxu0 %v3237_v54  ;;  %v3208_v15 = vmul.f32 %v11881_v25, %v3181_v4  ;;  %v3184_v54 = vsel %vm706_vm9, %v11814_v32, %v15688_v46  ;;  %v3235_v19 = vpack.c.bf16 %v2971_v45, %v2969_v29  ;;  %v3179_v47 = vsel %vm706_vm9, %v15682_v52, %v15683_v12  ;;  %v7723_v12 = vld [vmem:[%s15252_s2 + $0x5] ss:$8 sm:$0x3]  ;;  %v15692_v4 = vld [vmem:[#allocation64_spill] sm:$0xff] }
 0x534   : > { %v2968_v51 = vmul.f32 %v11865_v41, %v2947_v3  ;;  %v2938_v11 = vsel %vm554_vm3, %v15689_v39, %v11748_v8  ;;  %v3206_v37 = vmul.f32 %v11881_v25, %v3180_v43  ;;  %v3183_v42 = vsel %vm706_vm9, %v11776_v61, %v15690_v16  ;;  %v15695_v29 = vld [vmem:[#allocation36_spill] sm:$0xff] }
 0x535   : > { %3612 = vmatpush2.bf16.msra.mxu1 %v15687_v38  ;;  %v11999_v57 = vpop.permute.xlu0 %3980  ;;  %v3264_v63 = vpack.c.bf16 %v3210_v53, %v3208_v15  ;;  %v3263_v5 = vpack.c.bf16 %v3207_v7, %v3205_v55  ;;  %v3178_v56 = vsel %vm706_vm9, %v15688_v46, %v11814_v32  ;;  %v3203_v28 = vmul.f32 %v11892_v14, %v3184_v54 }
 0x536   : > { %3497 = vmatpush2.bf16.msra.mxu0 %v3236_v9  ;;  %3613 = vmatprep.subr.bf16.mxu1 %v3265_v10  ;;  %v12001_v40 = vpop.permute.xlu1 %3976  ;;  %v3234_v17 = vpack.c.bf16 %v2970_v6, %v2968_v51  ;;  %v2937_v9 = vsel %vm554_vm3, %v15691_v27, %v11724_v35  ;;  %v3204_v2 = vmul.f32 %v11881_v25, %v3179_v47 }
 0x537   : > { %3498 = vmatprep.subr.bf16.mxu0 %v3235_v19  ;;  %v2944_v45 = vsel %vm554_vm3, %v11748_v8, %v15689_v39  ;;  %v2963_v52 = vmul.f32 %v11877_v48, %v2938_v11  ;;  %v3233_v13 = vpack.c.bf16 %v2967_v33, %v2965_v34  ;;  %v2882_v32 = vsel %vm516_vm6, %v15693_v60, %v15692_v4 }
 0x538   : > { %v3177_v49 = vsel %vm706_vm9, %v15690_v16, %v11776_v61  ;;  %v3201_v8 = vmul.f32 %v11892_v14, %v3183_v42  ;;  %v3262_v7 = vpack.c.bf16 %v3206_v37, %v3204_v2  ;;  %v2943_v34 = vsel %vm554_vm3, %v11724_v35, %v15691_v27  ;;  %v15694_v61 = vld [vmem:[#allocation63_spill] sm:$0xff]  ;;  %v8064_v42 = vld [vmem:[%s15253_s3 + $0x2c] ss:$16 sps:$4 sm:$0xff]  }
 0x539   : > { %3614 = vmatpush2.bf16.msra.mxu1 %v3264_v63  ;;  %v12035_v23 = vpop.permute.xlu0 %3908  ;;  %v2961_v33 = vmul.f32 %v11877_v48, %v2937_v9  ;;  %v3202_v3 = vmul.f32 %v11881_v25, %v3178_v56  ;;  %v2881_v14 = vsel %vm516_vm6, %v15695_v29, %v15694_v61  ;;  %v2962_v53 = vmul.f32 %v11865_v41, %v2944_v45 }
 0x53a   : > { %3499 = vmatpush2.bf16.msra.mxu0 %v3234_v17  ;;  %3615 = vmatprep.subr.bf16.mxu1 %v3263_v5  ;;  %v12037_v44 = vpop.permute.xlu1 %3942  ;;  %v12051_v43 = vrot.slane %v7723_v12, %v9192_v22  ;;  %v3261_v6 = vpack.c.bf16 %v3203_v28, %v3201_v8  ;;  %v2888_v35 = vsel %vm516_vm6, %v15692_v4, %v15693_v60  ;;  %v8061_v28 = vld [vmem:[%s15253_s3] ss:$16 sps:$4 sm:$0xff]   ;;  %v8066_v60 = vld [vmem:[%s15253_s3 + $0x28] ss:$16 sps:$4 sm:$0xff]   ;;  %v8070_v8 = vld [vmem:[%s15253_s3 + $0x4c] ss:$16 sps:$4 sm:$0xff]  }
 0x53b   : > { %3500 = vmatprep.subr.bf16.mxu0 %v3233_v13  ;;  %v2911_v48 = vmul.f32 %v11170_v31, %v2882_v32  ;;  %v3200_v10 = vmul.f32 %v11881_v25, %v3177_v49  ;;  %v3231_v55 = vpack.c.bf16 %v2963_v52, %v2961_v33  ;;  %v2960_v15 = vmul.f32 %v11865_v41, %v2943_v34  ;;  %v15696_v41 = vld [vmem:[#allocation53_spill] sm:$0xff]  ;;  %v15699_v13 = vld [vmem:[#allocation35_spill] sm:$0xff]  ;;  %v15700_v32 = vld [vmem:[#allocation38_spill] sm:$0xff] }
 0x53c   : > { %v4061_v46 = vsel %vm592_vm2, %v11841_v26, %v11812_v24  ;;  %v2887_v25 = vsel %vm516_vm6, %v15694_v61, %v15695_v29  ;;  %v2909_v47 = vmul.f32 %v11170_v31, %v2881_v14  ;;  %v2910_v39 = vmul.f32 %v15696_v41, %v2888_v35  ;;  %v8067_v52 = vld [vmem:[%s15253_s3 + $0x24] ss:$16 sps:$4 sm:$0xff]   ;;  %v7721_v35 = vld [vmem:[%s15252_s2 + $0x2] ss:$8 sm:$0x3] }
 0x53d   : > { %3616 = vmatpush2.bf16.msra.mxu1 %v3262_v7  ;;  %v12064_v54 = vpop.permute.xlu0 %4012  ;;  %v3260_v51 = vpack.c.bf16 %v3202_v3, %v3200_v10  ;;  %v3230_v11 = vpack.c.bf16 %v2962_v53, %v2960_v15  ;;  %v12075_v37 = vrot.slane %v7723_v12, %v9190_v21  ;;  %v4058_v63 = vsel %vm592_vm2, %v11812_v24, %v11841_v26  ;;  %v15697_v24 = vld [vmem:[#allocation61_spill] sm:$0xff]  ;;  %v15701_v33 = vld [vmem:[#allocation59_spill] sm:$0xff]  ;;  %v8076_v15 = vld [vmem:[%s15253_s3 + $0x6c] ss:$16 sps:$4 sm:$0xff]  }
 0x53e   : > { %3501 = vmatpush2.bf16.msra.mxu0 %v3232_v0  ;;  %3617 = vmatprep.subr.bf16.mxu1 %v3261_v6  ;;  %v12066_v19 = vpop.permute.xlu1 %3904  ;;  %v8058_v0 = vld [vmem:[%s15253_s3 + $0x8] ss:$16 sps:$4 sm:$0xff]   ;;  %v4076_v16 = vmul.f32 %v12051_v43, %v4061_v46  ;;  %v3229_v31 = vpack.c.bf16 %v2911_v48, %v2909_v47  ;;  %v2908_v5 = vmul.f32 %v15696_v41, %v2887_v25  ;;  %v15702_v3 = vld [vmem:[#allocation39_spill] sm:$0xff] }
 0x53f   : > { %3502 = vmatprep.subr.bf16.mxu0 %v3231_v55  ;;  %v4075_v56 = vmul.f32 %v12075_v37, %v4058_v63  ;;  %v4202_v49 = vpack.c.bf16 %v11435_v1, %v15700_v32  ;;  %v4201_v61 = vpack.c.bf16 %v15702_v3, %v15701_v33  ;;  %v8069_v1 = vld [vmem:[%s15253_s3 + $0x20] ss:$16 sps:$4 sm:$0xff]   ;;  %v8073_v53 = vld [vmem:[%s15253_s3 + $0x44] ss:$16 sps:$4 sm:$0xff]   ;;  %v8072_v48 = vld [vmem:[%s15253_s3 + $0x48] ss:$16 sps:$4 sm:$0xff]   ;;  %v3986_v32 = vsel %vm516_vm6, %v11872_v30, %v11999_v57 }
 0x540   : > { %v3228_v9 = vpack.c.bf16 %v2910_v39, %v2908_v5  ;;  %v7736_v26 = vpack.c.bf16 %v4076_v16, %v15697_v24  ;;  %v7722_v6 = vld [vmem:[%s15252_s2 + $0x3] ss:$8 sm:$0x3]  ;;  %v4000_v39 = vrot.slane %v7721_v35, %v9192_v22  ;;  %v3996_v24 = vrot.slane %v7721_v35, %v9190_v21 }
 0x541   : > { %3618 = vmatpush2.bf16.msra.mxu1 %v3260_v51  ;;  %v3979_v17 = vpop.permute.xlu0 %3978  ;;  %v7739_v4 = vpack.c.bf16 %v4075_v56, %v15699_v13  ;;  %v4032_v46 = vrot.slane %v7722_v6, %v9190_v21  ;;  %v4036_v25 = vrot.slane %v7722_v6, %v9192_v22  ;;  %v8075_v56 = vld [vmem:[%s15253_s3 + $0x40] ss:$16 sps:$4 sm:$0xff]   ;;  %v4025_v13 = vsel %vm554_vm3, %v11874_v18, %v11839_v59 }
 0x542   : > { %3503 = vmatpush2.bf16.msra.mxu0 %v3230_v11  ;;  %v12089_v27 = vpop.permute.xlu1 %4156  ;;  %v8081_v35 = vld [vmem:[%s15253_s3 + $0x60] ss:$16 sps:$4 sm:$0xff]  }
 0x543   : > { %3504 = vmatprep.subr.bf16.mxu0 %v3229_v31  ;;  %v4039_v33 = vmul.f32 %v4032_v46, %v4025_v13 }
 0x544   : > { %3620 = vmatmul.mubr.bf16.vlgmr.msra.gmra.mxu1 %v8058_v0 }
 0x545   : > { %7712 = vmatprep.mubr.msk.bf16.mxu1 %vm1723_vm13, %v8064_v42  ;;  %v12097_v2 = vpop.permute.xlu0 %3940 }
 0x546   : > { %3505 = vmatpush2.bf16.msra.mxu0 %v3228_v9  ;;  %v4021_v45 = vpop.permute.xlu1 %4020 }
 0x547   : > { %7737 = vmatprep.subr.msk.bf16.mxu0 %vm9242_vm5, %v7736_v26  ;;  %v4024_v10 = vsel %vm554_vm3, %v11966_v62, %v4021_v45  ;;  %v4027_v55 = vsel %vm554_vm3, %v4021_v45, %v11966_v62  ;;  %v4022_v62 = vsel %vm554_vm3, %v11839_v59, %v11874_v18  ;;  %v3989_v59 = vsel %vm516_vm6, %v11999_v57, %v11872_v30 }
 0x548   : > { %v4043_v63 = vmul.f32 %v4032_v46, %v4027_v55  ;;  %v4044_v16 = vmul.f32 %v4036_v25, %v4024_v10  ;;  %v4004_v30 = vmul.f32 %v4000_v39, %v3986_v32  ;;  %v4003_v57 = vmul.f32 %v3996_v24, %v3989_v59 }
 0x549   : > { %3507 = vmatmul.mubr.bf16.vlgmr.msra.gmra.mxu0 %v8061_v28  ;;  %v12115_v7 = vpop.permute.xlu0 %3906  ;;  %v3953_v55 = vsel %vm478_vm7, %v11917_v58, %v11915_v50  ;;  %v3914_v32 = vsel %vm440_vm8, %v11964_v36, %v12035_v23 }
 0x54a   : > { %7740 = vmatpush1.bf16.msk.msra.mxu0 %vm9242_vm5, %v7739_v4  ;;  %v3985_v34 = vpop.permute.xlu1 %3984  ;;  %3516 = vmatprep.mubr.bf16.mxu0 %v8067_v52  ;;  %v4040_v4 = vmul.f32 %v4036_v25, %v4022_v62 }
 0x54b   : > { %4281 = vmatprep.subr.bf16.mxu0 %v4202_v49  ;;  %v3988_v47 = vsel %vm516_vm6, %v3979_v17, %v3985_v34  ;;  %v3991_v5 = vsel %vm516_vm6, %v3985_v34, %v3979_v17  ;;  %v8079_v17 = vld [vmem:[%s15253_s3 + $0x64] ss:$16 sps:$4 sm:$0xff]  }
 0x54c   : > { %3630 = vmatmul.mubr.bf16.gmra.mxu1 %v8066_v60  ;;  %v4008_v9 = vmul.f32 %v4000_v39, %v3988_v47  ;;  %v4007_v49 = vmul.f32 %v3996_v24, %v3991_v5  ;;  %v8084_v5 = vld [vmem:[%s15253_s3 + $0x88] ss:$16 sps:$4 sm:$0xff]  }
 0x54d   : > { %7713 = vmatprep.mubr.msk.bf16.mxu1 %vm1723_vm13, %v8070_v8  ;;  %v12123_v29 = vpop.permute.xlu0 %4158  ;;  %v8078_v8 = vld [vmem:[%s15253_s3 + $0x68] ss:$16 sps:$4 sm:$0xff]  }
 0x54e   : > { %4282 = vmatpush1.bf16.msra.mxu0 %v4201_v61  ;;  %v3983_v14 = vpop.permute.xlu1 %3982  ;;  %v4198_v34 = vpack.c.bf16 %v4040_v4, %v4008_v9 }
 0x54f   : > { %v3990_v60 = vsel %vm516_vm6, %v3983_v14, %v12001_v40 }
 0x550   : > { %v4005_v3 = vmul.f32 %v3996_v24, %v3990_v60 }
 0x551   : > { %3517 = vmatmul.mubr.bf16.gmra.mxu0 %v8069_v1  ;;  %v4019_v41 = vpop.permute.xlu0 %4018 }
 0x552   : > { %v12150_v51 = vpop.permute.xlu1 %4122  ;;  %3526 = vmatprep.mubr.bf16.mxu0 %v8073_v53  ;;  %v4023_v11 = vsel %vm554_vm3, %v12064_v54, %v4019_v41  ;;  %v4026_v0 = vsel %vm554_vm3, %v4019_v41, %v12064_v54  ;;  %v3987_v54 = vsel %vm516_vm6, %v12001_v40, %v3983_v14  ;;  %v8082_v40 = vld [vmem:[%s15253_s3 + $0x8c] ss:$16 sps:$4 sm:$0xff]   ;;  %v7720_v14 = vld [vmem:[%s15252_s2 + $0x1] ss:$8 sm:$0x3]  ;;  %v4197_v53 = vpack.c.bf16 %v4039_v33, %v4007_v49 }
 0x553   : > { %v4041_v31 = vmul.f32 %v4032_v46, %v4026_v0  ;;  %v4042_v42 = vmul.f32 %v4036_v25, %v4023_v11  ;;  %v4006_v18 = vmul.f32 %v4000_v39, %v3987_v54  ;;  %v3964_v10 = vrot.slane %v7720_v14, %v9192_v22  ;;  %v8085_v41 = vld [vmem:[%s15253_s3 + $0x84] ss:$16 sps:$4 sm:$0xff]  }
 0x554   : > { %3640 = vmatmul.mubr.bf16.gmra.mxu1 %v8072_v48  ;;  %v3960_v48 = vrot.slane %v7720_v14, %v9190_v21  ;;  %v4195_v46 = vpack.c.bf16 %v4005_v3, %v4003_v57  ;;  %v3917_v49 = vsel %vm440_vm8, %v12035_v23, %v11964_v36  ;;  %v8091_v36 = vld [vmem:[%s15253_s3 + $0xa4] ss:$16 sps:$4 sm:$0xff]  }
 0x555   : > { %7714 = vmatprep.mubr.msk.bf16.mxu1 %vm1723_vm13, %v8076_v15  ;;  %v4199_v26 = vpack.c.bf16 %v4043_v63, %v4041_v31  ;;  %v12175_v45 = vpop.permute.xlu0 %4154  ;;  %v4200_v52 = vpack.c.bf16 %v4044_v16, %v4042_v42  ;;  %v4196_v6 = vpack.c.bf16 %v4006_v18, %v4004_v30  ;;  %v3901_v15 = vld [vmem:[%s15252_s2] ss:$8 sm:$0x3] }
 0x556   : > { %v12173_v28 = vpop.permute.xlu1 %4124  ;;  %v3924_v9 = vrot.slane %v3901_v15, %v9190_v21 }
 0x557   : > { %4283 = vmatprep.subr.bf16.mxu0 %v4200_v52 }
 0x558   : > { %4284 = vmatpush1.bf16.msra.mxu0 %v4199_v26  ;;  %v3931_v3 = vmul.f32 %v3924_v9, %v3917_v49  ;;  %v8099_v49 = vld [vmem:[%s15253_s3 + $0xc0] ss:$16 sps:$4 sm:$0xff]  }
 0x559   : > { %3527 = vmatmul.mubr.bf16.gmra.mxu0 %v8075_v56  ;;  %v12203_v1 = vpop.permute.xlu0 %4160  ;;  %4285 = vmatprep.subr.bf16.mxu0 %v4198_v34  ;;  %v3928_v56 = vrot.slane %v3901_v15, %v9192_v22 }
 0x55a   : > { %v12201_v61 = vpop.permute.xlu1 %4084  ;;  %3536 = vmatprep.mubr.bf16.mxu0 %v8079_v17  ;;  %v3967_v17 = vmul.f32 %v3960_v48, %v3953_v55 }
 0x55b   : > { %v3932_v14 = vmul.f32 %v3928_v56, %v3914_v32 }
 0x55c   : > { %3650 = vmatmul.mubr.bf16.gmra.mxu1 %v8078_v8  ;;  %4286 = vmatpush1.bf16.msra.mxu0 %v4197_v53  ;;  %v8087_v8 = vld [vmem:[%s15253_s3 + $0x80] ss:$16 sps:$4 sm:$0xff]   ;;  %v8090_v53 = vld [vmem:[%s15253_s3 + $0xa8] ss:$16 sps:$4 sm:$0xff]  }
 0x55d   : > { %7715 = vmatprep.mubr.msk.bf16.mxu1 %vm1723_vm13, %v8082_v40  ;;  %v3947_v47 = vpop.permute.xlu0 %3946  ;;  %4287 = vmatprep.subr.bf16.mxu0 %v4196_v6 }
 0x55e   : > { %v3949_v25 = vpop.permute.xlu1 %3948  ;;  %v3951_v11 = vsel %vm478_vm7, %v12097_v2, %v3947_v47  ;;  %v3954_v0 = vsel %vm478_vm7, %v3947_v47, %v12097_v2  ;;  %v8088_v2 = vld [vmem:[%s15253_s3 + $0xac] ss:$16 sps:$4 sm:$0xff]  }
 0x55f   : > { %v3952_v62 = vsel %vm478_vm7, %v12037_v44, %v3949_v25  ;;  %v3955_v39 = vsel %vm478_vm7, %v3949_v25, %v12037_v44  ;;  %v3969_v31 = vmul.f32 %v3960_v48, %v3954_v0  ;;  %v3970_v42 = vmul.f32 %v3964_v10, %v3951_v11 }
 0x560   : > { %v3971_v63 = vmul.f32 %v3960_v48, %v3955_v39  ;;  %v3972_v16 = vmul.f32 %v3964_v10, %v3952_v62  ;;  %v3950_v44 = vsel %vm478_vm7, %v11915_v50, %v11917_v58  ;;  %4288 = vmatpush1.bf16.msra.mxu0 %v4195_v46  ;;  %v4169_v62 = vsel %vm706_vm9, %v12203_v1, %v12175_v45  ;;  %v8093_v39 = vld [vmem:[%s15253_s3 + $0xa0] ss:$16 sps:$4 sm:$0xff]  }
 0x561   : > { %3537 = vmatmul.mubr.bf16.gmra.mxu0 %v8081_v35  ;;  %v12248_v26 = vpop.permute.xlu0 %4120  ;;  %v3968_v13 = vmul.f32 %v3964_v10, %v3950_v44  ;;  %v8094_v35 = vld [vmem:[%s15253_s3 + $0xcc] ss:$16 sps:$4 sm:$0xff]   ;;  %v15703_v11 = vmov 1.0  }
 0x562   : > { %v4193_v24 = vpack.c.bf16 %v3971_v63, %v3969_v31  ;;  %v3913_v54 = vpop.permute.xlu1 %3912  ;;  %v4194_v52 = vpack.c.bf16 %v3972_v16, %v3970_v42  ;;  %3546 = vmatprep.mubr.bf16.mxu0 %v8085_v41  ;;  %v8097_v31 = vld [vmem:[%s15253_s3 + $0xc4] ss:$16 sps:$4 sm:$0xff]   ;;  %v4166_v42 = vsel %vm706_vm9, %v12175_v45, %v12203_v1  ;;  %v8102_v45 = vld [vmem:[%s15253_s3 + $0xec] ss:$16 sps:$4 sm:$0xff]  }
 0x563   : > { %v3916_v50 = vsel %vm440_vm8, %v12115_v7, %v3913_v54  ;;  %v3919_v58 = vsel %vm440_vm8, %v3913_v54, %v12115_v7  ;;  %v7726_v7 = vld [vmem:[%s15252_s2 + $0x10] ss:$8 sm:$0x3] }
 0x564   : > { %v3935_v4 = vmul.f32 %v3924_v9, %v3919_v58  ;;  %v3936_v60 = vmul.f32 %v3928_v56, %v3916_v50  ;;  %3660 = vmatmul.mubr.bf16.gmra.mxu1 %v8084_v5  ;;  %4289 = vmatprep.subr.bf16.mxu0 %v4194_v52  ;;  %v4176_v6 = vrot.slane %v7726_v7, %v9190_v21  ;;  %v8096_v52 = vld [vmem:[%s15253_s3 + $0xc8] ss:$16 sps:$4 sm:$0xff]  }
 0x565   : > { %7716 = vmatprep.mubr.msk.bf16.mxu1 %vm1723_vm13, %v8088_v2  ;;  %4290 = vmatpush1.bf16.msra.mxu0 %v4193_v24  ;;  %v12271_v34 = vpop.permute.xlu0 %4086  ;;  %v4180_v48 = vrot.slane %v7726_v7, %v9192_v22 }
 0x566   : > { %v4191_v59 = vpack.c.bf16 %v3967_v17, %v3935_v4  ;;  %v3911_v18 = vpop.permute.xlu1 %3910  ;;  %v4192_v40 = vpack.c.bf16 %v3968_v13, %v3936_v60  ;;  %v4183_v58 = vmul.f32 %v4176_v6, %v4166_v42  ;;  %v7725_v13 = vld [vmem:[%s15252_s2 + $0x7] ss:$8 sm:$0x3] }
 0x567   : > { %v3915_v23 = vsel %vm440_vm8, %v12066_v19, %v3911_v18  ;;  %v3918_v33 = vsel %vm440_vm8, %v3911_v18, %v12066_v19  ;;  %v4144_v7 = vrot.slane %v7725_v13, %v9192_v22 }
 0x568   : > { %v3933_v30 = vmul.f32 %v3924_v9, %v3918_v33  ;;  %v3934_v57 = vmul.f32 %v3928_v56, %v3915_v23  ;;  %4291 = vmatprep.subr.bf16.mxu0 %v4192_v40  ;;  %v4184_v9 = vmul.f32 %v4180_v48, %v4169_v62  ;;  %v15704_v56 = vld [vmem:[#allocation22_spill] sm:$0xff]  ;;  %v8100_v40 = vld [vmem:[%s15253_s3 + $0xe4] ss:$16 sps:$4 sm:$0xff]   ;;  %v8104_v62 = vld [vmem:[%s15253_s3 + $0xe0] ss:$16 sps:$4 sm:$0xff]  }
 0x569   : > { %3547 = vmatmul.mubr.bf16.gmra.mxu0 %v8087_v8  ;;  %v4119_v55 = vpop.permute.xlu0 %4118  ;;  %v4140_v8 = vrot.slane %v7725_v13, %v9190_v21  ;;  %v7724_v33 = vld [vmem:[%s15252_s2 + $0x6] ss:$8 sm:$0x3] }
 0x56a   : > { %v4189_v10 = vpack.c.bf16 %v3933_v30, %v3931_v3  ;;  %4292 = vmatpush1.bf16.msra.mxu0 %v4191_v59  ;;  %v4165_v19 = vpop.permute.xlu1 %4164  ;;  %v4190_v15 = vpack.c.bf16 %v3934_v57, %v3932_v14  ;;  %3556 = vmatprep.mubr.bf16.mxu0 %v8091_v36 }
 0x56b   : > { %v4168_v46 = vsel %vm706_vm9, %v12123_v29, %v4165_v19  ;;  %v4171_v25 = vsel %vm706_vm9, %v4165_v19, %v12123_v29 }
 0x56c   : > { %v4187_v47 = vmul.f32 %v4176_v6, %v4168_v46  ;;  %v4188_v41 = vmul.f32 %v4180_v48, %v4171_v25  ;;  %3670 = vmatmul.mubr.bf16.gmra.mxu1 %v8090_v53  ;;  %4293 = vmatprep.subr.bf16.mxu0 %v4190_v15  ;;  %v8105_v53 = vld [vmem:[%s15253_s3 + $0xe8] ss:$16 sps:$4 sm:$0xff]  }
 0x56d   : > { %7717 = vmatprep.mubr.msk.bf16.mxu1 %vm1723_vm13, %v8094_v35  ;;  %v12305_v29 = vpop.permute.xlu0 %4082 }
 0x56e   : > { %v4215_v0 = vpack.c.bf16 %v15703_v11, %v4187_v47  ;;  %4294 = vmatpush1.bf16.msra.mxu0 %v4189_v10  ;;  %v4163_v63 = vpop.permute.xlu1 %4162  ;;  %v4216_v16 = vpack.c.bf16 %v15703_v11, %v4188_v41 }
 0x56f   : > { %v4167_v5 = vsel %vm706_vm9, %v12089_v27, %v4163_v63  ;;  %v4170_v44 = vsel %vm706_vm9, %v4163_v63, %v12089_v27 }
 0x570   : > { %v4186_v2 = vmul.f32 %v4180_v48, %v4170_v44  ;;  %v4277_v24 = vand.u32 %v4216_v16, %v15704_v56  ;;  %v4274_v54 = vand.u32 %v4215_v0, %v15704_v56  ;;  %v4185_v17 = vmul.f32 %v4176_v6, %v4167_v5  ;;  %v8108_v16 = vld [vmem:[%s15251_s1 + $0x4] ss:$8 sps:$4 sm:$0xff]  }
 0x571   : > { %3557 = vmatmul.mubr.bf16.gmra.mxu0 %v8093_v39  ;;  %v4127_v50 = vpop.permute.xlu0 %4126  ;;  %v4133_v6 = vsel %vm668_vm11, %v12173_v28, %v4119_v55  ;;  %v4108_v48 = vrot.slane %v7724_v33, %v9192_v22 }
 0x572   : > { %v12329_v1 = vpop.permute.xlu1 %4050  ;;  %4299 = vmatprep.subr.bf16.mxu0 %v4277_v24  ;;  %v4214_v27 = vpack.c.bf16 %v4186_v2, %v4184_v9  ;;  %3566 = vmatprep.mubr.bf16.mxu0 %v8097_v31  ;;  %v4213_v4 = vpack.c.bf16 %v4185_v17, %v4183_v58  ;;  %v4131_v60 = vsel %vm668_vm11, %v12248_v26, %v4127_v50 }
 0x573   : > { %4300 = vmatpush2.bf16.msra.mxu0 %v4274_v54  ;;  %v4134_v32 = vsel %vm668_vm11, %v4127_v50, %v12248_v26  ;;  %v4130_v26 = vsel %vm668_vm11, %v4119_v55, %v12173_v28  ;;  %v4149_v3 = vmul.f32 %v4140_v8, %v4131_v60  ;;  %v4148_v28 = vmul.f32 %v4144_v7, %v4133_v6 }
 0x574   : > { %3680 = vmatmul.mubr.bf16.gmra.mxu1 %v8096_v52  ;;  %4301 = vmatprep.subr.bf16.mxu0 %v4214_v27  ;;  %v4150_v14 = vmul.f32 %v4144_v7, %v4134_v32  ;;  %v4147_v15 = vmul.f32 %v4140_v8, %v4130_v26 }
 0x575   : > { %7718 = vmatprep.mubr.msk.bf16.mxu1 %vm1723_vm13, %v8102_v45  ;;  %v4089_v18 = vpop.permute.xlu0 %4088 }
 0x576   : > { %v4129_v59 = vpop.permute.xlu1 %4128  ;;  %v4094_v39 = vsel %vm630_vm12, %v12305_v29, %v4089_v18  ;;  %v4097_v0 = vsel %vm630_vm12, %v4089_v18, %v12305_v29  ;;  %v8117_v18 = vld [vmem:[%s15251_s1 + $0x30] ss:$8 sps:$4 sm:$0xff]  }
 0x577   : > { %v4132_v36 = vsel %vm668_vm11, %v12150_v51, %v4129_v59  ;;  %v4135_v23 = vsel %vm668_vm11, %v4129_v59, %v12150_v51  ;;  %4302 = vmatpush2.bf16.msra.mxu0 %v4213_v4  ;;  %v4104_v51 = vrot.slane %v7724_v33, %v9190_v21  ;;  %v4112_v2 = vmul.f32 %v4108_v48, %v4097_v0  ;;  %v8115_v59 = vld [vmem:[%s15251_s1 + $0x34] ss:$8 sps:$4 sm:$0xff]  }
 0x578   : > { %v4151_v30 = vmul.f32 %v4140_v8, %v4132_v36  ;;  %v4152_v57 = vmul.f32 %v4144_v7, %v4135_v23  ;;  %v8106_v8 = vld [vmem:[%s15251_s1] ss:$8 sps:$4 sm:$0xff]  }
 0x579   : > { %3567 = vmatmul.mubr.bf16.gmra.mxu0 %v8099_v49  ;;  %v4049_v47 = vpop.permute.xlu0 %4048  ;;  %v4111_v9 = vmul.f32 %v4104_v51, %v4094_v39  ;;  %v8114_v7 = vld [vmem:[%s15251_s1 + $0x20] ss:$8 sps:$4 sm:$0xff]  }
 0x57a   : > { %v4211_v35 = vpack.c.bf16 %v4151_v30, %v4149_v3  ;;  %v4093_v10 = vpop.permute.xlu1 %4092  ;;  %v4212_v19 = vpack.c.bf16 %v4152_v57, %v4150_v14  ;;  %3576 = vmatprep.mubr.bf16.mxu0 %v8100_v40 }
 0x57b   : > { %v4096_v46 = vsel %vm630_vm12, %v12271_v34, %v4093_v10  ;;  %v4099_v25 = vsel %vm630_vm12, %v4093_v10, %v12271_v34 }
 0x57c   : > { %v4115_v55 = vmul.f32 %v4104_v51, %v4096_v46  ;;  %v4116_v41 = vmul.f32 %v4108_v48, %v4099_v25  ;;  %4303 = vmatprep.subr.bf16.mxu0 %v4212_v19  ;;  %3690 = vmatmul.mubr.bf16.gmra.mxu1 %v8105_v53 }
 0x57d   : > { %4304 = vmatpush2.bf16.msra.mxu0 %v4211_v35  ;;  %v4055_v42 = vpop.permute.xlu0 %4054 }
 0x57e   : > { %v4209_v34 = vpack.c.bf16 %v4147_v15, %v4115_v55  ;;  %v4210_v63 = vpack.c.bf16 %v4148_v28, %v4116_v41  ;;  %v4091_v31 = vpop.permute.xlu1 %4090  ;;  %v4059_v54 = vsel %vm592_vm2, %v4049_v47, %v4055_v42  ;;  %v4062_v52 = vsel %vm592_vm2, %v4055_v42, %v4049_v47 }
 0x57f   : > { %v4095_v5 = vsel %vm630_vm12, %v12201_v61, %v4091_v31  ;;  %v4098_v44 = vsel %vm630_vm12, %v4091_v31, %v12201_v61  ;;  %v4077_v58 = vmul.f32 %v12075_v37, %v4059_v54  ;;  %v4078_v13 = vmul.f32 %v12051_v43, %v4062_v52 }
 0x580   : > { %4305 = vmatprep.subr.bf16.mxu0 %v4210_v63  ;;  %v4113_v29 = vmul.f32 %v4104_v51, %v4095_v5  ;;  %v4114_v24 = vmul.f32 %v4108_v48, %v4098_v44 }
 0x581   : > { %3577 = vmatmul.mubr.bf16.gmra.mxu0 %v8104_v62 }
 0x582   : > { %4306 = vmatpush2.bf16.msra.mxu0 %v4209_v34  ;;  %7741 = vmatprep.mubr.msk.bf16.mxu0 %vm802_vm1, %v8108_v16  ;;  %v4207_v17 = vpack.c.bf16 %v4113_v29, %v4111_v9  ;;  %v4057_v45 = vpop.permute.xlu1 %4056  ;;  %v4208_v50 = vpack.c.bf16 %v4114_v24, %v4112_v2 }
 0x583   : > { %v4060_v61 = vsel %vm592_vm2, %v12329_v1, %v4057_v45  ;;  %v4063_v27 = vsel %vm592_vm2, %v4057_v45, %v12329_v1  ;;  %v8109_v1 = vld [vmem:[%s15251_s1 + $0x14] ss:$8 sps:$4 sm:$0xff]  }
 0x584   : > { %v4079_v4 = vmul.f32 %v12075_v37, %v4060_v61  ;;  %v4080_v60 = vmul.f32 %v12051_v43, %v4063_v27  ;;  %4307 = vmatprep.subr.bf16.mxu0 %v4208_v50  ;;  %v8111_v43 = vld [vmem:[%s15251_s1 + $0x10] ss:$8 sps:$4 sm:$0xff]   ;;  %v8112_v37 = vld [vmem:[%s15251_s1 + $0x24] ss:$8 sps:$4 sm:$0xff]  }
 0x586   : > { %4308 = vmatpush2.bf16.msra.mxu0 %v4207_v17  ;;  %v4205_v32 = vpack.c.bf16 %v4079_v4, %v4077_v58  ;;  %v4206_v49 = vpack.c.bf16 %v4080_v60, %v4078_v13 }
 0x588   : > { %4309 = vmatprep.subr.bf16.mxu0 %v4206_v49 }
 0x58a   : > { %4310 = vmatpush2.bf16.msra.mxu0 %v4205_v32 }
 0x58d   : > { %4312 = vmatmul.mubr.bf16.vlgmr.msra.gmra.mxu0 %v8106_v8 }
 0x58e   : > { %7742 = vmatprep.mubr.msk.bf16.mxu0 %vm802_vm1, %v8109_v1 }
 0x595   : > { %4322 = vmatmul.mubr.bf16.gmra.mxu0 %v8111_v43 }
 0x596   : > { %7743 = vmatprep.mubr.msk.bf16.mxu0 %vm802_vm1, %v8112_v37 }
 0x59d   : > { %4332 = vmatmul.mubr.bf16.gmra.mxu0 %v8114_v7 }
 0x59e   : > { %7744 = vmatprep.mubr.msk.bf16.mxu0 %vm802_vm1, %v8115_v59 }
 0x5a5   : > { %4342 = vmatmul.mubr.bf16.gmra.mxu0 %v8117_v18 }
 0x604   : > { %v3621_v40 = vpop.f32.mrf.mxu1 }
 0x606   : > { %v3623_v26 = vpop.f32.mrf.mxu1 }
 0x608   : > { %v3625_v36 = vpop.f32.mrf.mxu1 }
 0x609   : > { %v3508_v23 = vpop.f32.mrf.mxu0 }
 0x60a   : > { %v3627_v33 = vpop.f32.mrf.mxu1  ;;  %v3622_v15 = vadd.f32 %v3621_v40, %v3508_v23 }
 0x60b   : > { %v3510_v3 = vpop.f32.mrf.mxu0 }
 0x60c   : > { %v3631_v14 = vpop.f32.mrf.mxu1  ;;  %v3624_v25 = vadd.f32 %v3623_v26, %v3510_v3  ;;  %v3700_v39 = vmul.f32 0.5, %v3622_v15 }
 0x60d   : > { %v3512_v30 = vpop.f32.mrf.mxu0 }
 0x60e   : > { %v3633_v57 = vpop.f32.mrf.mxu1  ;;  %v3626_v28 = vadd.f32 %v3625_v36, %v3512_v30  ;;  %v3701_v63 = vmul.f32 0.5, %v3624_v25  ;;  %8387 = vtanh.f32 %v3700_v39 }
 0x60f   : > { %v3514_v53 = vpop.f32.mrf.mxu0 }
 0x610   : > { %v3635_v6 = vpop.f32.mrf.mxu1  ;;  %v3628_v41 = vadd.f32 %v3627_v33, %v3514_v53  ;;  %v3702_v31 = vmul.f32 0.5, %v3626_v28  ;;  %8389 = vtanh.f32 %v3701_v63 }
 0x611   : > { %v3518_v35 = vpop.f32.mrf.mxu0 }
 0x612   : > { %v3637_v51 = vpop.f32.mrf.mxu1  ;;  %v3632_v42 = vadd.f32 %v3631_v14, %v3518_v35  ;;  %v3703_v2 = vmul.f32 0.5, %v3628_v41  ;;  %8391 = vtanh.f32 %v3702_v31 }
 0x613   : > { %v3520_v48 = vpop.f32.mrf.mxu0 }
 0x614   : > { %v3641_v10 = vpop.f32.mrf.mxu1  ;;  %v3634_v29 = vadd.f32 %v3633_v57, %v3520_v48  ;;  %v3704_v61 = vmul.f32 0.5, %v3632_v42  ;;  %8393 = vtanh.f32 %v3703_v2 }
 0x615   : > { %v3522_v19 = vpop.f32.mrf.mxu0 }
 0x616   : > { %v3643_v46 = vpop.f32.mrf.mxu1  ;;  %v3636_v27 = vadd.f32 %v3635_v6, %v3522_v19  ;;  %v3705_v4 = vmul.f32 0.5, %v3634_v29 }
 0x617   : > { %v3524_v47 = vpop.f32.mrf.mxu0 }
 0x618   : > { %v3645_v55 = vpop.f32.mrf.mxu1  ;;  %v3638_v8 = vadd.f32 %v3637_v51, %v3524_v47  ;;  %v3706_v18 = vmul.f32 0.5, %v3636_v27 }
 0x619   : > { %v3528_v62 = vpop.f32.mrf.mxu0 }
 0x61a   : > { %v3642_v0 = vadd.f32 %v3641_v10, %v3528_v62  ;;  %v3647_v34 = vpop.f32.mrf.mxu1  ;;  %v3707_v3 = vmul.f32 0.5, %v3638_v8 }
 0x61b   : > { %v3530_v16 = vpop.f32.mrf.mxu0  ;;  %v8388_v25 = vpop.eup %8387 }
 0x61c   : > { %v3732_v5 = vadd.f32 0.01, %v3642_v0  ;;  %v3644_v44 = vadd.f32 %v3643_v46, %v3530_v16  ;;  %v3651_v9 = vpop.f32.mrf.mxu1  ;;  %v3716_v27 = vmul.f32 0.5, %v8388_v25  ;;  %v2724_v25 = vld [vmem:[%s9050_s28] sm:$0xff] }
 0x61d   : > { %v3532_v24 = vpop.f32.mrf.mxu0  ;;  %v8390_v41 = vpop.eup %8389 }
 0x61e   : > { %v3740_v54 = vmul.f32 0.5, %v3732_v5  ;;  %v3733_v52 = vadd.f32 0.01, %v3644_v44  ;;  %v3653_v17 = vpop.f32.mrf.mxu1  ;;  %v3646_v45 = vadd.f32 %v3645_v55, %v3532_v24 }
 0x61f   : > { %v3534_v50 = vpop.f32.mrf.mxu0  ;;  %v8392_v0 = vpop.eup %8391 }
 0x620   : > { %v3741_v58 = vmul.f32 0.5, %v3733_v52  ;;  %v3655_v13 = vpop.f32.mrf.mxu1  ;;  %v3734_v60 = vadd.f32 0.01, %v3646_v45  ;;  %v3648_v32 = vadd.f32 %v3647_v34, %v3534_v50  ;;  %8395 = vtanh.f32 %v3740_v54 }
 0x621   : > { %v3538_v49 = vpop.f32.mrf.mxu0  ;;  %v8394_v16 = vpop.eup %8393 }
 0x622   : > { %v3652_v1 = vadd.f32 %v3651_v9, %v3538_v49  ;;  %v3657_v43 = vpop.f32.mrf.mxu1  ;;  %8397 = vtanh.f32 %v3741_v58  ;;  %v3742_v37 = vmul.f32 0.5, %v3734_v60  ;;  %v3735_v7 = vadd.f32 0.01, %v3648_v32 }
 0x623   : > { %v3540_v59 = vpop.f32.mrf.mxu0  ;;  %8399 = vtanh.f32 %v3704_v61  ;;  %v3717_v60 = vmul.f32 0.5, %v8390_v41  ;;  %v3718_v32 = vmul.f32 0.5, %v8392_v0 }
 0x624   : > { %v3736_v40 = vadd.f32 0.01, %v3652_v1  ;;  %v3654_v26 = vadd.f32 %v3653_v17, %v3540_v59  ;;  %v3661_v36 = vpop.f32.mrf.mxu1  ;;  %8401 = vtanh.f32 %v3705_v4  ;;  %v3743_v23 = vmul.f32 0.5, %v3735_v7 }
 0x625   : > { %v3542_v33 = vpop.f32.mrf.mxu0  ;;  %8403 = vtanh.f32 %v3742_v37 }
 0x626   : > { %v3744_v14 = vmul.f32 0.5, %v3736_v40  ;;  %v3737_v30 = vadd.f32 0.01, %v3654_v26  ;;  %v3663_v57 = vpop.f32.mrf.mxu1  ;;  %8405 = vtanh.f32 %v3743_v23  ;;  %v3656_v53 = vadd.f32 %v3655_v13, %v3542_v33 }
 0x627   : > { %v3544_v6 = vpop.f32.mrf.mxu0  ;;  %8407 = vtanh.f32 %v3706_v18 }
 0x628   : > { %v3745_v35 = vmul.f32 0.5, %v3737_v30  ;;  %v3665_v51 = vpop.f32.mrf.mxu1  ;;  %8409 = vtanh.f32 %v3744_v14  ;;  %v3738_v48 = vadd.f32 0.01, %v3656_v53  ;;  %v3658_v10 = vadd.f32 %v3657_v43, %v3544_v6 }
 0x629   : > { %v3548_v19 = vpop.f32.mrf.mxu0  ;;  %8411 = vtanh.f32 %v3707_v3  ;;  %v3719_v43 = vmul.f32 0.5, %v8394_v16  ;;  %v3724_v3 = vadd.f32 0.5, %v3716_v27  ;;  %v3725_v6 = vadd.f32 0.5, %v3717_v60  ;;  %v2727_v60 = vld [vmem:[%s9050_s28 + $0x18] sm:$0xff] }
 0x62a   : > { %v3662_v15 = vadd.f32 %v3661_v36, %v3548_v19  ;;  %v3667_v46 = vpop.f32.mrf.mxu1  ;;  %8413 = vtanh.f32 %v3745_v35  ;;  %v3746_v47 = vmul.f32 0.5, %v3738_v48  ;;  %v3739_v28 = vadd.f32 0.01, %v3658_v10 }
 0x62b   : > { %v3550_v55 = vpop.f32.mrf.mxu0  ;;  %v3726_v35 = vadd.f32 0.5, %v3718_v32  ;;  %v3727_v19 = vadd.f32 0.5, %v3719_v43 }
 0x62c   : > { %8415 = vtanh.f32 %v3662_v15  ;;  %v3664_v62 = vadd.f32 %v3663_v57, %v3550_v55  ;;  %v3671_v39 = vpop.f32.mrf.mxu1  ;;  %v3747_v34 = vmul.f32 0.5, %v3739_v28 }
 0x62d   : > { %8417 = vtanh.f32 %v3746_v47  ;;  %v3552_v63 = vpop.f32.mrf.mxu0  ;;  %v8396_v5 = vpop.eup %8395 }
 0x62e   : > { %8419 = vtanh.f32 %v3664_v62  ;;  %v3666_v31 = vadd.f32 %v3665_v51, %v3552_v63  ;;  %v3673_v42 = vpop.f32.mrf.mxu1  ;;  %v3756_v17 = vmul.f32 0.5, %v8396_v5  ;;  %v2725_v62 = vld [vmem:[%s9050_s28 + $0x8] sm:$0xff] }
 0x62f   : > { %8421 = vtanh.f32 %v3747_v34  ;;  %v3554_v44 = vpop.f32.mrf.mxu0  ;;  %v8398_v9 = vpop.eup %8397 }
 0x630   : > { %8423 = vtanh.f32 %v3666_v31  ;;  %v3668_v2 = vadd.f32 %v3667_v46, %v3554_v44  ;;  %v3675_v29 = vpop.f32.mrf.mxu1  ;;  %v8400_v24 = vpop.eup %8399  ;;  %v3757_v58 = vmul.f32 0.5, %v8398_v9  ;;  %v3764_v40 = vadd.f32 0.5, %v3756_v17 }
 0x631   : > { %v3558_v54 = vpop.f32.mrf.mxu0  ;;  %v8402_v52 = vpop.eup %8401  ;;  %v3720_v37 = vmul.f32 0.5, %v8400_v24 }
 0x632   : > { %8425 = vtanh.f32 %v3668_v2  ;;  %v3672_v45 = vadd.f32 %v3671_v39, %v3558_v54  ;;  %v3677_v50 = vpop.f32.mrf.mxu1  ;;  %v8404_v61 = vpop.eup %8403  ;;  %v3721_v7 = vmul.f32 0.5, %v8402_v52  ;;  %v3765_v14 = vadd.f32 0.5, %v3757_v58 }
 0x633   : > { %v3560_v13 = vpop.f32.mrf.mxu0  ;;  %v8406_v4 = vpop.eup %8405  ;;  %v3758_v26 = vmul.f32 0.5, %v8404_v61  ;;  %v3728_v15 = vadd.f32 0.5, %v3720_v37  ;;  %v3812_v41 = vmul.f32 %v3764_v40, %v2724_v25  ;;  %v2728_v40 = vld [vmem:[%s9050_s28 + $0x20] sm:$0xff]  ;;  %v2729_v25 = vld [vmem:[%s9050_s28 + $0x28] sm:$0xff] }
 0x634   : > { %8427 = vtanh.f32 %v3672_v45  ;;  %v3674_v49 = vadd.f32 %v3673_v42, %v3560_v13  ;;  %v3681_v8 = vpop.f32.mrf.mxu1  ;;  %v8408_v1 = vpop.eup %8407  ;;  %v3759_v30 = vmul.f32 0.5, %v8406_v4  ;;  %v12432_v46 = vadd.f32 0.5, %v3721_v7 }
 0x635   : > { %v3562_v59 = vpop.f32.mrf.mxu0  ;;  %v8410_v18 = vpop.eup %8409  ;;  %v3766_v39 = vadd.f32 0.5, %v3758_v26  ;;  %v3722_v16 = vmul.f32 0.5, %v8408_v1  ;;  %v3813_v31 = vmul.f32 %v3765_v14, %v2725_v62 }
 0x636   : > { %8429 = vtanh.f32 %v3674_v49  ;;  %v3676_v36 = vadd.f32 %v3675_v29, %v3562_v59  ;;  %v3683_v23 = vpop.f32.mrf.mxu1  ;;  %v8412_v33 = vpop.eup %8411  ;;  %v3760_v47 = vmul.f32 0.5, %v8410_v18  ;;  %v3767_v42 = vadd.f32 0.5, %v3759_v30 }
 0x637   : > { %v3564_v57 = vpop.f32.mrf.mxu0  ;;  %v8414_v53 = vpop.eup %8413  ;;  %v3723_v45 = vmul.f32 0.5, %v8412_v33 }
 0x638   : > { %8431 = vtanh.f32 %v3676_v36  ;;  %v3678_v51 = vadd.f32 %v3677_v50, %v3564_v57  ;;  %v3685_v48 = vpop.f32.mrf.mxu1  ;;  %v3761_v2 = vmul.f32 0.5, %v8414_v53  ;;  %v2726_v50 = vld [vmem:[%s9050_s28 + $0x10] sm:$0xff]  ;;  %v3768_v61 = vadd.f32 0.5, %v3760_v47 }
 0x639   : > { %v8416_v10 = vpop.eup %8415  ;;  %v3568_v28 = vpop.f32.mrf.mxu0  ;;  %v3814_v4 = vmul.f32 %v3766_v39, %v2726_v50  ;;  %v3815_v37 = vmul.f32 %v3767_v42, %v2727_v60  ;;  %v2731_v42 = vld [vmem:[%s9050_s28 + $0x38] sm:$0xff] }
 0x63a   : > { %v8418_v55 = vpop.eup %8417  ;;  %v3820_v0 = vmul.f32 %v8416_v10, %v3724_v3  ;;  %8433 = vtanh.f32 %v3678_v51  ;;  %v3687_v34 = vpop.f32.mrf.mxu1  ;;  %v3682_v5 = vadd.f32 %v3681_v8, %v3568_v28  ;;  %v3769_v26 = vadd.f32 0.5, %v3761_v2 }
 0x63b   : > { %v8420_v63 = vpop.eup %8419  ;;  %v3570_v44 = vpop.f32.mrf.mxu0  ;;  %v3762_v27 = vmul.f32 0.5, %v8418_v55  ;;  %v3816_v14 = vmul.f32 %v3768_v61, %v2728_v40 }
 0x63c   : > { %v8422_v9 = vpop.eup %8421  ;;  %v3828_v29 = vadd.f32 %v3820_v0, %v3812_v41  ;;  %v3821_v24 = vmul.f32 %v8420_v63, %v3725_v6  ;;  %v3684_v54 = vadd.f32 %v3683_v23, %v3570_v44  ;;  %v12436_v52 = vpop.f32.mrf.mxu1  ;;  %v3780_v58 = vmul.f32 0.5, %v3682_v5  ;;  %v2730_v41 = vld [vmem:[%s9050_s28 + $0x30] sm:$0xff] }
 0x63d   : > { %v8424_v17 = vpop.eup %8423  ;;  %v3572_v13 = vpop.f32.mrf.mxu0  ;;  %v3763_v7 = vmul.f32 0.5, %v8422_v9  ;;  %v3770_v30 = vadd.f32 0.5, %v3762_v27  ;;  %v3817_v55 = vmul.f32 %v3769_v26, %v2729_v25  ;;  %v3731_v63 = vadd.f32 0.5, %v3723_v45 }
 0x63e   : > { %3852 = vst [vmem:[%s9050_s28] sm:$0xff] %v3828_v29  ;;  %v3829_v32 = vadd.f32 %v3821_v24, %v3813_v31  ;;  %v3822_v49 = vmul.f32 %v8424_v17, %v3726_v35  ;;  %v3781_v8 = vmul.f32 0.5, %v3684_v54  ;;  %v3693_v1 = vpop.f32.mrf.mxu1  ;;  %8435 = vtanh.f32 %v3780_v58 }
 0x63f   : > { %v8426_v43 = vpop.eup %8425  ;;  %v3686_v59 = vadd.f32 %v3685_v48, %v3572_v13  ;;  %v3574_v18 = vpop.f32.mrf.mxu0  ;;  %v3771_v47 = vadd.f32 0.5, %v3763_v7 }
 0x640   : > { %3853 = vst [vmem:[%s9050_s28 + $0x8] sm:$0xff] %v3829_v32  ;;  %v3830_v36 = vadd.f32 %v3822_v49, %v3814_v4  ;;  %v3823_v23 = vmul.f32 %v8426_v43, %v3727_v19  ;;  %v3688_v33 = vadd.f32 %v3687_v34, %v3574_v18  ;;  %8437 = vtanh.f32 %v3781_v8  ;;  %v12445_v6 = vpop.f32.mrf.mxu1 }
 0x641   : > { %v8428_v3 = vpop.eup %8427  ;;  %v3782_v57 = vmul.f32 0.5, %v3686_v59  ;;  %v12443_v53 = vpop.f32.mrf.mxu0  ;;  %8439 = vtanh.f32 %v3828_v29  ;;  %v3730_v19 = vadd.f32 0.5, %v3722_v16 }
 0x642   : > { %3854 = vst [vmem:[%s9050_s28 + $0x10] sm:$0xff] %v3830_v36  ;;  %v3831_v35 = vadd.f32 %v3823_v23, %v3815_v37  ;;  %v3824_v51 = vmul.f32 %v8428_v3, %v3728_v15  ;;  %v3783_v48 = vmul.f32 0.5, %v3688_v33  ;;  %v3818_v15 = vmul.f32 %v3770_v30, %v2730_v41  ;;  %v3697_v31 = vpop.f32.mrf.mxu1 }
 0x643   : > { %v8430_v10 = vpop.eup %8429  ;;  %8441 = vtanh.f32 %v3782_v57  ;;  %v3580_v28 = vpop.f32.mrf.mxu0 }
 0x644   : > { %3855 = vst [vmem:[%s9050_s28 + $0x18] sm:$0xff] %v3831_v35  ;;  %v12451_v62 = vadd.f32 %v3824_v51, %v3816_v14  ;;  %v3825_v39 = vmul.f32 %v8430_v10, %v12432_v46  ;;  %v3694_v0 = vadd.f32 %v3693_v1, %v3580_v28  ;;  %8443 = vtanh.f32 %v3783_v48 }
 0x645   : > { %v8432_v34 = vpop.eup %8431  ;;  %v12454_v16 = vpop.f32.mrf.mxu0  ;;  %8445 = vtanh.f32 %v3829_v32  ;;  %v3819_v46 = vmul.f32 %v3771_v47, %v2731_v42 }
 0x646   : > { %3856 = vst [vmem:[%s9050_s28 + $0x20] sm:$0xff] %v12451_v62  ;;  %v3833_v5 = vadd.f32 %v3825_v39, %v3817_v55  ;;  %v3826_v44 = vmul.f32 %v8432_v34, %v3730_v19  ;;  %v3785_v9 = vmul.f32 0.5, %v3694_v0  ;;  %8447 = vtanh.f32 %v3830_v36 }
 0x647   : > { %v8434_v2 = vpop.eup %8433  ;;  %v3584_v29 = vpop.f32.mrf.mxu0  ;;  %8449 = vtanh.f32 %v3831_v35 }
 0x648   : > { %3857 = vst [vmem:[%s9050_s28 + $0x28] sm:$0xff] %v3833_v5  ;;  %v12460_v24 = vadd.f32 %v3826_v44, %v3818_v15  ;;  %v3827_v54 = vmul.f32 %v8434_v2, %v3731_v63  ;;  %v3698_v17 = vadd.f32 %v3697_v31, %v3584_v29  ;;  %8451 = vtanh.f32 %v3785_v9 }
 0x649   : > { %8453 = vtanh.f32 %v3833_v5 }
 0x64a   : > { %3858 = vst [vmem:[%s9050_s28 + $0x30] sm:$0xff] %v12460_v24  ;;  %v3835_v45 = vadd.f32 %v3827_v54, %v3819_v46  ;;  %v3787_v50 = vmul.f32 0.5, %v3698_v17 }
 0x64b   : > { %v8436_v61 = vpop.eup %8435 }
 0x64c   : > { %3859 = vst [vmem:[%s9050_s28 + $0x38] sm:$0xff] %v3835_v45  ;;  %v3796_v27 = vmul.f32 0.5, %v8436_v61  ;;  %8455 = vtanh.f32 %v3787_v50 }
 0x64d   : > { %v4313_v58 = vpop.f32.mrf.mxu0  ;;  %v8438_v13 = vpop.eup %8437  ;;  %8457 = vtanh.f32 %v3835_v45 }
 0x64e   : > { %v8440_v4 = vpop.eup %8439  ;;  %v3804_v60 = vadd.f32 0.5, %v3796_v27  ;;  %v3797_v32 = vmul.f32 0.5, %v8438_v13  ;;  %v4352_v37 = vmul.f32 0.5, %v4313_v58 }
 0x64f   : > { %v4315_v49 = vpop.f32.mrf.mxu0 }
 0x650   : > { %v8442_v8 = vpop.eup %8441  ;;  %v12465_v1 = vmul.f32 %v8440_v4, %v3804_v60  ;;  %v4353_v18 = vmul.f32 0.5, %v4315_v49  ;;  %v3805_v26 = vadd.f32 0.5, %v3797_v32  ;;  %8459 = vtanh.f32 %v4352_v37 }
 0x651   : > { %v3798_v43 = vmul.f32 0.5, %v8442_v8  ;;  %v4317_v7 = vpop.f32.mrf.mxu0  ;;  %v8444_v59 = vpop.eup %8443 }
 0x652   : > { %15705 = vst [vmem:[#allocation69_spill] sm:$0xff] %v12465_v1  ;;  %v8446_v40 = vpop.eup %8445  ;;  %v3799_v23 = vmul.f32 0.5, %v8444_v59  ;;  %4577 = vrot.lane.b32.xlu0 %v12465_v1, %s15631_s14  ;;  %v4354_v14 = vmul.f32 0.5, %v4317_v7  ;;  %8461 = vtanh.f32 %v4353_v18 }
 0x653   : > { %v3806_v36 = vadd.f32 0.5, %v3798_v43  ;;  %v4319_v33 = vpop.f32.mrf.mxu0  ;;  %v8448_v3 = vpop.eup %8447  ;;  %v12471_v25 = vmul.f32 %v8446_v40, %v3805_v26 }
 0x654   : > { %v8450_v30 = vpop.eup %8449  ;;  %v3807_v35 = vadd.f32 0.5, %v3799_v23  ;;  %v4355_v51 = vmul.f32 0.5, %v4319_v33  ;;  %8463 = vtanh.f32 %v4354_v14 }
 0x655   : > { %v12469_v57 = vmul.f32 %v8448_v3, %v3806_v36  ;;  %v4323_v48 = vpop.f32.mrf.mxu0  ;;  %v8452_v10 = vpop.eup %8451  ;;  %15707 = vst [vmem:[#allocation74_spill] sm:$0xff] %v12471_v25 }
 0x656   : > { %v4368_v19 = vadd.f32 0.01, %v4323_v48  ;;  %v12473_v47 = vmul.f32 %v8450_v30, %v3807_v35  ;;  %v3801_v28 = vmul.f32 0.5, %v8452_v10  ;;  %4517 = vrot.lane.b32.xlu0 %v12465_v1, %s15628_s24  ;;  %v8454_v34 = vpop.eup %8453  ;;  %8465 = vtanh.f32 %v4355_v51  ;;  %v3874_v30 = vld [vmem:[%s9048_s29] sm:$0xff] }
 0x657   : > { %15706 = vst [vmem:[#allocation71_spill] sm:$0xff] %v12469_v57  ;;  %v4325_v55 = vpop.f32.mrf.mxu0  ;;  %4579 = vrot.lane.b32.xlu1 %v12469_v57, %s15631_s14 }
 0x658   : > { %15708 = vst [vmem:[#allocation68_spill] sm:$0xff] %v12473_v47  ;;  %v4372_v39 = vmul.f32 0.5, %v4368_v19  ;;  %v4369_v0 = vadd.f32 0.01, %v4325_v55  ;;  %v3809_v63 = vadd.f32 0.5, %v3801_v28  ;;  %v3875_v55 = vld [vmem:[%s9048_s29 + $0x8] sm:$0xff] }
 0x659   : > { %v4327_v15 = vpop.f32.mrf.mxu0  ;;  %v8456_v42 = vpop.eup %8455 }
 0x65a   : > { %8467 = vtanh.f32 %v4372_v39  ;;  %v4373_v5 = vmul.f32 0.5, %v4369_v0  ;;  %v4370_v44 = vadd.f32 0.01, %v4327_v15  ;;  %v12483_v9 = vmul.f32 %v8454_v34, %v3809_v63  ;;  %4457 = vrot.lane.b32.xlu0 %v12465_v1, %s15592_s20  ;;  %v8458_v50 = vpop.eup %8457 }
 0x65b   : > { %v3803_v2 = vmul.f32 0.5, %v8456_v42  ;;  %v4329_v46 = vpop.f32.mrf.mxu0  ;;  %4519 = vrot.lane.b32.xlu1 %v12469_v57, %s15628_s24 }
 0x65c   : > { %15709 = vst [vmem:[#allocation48_spill] sm:$0xff] %v12483_v9  ;;  %8469 = vtanh.f32 %v4373_v5  ;;  %v4374_v29 = vmul.f32 0.5, %v4370_v44  ;;  %v4371_v54 = vadd.f32 0.01, %v4329_v46  ;;  %v3876_v44 = vld [vmem:[%s9048_s29 + $0x10] sm:$0xff] }
 0x65d   : > { %v3811_v17 = vadd.f32 0.5, %v3803_v2  ;;  %v4333_v45 = vpop.f32.mrf.mxu0  ;;  %v8460_v4 = vpop.eup %8459 }
 0x65e   : > { %8471 = vtanh.f32 %v4374_v29  ;;  %v4375_v61 = vmul.f32 0.5, %v4371_v54  ;;  %4817 = vrot.lane.b32.xlu0 %v12465_v1, %s15593_s26  ;;  %v4360_v8 = vmul.f32 0.5, %v8460_v4 }
 0x65f   : > { %v12489_v27 = vmul.f32 %v8458_v50, %v3811_v17  ;;  %8473 = vtanh.f32 %v4333_v45  ;;  %v4335_v58 = vpop.f32.mrf.mxu0  ;;  %4459 = vrot.lane.b32.xlu1 %v12469_v57, %s15592_s20  ;;  %v8462_v60 = vpop.eup %8461  ;;  %v3692_v50 = vadd.f32 %v12436_v52, %v12443_v53 }
 0x660   : > { %8475 = vtanh.f32 %v4375_v61  ;;  %v4361_v7 = vmul.f32 0.5, %v8462_v60  ;;  %v4364_v26 = vadd.f32 0.5, %v4360_v8  ;;  %v3877_v61 = vld [vmem:[%s9048_s29 + $0x18] sm:$0xff] }
 0x661   : > { %15710 = vst [vmem:[#allocation65_spill] sm:$0xff] %v12489_v27  ;;  %8477 = vtanh.f32 %v4335_v58  ;;  %v4337_v13 = vpop.f32.mrf.mxu0  ;;  %v8464_v49 = vpop.eup %8463  ;;  %v3784_v53 = vmul.f32 0.5, %v3692_v50 }
 0x662   : > { %8479 = vtanh.f32 %v4337_v13  ;;  %4637 = vrot.lane.b32.xlu0 %v12465_v1, %s15594_s30  ;;  %v4362_v59 = vmul.f32 0.5, %v8464_v49  ;;  %v4365_v14 = vadd.f32 0.5, %v4361_v7 }
 0x663   : > { %v4339_v32 = vpop.f32.mrf.mxu0  ;;  %4819 = vrot.lane.b32.xlu1 %v12469_v57, %s15593_s26  ;;  %v8466_v43 = vpop.eup %8465 }
 0x664   : > { %8481 = vtanh.f32 %v4339_v32  ;;  %v4363_v36 = vmul.f32 0.5, %v8466_v43  ;;  %v4366_v51 = vadd.f32 0.5, %v4362_v59  ;;  %v3696_v32 = vadd.f32 %v12445_v6, %v12454_v16 }
 0x665   : > { %8483 = vtanh.f32 %v3784_v53 }
 0x666   : > { %4757 = vrot.lane.b32.xlu0 %v12465_v1, %s15514_s25  ;;  %v4367_v34 = vadd.f32 0.5, %v4363_v36  ;;  %v3786_v49 = vmul.f32 0.5, %v3696_v32 }
 0x667   : > { %v8468_v37 = vpop.eup %8467  ;;  %4639 = vrot.lane.b32.xlu1 %v12469_v57, %s15594_s30 }
 0x668   : > { %v4380_v18 = vmul.f32 0.5, %v8468_v37  ;;  %8485 = vtanh.f32 %v3786_v49 }
 0x669   : > { %v8470_v40 = vpop.eup %8469  ;;  %8487 = vtanh.f32 %v12451_v62 }
 0x66a   : > { %v4384_v23 = vadd.f32 0.5, %v4380_v18  ;;  %v4381_v33 = vmul.f32 0.5, %v8470_v40  ;;  %4697 = vrot.lane.b32.xlu0 %v12465_v1, %s15595_s13  ;;  %8489 = vtanh.f32 %v12460_v24  ;;  %v4343_v40 = vpop.f32.mrf.mxu0 }
 0x66b   : > { %v8472_v3 = vpop.eup %8471  ;;  %4759 = vrot.lane.b32.xlu1 %v12469_v57, %s15514_s25  ;;  %v4392_v36 = vmul.f32 0.5, %v4343_v40 }
 0x66c   : > { %v8474_v35 = vpop.eup %8473  ;;  %v4408_v48 = vmul.f32 %v4384_v23, %v3874_v30  ;;  %v4385_v10 = vadd.f32 0.5, %v4381_v33  ;;  %v4382_v19 = vmul.f32 0.5, %v8472_v3 }
 0x66d   : > { %v8476_v28 = vpop.eup %8475  ;;  %v4412_v39 = vmul.f32 %v8474_v35, %v4364_v26  ;;  %v4345_v26 = vpop.f32.mrf.mxu0  ;;  %8491 = vtanh.f32 %v4392_v36 }
 0x66e   : > { %v8478_v0 = vpop.eup %8477  ;;  %v4409_v63 = vmul.f32 %v4385_v10, %v3875_v55  ;;  %v4386_v15 = vadd.f32 0.5, %v4382_v19  ;;  %v4383_v42 = vmul.f32 0.5, %v8476_v28  ;;  %4877 = vrot.lane.b32.xlu0 %v12465_v1, %s15596_s23 }
 0x66f   : > { %v8480_v5 = vpop.eup %8479  ;;  %v12510_v2 = vadd.f32 %v4412_v39, %v4408_v48  ;;  %v4413_v46 = vmul.f32 %v8478_v0, %v4365_v14  ;;  %4699 = vrot.lane.b32.xlu1 %v12469_v57, %s15595_s13  ;;  %v4347_v23 = vpop.f32.mrf.mxu0 }
 0x670   : > { %v4410_v29 = vmul.f32 %v4386_v15, %v3876_v44  ;;  %v4387_v54 = vadd.f32 0.5, %v4383_v42  ;;  %v4414_v17 = vmul.f32 %v8480_v5, %v4366_v51  ;;  %v4394_v33 = vmul.f32 0.5, %v4347_v23 }
 0x671   : > { %v8482_v45 = vpop.eup %8481  ;;  %4428 = vst [vmem:[%s9048_s29] sm:$0xff] %v12510_v2  ;;  %v12521_v58 = vadd.f32 %v4413_v46, %v4409_v63  ;;  %v4393_v46 = vmul.f32 0.5, %v4345_v26 }
 0x672   : > { %v4411_v13 = vmul.f32 %v4387_v54, %v3877_v61  ;;  %v12523_v4 = vadd.f32 %v4414_v17, %v4410_v29  ;;  %v4415_v60 = vmul.f32 %v8482_v45, %v4367_v34  ;;  %4589 = vrot.lane.b32.xlu0 %v12471_v25, %s15631_s14  ;;  %v8484_v6 = vpop.eup %8483  ;;  %8493 = vtanh.f32 %v4394_v33  ;;  %v4349_v29 = vpop.f32.mrf.mxu0 }
 0x673   : > { %4429 = vst [vmem:[%s9048_s29 + $0x8] sm:$0xff] %v12521_v58  ;;  %4879 = vrot.lane.b32.xlu1 %v12469_v57, %s15596_s23  ;;  %v3800_v16 = vmul.f32 0.5, %v8484_v6  ;;  %8495 = vtanh.f32 %v12510_v2  ;;  %v4395_v45 = vmul.f32 0.5, %v4349_v29  ;;  %v8121_v57 = vld [vmem:[%s15253_s3 + $0xc] ss:$16 sps:$4 sm:$0xff]  }
 0x674   : > { %4430 = vst [vmem:[%s9048_s29 + $0x10] sm:$0xff] %v12523_v4  ;;  %v12533_v52 = vadd.f32 %v4415_v60, %v4411_v13  ;;  %8497 = vtanh.f32 %v12523_v4  ;;  %v7746_v60 = vld [vmem:[%s15254_s4 + $0x2] ss:$8 sm:$0x3]  ;;  %7784 = vmatprep.mubr.msk.bf16.mxu0 %vm1723_vm13, %v8121_v57 }
 0x675   : > { %v8486_v8 = vpop.eup %8485  ;;  %v3808_v62 = vadd.f32 0.5, %v3800_v16  ;;  %8499 = vtanh.f32 %v4393_v46  ;;  %v12697_v6 = vrot.slane %v7746_v60, %v9190_v21 }
 0x676   : > { %4431 = vst [vmem:[%s9048_s29 + $0x18] sm:$0xff] %v12533_v52  ;;  %4529 = vrot.lane.b32.xlu0 %v12471_v25, %s15628_s24  ;;  %v3802_v43 = vmul.f32 0.5, %v8486_v8  ;;  %v8488_v24 = vpop.eup %8487  ;;  %8501 = vtanh.f32 %v4395_v45 }
 0x677   : > { %4591 = vrot.lane.b32.xlu1 %v12473_v47, %s15631_s14  ;;  %v12569_v37 = vmul.f32 %v8488_v24, %v3808_v62  ;;  %v8490_v59 = vpop.eup %8489  ;;  %8503 = vtanh.f32 %v12521_v58  ;;  %15721 = vst [vmem:[#allocation50_spill] sm:$0xff] %v12697_v6  ;;  %v12700_v58 = vrot.slane %v7746_v60, %v9192_v22 }
 0x678   : > { %v3810_v7 = vadd.f32 0.5, %v3802_v43  ;;  %8505 = vtanh.f32 %v12533_v52 }
 0x679   : > { %15711 = vst [vmem:[#allocation32_spill] sm:$0xff] %v12569_v37 }
 0x67a   : > { %4469 = vrot.lane.b32.xlu0 %v12471_v25, %s15592_s20  ;;  %v12575_v18 = vmul.f32 %v8490_v59, %v3810_v7  ;;  %v8492_v14 = vpop.eup %8491 }
 0x67b   : > { %4531 = vrot.lane.b32.xlu1 %v12473_v47, %s15628_s24  ;;  %v4400_v30 = vmul.f32 0.5, %v8492_v14 }
 0x67c   : > { %15712 = vst [vmem:[#allocation60_spill] sm:$0xff] %v12575_v18 }
 0x67d   : > { %v4404_v10 = vadd.f32 0.5, %v4400_v30 }
 0x67e   : > { %4829 = vrot.lane.b32.xlu0 %v12471_v25, %s15593_s26 }
 0x67f   : > { %4471 = vrot.lane.b32.xlu1 %v12473_v47, %s15592_s20  ;;  %v8494_v48 = vpop.eup %8493 }
 0x680   : > { %v4402_v19 = vmul.f32 0.5, %v8494_v48  ;;  %v8496_v39 = vpop.eup %8495 }
 0x681   : > { %v12645_v0 = vmul.f32 %v8496_v39, %v4404_v10  ;;  %v8498_v42 = vpop.eup %8497 }
 0x682   : > { %4649 = vrot.lane.b32.xlu0 %v12471_v25, %s15594_s30  ;;  %v4406_v34 = vadd.f32 0.5, %v4402_v19  ;;  %v8500_v49 = vpop.eup %8499 }
 0x683   : > { %4831 = vrot.lane.b32.xlu1 %v12473_v47, %s15593_s26  ;;  %15713 = vst [vmem:[#allocation34_spill] sm:$0xff] %v12645_v0  ;;  %v4401_v43 = vmul.f32 0.5, %v8500_v49  ;;  %v8502_v59 = vpop.eup %8501 }
 0x684   : > { %v12655_v5 = vmul.f32 %v8498_v42, %v4406_v34  ;;  %v4403_v48 = vmul.f32 0.5, %v8502_v59  ;;  %v8504_v10 = vpop.eup %8503 }
 0x685   : > { %v8506_v46 = vpop.eup %8505 }
 0x686   : > { %4769 = vrot.lane.b32.xlu0 %v12471_v25, %s15514_s25  ;;  %15714 = vst [vmem:[#allocation29_spill] sm:$0xff] %v12655_v5  ;;  %v4407_v42 = vadd.f32 0.5, %v4403_v48 }
 0x687   : > { %4651 = vrot.lane.b32.xlu1 %v12473_v47, %s15594_s30 }
 0x688   : > { %v12746_v60 = vmul.f32 %v8506_v46, %v4407_v42 }
 0x68a   : > { %4709 = vrot.lane.b32.xlu0 %v12471_v25, %s15595_s13  ;;  %15724 = vst [vmem:[#allocation67_spill] sm:$0xff] %v12746_v60 }
 0x68b   : > { %4771 = vrot.lane.b32.xlu1 %v12473_v47, %s15514_s25 }
 0x68e   : > { %4889 = vrot.lane.b32.xlu0 %v12471_v25, %s15596_s23 }
 0x68f   : > { %4711 = vrot.lane.b32.xlu1 %v12473_v47, %s15595_s13 }
 0x692   : > { %4521 = vrot.lane.b32.xlu0 %v12569_v37, %s15628_s24 }
 0x693   : > { %4891 = vrot.lane.b32.xlu1 %v12473_v47, %s15596_s23 }
 0x696   : > { %4461 = vrot.lane.b32.xlu0 %v12569_v37, %s15592_s20 }
 0x697   : > { %4523 = vrot.lane.b32.xlu1 %v12575_v18, %s15628_s24 }
 0x69a   : > { %4821 = vrot.lane.b32.xlu0 %v12569_v37, %s15593_s26 }
 0x69b   : > { %4463 = vrot.lane.b32.xlu1 %v12575_v18, %s15592_s20 }
 0x69e   : > { %4641 = vrot.lane.b32.xlu0 %v12569_v37, %s15594_s30 }
 0x69f   : > { %4823 = vrot.lane.b32.xlu1 %v12575_v18, %s15593_s26 }
 0x6a2   : > { %4761 = vrot.lane.b32.xlu0 %v12569_v37, %s15514_s25 }
 0x6a3   : > { %4643 = vrot.lane.b32.xlu1 %v12575_v18, %s15594_s30 }
 0x6a6   : > { %4581 = vrot.lane.b32.xlu0 %v12569_v37, %s15631_s14 }
 0x6a7   : > { %4763 = vrot.lane.b32.xlu1 %v12575_v18, %s15514_s25 }
 0x6aa   : > { %4701 = vrot.lane.b32.xlu0 %v12569_v37, %s15595_s13 }
 0x6ab   : > { %4583 = vrot.lane.b32.xlu1 %v12575_v18, %s15631_s14 }
 0x6ae   : > { %4881 = vrot.lane.b32.xlu0 %v12569_v37, %s15596_s23 }
 0x6af   : > { %4703 = vrot.lane.b32.xlu1 %v12575_v18, %s15595_s13 }
 0x6b2   : > { %4533 = vrot.lane.b32.xlu0 %v12483_v9, %s15628_s24 }
 0x6b3   : > { %4883 = vrot.lane.b32.xlu1 %v12575_v18, %s15596_s23 }
 0x6b6   : > { %4473 = vrot.lane.b32.xlu0 %v12483_v9, %s15592_s20 }
 0x6b7   : > { %4535 = vrot.lane.b32.xlu1 %v12489_v27, %s15628_s24 }
 0x6ba   : > { %4833 = vrot.lane.b32.xlu0 %v12483_v9, %s15593_s26 }
 0x6bb   : > { %4475 = vrot.lane.b32.xlu1 %v12489_v27, %s15592_s20 }
 0x6be   : > { %4653 = vrot.lane.b32.xlu0 %v12483_v9, %s15594_s30 }
 0x6bf   : > { %4835 = vrot.lane.b32.xlu1 %v12489_v27, %s15593_s26 }
 0x6c2   : > { %4773 = vrot.lane.b32.xlu0 %v12483_v9, %s15514_s25 }
 0x6c3   : > { %4655 = vrot.lane.b32.xlu1 %v12489_v27, %s15594_s30 }
 0x6c4   : > { %v4578_v3 = vpop.permute.xlu0 %4577 }
 0x6c6   : > { %4593 = vrot.lane.b32.xlu0 %v12483_v9, %s15631_s14 }
 0x6c7   : > { %4775 = vrot.lane.b32.xlu1 %v12489_v27, %s15514_s25 }
 0x6c8   : > { %v12631_v51 = vpop.permute.xlu0 %4517 }
 0x6c9   : > { %v4580_v35 = vpop.permute.xlu1 %4579 }
 0x6ca   : > { %4713 = vrot.lane.b32.xlu0 %v12483_v9, %s15595_s13 }
 0x6cb   : > { %4595 = vrot.lane.b32.xlu1 %v12489_v27, %s15631_s14 }
 0x6cc   : > { %v12639_v55 = vpop.permute.xlu0 %4457 }
 0x6cd   : > { %v12637_v28 = vpop.permute.xlu1 %4519 }
 0x6ce   : > { %4893 = vrot.lane.b32.xlu0 %v12483_v9, %s15596_s23 }
 0x6cf   : > { %4715 = vrot.lane.b32.xlu1 %v12489_v27, %s15595_s13 }
 0x6d0   : > { %v12649_v15 = vpop.permute.xlu0 %4817 }
 0x6d1   : > { %v12647_v63 = vpop.permute.xlu1 %4459 }
 0x6d2   : > { %4573 = vrot.lane.b32.xlu0 %v12645_v0, %s15631_s14 }
 0x6d3   : > { %4895 = vrot.lane.b32.xlu1 %v12489_v27, %s15596_s23 }
 0x6d4   : > { %v12659_v2 = vpop.permute.xlu0 %4637 }
 0x6d5   : > { %v12657_v44 = vpop.permute.xlu1 %4819  ;;  %15715 = vst [vmem:[#allocation25_spill] sm:$0xff] %v12659_v2 }
 0x6d6   : > { %4513 = vrot.lane.b32.xlu0 %v12645_v0, %s15628_s24 }
 0x6d7   : > { %4575 = vrot.lane.b32.xlu1 %v12655_v5, %s15631_s14 }
 0x6d8   : > { %v12667_v17 = vpop.permute.xlu0 %4757 }
 0x6d9   : > { %v12665_v54 = vpop.permute.xlu1 %4639 }
 0x6da   : > { %15716 = vst [vmem:[#allocation24_spill] sm:$0xff] %v12665_v54  ;;  %4453 = vrot.lane.b32.xlu0 %v12645_v0, %s15592_s20 }
 0x6db   : > { %4515 = vrot.lane.b32.xlu1 %v12655_v5, %s15628_s24 }
 0x6dc   : > { %v12675_v61 = vpop.permute.xlu0 %4697 }
 0x6dd   : > { %v12673_v50 = vpop.permute.xlu1 %4759  ;;  %15717 = vst [vmem:[#allocation23_spill] sm:$0xff] %v12675_v61 }
 0x6de   : > { %4693 = vrot.lane.b32.xlu0 %v12645_v0, %s15595_s13 }
 0x6df   : > { %4455 = vrot.lane.b32.xlu1 %v12655_v5, %s15592_s20 }
 0x6e0   : > { %v12683_v4 = vpop.permute.xlu0 %4877 }
 0x6e1   : > { %v12681_v13 = vpop.permute.xlu1 %4699  ;;  %15719 = vst [vmem:[#allocation47_spill] sm:$0xff] %v12683_v4 }
 0x6e2   : > { %15718 = vst [vmem:[#allocation26_spill] sm:$0xff] %v12681_v13  ;;  %4813 = vrot.lane.b32.xlu0 %v12645_v0, %s15593_s26 }
 0x6e3   : > { %4695 = vrot.lane.b32.xlu1 %v12655_v5, %s15595_s13 }
 0x6e4   : > { %v4590_v32 = vpop.permute.xlu0 %4589 }
 0x6e5   : > { %v12693_v53 = vpop.permute.xlu1 %4879  ;;  %v4599_v16 = vsel %vm516_vm6, %v4578_v3, %v4590_v32  ;;  %v4605_v8 = vsel %vm516_vm6, %v4590_v32, %v4578_v3 }
 0x6e6   : > { %15720 = vst [vmem:[#allocation52_spill] sm:$0xff] %v12693_v53  ;;  %4633 = vrot.lane.b32.xlu0 %v12645_v0, %s15594_s30  ;;  %v4624_v40 = vmul.f32 %v12697_v6, %v4605_v8  ;;  %v4625_v26 = vmul.f32 %v12700_v58, %v4599_v16  ;;  %v7750_v53 = vld [vmem:[%s15254_s4 + $0x7] ss:$8 sm:$0x3] }
 0x6e7   : > { %4815 = vrot.lane.b32.xlu1 %v12655_v5, %s15593_s26  ;;  %v12895_v47 = vrot.slane %v7750_v53, %v9190_v21 }
 0x6e8   : > { %v12710_v62 = vpop.permute.xlu0 %4529 }
 0x6e9   : > { %v4592_v52 = vpop.permute.xlu1 %4591 }
 0x6ea   : > { %v4600_v24 = vsel %vm516_vm6, %v4580_v35, %v4592_v52  ;;  %v4606_v7 = vsel %vm516_vm6, %v4592_v52, %v4580_v35  ;;  %4753 = vrot.lane.b32.xlu0 %v12645_v0, %s15514_s25  ;;  %v4405_v35 = vadd.f32 0.5, %v4401_v43 }
 0x6eb   : > { %v4626_v36 = vmul.f32 %v12697_v6, %v4606_v7  ;;  %v4627_v23 = vmul.f32 %v12700_v58, %v4600_v24  ;;  %4635 = vrot.lane.b32.xlu1 %v12655_v5, %s15594_s30 }
 0x6ec   : > { %v12726_v14 = vpop.permute.xlu0 %4469  ;;  %v12736_v34 = vmul.f32 %v8504_v10, %v4405_v35 }
 0x6ed   : > { %v4946_v33 = vpack.c.bf16 %v4626_v36, %v4624_v40  ;;  %v12724_v3 = vpop.permute.xlu1 %4531  ;;  %v4947_v30 = vpack.c.bf16 %v4627_v23, %v4625_v26  ;;  %v5605_v23 = vrot.slane %v12645_v0, 4 }
 0x6ee   : > { %4873 = vrot.lane.b32.xlu0 %v12645_v0, %s15596_s23  ;;  %15722 = vst [vmem:[#allocation30_spill] sm:$0xff] %v12736_v34  ;;  %v15391_v42 = vrot.slane %v12736_v34, 4  ;;  %v12915_v0 = vrot.slane %v12746_v60, 4  ;;  %v4546_v13 = vsel %vm478_vm7, %v12724_v3, %v12637_v28 }
 0x6ef   : > { %5194 = vmatprep.subr.bf16.mxu1 %v4947_v30  ;;  %4755 = vrot.lane.b32.xlu1 %v12655_v5, %s15514_s25 }
 0x6f0   : > { %5195 = vmatpush1.bf16.msra.mxu1 %v4946_v33  ;;  %v12734_v39 = vpop.permute.xlu0 %4829  ;;  %v7792_v33 = vld [vmem:[%s9042_s11 + $0x18] sm:$0xff]  ;;  %15742 = vst [vmem:[#allocation44_spill] sm:$0xff] %v12915_v0  ;;  %s8908_s11 = smov [#allocation2]  }
 0x6f1   : > { %v12732_v19 = vpop.permute.xlu1 %4471  ;;  %v5599_v48 = vcombine.high %v7792_v33, %v7792_v33  ;;  %v12803_v10 = vsel %vm408_vm0, %v7792_v33, %v5605_v23  ;;  %s8719_s18 = sshll.u32 %s8908_s11, 4  ;;  %s8720_s18 = int_to_ptr.vmem [resolvable:$false] %s8719_s18 }
 0x6f2   : > { %4585 = vrot.lane.b32.xlu0 %v12736_v34, %s15631_s14  ;;  %15731 = vst [vmem:[#allocation41_spill] sm:$0xff] %v12803_v10  ;;  %p8722_p5 = scmp.lt.s32.totalorder %s15052_s7, %s8720_s18 }
 0x6f3   : > { %4875 = vrot.lane.b32.xlu1 %v12655_v5, %s15596_s23  ;;  %v12817_v31 = vsel %vm408_vm0, %v5599_v48, %v15391_v42  ;;  %v12836_v42 = vrot.slane %v12655_v5, 4 }
 0x6f4   : > { %v12744_v45 = vpop.permute.xlu0 %4649  ;;  %15733 = vst [vmem:[#allocation45_spill] sm:$0xff] %v12817_v31 }
 0x6f5   : > { %v12742_v29 = vpop.permute.xlu1 %4831  ;;  %15723 = vst [vmem:[#allocation40_spill] sm:$0xff] %v12744_v45  ;;  %15736 = vst [vmem:[#allocation28_spill] sm:$0xff] %v12836_v42  ;;  %v12848_v38 = vsel %vm408_vm0, %v12836_v42, 0.0 }
 0x6f6   : > { %4525 = vrot.lane.b32.xlu0 %v12736_v34, %s15628_s24  ;;  %v4840_v45 = vsel %vm668_vm11, %v12657_v44, %v12742_v29 }
 0x6f7   : > { %4587 = vrot.lane.b32.xlu1 %v12746_v60, %s15631_s14 }
 0x6f8   : > { %v12754_v49 = vpop.permute.xlu0 %4769 }
 0x6f9   : > { %v12752_v32 = vpop.permute.xlu1 %4651 }
 0x6fa   : > { %15725 = vst [vmem:[#allocation55_spill] sm:$0xff] %v12752_v32  ;;  %4465 = vrot.lane.b32.xlu0 %v12736_v34, %s15592_s20 }
 0x6fb   : > { %4527 = vrot.lane.b32.xlu1 %v12746_v60, %s15628_s24 }
 0x6fc   : > { %v12762_v8 = vpop.permute.xlu0 %4709 }
 0x6fd   : > { %v12760_v16 = vpop.permute.xlu1 %4771  ;;  %15726 = vst [vmem:[#allocation54_spill] sm:$0xff] %v12762_v8 }
 0x6fe   : > { %4705 = vrot.lane.b32.xlu0 %v12736_v34, %s15595_s13 }
 0x6ff   : > { %4467 = vrot.lane.b32.xlu1 %v12746_v60, %s15592_s20 }
 0x700   : > { %v12770_v43 = vpop.permute.xlu0 %4889 }
 0x701   : > { %v12768_v52 = vpop.permute.xlu1 %4711  ;;  %15728 = vst [vmem:[#allocation51_spill] sm:$0xff] %v12770_v43  ;;  %v12863_v43 = vsel %vm408_vm0, %v5605_v23, %v12836_v42 }
 0x702   : > { %15727 = vst [vmem:[#allocation49_spill] sm:$0xff] %v12768_v52  ;;  %4825 = vrot.lane.b32.xlu0 %v12736_v34, %s15593_s26  ;;  %15740 = vst [vmem:[#allocation58_spill] sm:$0xff] %v12863_v43 }
 0x703   : > { %4707 = vrot.lane.b32.xlu1 %v12746_v60, %s15595_s13 }
 0x704   : > { %v12778_v7 = vpop.permute.xlu0 %4521 }
 0x705   : > { %v12776_v24 = vpop.permute.xlu1 %4891 }
 0x706   : > { %15729 = vst [vmem:[#allocation62_spill] sm:$0xff] %v12776_v24  ;;  %4645 = vrot.lane.b32.xlu0 %v12736_v34, %s15594_s30  ;;  %v8124_v24 = vld [vmem:[%s15253_s3 + $0x4] ss:$16 sps:$4 sm:$0xff]  }
 0x707   : > { %4827 = vrot.lane.b32.xlu1 %v12746_v60, %s15593_s26  ;;  %5226 = vmatprep.mubr.bf16.mxu1 %v8124_v24  ;;  %v12898_v24 = vrot.slane %v7750_v53, %v9192_v22 }
 0x708   : > { %v12786_v40 = vpop.permute.xlu0 %4461 }
 0x709   : > { %v12784_v59 = vpop.permute.xlu1 %4523 }
 0x70a   : > { %4765 = vrot.lane.b32.xlu0 %v12736_v34, %s15514_s25 }
 0x70b   : > { %4647 = vrot.lane.b32.xlu1 %v12746_v60, %s15594_s30 }
 0x70c   : > { %v4822_v36 = vpop.permute.xlu0 %4821 }
 0x70d   : > { %v12792_v26 = vpop.permute.xlu1 %4463 }
 0x70e   : > { %4885 = vrot.lane.b32.xlu0 %v12736_v34, %s15596_s23 }
 0x70f   : > { %4767 = vrot.lane.b32.xlu1 %v12746_v60, %s15514_s25 }
 0x710   : > { %v12800_v35 = vpop.permute.xlu0 %4641 }
 0x711   : > { %v4824_v30 = vpop.permute.xlu1 %4823  ;;  %15730 = vst [vmem:[#allocation57_spill] sm:$0xff] %v12800_v35 }
 0x712   : > { %5766 = vrot.lane.b32.xlu0 %v12803_v10, %s15595_s13 }
 0x713   : > { %4887 = vrot.lane.b32.xlu1 %v12746_v60, %s15596_s23 }
 0x714   : > { %v12812_v41 = vpop.permute.xlu0 %4761 }
 0x715   : > { %v12810_v46 = vpop.permute.xlu1 %4643 }
 0x716   : > { %15732 = vst [vmem:[#allocation66_spill] sm:$0xff] %v12810_v46  ;;  %5730 = vrot.lane.b32.xlu0 %v12803_v10, %s15594_s30 }
 0x717   : > { %5772 = vrot.lane.b32.xlu1 %v12817_v31, %s15595_s13 }
 0x718   : > { %v12825_v56 = vpop.permute.xlu0 %4581 }
 0x719   : > { %v12823_v33 = vpop.permute.xlu1 %4763  ;;  %15734 = vst [vmem:[#allocation42_spill] sm:$0xff] %v12825_v56 }
 0x71a   : > { %5694 = vrot.lane.b32.xlu0 %v12803_v10, %s15631_s14 }
 0x71b   : > { %5736 = vrot.lane.b32.xlu1 %v12817_v31, %s15594_s30 }
 0x71c   : > { %v12833_v48 = vpop.permute.xlu0 %4701 }
 0x71d   : > { %v12831_v11 = vpop.permute.xlu1 %4583 }
 0x71e   : > { %15735 = vst [vmem:[#allocation31_spill] sm:$0xff] %v12831_v11  ;;  %5658 = vrot.lane.b32.xlu0 %v12803_v10, %s15628_s24 }
 0x71f   : > { %5664 = vrot.lane.b32.xlu1 %v12817_v31, %s15628_s24 }
 0x720   : > { %v12844_v56 = vpop.permute.xlu0 %4881 }
 0x721   : > { %v12842_v12 = vpop.permute.xlu1 %4703  ;;  %15738 = vst [vmem:[#allocation27_spill] sm:$0xff] %v12844_v56  ;;  %v4846_v56 = vsel %vm668_vm11, %v12742_v29, %v12657_v44  ;;  %v12942_v29 = vsel %vm408_vm0, %v12915_v0, 0.0 }
 0x722   : > { %15737 = vst [vmem:[#allocation43_spill] sm:$0xff] %v12842_v12  ;;  %5622 = vrot.lane.b32.xlu0 %v12803_v10, %s15592_s20  ;;  %v4867_v2 = vmul.f32 %v12898_v24, %v4846_v56  ;;  %v4866_v56 = vmul.f32 %v12895_v47, %v4840_v45 }
 0x723   : > { %5734 = vrot.lane.b32.xlu1 %v12848_v38, %s15594_s30 }
 0x724   : > { %v12856_v1 = vpop.permute.xlu0 %4533 }
 0x725   : > { %v12854_v11 = vpop.permute.xlu1 %4883 }
 0x726   : > { %15739 = vst [vmem:[#allocation33_spill] sm:$0xff] %v12854_v11  ;;  %5700 = vrot.lane.b32.xlu0 %v12817_v31, %s15631_s14 }
 0x727   : > { %5696 = vrot.lane.b32.xlu1 %v12863_v43, %s15631_s14 }
 0x728   : > { %v12871_v35 = vpop.permute.xlu0 %4473 }
 0x729   : > { %v12869_v4 = vpop.permute.xlu1 %4535 }
 0x72a   : > { %5628 = vrot.lane.b32.xlu0 %v12817_v31, %s15592_s20 }
 0x72b   : > { %5662 = vrot.lane.b32.xlu1 %v12848_v38, %s15628_s24 }
 0x72c   : > { %v4834_v42 = vpop.permute.xlu0 %4833 }
 0x72d   : > { %v12881_v23 = vpop.permute.xlu1 %4475  ;;  %v4841_v57 = vsel %vm668_vm11, %v4822_v36, %v4834_v42  ;;  %v4847_v25 = vsel %vm668_vm11, %v4834_v42, %v4822_v36  ;;  %v4845_v36 = vsel %vm668_vm11, %v12734_v39, %v12649_v15 }
 0x72e   : > { %5732 = vrot.lane.b32.xlu0 %v12863_v43, %s15594_s30  ;;  %v4868_v11 = vmul.f32 %v12895_v47, %v4841_v57  ;;  %v4869_v32 = vmul.f32 %v12898_v24, %v4847_v25  ;;  %v4865_v44 = vmul.f32 %v12898_v24, %v4845_v36 }
 0x72f   : > { %5624 = vrot.lane.b32.xlu1 %v12863_v43, %s15592_s20 }
 0x730   : > { %v12904_v5 = vpop.permute.xlu0 %4653 }
 0x731   : > { %v4836_v46 = vpop.permute.xlu1 %4835  ;;  %15741 = vst [vmem:[#allocation46_spill] sm:$0xff] %v12904_v5 }
 0x732   : > { %v4842_v42 = vsel %vm668_vm11, %v4824_v30, %v4836_v46  ;;  %v4848_v53 = vsel %vm668_vm11, %v4836_v46, %v4824_v30  ;;  %5698 = vrot.lane.b32.xlu0 %v12848_v38, %s15631_s14 }
 0x733   : > { %v4870_v5 = vmul.f32 %v12895_v47, %v4842_v42  ;;  %v4871_v54 = vmul.f32 %v12898_v24, %v4848_v53  ;;  %5876 = vrot.lane.b32.xlu1 %v12863_v43, %s15596_s23  ;;  %v4839_v42 = vsel %vm668_vm11, %v12649_v15, %v12734_v39 }
 0x734   : > { %v12932_v25 = vpop.permute.xlu0 %4773 }
 0x735   : > { %v4978_v30 = vpack.c.bf16 %v4870_v5, %v4868_v11  ;;  %v12930_v46 = vpop.permute.xlu1 %4655  ;;  %v4979_v57 = vpack.c.bf16 %v4871_v54, %v4869_v32  ;;  %v4977_v11 = vpack.c.bf16 %v4867_v2, %v4865_v44  ;;  %v4864_v5 = vmul.f32 %v12895_v47, %v4839_v42 }
 0x736   : > { %15743 = vst [vmem:[#allocation75_spill] sm:$0xff] %v12930_v46  ;;  %5660 = vrot.lane.b32.xlu0 %v12863_v43, %s15628_s24  ;;  %v15746_v2 = vrot.slane %v12736_v34, 4 }
 0x737   : > { %5307 = vmatprep.subr.bf16.mxu0 %v4979_v57  ;;  %5740 = vrot.lane.b32.xlu1 %v12942_v29, %s15594_s30  ;;  %v4976_v39 = vpack.c.bf16 %v4866_v56, %v4864_v5 }
 0x738   : > { %5308 = vmatpush1.bf16.msra.mxu0 %v4978_v30  ;;  %v12951_v54 = vpop.permute.xlu0 %4593  ;;  %v12965_v36 = vsel %vm408_vm0, %v15746_v2, %v12915_v0 }
 0x739   : > { %v12949_v15 = vpop.permute.xlu1 %4775  ;;  %15744 = vst [vmem:[#allocation72_spill] sm:$0xff] %v12951_v54  ;;  %5309 = vmatprep.subr.bf16.mxu0 %v4977_v11 }
 0x73a   : > { %5626 = vrot.lane.b32.xlu0 %v12848_v38, %s15592_s20 }
 0x73b   : > { %5704 = vrot.lane.b32.xlu1 %v12942_v29, %s15631_s14 }
 0x73c   : > { %5310 = vmatpush1.bf16.msra.mxu0 %v4976_v39  ;;  %v12959_v32 = vpop.permute.xlu0 %4713 }
 0x73d   : > { %v12957_v45 = vpop.permute.xlu1 %4595 }
 0x73e   : > { %15745 = vst [vmem:[#allocation73_spill] sm:$0xff] %v12957_v45  ;;  %5878 = vrot.lane.b32.xlu0 %v12848_v38, %s15596_s23 }
 0x73f   : > { %5702 = vrot.lane.b32.xlu1 %v12965_v36, %s15631_s14 }
 0x740   : > { %v12973_v30 = vpop.permute.xlu0 %4893 }
 0x741   : > { %v12971_v53 = vpop.permute.xlu1 %4715  ;;  %15748 = vst [vmem:[#allocation64_spill] sm:$0xff] %v12973_v30 }
 0x742   : > { %15747 = vst [vmem:[#allocation70_spill] sm:$0xff] %v12971_v53  ;;  %5738 = vrot.lane.b32.xlu0 %v12965_v36, %s15594_s30 }
 0x743   : > { %5842 = vrot.lane.b32.xlu1 %v12848_v38, %s15593_s26 }
 0x744   : > { %v4574_v42 = vpop.permute.xlu0 %4573 }
 0x745   : > { %v12979_v57 = vpop.permute.xlu1 %4895 }
 0x746   : > { %15749 = vst [vmem:[#allocation37_spill] sm:$0xff] %v12979_v57  ;;  %5874 = vrot.lane.b32.xlu0 %v12803_v10, %s15596_s23  ;;  %v4452_v57 = vld [vmem:[%s15254_s4] ss:$8 sm:$0x3] }
 0x747   : > { %5844 = vrot.lane.b32.xlu1 %v12817_v31, %s15593_s26  ;;  %v13061_v27 = vrot.slane %v4452_v57, %v9190_v21 }
 0x748   : > { %v12985_v44 = vpop.permute.xlu0 %4513 }
 0x749   : > { %v4576_v56 = vpop.permute.xlu1 %4575 }
 0x74a   : > { %5880 = vrot.lane.b32.xlu0 %v12817_v31, %s15596_s23 }
 0x74b   : > { %5804 = vrot.lane.b32.xlu1 %v12863_v43, %s15514_s25 }
 0x74c   : > { %v12991_v11 = vpop.permute.xlu0 %4453 }
 0x74d   : > { %v12993_v5 = vpop.permute.xlu1 %4515 }
 0x74e   : > { %5666 = vrot.lane.b32.xlu0 %v12965_v36, %s15628_s24 }
 0x74f   : > { %5668 = vrot.lane.b32.xlu1 %v12942_v29, %s15628_s24 }
 0x750   : > { %v12999_v39 = vpop.permute.xlu0 %4693 }
 0x751   : > { %15750 = vst [vmem:[#allocation63_spill] sm:$0xff] %v12999_v39  ;;  %v13001_v2 = vpop.permute.xlu1 %4455 }
 0x752   : > { %5840 = vrot.lane.b32.xlu0 %v12863_v43, %s15593_s26 }
 0x753   : > { %5632 = vrot.lane.b32.xlu1 %v12942_v29, %s15592_s20 }
 0x754   : > { %v13007_v0 = vpop.permute.xlu0 %4813 }
 0x755   : > { %v13009_v54 = vpop.permute.xlu1 %4695 }
 0x756   : > { %15751 = vst [vmem:[#allocation36_spill] sm:$0xff] %v13009_v54  ;;  %5806 = vrot.lane.b32.xlu0 %v12848_v38, %s15514_s25 }
 0x757   : > { %5630 = vrot.lane.b32.xlu1 %v12965_v36, %s15592_s20 }
 0x758   : > { %v13015_v45 = vpop.permute.xlu0 %4633 }
 0x759   : > { %15752 = vst [vmem:[#allocation53_spill] sm:$0xff] %v13015_v45  ;;  %v13017_v30 = vpop.permute.xlu1 %4815 }
 0x75a   : > { %5838 = vrot.lane.b32.xlu0 %v12803_v10, %s15593_s26 }
 0x75b   : > { %5884 = vrot.lane.b32.xlu1 %v12942_v29, %s15596_s23 }
 0x75c   : > { %v13023_v46 = vpop.permute.xlu0 %4753 }
 0x75d   : > { %15753 = vst [vmem:[#allocation61_spill] sm:$0xff] %v13023_v46  ;;  %v13025_v60 = vpop.permute.xlu1 %4635 }
 0x75e   : > { %15754 = vst [vmem:[#allocation35_spill] sm:$0xff] %v13025_v60  ;;  %5802 = vrot.lane.b32.xlu0 %v12803_v10, %s15514_s25  ;;  %v7745_v60 = vld [vmem:[%s15254_s4 + $0x1] ss:$8 sm:$0x3] }
 0x75f   : > { %5882 = vrot.lane.b32.xlu1 %v12965_v36, %s15596_s23  ;;  %v13054_v37 = vrot.slane %v7745_v60, %v9192_v22 }
 0x760   : > { %v13031_v34 = vpop.permute.xlu0 %4873 }
 0x761   : > { %15755 = vst [vmem:[#allocation38_spill] sm:$0xff] %v13031_v34  ;;  %v13033_v45 = vpop.permute.xlu1 %4755  ;;  %v7749_v34 = vld [vmem:[%s15254_s4 + $0x6] ss:$8 sm:$0x3] }
 0x762   : > { %15756 = vst [vmem:[#allocation59_spill] sm:$0xff] %v13033_v45  ;;  %5846 = vrot.lane.b32.xlu0 %v12965_v36, %s15593_s26  ;;  %v13075_v61 = vrot.slane %v7749_v34, %v9190_v21 }
 0x763   : > { %5770 = vrot.lane.b32.xlu1 %v12848_v38, %s15595_s13  ;;  %v13051_v38 = vrot.slane %v7745_v60, %v9190_v21  ;;  %v4540_v60 = vsel %vm478_vm7, %v12637_v28, %v12724_v3  ;;  %v4545_v28 = vsel %vm478_vm7, %v12710_v62, %v12631_v51 }
 0x764   : > { %v4586_v18 = vpop.permute.xlu0 %4585 }
 0x765   : > { %v13045_v10 = vpop.permute.xlu1 %4875  ;;  %v4597_v9 = vsel %vm516_vm6, %v4574_v42, %v4586_v18  ;;  %v4603_v8 = vsel %vm516_vm6, %v4586_v18, %v4574_v42  ;;  %v4542_v18 = vsel %vm478_vm7, %v12784_v59, %v12869_v4 }
 0x766   : > { %15757 = vst [vmem:[#allocation39_spill] sm:$0xff] %v13045_v10  ;;  %5808 = vrot.lane.b32.xlu0 %v12817_v31, %s15514_s25  ;;  %v13064_v10 = vrot.slane %v4452_v57, %v9192_v22  ;;  %v13078_v31 = vrot.slane %v7749_v34, %v9192_v22  ;;  %v7748_v57 = vld [vmem:[%s15254_s4 + $0x5] ss:$8 sm:$0x3]  ;;  %v4541_v34 = vsel %vm478_vm7, %v12778_v7, %v12856_v1 }
 0x767   : > { %5848 = vrot.lane.b32.xlu1 %v12942_v29, %s15593_s26  ;;  %v4620_v39 = vmul.f32 %v12697_v6, %v4603_v8  ;;  %v4621_v45 = vmul.f32 %v12700_v58, %v4597_v9  ;;  %v13110_v3 = vrot.slane %v7748_v57, %v9190_v21  ;;  %v4548_v9 = vsel %vm478_vm7, %v12869_v4, %v12784_v59 }
 0x768   : > { %v4526_v42 = vpop.permute.xlu0 %4525  ;;  %v4539_v8 = vsel %vm478_vm7, %v12631_v51, %v12710_v62  ;;  %v4566_v59 = vmul.f32 %v13051_v38, %v4546_v13  ;;  %v4569_v51 = vmul.f32 %v13054_v37, %v4541_v34  ;;  %v4564_v62 = vmul.f32 %v13051_v38, %v4545_v28 }
 0x769   : > { %v4588_v52 = vpop.permute.xlu1 %4587  ;;  %v4570_v13 = vmul.f32 %v13051_v38, %v4548_v9 }
 0x76a   : > { %v4598_v53 = vsel %vm516_vm6, %v4576_v56, %v4588_v52  ;;  %v4604_v12 = vsel %vm516_vm6, %v4588_v52, %v4576_v56  ;;  %5768 = vrot.lane.b32.xlu0 %v12863_v43, %s15595_s13  ;;  %v4485_v52 = vsel %vm440_vm8, %v12726_v14, %v12639_v55  ;;  %v4547_v43 = vsel %vm478_vm7, %v12856_v1, %v12778_v7 }
 0x76b   : > { %v4622_v46 = vmul.f32 %v12697_v6, %v4604_v12  ;;  %v4623_v54 = vmul.f32 %v12700_v58, %v4598_v53  ;;  %5812 = vrot.lane.b32.xlu1 %v12942_v29, %s15514_s25  ;;  %v4571_v12 = vmul.f32 %v13054_v37, %v4542_v18  ;;  %v4567_v18 = vmul.f32 %v13054_v37, %v4540_v60 }
 0x76c   : > { %v13127_v56 = vpop.permute.xlu0 %4465  ;;  %v4486_v1 = vsel %vm440_vm8, %v12732_v19, %v12647_v63  ;;  %v4480_v7 = vsel %vm440_vm8, %v12647_v63, %v12732_v19  ;;  %v4940_v28 = vpack.c.bf16 %v4566_v59, %v4564_v62  ;;  %v4780_v63 = vsel %vm630_vm12, %v12673_v50, %v12760_v16 }
 0x76d   : > { %v4944_v53 = vpack.c.bf16 %v4622_v46, %v4620_v39  ;;  %v4528_v6 = vpop.permute.xlu1 %4527  ;;  %v4945_v4 = vpack.c.bf16 %v4623_v54, %v4621_v45  ;;  %v4479_v46 = vsel %vm440_vm8, %v12639_v55, %v12726_v14  ;;  %v13142_v54 = vrot.slane %v7748_v57, %v9192_v22 }
 0x76e   : > { %v4565_v45 = vmul.f32 %v13054_v37, %v4539_v8  ;;  %5774 = vrot.lane.b32.xlu0 %v12965_v36, %s15595_s13  ;;  %v4943_v55 = vpack.c.bf16 %v4571_v12, %v4569_v51  ;;  %v13155_v14 = vmul.f32 %v13061_v27, %v4485_v52  ;;  %v4568_v39 = vmul.f32 %v13051_v38, %v4547_v43 }
 0x76f   : > { %5196 = vmatprep.subr.bf16.mxu1 %v4945_v4  ;;  %5810 = vrot.lane.b32.xlu1 %v12965_v36, %s15514_s25  ;;  %v4538_v60 = vsel %vm478_vm7, %v12993_v5, %v4528_v6  ;;  %v13170_v9 = vmul.f32 %v13064_v10, %v4479_v46  ;;  %v13177_v43 = vmul.f32 %v13061_v27, %v4486_v1 }
 0x770   : > { %5197 = vmatpush1.bf16.msra.mxu1 %v4944_v53  ;;  %v13165_v57 = vpop.permute.xlu0 %4705  ;;  %v4941_v19 = vpack.c.bf16 %v4567_v18, %v4565_v45  ;;  %v4942_v12 = vpack.c.bf16 %v4570_v13, %v4568_v39  ;;  %v4537_v8 = vsel %vm478_vm7, %v12985_v44, %v4526_v42  ;;  %v4544_v52 = vsel %vm478_vm7, %v4528_v6, %v12993_v5 }
 0x771   : > { %v13167_v34 = vpop.permute.xlu1 %4467  ;;  %5198 = vmatprep.subr.bf16.mxu1 %v4943_v55  ;;  %v13186_v53 = vmul.f32 %v13064_v10, %v4480_v7  ;;  %v4786_v4 = vsel %vm630_vm12, %v12760_v16, %v12673_v50  ;;  %v4482_v59 = vsel %vm440_vm8, %v12792_v26, %v12881_v23  ;;  %v4563_v18 = vmul.f32 %v13054_v37, %v4538_v60 }
 0x772   : > { %v4779_v6 = vsel %vm630_vm12, %v12667_v17, %v12754_v49  ;;  %v4785_v50 = vsel %vm630_vm12, %v12754_v49, %v12667_v17  ;;  %v13208_v16 = vmul.f32 %v13075_v61, %v4780_v63  ;;  %v4543_v5 = vsel %vm478_vm7, %v4526_v42, %v12985_v44 }
 0x773   : > { %5776 = vrot.lane.b32.xlu1 %v12942_v29, %s15595_s13  ;;  %v4481_v62 = vsel %vm440_vm8, %v12786_v40, %v12871_v35  ;;  %v4488_v17 = vsel %vm440_vm8, %v12881_v23, %v12792_v26  ;;  %v4561_v49 = vmul.f32 %v13054_v37, %v4537_v8  ;;  %v4562_v46 = vmul.f32 %v13051_v38, %v4544_v52 }
 0x774   : > { %5199 = vmatpush1.bf16.msra.mxu1 %v4942_v12  ;;  %v4826_v51 = vpop.permute.xlu0 %4825  ;;  %v13226_v44 = vmul.f32 %v13078_v31, %v4786_v4  ;;  %v4487_v42 = vsel %vm440_vm8, %v12871_v35, %v12786_v40  ;;  %v4511_v13 = vmul.f32 %v13064_v10, %v4482_v59  ;;  %v4788_v26 = vsel %vm630_vm12, %v12949_v15, %v12823_v33 }
 0x775   : > { %v13213_v29 = vpop.permute.xlu1 %4707  ;;  %5200 = vmatprep.subr.bf16.mxu1 %v4941_v19  ;;  %v4560_v37 = vmul.f32 %v13051_v38, %v4543_v5  ;;  %v4837_v23 = vsel %vm668_vm11, %v13007_v0, %v4826_v51  ;;  %v4843_v45 = vsel %vm668_vm11, %v4826_v51, %v13007_v0  ;;  %v4939_v1 = vpack.c.bf16 %v4563_v18, %v4561_v49 }
 0x776   : > { %v4509_v40 = vmul.f32 %v13064_v10, %v4481_v62  ;;  %v4510_v35 = vmul.f32 %v13061_v27, %v4488_v17  ;;  %v4787_v55 = vsel %vm630_vm12, %v12932_v25, %v12812_v41  ;;  %v4782_v38 = vsel %vm630_vm12, %v12823_v33, %v12949_v15 }
 0x777   : > { %v4811_v0 = vmul.f32 %v13078_v31, %v4788_v26  ;;  %v4938_v60 = vpack.c.bf16 %v4562_v46, %v4560_v37  ;;  %v4860_v12 = vmul.f32 %v12895_v47, %v4837_v23  ;;  %v4861_v33 = vmul.f32 %v12898_v24, %v4843_v45  ;;  %v15758_v26 = vld [vmem:[#allocation36_spill] sm:$0xff]  ;;  %v15759_v23 = vld [vmem:[#allocation61_spill] sm:$0xff] }
 0x778   : > { %5201 = vmatpush1.bf16.msra.mxu1 %v4940_v28  ;;  %v13254_v7 = vpop.permute.xlu0 %4645  ;;  %v4508_v8 = vmul.f32 %v13061_v27, %v4487_v42  ;;  %v4781_v52 = vsel %vm630_vm12, %v12812_v41, %v12932_v25  ;;  %v4809_v4 = vmul.f32 %v13078_v31, %v4787_v55  ;;  %v4937_v59 = vpack.c.bf16 %v4511_v13, %v4509_v40 }
 0x779   : > { %v4828_v39 = vpop.permute.xlu1 %4827  ;;  %5202 = vmatprep.subr.bf16.mxu1 %v4939_v1  ;;  %v4478_v18 = vsel %vm440_vm8, %v13001_v2, %v13167_v34  ;;  %v4934_v62 = vpack.c.bf16 %v13177_v43, %v13155_v14  ;;  %v4804_v41 = vmul.f32 %v13075_v61, %v4779_v6  ;;  %v4805_v25 = vmul.f32 %v13078_v31, %v4785_v50  ;;  %v15760_v1 = vld [vmem:[#allocation59_spill] sm:$0xff] }
 0x77a   : > { %v4838_v63 = vsel %vm668_vm11, %v13017_v30, %v4828_v39  ;;  %v4844_v19 = vsel %vm668_vm11, %v4828_v39, %v13017_v30  ;;  %v4810_v30 = vmul.f32 %v13075_v61, %v4782_v38  ;;  %v4935_v17 = vpack.c.bf16 %v13186_v53, %v13170_v9  ;;  %v15763_v39 = vld [vmem:[#allocation70_spill] sm:$0xff] }
 0x77b   : > { %v4862_v15 = vmul.f32 %v12895_v47, %v4838_v63  ;;  %v4863_v28 = vmul.f32 %v12898_v24, %v4844_v19  ;;  %v4936_v49 = vpack.c.bf16 %v4510_v35, %v4508_v8  ;;  %v4808_v46 = vmul.f32 %v13075_v61, %v4781_v52  ;;  %v15761_v35 = vld [vmem:[#allocation63_spill] sm:$0xff] }
 0x77c   : > { %5203 = vmatpush1.bf16.msra.mxu1 %v4938_v60  ;;  %v4766_v24 = vpop.permute.xlu0 %4765  ;;  %v4477_v42 = vsel %vm440_vm8, %v12991_v11, %v13127_v56  ;;  %v4973_v13 = vpack.c.bf16 %v4811_v0, %v4809_v4  ;;  %v4970_v14 = vpack.c.bf16 %v13208_v16, %v4804_v41  ;;  %v4484_v43 = vsel %vm440_vm8, %v13167_v34, %v13001_v2 }
 0x77d   : > { %v4974_v47 = vpack.c.bf16 %v4862_v15, %v4860_v12  ;;  %v13278_v5 = vpop.permute.xlu1 %4647  ;;  %v4975_v51 = vpack.c.bf16 %v4863_v28, %v4861_v33  ;;  %5204 = vmatprep.subr.bf16.mxu1 %v4937_v59  ;;  %v4503_v6 = vmul.f32 %v13064_v10, %v4478_v18  ;;  %v4971_v9 = vpack.c.bf16 %v13226_v44, %v4805_v25 }
 0x77e   : > { %v4972_v53 = vpack.c.bf16 %v4810_v30, %v4808_v46  ;;  %v4727_v50 = vsel %vm592_vm2, %v12959_v32, %v12833_v48  ;;  %v4724_v16 = vsel %vm592_vm2, %v13213_v29, %v15758_v26  ;;  %v4483_v34 = vsel %vm440_vm8, %v13127_v56, %v12991_v11  ;;  %v15762_v56 = vld [vmem:[#allocation43_spill] sm:$0xff] }
 0x77f   : > { %5311 = vmatprep.subr.bf16.mxu0 %v4975_v51  ;;  %v4501_v44 = vmul.f32 %v13064_v10, %v4477_v42  ;;  %v4783_v45 = vsel %vm630_vm12, %v4766_v24, %v15759_v23  ;;  %v4723_v55 = vsel %vm592_vm2, %v13165_v57, %v15761_v35  ;;  %v4502_v38 = vmul.f32 %v13061_v27, %v4484_v43  ;;  %v15766_v42 = vld [vmem:[#allocation23_spill] sm:$0xff] }
 0x780   : > { %5312 = vmatpush1.bf16.msra.mxu0 %v4974_v47  ;;  %5205 = vmatpush1.bf16.msra.mxu1 %v4936_v49  ;;  %v13306_v37 = vpop.permute.xlu0 %4885  ;;  %v4728_v0 = vsel %vm592_vm2, %v15763_v39, %v15762_v56  ;;  %v4718_v60 = vsel %vm592_vm2, %v15758_v26, %v13213_v29  ;;  %v4743_v63 = vmul.f32 %v13142_v54, %v4724_v16  ;;  %v15764_v47 = vld [vmem:[#allocation26_spill] sm:$0xff]  ;;  %v15768_v16 = vld [vmem:[#allocation48_spill] sm:$0xff] }
 0x781   : > { %5313 = vmatprep.subr.bf16.mxu0 %v4973_v13  ;;  %v4768_v2 = vpop.permute.xlu1 %4767  ;;  %5206 = vmatprep.subr.bf16.mxu1 %v4935_v17  ;;  %v4933_v19 = vpack.c.bf16 %v4503_v6, %v4501_v44  ;;  %v4500_v12 = vmul.f32 %v13061_v27, %v4483_v34  ;;  %v4777_v33 = vsel %vm630_vm12, %v15759_v23, %v4766_v24  ;;  %v15765_v24 = vld [vmem:[#allocation49_spill] sm:$0xff]  ;;  %v15767_v13 = vld [vmem:[#allocation54_spill] sm:$0xff]  ;;  %v15770_v44 = vld [vmem:[#allocation32_spill] sm:$0xff] }
 0x782   : > { %v4784_v40 = vsel %vm630_vm12, %v4768_v2, %v15760_v1  ;;  %v4778_v10 = vsel %vm630_vm12, %v15760_v1, %v4768_v2  ;;  %v4801_v15 = vmul.f32 %v13078_v31, %v4783_v45  ;;  %v4722_v29 = vsel %vm592_vm2, %v15762_v56, %v15763_v39  ;;  %v15769_v2 = vld [vmem:[#allocation65_spill] sm:$0xff]  ;;  %v15771_v23 = vld [vmem:[#allocation60_spill] sm:$0xff] }
 0x783   : > { %v4803_v11 = vmul.f32 %v13078_v31, %v4784_v40  ;;  %v4717_v27 = vsel %vm592_vm2, %v15761_v35, %v13165_v57  ;;  %v4741_v52 = vmul.f32 %v13142_v54, %v4723_v55  ;;  %v4802_v31 = vmul.f32 %v13075_v61, %v4778_v10 }
 0x784   : > { %5314 = vmatpush1.bf16.msra.mxu0 %v4972_v53  ;;  %5207 = vmatpush1.bf16.msra.mxu1 %v4934_v62  ;;  %v13342_v28 = vpop.permute.xlu0 %5766  ;;  %v4751_v4 = vmul.f32 %v13142_v54, %v4728_v0  ;;  %v4932_v59 = vpack.c.bf16 %v4502_v38, %v4500_v12  ;;  %v4742_v30 = vmul.f32 %v13110_v3, %v4718_v60  ;;  %v15772_v0 = vld [vmem:[#allocation25_spill] sm:$0xff]  ;;  %v15773_v60 = vld [vmem:[#allocation40_spill] sm:$0xff] }
 0x785   : > { %5315 = vmatprep.subr.bf16.mxu0 %v4971_v9  ;;  %v13344_v8 = vpop.permute.xlu1 %4887  ;;  %5208 = vmatprep.subr.bf16.mxu1 %v4933_v19  ;;  %v4969_v18 = vpack.c.bf16 %v4803_v11, %v4801_v15  ;;  %v4726_v51 = vsel %vm592_vm2, %v15765_v24, %v15764_v47  ;;  %v4800_v62 = vmul.f32 %v13075_v61, %v4777_v33  ;;  %v7747_v61 = vld [vmem:[%s15254_s4 + $0x3] ss:$8 sm:$0x3]  ;;  %v7751_v9 = vld [vmem:[%s15254_s4 + $0x10] ss:$8 sm:$0x3] }
 0x786   : > { %v4963_v57 = vpack.c.bf16 %v4743_v63, %v4741_v52  ;;  %v4721_v41 = vsel %vm592_vm2, %v12833_v48, %v12959_v32  ;;  %v4749_v25 = vmul.f32 %v13142_v54, %v4727_v50  ;;  %v4740_v17 = vmul.f32 %v13110_v3, %v4717_v27  ;;  %v15774_v63 = vld [vmem:[#allocation24_spill] sm:$0xff]  ;;  %v15775_v19 = vld [vmem:[#allocation55_spill] sm:$0xff]  ;;  %v15776_v27 = vld [vmem:[#allocation33_spill] sm:$0xff] }
 0x787   : > { %v4750_v48 = vmul.f32 %v13110_v3, %v4722_v29  ;;  %v4968_v32 = vpack.c.bf16 %v4802_v31, %v4800_v62  ;;  %v4720_v43 = vsel %vm592_vm2, %v15764_v47, %v15765_v24  ;;  %v4747_v6 = vmul.f32 %v13142_v54, %v4726_v51  ;;  %v15777_v52 = vld [vmem:[#allocation37_spill] sm:$0xff]  ;;  %v15782_v62 = vld [vmem:[#allocation75_spill] sm:$0xff] }
 0x788   : > { %5316 = vmatpush1.bf16.msra.mxu0 %v4970_v14  ;;  %5209 = vmatpush1.bf16.msra.mxu1 %v4932_v59  ;;  %v13369_v49 = vpop.permute.xlu0 %5730  ;;  %v4725_v14 = vsel %vm592_vm2, %v15767_v13, %v15766_v42  ;;  %v4962_v53 = vpack.c.bf16 %v4742_v30, %v4740_v17  ;;  %v4967_v50 = vpack.c.bf16 %v4751_v4, %v4749_v25  ;;  %v15778_v4 = vld [vmem:[#allocation30_spill] sm:$0xff]  ;;  %v15779_v59 = vld [vmem:[#allocation67_spill] sm:$0xff]  ;;  %v15781_v47 = vld [vmem:[#allocation29_spill] sm:$0xff] }
 0x789   : > { %5317 = vmatprep.subr.bf16.mxu0 %v4969_v18  ;;  %v13371_v46 = vpop.permute.xlu1 %5772  ;;  %5210 = vmatprep.subr.bf16.mxu1 %v4963_v57  ;;  %v4748_v26 = vmul.f32 %v13110_v3, %v4721_v41  ;;  %v4961_v34 = vpack.c.bf16 %v15769_v2, %v15768_v16  ;;  %v4960_v45 = vpack.c.bf16 %v15771_v23, %v15770_v44  ;;  %v15780_v18 = vld [vmem:[#allocation34_spill] sm:$0xff]  ;;  %v15792_v2 = vld [vmem:[#allocation57_spill] sm:$0xff] }
 0x78a   : > { %v13395_v1 = vrot.slane %v7747_v61, %v9190_v21  ;;  %v4719_v40 = vsel %vm592_vm2, %v15766_v42, %v15767_v13  ;;  %v4745_v35 = vmul.f32 %v13142_v54, %v4725_v14  ;;  %v13407_v10 = vrot.slane %v7747_v61, %v9192_v22  ;;  %v15783_v57 = vld [vmem:[#allocation66_spill] sm:$0xff]  ;;  %v15784_v14 = vld [vmem:[#allocation27_spill] sm:$0xff] }
 0x78b   : > { %v4746_v11 = vmul.f32 %v13110_v3, %v4720_v43  ;;  %v13411_v56 = vrot.slane %v7751_v9, %v9190_v21  ;;  %v4966_v39 = vpack.c.bf16 %v4750_v48, %v4748_v26  ;;  %v4665_v54 = vsel %vm554_vm3, %v15773_v60, %v15772_v0  ;;  %v15785_v48 = vld [vmem:[#allocation64_spill] sm:$0xff]  ;;  %v15791_v16 = vld [vmem:[#allocation46_spill] sm:$0xff] }
 0x78c   : > { %5318 = vmatpush1.bf16.msra.mxu0 %v4968_v32  ;;  %5211 = vmatpush2.bf16.msra.mxu1 %v4962_v53  ;;  %v13402_v55 = vpop.permute.xlu0 %5694  ;;  %v4666_v12 = vsel %vm554_vm3, %v15775_v19, %v15774_v63  ;;  %v13422_v33 = vrot.slane %v7751_v9, %v9192_v22  ;;  %v4965_v15 = vpack.c.bf16 %v4747_v6, %v4745_v35  ;;  %v15786_v43 = vld [vmem:[#allocation68_spill] sm:$0xff]  ;;  %v15787_v6 = vld [vmem:[#allocation74_spill] sm:$0xff] }
 0x78d   : > { %5319 = vmatprep.subr.bf16.mxu0 %v4967_v50  ;;  %v13404_v38 = vpop.permute.xlu1 %5736  ;;  %5212 = vmatprep.subr.bf16.mxu1 %v4961_v34  ;;  %v4744_v29 = vmul.f32 %v13110_v3, %v4719_v40  ;;  %v4908_v31 = vsel %vm706_vm9, %v15777_v52, %v15776_v27  ;;  %v4957_v30 = vpack.c.bf16 %v15779_v59, %v15778_v4  ;;  %v15789_v53 = vld [vmem:[#allocation52_spill] sm:$0xff]  ;;  %v15790_v50 = vld [vmem:[#allocation62_spill] sm:$0xff] }
 0x78e   : > { %v4956_v24 = vpack.c.bf16 %v15781_v47, %v15780_v18  ;;  %v4659_v51 = vsel %vm554_vm3, %v15772_v0, %v15773_v60  ;;  %v4660_v3 = vsel %vm554_vm3, %v15774_v63, %v15775_v19  ;;  %v4662_v41 = vsel %vm554_vm3, %v15783_v57, %v15782_v62  ;;  %v15794_v0 = vld [vmem:[#allocation51_spill] sm:$0xff] }
 0x78f   : > { %v13450_v61 = vmul.f32 %v13395_v1, %v4665_v54  ;;  %v13453_v42 = vmul.f32 %v13395_v1, %v4666_v12  ;;  %v4964_v13 = vpack.c.bf16 %v4746_v11, %v4744_v29  ;;  %v4907_v32 = vsel %vm706_vm9, %v15785_v48, %v15784_v14  ;;  %v15795_v19 = vld [vmem:[#allocation71_spill] sm:$0xff]  ;;  %v15796_v12 = vld [vmem:[#allocation69_spill] sm:$0xff] }
 0x790   : > { %5320 = vmatpush1.bf16.msra.mxu0 %v4966_v39  ;;  %5213 = vmatpush2.bf16.msra.mxu1 %v4960_v45  ;;  %v13445_v25 = vpop.permute.xlu0 %5658  ;;  %v15788_v9 = vpack.c.bf16 %v15786_v43, %v15787_v6  ;;  %v4906_v26 = vsel %vm706_vm9, %v15790_v50, %v15789_v53  ;;  %v4661_v34 = vsel %vm554_vm3, %v15792_v2, %v15791_v16  ;;  %v15793_v39 = vld [vmem:[#allocation47_spill] sm:$0xff] }
 0x791   : > { %5321 = vmatprep.subr.bf16.mxu0 %v4965_v15  ;;  %v13447_v17 = vpop.permute.xlu1 %5664  ;;  %v4902_v44 = vsel %vm706_vm9, %v15776_v27, %v15777_v52  ;;  %v4931_v23 = vmul.f32 %v13422_v33, %v4908_v31  ;;  %v4685_v45 = vmul.f32 %v13407_v10, %v4659_v51  ;;  %v4687_v40 = vmul.f32 %v13407_v10, %v4660_v3  ;;  %v15798_v52 = vld [vmem:[#allocation56_spill] sm:$0xff] }
 0x792   : > { %5214 = vmatprep.subr.bf16.mxu1 %v15788_v9  ;;  %v4668_v35 = vsel %vm554_vm3, %v15782_v62, %v15783_v57  ;;  %v4691_v11 = vmul.f32 %v13407_v10, %v4662_v41  ;;  %v4905_v60 = vsel %vm706_vm9, %v15794_v0, %v15793_v39  ;;  %v4901_v54 = vsel %vm706_vm9, %v15784_v14, %v15785_v48  ;;  %v15800_v48 = vld [vmem:[#allocation35_spill] sm:$0xff] }
 0x793   : > { %v4929_v63 = vmul.f32 %v13422_v33, %v4907_v32  ;;  %v15797_v15 = vpack.c.bf16 %v15795_v19, %v15796_v12  ;;  %v4927_v31 = vmul.f32 %v13422_v33, %v4906_v26  ;;  %v4667_v4 = vsel %vm554_vm3, %v15791_v16, %v15792_v2 }
 0x794   : > { %5322 = vmatpush1.bf16.msra.mxu0 %v4964_v13  ;;  %v13494_v29 = vpop.permute.xlu0 %5622  ;;  %v4689_v59 = vmul.f32 %v13407_v10, %v4661_v34  ;;  %v4930_v18 = vmul.f32 %v13411_v56, %v4902_v44  ;;  %v4952_v47 = vpack.c.bf16 %v13453_v42, %v13450_v61  ;;  %v4900_v51 = vsel %vm706_vm9, %v15789_v53, %v15790_v50  ;;  %v15799_v13 = vld [vmem:[#allocation39_spill] sm:$0xff]  ;;  %v15801_v50 = vld [vmem:[#allocation38_spill] sm:$0xff]  ;;  %v15802_v34 = vld [vmem:[#allocation53_spill] sm:$0xff] }
 0x795   : > { %5215 = vmatpush2.bf16.msra.mxu1 %v15797_v15  ;;  %v13496_v27 = vpop.permute.xlu1 %5734  ;;  %5331 = vmatprep.subr.bf16.mxu0 %v15798_v52  ;;  %v4690_v3 = vmul.f32 %v13395_v1, %v4668_v35  ;;  %v4985_v62 = vpack.c.bf16 %v4931_v23, %v4929_v63  ;;  %v4925_v57 = vmul.f32 %v13422_v33, %v4905_v60  ;;  %v15804_v63 = vld [vmem:[#allocation31_spill] sm:$0xff] }
 0x796   : > { %5216 = vmatprep.subr.bf16.mxu1 %v4957_v30  ;;  %v4928_v41 = vmul.f32 %v13411_v56, %v4901_v54  ;;  %v4904_v30 = vsel %vm706_vm9, %v13344_v8, %v15799_v13  ;;  %v4955_v61 = vpack.c.bf16 %v4691_v11, %v4689_v59  ;;  %v4899_v42 = vsel %vm706_vm9, %v15793_v39, %v15794_v0  ;;  %v7796_v0 = vld [vmem:[%s15252_s2 + $0x5] ss:$8 sm:$0x3] }
 0x797   : > { %v4688_v14 = vmul.f32 %v13395_v1, %v4667_v4  ;;  %v4658_v32 = vsel %vm554_vm3, %v15800_v48, %v13278_v5  ;;  %v4926_v9 = vmul.f32 %v13411_v56, %v4900_v51  ;;  %v4903_v26 = vsel %vm706_vm9, %v13306_v37, %v15801_v50  ;;  %v15803_v54 = vld [vmem:[#allocation73_spill] sm:$0xff]  ;;  %v15806_v59 = vld [vmem:[#allocation42_spill] sm:$0xff] }
 0x798   : > { %5332 = vmatpush2.bf16.msra.mxu0 %v15798_v52  ;;  %v13529_v43 = vpop.permute.xlu0 %5700  ;;  %v4984_v53 = vpack.c.bf16 %v4930_v18, %v4928_v41  ;;  %v4983_v16 = vpack.c.bf16 %v4927_v31, %v4925_v57  ;;  %v4898_v44 = vsel %vm706_vm9, %v15799_v13, %v13344_v8  ;;  %v4923_v23 = vmul.f32 %v13422_v33, %v4904_v30 }
 0x799   : > { %5217 = vmatpush2.bf16.msra.mxu1 %v4956_v24  ;;  %5333 = vmatprep.subr.bf16.mxu0 %v4985_v62  ;;  %v13531_v6 = vpop.permute.xlu1 %5696  ;;  %v4954_v2 = vpack.c.bf16 %v4690_v3, %v4688_v14  ;;  %v4657_v24 = vsel %vm554_vm3, %v15802_v34, %v13254_v7  ;;  %v4924_v35 = vmul.f32 %v13411_v56, %v4899_v42 }
 0x79a   : > { %5218 = vmatprep.subr.bf16.mxu1 %v4955_v61  ;;  %v4664_v11 = vsel %vm554_vm3, %v13278_v5, %v15800_v48  ;;  %v4683_v39 = vmul.f32 %v13407_v10, %v4658_v32  ;;  %v4953_v60 = vpack.c.bf16 %v4687_v40, %v4685_v45  ;;  %v4602_v8 = vsel %vm516_vm6, %v15804_v63, %v15803_v54 }
 0x79b   : > { %v4897_v19 = vsel %vm706_vm9, %v15801_v50, %v13306_v37  ;;  %v4921_v5 = vmul.f32 %v13422_v33, %v4903_v26  ;;  %v4982_v31 = vpack.c.bf16 %v4926_v9, %v4924_v35  ;;  %v4663_v45 = vsel %vm554_vm3, %v13254_v7, %v15802_v34  ;;  %v15805_v37 = vld [vmem:[#allocation72_spill] sm:$0xff] }
 0x79c   : > { %5334 = vmatpush2.bf16.msra.mxu0 %v4984_v53  ;;  %v13565_v12 = vpop.permute.xlu0 %5628  ;;  %v4681_v40 = vmul.f32 %v13407_v10, %v4657_v24  ;;  %v4922_v4 = vmul.f32 %v13411_v56, %v4898_v44  ;;  %v4601_v33 = vsel %vm516_vm6, %v15806_v59, %v15805_v37  ;;  %v4682_v18 = vmul.f32 %v13395_v1, %v4664_v11  ;;  %v8125_v26 = vld [vmem:[%s15253_s3 + $0x2c] ss:$16 sps:$4 sm:$0xff]  }
 0x79d   : > { %5219 = vmatpush2.bf16.msra.mxu1 %v4954_v2  ;;  %5335 = vmatprep.subr.bf16.mxu0 %v4983_v16  ;;  %v13567_v15 = vpop.permute.xlu1 %5662  ;;  %v13581_v51 = vrot.slane %v7796_v0, %v9192_v22  ;;  %v4981_v3 = vpack.c.bf16 %v4923_v23, %v4921_v5  ;;  %v4608_v7 = vsel %vm516_vm6, %v15803_v54, %v15804_v63  ;;  %v8122_v23 = vld [vmem:[%s15253_s3] ss:$16 sps:$4 sm:$0xff]   ;;  %v8127_v63 = vld [vmem:[%s15253_s3 + $0x28] ss:$16 sps:$4 sm:$0xff]   ;;  %v8131_v5 = vld [vmem:[%s15253_s3 + $0x4c] ss:$16 sps:$4 sm:$0xff]  }
 0x79e   : > { %5220 = vmatprep.subr.bf16.mxu1 %v4953_v60  ;;  %v4631_v10 = vmul.f32 %v12700_v58, %v4602_v8  ;;  %v4920_v62 = vmul.f32 %v13411_v56, %v4897_v19  ;;  %v4951_v57 = vpack.c.bf16 %v4683_v39, %v4681_v40  ;;  %v4680_v41 = vmul.f32 %v13395_v1, %v4663_v45  ;;  %v15807_v1 = vld [vmem:[#allocation50_spill] sm:$0xff]  ;;  %v8128_v39 = vld [vmem:[%s15253_s3 + $0x24] ss:$16 sps:$4 sm:$0xff]   ;;  %v15810_v60 = vld [vmem:[#allocation28_spill] sm:$0xff] }
 0x79f   : > { %v5781_v13 = vsel %vm592_vm2, %v13371_v46, %v13342_v28  ;;  %v4607_v56 = vsel %vm516_vm6, %v15805_v37, %v15806_v59  ;;  %v4629_v42 = vmul.f32 %v12700_v58, %v4601_v33  ;;  %v4630_v48 = vmul.f32 %v15807_v1, %v4608_v7  ;;  %v15811_v8 = vld [vmem:[#allocation45_spill] sm:$0xff] }
 0x7a0   : > { %5336 = vmatpush2.bf16.msra.mxu0 %v4982_v31  ;;  %v13594_v30 = vpop.permute.xlu0 %5732  ;;  %v4980_v14 = vpack.c.bf16 %v4922_v4, %v4920_v62  ;;  %v4950_v32 = vpack.c.bf16 %v4682_v18, %v4680_v41  ;;  %v13605_v9 = vrot.slane %v7796_v0, %v9190_v21  ;;  %v5778_v53 = vsel %vm592_vm2, %v13342_v28, %v13371_v46  ;;  %v15808_v28 = vld [vmem:[#allocation44_spill] sm:$0xff]  ;;  %v15812_v40 = vld [vmem:[#allocation41_spill] sm:$0xff]  ;;  %v15813_v4 = vld [vmem:[#allocation58_spill] sm:$0xff] }
 0x7a1   : > { %5221 = vmatpush2.bf16.msra.mxu1 %v4952_v47  ;;  %5337 = vmatprep.subr.bf16.mxu0 %v4981_v3  ;;  %v13596_v61 = vpop.permute.xlu1 %5624  ;;  %v8119_v47 = vld [vmem:[%s15253_s3 + $0x8] ss:$16 sps:$4 sm:$0xff]   ;;  %v5796_v50 = vmul.f32 %v13581_v51, %v5781_v13  ;;  %v4949_v58 = vpack.c.bf16 %v4631_v10, %v4629_v42  ;;  %v4628_v16 = vmul.f32 %v15807_v1, %v4607_v56  ;;  %v8134_v18 = vld [vmem:[%s15253_s3 + $0x44] ss:$16 sps:$4 sm:$0xff]   ;;  %v8137_v41 = vld [vmem:[%s15253_s3 + $0x6c] ss:$16 sps:$4 sm:$0xff]  }
 0x7a2   : > { %5222 = vmatprep.subr.bf16.mxu1 %v4951_v57  ;;  %v5795_v44 = vmul.f32 %v13605_v9, %v5778_v53  ;;  %v5922_v19 = vpack.c.bf16 %v12965_v36, %v15811_v8  ;;  %v5921_v37 = vpack.c.bf16 %v15813_v4, %v15812_v40  ;;  %v8130_v36 = vld [vmem:[%s15253_s3 + $0x20] ss:$16 sps:$4 sm:$0xff]   ;;  %v8133_v10 = vld [vmem:[%s15253_s3 + $0x48] ss:$16 sps:$4 sm:$0xff]   ;;  %v5745_v0 = vsel %vm554_vm3, %v13404_v38, %v13369_v49 }
 0x7a3   : > { %v4948_v24 = vpack.c.bf16 %v4630_v48, %v4628_v16  ;;  %v7809_v46 = vpack.c.bf16 %v5796_v50, %v15808_v28  ;;  %v7795_v3 = vld [vmem:[%s15252_s2 + $0x3] ss:$8 sm:$0x3]  ;;  %v7794_v7 = vld [vmem:[%s15252_s2 + $0x2] ss:$8 sm:$0x3] }
 0x7a4   : > { %5338 = vmatpush2.bf16.msra.mxu0 %v4980_v14  ;;  %v5699_v2 = vpop.permute.xlu0 %5698  ;;  %v7812_v54 = vpack.c.bf16 %v5795_v44, %v15810_v60  ;;  %v5752_v13 = vrot.slane %v7795_v3, %v9190_v21  ;;  %v5756_v56 = vrot.slane %v7795_v3, %v9192_v22  ;;  %v5720_v48 = vrot.slane %v7794_v7, %v9192_v22  ;;  %v8136_v44 = vld [vmem:[%s15253_s3 + $0x40] ss:$16 sps:$4 sm:$0xff]  }
 0x7a5   : > { %5223 = vmatpush2.bf16.msra.mxu1 %v4950_v32  ;;  %v13619_v34 = vpop.permute.xlu1 %5876  ;;  %v5716_v28 = vrot.slane %v7794_v7, %v9190_v21  ;;  %v8142_v3 = vld [vmem:[%s15253_s3 + $0x60] ss:$16 sps:$4 sm:$0xff]  }
 0x7a6   : > { %5224 = vmatprep.subr.bf16.mxu1 %v4949_v58 }
 0x7a7   : > { %5340 = vmatmul.mubr.bf16.vlgmr.msra.gmra.mxu0 %v8119_v47 }
 0x7a8   : > { %7785 = vmatprep.mubr.msk.bf16.mxu0 %vm1723_vm13, %v8125_v26  ;;  %v13627_v35 = vpop.permute.xlu0 %5660 }
 0x7a9   : > { %5225 = vmatpush2.bf16.msra.mxu1 %v4948_v24  ;;  %v5741_v11 = vpop.permute.xlu1 %5740 }
 0x7aa   : > { %7810 = vmatprep.subr.msk.bf16.mxu1 %vm9242_vm5, %v7809_v46  ;;  %v5744_v62 = vsel %vm554_vm3, %v13496_v27, %v5741_v11  ;;  %v5747_v57 = vsel %vm554_vm3, %v5741_v11, %v13496_v27  ;;  %v5742_v27 = vsel %vm554_vm3, %v13369_v49, %v13404_v38  ;;  %v5709_v49 = vsel %vm516_vm6, %v13529_v43, %v13402_v55 }
 0x7ab   : > { %v5763_v53 = vmul.f32 %v5752_v13, %v5747_v57  ;;  %v5764_v50 = vmul.f32 %v5756_v56, %v5744_v62  ;;  %v5760_v60 = vmul.f32 %v5756_v56, %v5742_v27  ;;  %v5673_v62 = vsel %vm478_vm7, %v13447_v17, %v13445_v25  ;;  %v5621_v57 = vld [vmem:[%s15252_s2] ss:$8 sm:$0x3] }
 0x7ac   : > { %5227 = vmatmul.mubr.bf16.vlgmr.msra.gmra.mxu1 %v8122_v23  ;;  %v13645_v31 = vpop.permute.xlu0 %5626 }
 0x7ad   : > { %7813 = vmatpush1.bf16.msk.msra.mxu1 %vm9242_vm5, %v7812_v54  ;;  %v5705_v45 = vpop.permute.xlu1 %5704  ;;  %5236 = vmatprep.mubr.bf16.mxu1 %v8128_v39 }
 0x7ae   : > { %6001 = vmatprep.subr.bf16.mxu1 %v5922_v19  ;;  %v5708_v42 = vsel %vm516_vm6, %v5699_v2, %v5705_v45  ;;  %v5711_v16 = vsel %vm516_vm6, %v5705_v45, %v5699_v2  ;;  %v8140_v2 = vld [vmem:[%s15253_s3 + $0x64] ss:$16 sps:$4 sm:$0xff]   ;;  %v8139_v19 = vld [vmem:[%s15253_s3 + $0x68] ss:$16 sps:$4 sm:$0xff]   ;;  %v5759_v45 = vmul.f32 %v5752_v13, %v5745_v0 }
 0x7af   : > { %5350 = vmatmul.mubr.bf16.gmra.mxu0 %v8127_v63  ;;  %v5728_v24 = vmul.f32 %v5720_v48, %v5708_v42  ;;  %v5706_v63 = vsel %vm516_vm6, %v13402_v55, %v13529_v43  ;;  %v5727_v8 = vmul.f32 %v5716_v28, %v5711_v16  ;;  %v5723_v43 = vmul.f32 %v5716_v28, %v5709_v49  ;;  %v8146_v42 = vld [vmem:[%s15253_s3 + $0x84] ss:$16 sps:$4 sm:$0xff]  }
 0x7b0   : > { %7786 = vmatprep.mubr.msk.bf16.mxu0 %vm1723_vm13, %v8131_v5  ;;  %v13653_v59 = vpop.permute.xlu0 %5878  ;;  %v5724_v55 = vmul.f32 %v5720_v48, %v5706_v63  ;;  %v5644_v16 = vrot.slane %v5621_v57, %v9190_v21  ;;  %v5637_v63 = vsel %vm440_vm8, %v13565_v12, %v13494_v29 }
 0x7b1   : > { %6002 = vmatpush1.bf16.msra.mxu1 %v5921_v37  ;;  %v5703_v33 = vpop.permute.xlu1 %5702  ;;  %v5918_v5 = vpack.c.bf16 %v5760_v60, %v5728_v24  ;;  %v5648_v24 = vrot.slane %v5621_v57, %v9192_v22 }
 0x7b2   : > { %v5710_v54 = vsel %vm516_vm6, %v5703_v33, %v13531_v6 }
 0x7b3   : > { %v5725_v40 = vmul.f32 %v5716_v28, %v5710_v54  ;;  %v5634_v54 = vsel %vm440_vm8, %v13494_v29, %v13565_v12  ;;  %v8152_v29 = vld [vmem:[%s15253_s3 + $0xa4] ss:$16 sps:$4 sm:$0xff]  }
 0x7b4   : > { %5237 = vmatmul.mubr.bf16.gmra.mxu1 %v8130_v36  ;;  %v5739_v1 = vpop.permute.xlu0 %5738  ;;  %v7793_v36 = vld [vmem:[%s15252_s2 + $0x1] ss:$8 sm:$0x3] }
 0x7b5   : > { %v13680_v14 = vpop.permute.xlu1 %5842  ;;  %5246 = vmatprep.mubr.bf16.mxu1 %v8134_v18  ;;  %v5743_v32 = vsel %vm554_vm3, %v13594_v30, %v5739_v1  ;;  %v5746_v47 = vsel %vm554_vm3, %v5739_v1, %v13594_v30  ;;  %v5707_v30 = vsel %vm516_vm6, %v13531_v6, %v5703_v33  ;;  %v8143_v6 = vld [vmem:[%s15253_s3 + $0x8c] ss:$16 sps:$4 sm:$0xff]   ;;  %v5917_v33 = vpack.c.bf16 %v5759_v45, %v5727_v8  ;;  %v8148_v8 = vld [vmem:[%s15253_s3 + $0x80] ss:$16 sps:$4 sm:$0xff]  }
 0x7b6   : > { %v5761_v58 = vmul.f32 %v5752_v13, %v5746_v47  ;;  %v5762_v26 = vmul.f32 %v5756_v56, %v5743_v32  ;;  %v5726_v38 = vmul.f32 %v5720_v48, %v5707_v30  ;;  %v5680_v7 = vrot.slane %v7793_v36, %v9190_v21 }
 0x7b7   : > { %5360 = vmatmul.mubr.bf16.gmra.mxu0 %v8133_v10  ;;  %v5684_v10 = vrot.slane %v7793_v36, %v9192_v22  ;;  %v5651_v45 = vmul.f32 %v5644_v16, %v5637_v63 }
 0x7b8   : > { %7787 = vmatprep.mubr.msk.bf16.mxu0 %vm1723_vm13, %v8137_v41  ;;  %v5919_v46 = vpack.c.bf16 %v5763_v53, %v5761_v58  ;;  %v13705_v11 = vpop.permute.xlu0 %5874  ;;  %v5920_v39 = vpack.c.bf16 %v5764_v50, %v5762_v26  ;;  %v5916_v18 = vpack.c.bf16 %v5726_v38, %v5724_v55  ;;  %v5915_v41 = vpack.c.bf16 %v5725_v40, %v5723_v43  ;;  %v8145_v26 = vld [vmem:[%s15253_s3 + $0x88] ss:$16 sps:$4 sm:$0xff]  }
 0x7b9   : > { %v13703_v23 = vpop.permute.xlu1 %5844  ;;  %v5652_v40 = vmul.f32 %v5648_v24, %v5634_v54  ;;  %v8151_v43 = vld [vmem:[%s15253_s3 + $0xa8] ss:$16 sps:$4 sm:$0xff]   ;;  %v8160_v54 = vld [vmem:[%s15253_s3 + $0xc0] ss:$16 sps:$4 sm:$0xff]  }
 0x7ba   : > { %6003 = vmatprep.subr.bf16.mxu1 %v5920_v39  ;;  %v5687_v39 = vmul.f32 %v5680_v7, %v5673_v62 }
 0x7bb   : > { %6004 = vmatpush1.bf16.msra.mxu1 %v5919_v46 }
 0x7bc   : > { %5247 = vmatmul.mubr.bf16.gmra.mxu1 %v8136_v44  ;;  %v13733_v37 = vpop.permute.xlu0 %5880  ;;  %6005 = vmatprep.subr.bf16.mxu1 %v5918_v5 }
 0x7bd   : > { %v13731_v4 = vpop.permute.xlu1 %5804  ;;  %5256 = vmatprep.mubr.bf16.mxu1 %v8140_v2 }
 0x7bf   : > { %5370 = vmatmul.mubr.bf16.gmra.mxu0 %v8139_v19  ;;  %6006 = vmatpush1.bf16.msra.mxu1 %v5917_v33 }
 0x7c0   : > { %7788 = vmatprep.mubr.msk.bf16.mxu0 %vm1723_vm13, %v8143_v6  ;;  %v5667_v56 = vpop.permute.xlu0 %5666  ;;  %6007 = vmatprep.subr.bf16.mxu1 %v5916_v18  ;;  %v8155_v18 = vld [vmem:[%s15253_s3 + $0xcc] ss:$16 sps:$4 sm:$0xff]  }
 0x7c1   : > { %v5669_v13 = vpop.permute.xlu1 %5668  ;;  %v5671_v48 = vsel %vm478_vm7, %v13627_v35, %v5667_v56  ;;  %v5674_v32 = vsel %vm478_vm7, %v5667_v56, %v13627_v35  ;;  %v8149_v35 = vld [vmem:[%s15253_s3 + $0xac] ss:$16 sps:$4 sm:$0xff]  }
 0x7c2   : > { %v5672_v1 = vsel %vm478_vm7, %v13567_v15, %v5669_v13  ;;  %v5675_v27 = vsel %vm478_vm7, %v5669_v13, %v13567_v15  ;;  %v5689_v50 = vmul.f32 %v5680_v7, %v5674_v32  ;;  %v5690_v58 = vmul.f32 %v5684_v10, %v5671_v48 }
 0x7c3   : > { %v5691_v47 = vmul.f32 %v5680_v7, %v5675_v27  ;;  %v5692_v53 = vmul.f32 %v5684_v10, %v5672_v1  ;;  %v5670_v15 = vsel %vm478_vm7, %v13445_v25, %v13447_v17  ;;  %6008 = vmatpush1.bf16.msra.mxu1 %v5915_v41  ;;  %v8154_v1 = vld [vmem:[%s15253_s3 + $0xa0] ss:$16 sps:$4 sm:$0xff]   ;;  %v15814_v27 = vmov 1.0  }
 0x7c4   : > { %5257 = vmatmul.mubr.bf16.gmra.mxu1 %v8142_v3  ;;  %v13778_v30 = vpop.permute.xlu0 %5840  ;;  %v5688_v2 = vmul.f32 %v5684_v10, %v5670_v15 }
 0x7c5   : > { %v5913_v44 = vpack.c.bf16 %v5691_v47, %v5689_v50  ;;  %v5633_v28 = vpop.permute.xlu1 %5632  ;;  %v5914_v46 = vpack.c.bf16 %v5692_v53, %v5690_v58  ;;  %5266 = vmatprep.mubr.bf16.mxu1 %v8146_v42  ;;  %v5889_v42 = vsel %vm706_vm9, %v13733_v37, %v13705_v11  ;;  %v8158_v53 = vld [vmem:[%s15253_s3 + $0xc4] ss:$16 sps:$4 sm:$0xff]   ;;  %v5886_v50 = vsel %vm706_vm9, %v13705_v11, %v13733_v37  ;;  %v8163_v11 = vld [vmem:[%s15253_s3 + $0xec] ss:$16 sps:$4 sm:$0xff]  }
 0x7c6   : > { %v5636_v25 = vsel %vm440_vm8, %v13645_v31, %v5633_v28  ;;  %v5639_v17 = vsel %vm440_vm8, %v5633_v28, %v13645_v31  ;;  %v7799_v31 = vld [vmem:[%s15252_s2 + $0x10] ss:$8 sm:$0x3] }
 0x7c7   : > { %v5655_v0 = vmul.f32 %v5644_v16, %v5639_v17  ;;  %v5656_v60 = vmul.f32 %v5648_v24, %v5636_v25  ;;  %5380 = vmatmul.mubr.bf16.gmra.mxu0 %v8145_v26  ;;  %6009 = vmatprep.subr.bf16.mxu1 %v5914_v46  ;;  %v5896_v33 = vrot.slane %v7799_v31, %v9190_v21  ;;  %v8157_v28 = vld [vmem:[%s15253_s3 + $0xc8] ss:$16 sps:$4 sm:$0xff]   ;;  %v7798_v17 = vld [vmem:[%s15252_s2 + $0x7] ss:$8 sm:$0x3] }
 0x7c8   : > { %7789 = vmatprep.mubr.msk.bf16.mxu0 %vm1723_vm13, %v8149_v35  ;;  %6010 = vmatpush1.bf16.msra.mxu1 %v5913_v44  ;;  %v13801_v38 = vpop.permute.xlu0 %5806  ;;  %v5900_v3 = vrot.slane %v7799_v31, %v9192_v22  ;;  %v15815_v35 = vld [vmem:[#allocation22_spill] sm:$0xff]  ;;  %v5860_v63 = vrot.slane %v7798_v17, %v9190_v21 }
 0x7c9   : > { %v5911_v19 = vpack.c.bf16 %v5687_v39, %v5655_v0  ;;  %v5631_v49 = vpop.permute.xlu1 %5630  ;;  %v5912_v5 = vpack.c.bf16 %v5688_v2, %v5656_v60  ;;  %v5903_v25 = vmul.f32 %v5896_v33, %v5886_v50 }
 0x7ca   : > { %v5635_v12 = vsel %vm440_vm8, %v13596_v61, %v5631_v49  ;;  %v5638_v6 = vsel %vm440_vm8, %v5631_v49, %v13596_v61  ;;  %v5904_v15 = vmul.f32 %v5900_v3, %v5889_v42  ;;  %v8161_v49 = vld [vmem:[%s15253_s3 + $0xe4] ss:$16 sps:$4 sm:$0xff]  }
 0x7cb   : > { %v5653_v36 = vmul.f32 %v5644_v16, %v5638_v6  ;;  %v5654_v55 = vmul.f32 %v5648_v24, %v5635_v12  ;;  %6011 = vmatprep.subr.bf16.mxu1 %v5912_v5  ;;  %v7797_v12 = vld [vmem:[%s15252_s2 + $0x6] ss:$8 sm:$0x3] }
 0x7cc   : > { %5267 = vmatmul.mubr.bf16.gmra.mxu1 %v8148_v8  ;;  %v5839_v10 = vpop.permute.xlu0 %5838  ;;  %v5864_v8 = vrot.slane %v7798_v17, %v9192_v22 }
 0x7cd   : > { %v5909_v7 = vpack.c.bf16 %v5653_v36, %v5651_v45  ;;  %6012 = vmatpush1.bf16.msra.mxu1 %v5911_v19  ;;  %v5885_v61 = vpop.permute.xlu1 %5884  ;;  %v5910_v62 = vpack.c.bf16 %v5654_v55, %v5652_v40  ;;  %5276 = vmatprep.mubr.bf16.mxu1 %v8152_v29  ;;  %v8166_v55 = vld [vmem:[%s15253_s3 + $0xe8] ss:$16 sps:$4 sm:$0xff]  }
 0x7ce   : > { %v5888_v57 = vsel %vm706_vm9, %v13653_v59, %v5885_v61  ;;  %v5891_v41 = vsel %vm706_vm9, %v5885_v61, %v13653_v59 }
 0x7cf   : > { %v5907_v13 = vmul.f32 %v5896_v33, %v5888_v57  ;;  %v5908_v56 = vmul.f32 %v5900_v3, %v5891_v41  ;;  %5390 = vmatmul.mubr.bf16.gmra.mxu0 %v8151_v43  ;;  %6013 = vmatprep.subr.bf16.mxu1 %v5910_v62  ;;  %v5853_v43 = vsel %vm668_vm11, %v13703_v23, %v5839_v10 }
 0x7d0   : > { %7790 = vmatprep.mubr.msk.bf16.mxu0 %vm1723_vm13, %v8155_v18  ;;  %v13835_v59 = vpop.permute.xlu0 %5802  ;;  %v5828_v18 = vrot.slane %v7797_v12, %v9192_v22 }
 0x7d1   : > { %v5935_v48 = vpack.c.bf16 %v15814_v27, %v5907_v13  ;;  %6014 = vmatpush1.bf16.msra.mxu1 %v5909_v7  ;;  %v5883_v32 = vpop.permute.xlu1 %5882  ;;  %v5936_v47 = vpack.c.bf16 %v15814_v27, %v5908_v56  ;;  %v8165_v56 = vld [vmem:[%s15253_s3 + $0xe0] ss:$16 sps:$4 sm:$0xff]  }
 0x7d2   : > { %v5887_v58 = vsel %vm706_vm9, %v13619_v34, %v5883_v32  ;;  %v5890_v26 = vsel %vm706_vm9, %v5883_v32, %v13619_v34 }
 0x7d3   : > { %v5906_v16 = vmul.f32 %v5900_v3, %v5890_v26  ;;  %v5997_v24 = vand.u32 %v5936_v47, %v15815_v35  ;;  %v5994_v44 = vand.u32 %v5935_v48, %v15815_v35  ;;  %v5905_v46 = vmul.f32 %v5896_v33, %v5887_v58  ;;  %v8169_v48 = vld [vmem:[%s15251_s1 + $0x4] ss:$8 sps:$4 sm:$0xff]  }
 0x7d4   : > { %5277 = vmatmul.mubr.bf16.gmra.mxu1 %v8154_v1  ;;  %v5847_v39 = vpop.permute.xlu0 %5846 }
 0x7d5   : > { %v13859_v37 = vpop.permute.xlu1 %5770  ;;  %6019 = vmatprep.subr.bf16.mxu1 %v5997_v24  ;;  %v5934_v34 = vpack.c.bf16 %v5906_v16, %v5904_v15  ;;  %5286 = vmatprep.mubr.bf16.mxu1 %v8158_v53  ;;  %v5933_v2 = vpack.c.bf16 %v5905_v46, %v5903_v25  ;;  %v5851_v0 = vsel %vm668_vm11, %v13778_v30, %v5847_v39 }
 0x7d6   : > { %6020 = vmatpush2.bf16.msra.mxu1 %v5994_v44  ;;  %v5854_v60 = vsel %vm668_vm11, %v5847_v39, %v13778_v30  ;;  %v5850_v30 = vsel %vm668_vm11, %v5839_v10, %v13703_v23  ;;  %v5869_v6 = vmul.f32 %v5860_v63, %v5851_v0  ;;  %v5868_v23 = vmul.f32 %v5864_v8, %v5853_v43  ;;  %v8167_v0 = vld [vmem:[%s15251_s1] ss:$8 sps:$4 sm:$0xff]  }
 0x7d7   : > { %5400 = vmatmul.mubr.bf16.gmra.mxu0 %v8157_v28  ;;  %6021 = vmatprep.subr.bf16.mxu1 %v5934_v34  ;;  %v5870_v45 = vmul.f32 %v5864_v8, %v5854_v60  ;;  %v5867_v61 = vmul.f32 %v5860_v63, %v5850_v30  ;;  %v8175_v60 = vld [vmem:[%s15251_s1 + $0x20] ss:$8 sps:$4 sm:$0xff]  }
 0x7d8   : > { %7791 = vmatprep.mubr.msk.bf16.mxu0 %vm1723_vm13, %v8163_v11  ;;  %v5809_v19 = vpop.permute.xlu0 %5808 }
 0x7d9   : > { %v5849_v31 = vpop.permute.xlu1 %5848  ;;  %v5814_v42 = vsel %vm630_vm12, %v13835_v59, %v5809_v19  ;;  %v5817_v1 = vsel %vm630_vm12, %v5809_v19, %v13835_v59 }
 0x7da   : > { %v5852_v5 = vsel %vm668_vm11, %v13680_v14, %v5849_v31  ;;  %v5855_v29 = vsel %vm668_vm11, %v5849_v31, %v13680_v14  ;;  %6022 = vmatpush2.bf16.msra.mxu1 %v5933_v2  ;;  %v5824_v14 = vrot.slane %v7797_v12, %v9190_v21  ;;  %v5832_v26 = vmul.f32 %v5828_v18, %v5817_v1 }
 0x7db   : > { %v5871_v40 = vmul.f32 %v5860_v63, %v5852_v5  ;;  %v5872_v36 = vmul.f32 %v5864_v8, %v5855_v29  ;;  %v8178_v63 = vld [vmem:[%s15251_s1 + $0x30] ss:$8 sps:$4 sm:$0xff]  }
 0x7dc   : > { %5287 = vmatmul.mubr.bf16.gmra.mxu1 %v8160_v54  ;;  %v5769_v41 = vpop.permute.xlu0 %5768  ;;  %v5831_v58 = vmul.f32 %v5824_v14, %v5814_v42  ;;  %v8176_v54 = vld [vmem:[%s15251_s1 + $0x34] ss:$8 sps:$4 sm:$0xff]  }
 0x7dd   : > { %v5931_v33 = vpack.c.bf16 %v5871_v40, %v5869_v6  ;;  %v5813_v3 = vpop.permute.xlu1 %5812  ;;  %v5932_v7 = vpack.c.bf16 %v5872_v36, %v5870_v45  ;;  %5296 = vmatprep.mubr.bf16.mxu1 %v8161_v49 }
 0x7de   : > { %v5816_v62 = vsel %vm630_vm12, %v13801_v38, %v5813_v3  ;;  %v5819_v57 = vsel %vm630_vm12, %v5813_v3, %v13801_v38 }
 0x7df   : > { %v5835_v10 = vmul.f32 %v5824_v14, %v5816_v62  ;;  %v5836_v13 = vmul.f32 %v5828_v18, %v5819_v57  ;;  %6023 = vmatprep.subr.bf16.mxu1 %v5932_v7  ;;  %5410 = vmatmul.mubr.bf16.gmra.mxu0 %v8166_v55 }
 0x7e0   : > { %6024 = vmatpush2.bf16.msra.mxu1 %v5931_v33  ;;  %v5775_v47 = vpop.permute.xlu0 %5774 }
 0x7e1   : > { %v5929_v38 = vpack.c.bf16 %v5867_v61, %v5835_v10  ;;  %v5930_v27 = vpack.c.bf16 %v5868_v23, %v5836_v13  ;;  %v5811_v32 = vpop.permute.xlu1 %5810  ;;  %v5779_v16 = vsel %vm592_vm2, %v5769_v41, %v5775_v47  ;;  %v5782_v35 = vsel %vm592_vm2, %v5775_v47, %v5769_v41 }
 0x7e2   : > { %v5815_v53 = vsel %vm630_vm12, %v13731_v4, %v5811_v32  ;;  %v5818_v50 = vsel %vm630_vm12, %v5811_v32, %v13731_v4  ;;  %v5797_v11 = vmul.f32 %v13605_v9, %v5779_v16  ;;  %v5798_v39 = vmul.f32 %v13581_v51, %v5782_v35 }
 0x7e3   : > { %6025 = vmatprep.subr.bf16.mxu1 %v5930_v27  ;;  %v5833_v59 = vmul.f32 %v5824_v14, %v5815_v53  ;;  %v5834_v15 = vmul.f32 %v5828_v18, %v5818_v50 }
 0x7e4   : > { %5297 = vmatmul.mubr.bf16.gmra.mxu1 %v8165_v56 }
 0x7e5   : > { %6026 = vmatpush2.bf16.msra.mxu1 %v5929_v38  ;;  %7814 = vmatprep.mubr.msk.bf16.mxu1 %vm802_vm1, %v8169_v48  ;;  %v5927_v24 = vpack.c.bf16 %v5833_v59, %v5831_v58  ;;  %v5777_v44 = vpop.permute.xlu1 %5776  ;;  %v5928_v28 = vpack.c.bf16 %v5834_v15, %v5832_v26 }
 0x7e6   : > { %v5780_v4 = vsel %vm592_vm2, %v13859_v37, %v5777_v44  ;;  %v5783_v46 = vsel %vm592_vm2, %v5777_v44, %v13859_v37  ;;  %v8170_v37 = vld [vmem:[%s15251_s1 + $0x14] ss:$8 sps:$4 sm:$0xff]  }
 0x7e7   : > { %v5799_v34 = vmul.f32 %v13605_v9, %v5780_v4  ;;  %v5800_v25 = vmul.f32 %v13581_v51, %v5783_v46  ;;  %6027 = vmatprep.subr.bf16.mxu1 %v5928_v28  ;;  %v8172_v51 = vld [vmem:[%s15251_s1 + $0x10] ss:$8 sps:$4 sm:$0xff]   ;;  %v8173_v9 = vld [vmem:[%s15251_s1 + $0x24] ss:$8 sps:$4 sm:$0xff]  }
 0x7e9   : > { %6028 = vmatpush2.bf16.msra.mxu1 %v5927_v24  ;;  %v5925_v17 = vpack.c.bf16 %v5799_v34, %v5797_v11  ;;  %v5926_v2 = vpack.c.bf16 %v5800_v25, %v5798_v39 }
 0x7eb   : > { %6029 = vmatprep.subr.bf16.mxu1 %v5926_v2 }
 0x7ed   : > { %6030 = vmatpush2.bf16.msra.mxu1 %v5925_v17 }
 0x7f0   : > { %6032 = vmatmul.mubr.bf16.vlgmr.msra.gmra.mxu1 %v8167_v0 }
 0x7f1   : > { %7815 = vmatprep.mubr.msk.bf16.mxu1 %vm802_vm1, %v8170_v37 }
 0x7f8   : > { %6042 = vmatmul.mubr.bf16.gmra.mxu1 %v8172_v51 }
 0x7f9   : > { %7816 = vmatprep.mubr.msk.bf16.mxu1 %vm802_vm1, %v8173_v9 }
 0x800   : > { %6052 = vmatmul.mubr.bf16.gmra.mxu1 %v8175_v60 }
 0x801   : > { %7817 = vmatprep.mubr.msk.bf16.mxu1 %vm802_vm1, %v8176_v54 }
 0x808   : > { %6062 = vmatmul.mubr.bf16.gmra.mxu1 %v8178_v63 }
 0x867   : > { %v5341_v8 = vpop.f32.mrf.mxu0 }
 0x869   : > { %v5343_v31 = vpop.f32.mrf.mxu0 }
 0x86b   : > { %v5345_v19 = vpop.f32.mrf.mxu0 }
 0x86c   : > { %v5228_v49 = vpop.f32.mrf.mxu1 }
 0x86d   : > { %v5347_v30 = vpop.f32.mrf.mxu0  ;;  %v5342_v3 = vadd.f32 %v5341_v8, %v5228_v49 }
 0x86e   : > { %v5230_v5 = vpop.f32.mrf.mxu1 }
 0x86f   : > { %v5351_v29 = vpop.f32.mrf.mxu0  ;;  %v5344_v61 = vadd.f32 %v5343_v31, %v5230_v5  ;;  %v5420_v13 = vmul.f32 0.5, %v5342_v3 }
 0x870   : > { %v5232_v12 = vpop.f32.mrf.mxu1 }
 0x871   : > { %v5353_v6 = vpop.f32.mrf.mxu0  ;;  %v5346_v57 = vadd.f32 %v5345_v19, %v5232_v12  ;;  %v5421_v1 = vmul.f32 0.5, %v5344_v61  ;;  %8507 = vtanh.f32 %v5420_v13 }
 0x872   : > { %v5234_v45 = vpop.f32.mrf.mxu1 }
 0x873   : > { %v5355_v40 = vpop.f32.mrf.mxu0  ;;  %v5348_v56 = vadd.f32 %v5347_v30, %v5234_v45  ;;  %v5422_v32 = vmul.f32 0.5, %v5346_v57  ;;  %8509 = vtanh.f32 %v5421_v1 }
 0x874   : > { %v5238_v36 = vpop.f32.mrf.mxu1 }
 0x875   : > { %v13962_v55 = vpop.f32.mrf.mxu0  ;;  %v5352_v47 = vadd.f32 %v5351_v29, %v5238_v36  ;;  %v5423_v59 = vmul.f32 0.5, %v5348_v56  ;;  %8511 = vtanh.f32 %v5422_v32 }
 0x876   : > { %v5240_v43 = vpop.f32.mrf.mxu1 }
 0x877   : > { %v5361_v33 = vpop.f32.mrf.mxu0  ;;  %v5354_v15 = vadd.f32 %v5353_v6, %v5240_v43  ;;  %v5424_v28 = vmul.f32 0.5, %v5352_v47 }
 0x878   : > { %v5242_v14 = vpop.f32.mrf.mxu1 }
 0x879   : > { %v5363_v18 = vpop.f32.mrf.mxu0  ;;  %v5356_v39 = vadd.f32 %v5355_v40, %v5242_v14  ;;  %v5425_v17 = vmul.f32 0.5, %v5354_v15 }
 0x87a   : > { %v5244_v7 = vpop.f32.mrf.mxu1 }
 0x87b   : > { %v5365_v62 = vpop.f32.mrf.mxu0  ;;  %v5426_v8 = vmul.f32 0.5, %v5356_v39  ;;  %v5358_v6 = vadd.f32 %v13962_v55, %v5244_v7 }
 0x87c   : > { %v5248_v41 = vpop.f32.mrf.mxu1 }
 0x87d   : > { %v5362_v23 = vadd.f32 %v5361_v33, %v5248_v41  ;;  %v5367_v10 = vpop.f32.mrf.mxu0 }
 0x87e   : > { %v5250_v42 = vpop.f32.mrf.mxu1  ;;  %v8508_v61 = vpop.eup %8507 }
 0x87f   : > { %v5452_v38 = vadd.f32 0.01, %v5362_v23  ;;  %v5364_v27 = vadd.f32 %v5363_v18, %v5250_v42  ;;  %v5371_v48 = vpop.f32.mrf.mxu0  ;;  %v5427_v23 = vmul.f32 0.5, %v5358_v6  ;;  %v5436_v15 = vmul.f32 0.5, %v8508_v61  ;;  %v4445_v61 = vld [vmem:[%s9050_s28 + $0x8] sm:$0xff] }
 0x880   : > { %v5252_v53 = vpop.f32.mrf.mxu1  ;;  %v8510_v41 = vpop.eup %8509 }
 0x881   : > { %v5460_v50 = vmul.f32 0.5, %v5452_v38  ;;  %v5453_v58 = vadd.f32 0.01, %v5364_v27  ;;  %v5373_v26 = vpop.f32.mrf.mxu0  ;;  %v5366_v16 = vadd.f32 %v5365_v62, %v5252_v53 }
 0x882   : > { %v5254_v35 = vpop.f32.mrf.mxu1  ;;  %v8512_v7 = vpop.eup %8511 }
 0x883   : > { %v5461_v24 = vmul.f32 0.5, %v5453_v58  ;;  %v5375_v44 = vpop.f32.mrf.mxu0  ;;  %v5454_v4 = vadd.f32 0.01, %v5366_v16  ;;  %v5368_v46 = vadd.f32 %v5367_v10, %v5254_v35  ;;  %8513 = vtanh.f32 %v5460_v50 }
 0x884   : > { %v5258_v11 = vpop.f32.mrf.mxu1  ;;  %8515 = vtanh.f32 %v5423_v59 }
 0x885   : > { %v5372_v34 = vadd.f32 %v5371_v48, %v5258_v11  ;;  %v5377_v25 = vpop.f32.mrf.mxu0  ;;  %v5462_v2 = vmul.f32 0.5, %v5454_v4  ;;  %v5455_v0 = vadd.f32 0.01, %v5368_v46  ;;  %8517 = vtanh.f32 %v5461_v24 }
 0x886   : > { %v5260_v37 = vpop.f32.mrf.mxu1  ;;  %8519 = vtanh.f32 %v5424_v28  ;;  %v5437_v46 = vmul.f32 0.5, %v8510_v41 }
 0x887   : > { %v5456_v51 = vadd.f32 0.01, %v5372_v34  ;;  %v5374_v9 = vadd.f32 %v5373_v26, %v5260_v37  ;;  %v5381_v60 = vpop.f32.mrf.mxu0  ;;  %v5463_v54 = vmul.f32 0.5, %v5455_v0  ;;  %8521 = vtanh.f32 %v5462_v2 }
 0x888   : > { %v5262_v63 = vpop.f32.mrf.mxu1  ;;  %8523 = vtanh.f32 %v5425_v17  ;;  %v5444_v37 = vadd.f32 0.5, %v5436_v15 }
 0x889   : > { %v5464_v31 = vmul.f32 0.5, %v5456_v51  ;;  %v5457_v19 = vadd.f32 0.01, %v5374_v9  ;;  %v5383_v49 = vpop.f32.mrf.mxu0  ;;  %v5376_v30 = vadd.f32 %v5375_v44, %v5262_v63  ;;  %8525 = vtanh.f32 %v5463_v54 }
 0x88a   : > { %v5264_v5 = vpop.f32.mrf.mxu1  ;;  %v5438_v51 = vmul.f32 0.5, %v8512_v7 }
 0x88b   : > { %v5465_v29 = vmul.f32 0.5, %v5457_v19  ;;  %v5385_v12 = vpop.f32.mrf.mxu0  ;;  %8527 = vtanh.f32 %v5464_v31  ;;  %v5458_v45 = vadd.f32 0.01, %v5376_v30  ;;  %v5378_v40 = vadd.f32 %v5377_v25, %v5264_v5 }
 0x88c   : > { %v5268_v36 = vpop.f32.mrf.mxu1  ;;  %8529 = vtanh.f32 %v5426_v8  ;;  %v5445_v30 = vadd.f32 0.5, %v5437_v46 }
 0x88d   : > { %v5382_v43 = vadd.f32 %v5381_v60, %v5268_v36  ;;  %v5387_v33 = vpop.f32.mrf.mxu0  ;;  %8531 = vtanh.f32 %v5465_v29  ;;  %v5466_v14 = vmul.f32 0.5, %v5458_v45  ;;  %v5459_v18 = vadd.f32 0.01, %v5378_v40  ;;  %v4444_v29 = vld [vmem:[%s9050_s28] sm:$0xff] }
 0x88e   : > { %v5270_v3 = vpop.f32.mrf.mxu1 }
 0x88f   : > { %8533 = vtanh.f32 %v5382_v43  ;;  %v5384_v62 = vadd.f32 %v5383_v49, %v5270_v3  ;;  %v5391_v57 = vpop.f32.mrf.mxu0  ;;  %v5467_v10 = vmul.f32 0.5, %v5459_v18  ;;  %v5446_v18 = vadd.f32 0.5, %v5438_v51 }
 0x890   : > { %8535 = vtanh.f32 %v5466_v14  ;;  %v5272_v55 = vpop.f32.mrf.mxu1  ;;  %v8514_v42 = vpop.eup %8513 }
 0x891   : > { %8537 = vtanh.f32 %v5384_v62  ;;  %v5386_v13 = vadd.f32 %v5385_v12, %v5272_v55  ;;  %v5393_v56 = vpop.f32.mrf.mxu0  ;;  %v8516_v38 = vpop.eup %8515  ;;  %v5476_v50 = vmul.f32 0.5, %v8514_v42 }
 0x892   : > { %8539 = vtanh.f32 %v5467_v10  ;;  %v5274_v1 = vpop.f32.mrf.mxu1  ;;  %v8518_v32 = vpop.eup %8517  ;;  %v5439_v9 = vmul.f32 0.5, %v8516_v38 }
 0x893   : > { %8541 = vtanh.f32 %v5386_v13  ;;  %v5388_v27 = vadd.f32 %v5387_v33, %v5274_v1  ;;  %v5395_v48 = vpop.f32.mrf.mxu0  ;;  %v8520_v53 = vpop.eup %8519  ;;  %v5477_v24 = vmul.f32 0.5, %v8518_v32  ;;  %v5484_v34 = vadd.f32 0.5, %v5476_v50 }
 0x894   : > { %8543 = vtanh.f32 %v5427_v23  ;;  %v5278_v47 = vpop.f32.mrf.mxu1  ;;  %v8522_v59 = vpop.eup %8521  ;;  %v5440_v5 = vmul.f32 0.5, %v8520_v53  ;;  %v5447_v3 = vadd.f32 0.5, %v5439_v9 }
 0x895   : > { %8545 = vtanh.f32 %v5388_v27  ;;  %v5392_v58 = vadd.f32 %v5391_v57, %v5278_v47  ;;  %v5397_v26 = vpop.f32.mrf.mxu0  ;;  %v8524_v35 = vpop.eup %8523  ;;  %v5478_v25 = vmul.f32 0.5, %v8522_v59  ;;  %v5485_v63 = vadd.f32 0.5, %v5477_v24  ;;  %v4446_v27 = vld [vmem:[%s9050_s28 + $0x10] sm:$0xff] }
 0x896   : > { %v5280_v16 = vpop.f32.mrf.mxu1  ;;  %v8526_v4 = vpop.eup %8525  ;;  %v5532_v40 = vmul.f32 %v5484_v34, %v4444_v29  ;;  %v5448_v1 = vadd.f32 0.5, %v5440_v5  ;;  %v5441_v38 = vmul.f32 0.5, %v8524_v35 }
 0x897   : > { %8547 = vtanh.f32 %v5392_v58  ;;  %v5394_v44 = vadd.f32 %v5393_v56, %v5280_v16  ;;  %v5401_v28 = vpop.f32.mrf.mxu0  ;;  %v5479_v8 = vmul.f32 0.5, %v8526_v4  ;;  %v5486_v36 = vadd.f32 0.5, %v5478_v25 }
 0x898   : > { %v5282_v11 = vpop.f32.mrf.mxu1  ;;  %v8528_v39 = vpop.eup %8527  ;;  %v5533_v10 = vmul.f32 %v5485_v63, %v4445_v61  ;;  %v4449_v63 = vld [vmem:[%s9050_s28 + $0x28] sm:$0xff] }
 0x899   : > { %8549 = vtanh.f32 %v5394_v44  ;;  %v5396_v17 = vadd.f32 %v5395_v48, %v5282_v11  ;;  %v13965_v2 = vpop.f32.mrf.mxu0  ;;  %v8530_v0 = vpop.eup %8529  ;;  %v5480_v12 = vmul.f32 0.5, %v8528_v39  ;;  %v5487_v55 = vadd.f32 0.5, %v5479_v8  ;;  %v4447_v44 = vld [vmem:[%s9050_s28 + $0x18] sm:$0xff]  ;;  %v4448_v11 = vld [vmem:[%s9050_s28 + $0x20] sm:$0xff] }
 0x89a   : > { %v5284_v60 = vpop.f32.mrf.mxu1  ;;  %v8532_v54 = vpop.eup %8531  ;;  %v5534_v50 = vmul.f32 %v5486_v36, %v4446_v27  ;;  %v5442_v24 = vmul.f32 0.5, %v8530_v0 }
 0x89b   : > { %8551 = vtanh.f32 %v5396_v17  ;;  %v5398_v31 = vadd.f32 %v5397_v26, %v5284_v60  ;;  %v5405_v19 = vpop.f32.mrf.mxu0  ;;  %v5481_v62 = vmul.f32 0.5, %v8532_v54  ;;  %v5488_v48 = vadd.f32 0.5, %v5480_v12 }
 0x89c   : > { %v8534_v49 = vpop.eup %8533  ;;  %v5288_v6 = vpop.f32.mrf.mxu1  ;;  %v5535_v46 = vmul.f32 %v5487_v55, %v4447_v44  ;;  %v4451_v55 = vld [vmem:[%s9050_s28 + $0x38] sm:$0xff] }
 0x89d   : > { %v8536_v45 = vpop.eup %8535  ;;  %v5540_v43 = vmul.f32 %v8534_v49, %v5444_v37  ;;  %8553 = vtanh.f32 %v5398_v31  ;;  %v13968_v33 = vpop.f32.mrf.mxu0  ;;  %v5402_v57 = vadd.f32 %v5401_v28, %v5288_v6  ;;  %v5489_v28 = vadd.f32 0.5, %v5481_v62 }
 0x89e   : > { %v8538_v14 = vpop.eup %8537  ;;  %v13971_v41 = vpop.f32.mrf.mxu1  ;;  %v5482_v58 = vmul.f32 0.5, %v8536_v45  ;;  %v5449_v37 = vadd.f32 0.5, %v5441_v38  ;;  %v5536_v9 = vmul.f32 %v5488_v48, %v4448_v11 }
 0x89f   : > { %v8540_v23 = vpop.eup %8539  ;;  %v5548_v7 = vadd.f32 %v5540_v43, %v5532_v40  ;;  %v5541_v13 = vmul.f32 %v8538_v14, %v5445_v30  ;;  %v13973_v56 = vpop.f32.mrf.mxu0  ;;  %v5500_v32 = vmul.f32 0.5, %v5402_v57  ;;  %v5450_v30 = vadd.f32 0.5, %v5442_v24  ;;  %v4450_v14 = vld [vmem:[%s9050_s28 + $0x30] sm:$0xff] }
 0x8a0   : > { %v8542_v42 = vpop.eup %8541  ;;  %v5292_v47 = vpop.f32.mrf.mxu1  ;;  %v5483_v39 = vmul.f32 0.5, %v8540_v23  ;;  %v5490_v8 = vadd.f32 0.5, %v5482_v58  ;;  %v5537_v5 = vmul.f32 %v5489_v28, %v4449_v63 }
 0x8a1   : > { %v8544_v53 = vpop.eup %8543  ;;  %5572 = vst [vmem:[%s9050_s28] sm:$0xff] %v5548_v7  ;;  %v13977_v26 = vadd.f32 %v5541_v13, %v5533_v10  ;;  %v5542_v59 = vmul.f32 %v8542_v42, %v5446_v18  ;;  %v5413_v15 = vpop.f32.mrf.mxu0  ;;  %8555 = vtanh.f32 %v5500_v32  ;;  %v5406_v35 = vadd.f32 %v5405_v19, %v5292_v47 }
 0x8a2   : > { %v8546_v16 = vpop.eup %8545  ;;  %v13980_v4 = vpop.f32.mrf.mxu1  ;;  %v5443_v51 = vmul.f32 0.5, %v8544_v53  ;;  %8557 = vtanh.f32 %v5548_v7  ;;  %v5491_v12 = vadd.f32 0.5, %v5483_v39  ;;  %v5538_v61 = vmul.f32 %v5490_v8, %v4450_v14 }
 0x8a3   : > { %5573 = vst [vmem:[%s9050_s28 + $0x8] sm:$0xff] %v13977_v26  ;;  %v5550_v34 = vadd.f32 %v5542_v59, %v5534_v50  ;;  %v5543_v25 = vmul.f32 %v8546_v16, %v5447_v3  ;;  %v5502_v0 = vmul.f32 0.5, %v5406_v35  ;;  %v13987_v54 = vpop.f32.mrf.mxu0  ;;  %v5404_v47 = vadd.f32 %v13965_v2, %v13971_v41 }
 0x8a4   : > { %v8548_v17 = vpop.eup %8547  ;;  %v13985_v60 = vpop.f32.mrf.mxu1  ;;  %v5451_v43 = vadd.f32 0.5, %v5443_v51  ;;  %v5539_v13 = vmul.f32 %v5491_v12, %v4451_v55  ;;  %v5408_v44 = vadd.f32 %v13968_v33, %v13980_v4 }
 0x8a5   : > { %5574 = vst [vmem:[%s9050_s28 + $0x10] sm:$0xff] %v5550_v34  ;;  %v13991_v31 = vadd.f32 %v5543_v25, %v5535_v46  ;;  %v5544_v19 = vmul.f32 %v8548_v17, %v5448_v1  ;;  %8559 = vtanh.f32 %v5502_v0  ;;  %v5417_v3 = vpop.f32.mrf.mxu0  ;;  %v5501_v24 = vmul.f32 0.5, %v5404_v47 }
 0x8a6   : > { %v8550_v49 = vpop.eup %8549  ;;  %v5300_v29 = vpop.f32.mrf.mxu1  ;;  %8561 = vtanh.f32 %v5550_v34  ;;  %v5503_v17 = vmul.f32 0.5, %v5408_v44 }
 0x8a7   : > { %5575 = vst [vmem:[%s9050_s28 + $0x18] sm:$0xff] %v13991_v31  ;;  %v13995_v6 = vadd.f32 %v5544_v19, %v5536_v9  ;;  %v5545_v45 = vmul.f32 %v8550_v49, %v5449_v37  ;;  %v5414_v40 = vadd.f32 %v5413_v15, %v5300_v29 }
 0x8a8   : > { %v8552_v36 = vpop.eup %8551  ;;  %v13998_v18 = vpop.f32.mrf.mxu1 }
 0x8a9   : > { %5576 = vst [vmem:[%s9050_s28 + $0x20] sm:$0xff] %v13995_v6  ;;  %v5553_v62 = vadd.f32 %v5545_v45, %v5537_v5  ;;  %v5546_v57 = vmul.f32 %v8552_v36, %v5450_v30  ;;  %v5505_v23 = vmul.f32 0.5, %v5414_v40 }
 0x8aa   : > { %v8554_v10 = vpop.eup %8553  ;;  %v5304_v7 = vpop.f32.mrf.mxu1 }
 0x8ab   : > { %5577 = vst [vmem:[%s9050_s28 + $0x28] sm:$0xff] %v5553_v62  ;;  %v14004_v42 = vadd.f32 %v5546_v57, %v5538_v61  ;;  %v5547_v1 = vmul.f32 %v8554_v10, %v5451_v43  ;;  %v5418_v38 = vadd.f32 %v5417_v3, %v5304_v7  ;;  %8563 = vtanh.f32 %v5505_v23 }
 0x8ac   : > { %8565 = vtanh.f32 %v5553_v62 }
 0x8ad   : > { %5578 = vst [vmem:[%s9050_s28 + $0x30] sm:$0xff] %v14004_v42  ;;  %v5555_v27 = vadd.f32 %v5547_v1, %v5539_v13  ;;  %v5507_v48 = vmul.f32 0.5, %v5418_v38 }
 0x8ae   : > { %v8556_v32 = vpop.eup %8555 }
 0x8af   : > { %5579 = vst [vmem:[%s9050_s28 + $0x38] sm:$0xff] %v5555_v27  ;;  %v5516_v53 = vmul.f32 0.5, %v8556_v32  ;;  %8567 = vtanh.f32 %v5507_v48  ;;  %v8558_v58 = vpop.eup %8557 }
 0x8b0   : > { %v6033_v50 = vpop.f32.mrf.mxu1  ;;  %8569 = vtanh.f32 %v5555_v27 }
 0x8b1   : > { %v5524_v59 = vadd.f32 0.5, %v5516_v53  ;;  %v6072_v46 = vmul.f32 0.5, %v6033_v50  ;;  %8571 = vtanh.f32 %v5501_v24 }
 0x8b2   : > { %v6035_v15 = vpop.f32.mrf.mxu1  ;;  %v8560_v16 = vpop.eup %8559 }
 0x8b3   : > { %v14013_v28 = vmul.f32 %v8558_v58, %v5524_v59  ;;  %v5518_v35 = vmul.f32 0.5, %v8560_v16  ;;  %v6073_v39 = vmul.f32 0.5, %v6035_v15  ;;  %v8562_v25 = vpop.eup %8561  ;;  %8573 = vtanh.f32 %v6072_v46 }
 0x8b4   : > { %v6037_v11 = vpop.f32.mrf.mxu1  ;;  %v5412_v15 = vadd.f32 %v13973_v56, %v13985_v60 }
 0x8b5   : > { %15816 = vst [vmem:[#allocation36_spill] sm:$0xff] %v14013_v28  ;;  %v5526_v34 = vadd.f32 0.5, %v5518_v35  ;;  %v6074_v2 = vmul.f32 0.5, %v6037_v11  ;;  %6297 = vrot.lane.b32.xlu0 %v14013_v28, %s15631_s14  ;;  %8575 = vtanh.f32 %v6073_v39 }
 0x8b6   : > { %v6039_v41 = vpop.f32.mrf.mxu1 }
 0x8b7   : > { %v14017_v37 = vmul.f32 %v8562_v25, %v5526_v34  ;;  %v6075_v33 = vmul.f32 0.5, %v6039_v41  ;;  %8577 = vtanh.f32 %v6074_v2 }
 0x8b8   : > { %v6043_v4 = vpop.f32.mrf.mxu1  ;;  %v8564_v51 = vpop.eup %8563  ;;  %8579 = vtanh.f32 %v5503_v17 }
 0x8b9   : > { %15817 = vst [vmem:[#allocation61_spill] sm:$0xff] %v14017_v37  ;;  %v6088_v9 = vadd.f32 0.01, %v6043_v4  ;;  %v5521_v0 = vmul.f32 0.5, %v8564_v51  ;;  %6299 = vrot.lane.b32.xlu1 %v14017_v37, %s15631_s14  ;;  %6237 = vrot.lane.b32.xlu0 %v14013_v28, %s15628_s24  ;;  %v8566_v49 = vpop.eup %8565  ;;  %8581 = vtanh.f32 %v6075_v33  ;;  %v5504_v4 = vmul.f32 0.5, %v5412_v15 }
 0x8ba   : > { %v6045_v63 = vpop.f32.mrf.mxu1  ;;  %v5416_v51 = vadd.f32 %v13987_v54, %v13998_v18  ;;  %v5595_v18 = vld [vmem:[%s9048_s29 + $0x8] sm:$0xff] }
 0x8bb   : > { %v6092_v8 = vmul.f32 0.5, %v6088_v9  ;;  %v6089_v19 = vadd.f32 0.01, %v6045_v63  ;;  %v5529_v30 = vadd.f32 0.5, %v5521_v0  ;;  %v5594_v63 = vld [vmem:[%s9048_s29] sm:$0xff] }
 0x8bc   : > { %v6047_v5 = vpop.f32.mrf.mxu1  ;;  %v8568_v29 = vpop.eup %8567 }
 0x8bd   : > { %8583 = vtanh.f32 %v6092_v8  ;;  %v6093_v12 = vmul.f32 0.5, %v6089_v19  ;;  %v6090_v45 = vadd.f32 0.01, %v6047_v5  ;;  %v14023_v40 = vmul.f32 %v8566_v49, %v5529_v30  ;;  %6239 = vrot.lane.b32.xlu1 %v14017_v37, %s15628_s24  ;;  %6537 = vrot.lane.b32.xlu0 %v14013_v28, %s15593_s26  ;;  %v8570_v57 = vpop.eup %8569 }
 0x8be   : > { %v5523_v36 = vmul.f32 0.5, %v8568_v29  ;;  %v6049_v43 = vpop.f32.mrf.mxu1  ;;  %v8572_v7 = vpop.eup %8571 }
 0x8bf   : > { %8585 = vtanh.f32 %v6093_v12  ;;  %v6094_v14 = vmul.f32 0.5, %v6090_v45  ;;  %v6091_v3 = vadd.f32 0.01, %v6049_v43  ;;  %v5517_v32 = vmul.f32 0.5, %v8572_v7 }
 0x8c0   : > { %8587 = vtanh.f32 %v13977_v26  ;;  %v5531_v61 = vadd.f32 0.5, %v5523_v36  ;;  %v6053_v62 = vpop.f32.mrf.mxu1  ;;  %v8574_v26 = vpop.eup %8573 }
 0x8c1   : > { %8589 = vtanh.f32 %v6094_v14  ;;  %v6095_v23 = vmul.f32 0.5, %v6091_v3  ;;  %6539 = vrot.lane.b32.xlu1 %v14017_v37, %s15593_s26  ;;  %6177 = vrot.lane.b32.xlu0 %v14013_v28, %s15592_s20  ;;  %v6080_v47 = vmul.f32 0.5, %v8574_v26  ;;  %v5525_v11 = vadd.f32 0.5, %v5517_v32 }
 0x8c2   : > { %v14030_v10 = vmul.f32 %v8570_v57, %v5531_v61  ;;  %8591 = vtanh.f32 %v6053_v62  ;;  %v6055_v55 = vpop.f32.mrf.mxu1  ;;  %v8576_v1 = vpop.eup %8575  ;;  %v5506_v32 = vmul.f32 0.5, %v5416_v51 }
 0x8c3   : > { %8593 = vtanh.f32 %v6095_v23  ;;  %v6084_v34 = vadd.f32 0.5, %v6080_v47  ;;  %v5596_v23 = vld [vmem:[%s9048_s29 + $0x10] sm:$0xff]  ;;  %v5597_v47 = vld [vmem:[%s9048_s29 + $0x18] sm:$0xff] }
 0x8c4   : > { %15818 = vst [vmem:[#allocation59_spill] sm:$0xff] %v14030_v10  ;;  %8595 = vtanh.f32 %v6055_v55  ;;  %v6057_v13 = vpop.f32.mrf.mxu1  ;;  %v8578_v27 = vpop.eup %8577 }
 0x8c5   : > { %8597 = vtanh.f32 %v6057_v13  ;;  %6179 = vrot.lane.b32.xlu1 %v14017_v37, %s15592_s20  ;;  %6477 = vrot.lane.b32.xlu0 %v14013_v28, %s15514_s25  ;;  %v8580_v48 = vpop.eup %8579  ;;  %v6082_v16 = vmul.f32 0.5, %v8578_v27 }
 0x8c6   : > { %8599 = vtanh.f32 %v13991_v31  ;;  %v6059_v38 = vpop.f32.mrf.mxu1  ;;  %v8582_v50 = vpop.eup %8581  ;;  %v6081_v31 = vmul.f32 0.5, %v8576_v1  ;;  %v5519_v39 = vmul.f32 0.5, %v8580_v48 }
 0x8c7   : > { %8601 = vtanh.f32 %v6059_v38  ;;  %v6083_v2 = vmul.f32 0.5, %v8582_v50  ;;  %v6086_v0 = vadd.f32 0.5, %v6082_v16 }
 0x8c8   : > { %v6063_v53 = vpop.f32.mrf.mxu1  ;;  %v6085_v9 = vadd.f32 0.5, %v6081_v31  ;;  %v5527_v54 = vadd.f32 0.5, %v5519_v39 }
 0x8c9   : > { %v6112_v58 = vmul.f32 0.5, %v6063_v53  ;;  %6479 = vrot.lane.b32.xlu1 %v14017_v37, %s15514_s25  ;;  %6417 = vrot.lane.b32.xlu0 %v14013_v28, %s15595_s13  ;;  %v6087_v14 = vadd.f32 0.5, %v6083_v2 }
 0x8ca   : > { %v8584_v59 = vpop.eup %8583  ;;  %v6065_v24 = vpop.f32.mrf.mxu1 }
 0x8cb   : > { %v6100_v44 = vmul.f32 0.5, %v8584_v59  ;;  %8603 = vtanh.f32 %v6112_v58  ;;  %v6113_v35 = vmul.f32 0.5, %v6065_v24 }
 0x8cc   : > { %v8586_v46 = vpop.eup %8585  ;;  %v6067_v41 = vpop.f32.mrf.mxu1 }
 0x8cd   : > { %v8588_v56 = vpop.eup %8587  ;;  %v6104_v60 = vadd.f32 0.5, %v6100_v44  ;;  %v6101_v25 = vmul.f32 0.5, %v8586_v46  ;;  %8605 = vtanh.f32 %v6113_v35  ;;  %v6114_v17 = vmul.f32 0.5, %v6067_v41  ;;  %6419 = vrot.lane.b32.xlu1 %v14017_v37, %s15595_s13  ;;  %6357 = vrot.lane.b32.xlu0 %v14013_v28, %s15594_s30 }
 0x8ce   : > { %v8590_v33 = vpop.eup %8589  ;;  %v6069_v8 = vpop.f32.mrf.mxu1  ;;  %v14054_v12 = vmul.f32 %v8588_v56, %v5525_v11 }
 0x8cf   : > { %v8592_v19 = vpop.eup %8591  ;;  %v6128_v49 = vmul.f32 %v6104_v60, %v5594_v63  ;;  %v6105_v30 = vadd.f32 0.5, %v6101_v25  ;;  %v6102_v5 = vmul.f32 0.5, %v8590_v33  ;;  %8607 = vtanh.f32 %v6114_v17 }
 0x8d0   : > { %v8594_v29 = vpop.eup %8593  ;;  %15819 = vst [vmem:[#allocation63_spill] sm:$0xff] %v14054_v12  ;;  %v6132_v45 = vmul.f32 %v8592_v19, %v6084_v34  ;;  %v6115_v36 = vmul.f32 0.5, %v6069_v8 }
 0x8d1   : > { %v8596_v43 = vpop.eup %8595  ;;  %v6129_v3 = vmul.f32 %v6105_v30, %v5595_v18  ;;  %v6106_v61 = vadd.f32 0.5, %v6102_v5  ;;  %v6103_v62 = vmul.f32 0.5, %v8594_v29  ;;  %6359 = vrot.lane.b32.xlu1 %v14017_v37, %s15594_s30  ;;  %6309 = vrot.lane.b32.xlu0 %v14054_v12, %s15631_s14 }
 0x8d2   : > { %v8598_v57 = vpop.eup %8597  ;;  %v6136_v55 = vadd.f32 %v6132_v45, %v6128_v49  ;;  %v6133_v7 = vmul.f32 %v8596_v43, %v6085_v9  ;;  %8609 = vtanh.f32 %v6115_v36 }
 0x8d3   : > { %v8600_v13 = vpop.eup %8599  ;;  %8611 = vtanh.f32 %v5504_v4  ;;  %v6130_v26 = vmul.f32 %v6106_v61, %v5596_v23  ;;  %v6107_v1 = vadd.f32 0.5, %v6103_v62  ;;  %v6134_v38 = vmul.f32 %v8598_v57, %v6086_v0 }
 0x8d4   : > { %v8602_v27 = vpop.eup %8601  ;;  %v14062_v48 = vmul.f32 %v8600_v13, %v5527_v54  ;;  %8613 = vtanh.f32 %v6136_v55  ;;  %6148 = vst [vmem:[%s9048_s29] sm:$0xff] %v6136_v55  ;;  %v6137_v53 = vadd.f32 %v6133_v7, %v6129_v3 }
 0x8d5   : > { %v6131_v50 = vmul.f32 %v6107_v1, %v5597_v47  ;;  %v6138_v58 = vadd.f32 %v6134_v38, %v6130_v26  ;;  %v6135_v59 = vmul.f32 %v8602_v27, %v6087_v14  ;;  %6249 = vrot.lane.b32.xlu0 %v14054_v12, %s15628_s24  ;;  %v7819_v26 = vld [vmem:[%s15254_s4 + $0x2] ss:$8 sm:$0x3]  ;;  %v7818_v27 = vld [vmem:[%s15254_s4 + $0x1] ss:$8 sm:$0x3] }
 0x8d6   : > { %15820 = vst [vmem:[#allocation43_spill] sm:$0xff] %v14062_v48  ;;  %8615 = vtanh.f32 %v6137_v53  ;;  %6149 = vst [vmem:[%s9048_s29 + $0x8] sm:$0xff] %v6137_v53  ;;  %6311 = vrot.lane.b32.xlu1 %v14062_v48, %s15631_s14  ;;  %v14231_v47 = vrot.slane %v7819_v26, %v9192_v22 }
 0x8d7   : > { %8617 = vtanh.f32 %v6138_v58  ;;  %6150 = vst [vmem:[%s9048_s29 + $0x10] sm:$0xff] %v6138_v58  ;;  %v6139_v15 = vadd.f32 %v6135_v59, %v6131_v50  ;;  %v14242_v59 = vrot.slane %v7818_v27, %v9190_v21 }
 0x8d8   : > { %v8604_v31 = vpop.eup %8603  ;;  %8619 = vtanh.f32 %v5506_v32  ;;  %v14228_v32 = vrot.slane %v7819_v26, %v9190_v21 }
 0x8d9   : > { %8621 = vtanh.f32 %v6139_v15  ;;  %6151 = vst [vmem:[%s9048_s29 + $0x18] sm:$0xff] %v6139_v15  ;;  %v6120_v24 = vmul.f32 0.5, %v8604_v31  ;;  %6549 = vrot.lane.b32.xlu0 %v14054_v12, %s15593_s26  ;;  %v14245_v15 = vrot.slane %v7818_v27, %v9192_v22 }
 0x8da   : > { %v8606_v16 = vpop.eup %8605  ;;  %6251 = vrot.lane.b32.xlu1 %v14062_v48, %s15628_s24  ;;  %8623 = vtanh.f32 %v13995_v6 }
 0x8db   : > { %v6121_v35 = vmul.f32 0.5, %v8606_v16  ;;  %v6124_v11 = vadd.f32 0.5, %v6120_v24  ;;  %8625 = vtanh.f32 %v14004_v42 }
 0x8dc   : > { %v8608_v44 = vpop.eup %8607 }
 0x8dd   : > { %v6122_v46 = vmul.f32 0.5, %v8608_v44  ;;  %6189 = vrot.lane.b32.xlu0 %v14054_v12, %s15592_s20  ;;  %v6125_v2 = vadd.f32 0.5, %v6121_v35 }
 0x8de   : > { %6551 = vrot.lane.b32.xlu1 %v14062_v48, %s15593_s26 }
 0x8df   : > { %v8610_v39 = vpop.eup %8609  ;;  %v6126_v60 = vadd.f32 0.5, %v6122_v46 }
 0x8e0   : > { %v8612_v34 = vpop.eup %8611  ;;  %v6123_v41 = vmul.f32 0.5, %v8610_v39 }
 0x8e1   : > { %v8614_v56 = vpop.eup %8613  ;;  %6489 = vrot.lane.b32.xlu0 %v14054_v12, %s15514_s25  ;;  %v5520_v4 = vmul.f32 0.5, %v8612_v34 }
 0x8e2   : > { %v14083_v25 = vmul.f32 %v8614_v56, %v6124_v11  ;;  %6191 = vrot.lane.b32.xlu1 %v14062_v48, %s15592_s20  ;;  %v6127_v17 = vadd.f32 0.5, %v6123_v41 }
 0x8e3   : > { %v8616_v6 = vpop.eup %8615  ;;  %v5528_v8 = vadd.f32 0.5, %v5520_v4 }
 0x8e4   : > { %15821 = vst [vmem:[#allocation70_spill] sm:$0xff] %v14083_v25  ;;  %v8618_v33 = vpop.eup %8617  ;;  %6152 = vst [vmem:[%s9044_s10] sm:$0xff] %v14083_v25  ;;  %v14091_v51 = vmul.f32 %v8616_v6, %v6125_v2  ;;  %v7823_v2 = vld [vmem:[%s15254_s4 + $0x7] ss:$8 sm:$0x3] }
 0x8e5   : > { %v8620_v9 = vpop.eup %8619  ;;  %v14093_v42 = vmul.f32 %v8618_v33, %v6126_v60  ;;  %6429 = vrot.lane.b32.xlu0 %v14054_v12, %s15595_s13  ;;  %v14271_v4 = vrot.slane %v7823_v2, %v9190_v21 }
 0x8e6   : > { %15822 = vst [vmem:[#allocation26_spill] sm:$0xff] %v14091_v51  ;;  %v8622_v0 = vpop.eup %8621  ;;  %6153 = vst [vmem:[%s9044_s10 + $0x8] sm:$0xff] %v14091_v51  ;;  %6491 = vrot.lane.b32.xlu1 %v14062_v48, %s15514_s25  ;;  %v5522_v19 = vmul.f32 0.5, %v8620_v9  ;;  %v14274_v9 = vrot.slane %v7823_v2, %v9192_v22 }
 0x8e7   : > { %15823 = vst [vmem:[#allocation49_spill] sm:$0xff] %v14093_v42  ;;  %6154 = vst [vmem:[%s9044_s10 + $0x10] sm:$0xff] %v14093_v42  ;;  %v14103_v63 = vmul.f32 %v8622_v0, %v6127_v17  ;;  %v8624_v49 = vpop.eup %8623  ;;  %v6172_v0 = vld [vmem:[%s15254_s4] ss:$8 sm:$0x3] }
 0x8e8   : > { %v14111_v30 = vmul.f32 %v8624_v49, %v5528_v8  ;;  %v5530_v5 = vadd.f32 0.5, %v5522_v19  ;;  %v8626_v29 = vpop.eup %8625  ;;  %v14305_v26 = vrot.slane %v6172_v0, %v9192_v22 }
 0x8e9   : > { %15824 = vst [vmem:[#allocation23_spill] sm:$0xff] %v14103_v63  ;;  %6155 = vst [vmem:[%s9044_s10 + $0x18] sm:$0xff] %v14103_v63  ;;  %6369 = vrot.lane.b32.xlu0 %v14054_v12, %s15594_s30  ;;  %s8721_s10 = scalar_lea.vmem %s8720_s18, 1024 }
 0x8ea   : > { %6431 = vrot.lane.b32.xlu1 %v14062_v48, %s15595_s13  ;;  %15825 = vst [vmem:[#allocation54_spill] sm:$0xff] %v14111_v30  ;;  %v14117_v54 = vmul.f32 %v8626_v29, %v5530_v5  ;;  %p8723_p6 = scmp.lt.s32.totalorder %s8721_s10, %s8715_s27 }
 0x8ec   : > { %15826 = vst [vmem:[#allocation48_spill] sm:$0xff] %v14117_v54  ;;  %p8724_p7 = por %p8723_p6, %p8722_p5 }
 0x8ed   : > { %6241 = vrot.lane.b32.xlu0 %v14111_v30, %s15628_s24 }
 0x8ee   : > { %6371 = vrot.lane.b32.xlu1 %v14062_v48, %s15594_s30  ;;  %p8725_p8 = pnand %p8724_p7, %p8718_p4 }
 0x8f1   : > { %6541 = vrot.lane.b32.xlu0 %v14111_v30, %s15593_s26 }
 0x8f2   : > { %6243 = vrot.lane.b32.xlu1 %v14117_v54, %s15628_s24 }
 0x8f5   : > { %6181 = vrot.lane.b32.xlu0 %v14111_v30, %s15592_s20 }
 0x8f6   : > { %6543 = vrot.lane.b32.xlu1 %v14117_v54, %s15593_s26 }
 0x8f9   : > { %6481 = vrot.lane.b32.xlu0 %v14111_v30, %s15514_s25 }
 0x8fa   : > { %6183 = vrot.lane.b32.xlu1 %v14117_v54, %s15592_s20 }
 0x8fd   : > { %6421 = vrot.lane.b32.xlu0 %v14111_v30, %s15595_s13 }
 0x8fe   : > { %6483 = vrot.lane.b32.xlu1 %v14117_v54, %s15514_s25 }
 0x901   : > { %6361 = vrot.lane.b32.xlu0 %v14111_v30, %s15594_s30 }
 0x902   : > { %6423 = vrot.lane.b32.xlu1 %v14117_v54, %s15595_s13 }
 0x905   : > { %6601 = vrot.lane.b32.xlu0 %v14111_v30, %s15596_s23 }
 0x906   : > { %6363 = vrot.lane.b32.xlu1 %v14117_v54, %s15594_s30 }
 0x909   : > { %6253 = vrot.lane.b32.xlu0 %v14023_v40, %s15628_s24 }
 0x90a   : > { %6603 = vrot.lane.b32.xlu1 %v14117_v54, %s15596_s23 }
 0x90d   : > { %6553 = vrot.lane.b32.xlu0 %v14023_v40, %s15593_s26 }
 0x90e   : > { %6255 = vrot.lane.b32.xlu1 %v14030_v10, %s15628_s24 }
 0x911   : > { %6193 = vrot.lane.b32.xlu0 %v14023_v40, %s15592_s20 }
 0x912   : > { %6555 = vrot.lane.b32.xlu1 %v14030_v10, %s15593_s26 }
 0x915   : > { %6493 = vrot.lane.b32.xlu0 %v14023_v40, %s15514_s25 }
 0x916   : > { %6195 = vrot.lane.b32.xlu1 %v14030_v10, %s15592_s20 }
 0x919   : > { %6433 = vrot.lane.b32.xlu0 %v14023_v40, %s15595_s13 }
 0x91a   : > { %6495 = vrot.lane.b32.xlu1 %v14030_v10, %s15514_s25 }
 0x91d   : > { %6373 = vrot.lane.b32.xlu0 %v14023_v40, %s15594_s30 }
 0x91e   : > { %6435 = vrot.lane.b32.xlu1 %v14030_v10, %s15595_s13 }
 0x921   : > { %6293 = vrot.lane.b32.xlu0 %v14083_v25, %s15631_s14 }
 0x922   : > { %6375 = vrot.lane.b32.xlu1 %v14030_v10, %s15594_s30 }
 0x925   : > { %6233 = vrot.lane.b32.xlu0 %v14083_v25, %s15628_s24 }
 0x926   : > { %6295 = vrot.lane.b32.xlu1 %v14093_v42, %s15631_s14 }
 0x927   : > { %v6298_v18 = vpop.permute.xlu0 %6297 }
 0x929   : > { %6533 = vrot.lane.b32.xlu0 %v14083_v25, %s15593_s26 }
 0x92a   : > { %6235 = vrot.lane.b32.xlu1 %v14093_v42, %s15628_s24 }
 0x92b   : > { %v6300_v45 = vpop.permute.xlu1 %6299  ;;  %v6238_v36 = vpop.permute.xlu0 %6237 }
 0x92d   : > { %6173 = vrot.lane.b32.xlu0 %v14083_v25, %s15592_s20 }
 0x92e   : > { %6535 = vrot.lane.b32.xlu1 %v14093_v42, %s15593_s26 }
 0x92f   : > { %v6240_v43 = vpop.permute.xlu1 %6239  ;;  %v6538_v14 = vpop.permute.xlu0 %6537 }
 0x931   : > { %6413 = vrot.lane.b32.xlu0 %v14083_v25, %s15595_s13 }
 0x932   : > { %6175 = vrot.lane.b32.xlu1 %v14093_v42, %s15592_s20 }
 0x933   : > { %v14187_v3 = vpop.permute.xlu1 %6539  ;;  %v14189_v61 = vpop.permute.xlu0 %6177 }
 0x935   : > { %6473 = vrot.lane.b32.xlu0 %v14083_v25, %s15514_s25 }
 0x936   : > { %6415 = vrot.lane.b32.xlu1 %v14093_v42, %s15595_s13 }
 0x937   : > { %v14195_v62 = vpop.permute.xlu1 %6179  ;;  %v14197_v57 = vpop.permute.xlu0 %6477 }
 0x939   : > { %6305 = vrot.lane.b32.xlu0 %v14091_v51, %s15631_s14 }
 0x93a   : > { %6475 = vrot.lane.b32.xlu1 %v14093_v42, %s15514_s25 }
 0x93b   : > { %v14203_v23 = vpop.permute.xlu1 %6479  ;;  %v14205_v55 = vpop.permute.xlu0 %6417 }
 0x93d   : > { %6613 = vrot.lane.b32.xlu0 %v14023_v40, %s15596_s23 }
 0x93e   : > { %6307 = vrot.lane.b32.xlu1 %v14103_v63, %s15631_s14 }
 0x93f   : > { %v14211_v7 = vpop.permute.xlu1 %6419  ;;  %v14213_v13 = vpop.permute.xlu0 %6357 }
 0x941   : > { %6245 = vrot.lane.b32.xlu0 %v14091_v51, %s15628_s24 }
 0x942   : > { %6615 = vrot.lane.b32.xlu1 %v14030_v10, %s15596_s23 }
 0x943   : > { %v14222_v1 = vpop.permute.xlu1 %6359  ;;  %v6310_v38 = vpop.permute.xlu0 %6309 }
 0x944   : > { %v6319_v53 = vsel %vm516_vm6, %v6298_v18, %v6310_v38  ;;  %v6325_v50 = vsel %vm516_vm6, %v6310_v38, %v6298_v18 }
 0x945   : > { %6545 = vrot.lane.b32.xlu0 %v14091_v51, %s15593_s26  ;;  %v6344_v46 = vmul.f32 %v14228_v32, %v6325_v50  ;;  %v6345_v11 = vmul.f32 %v14231_v47, %v6319_v53 }
 0x946   : > { %6355 = vrot.lane.b32.xlu1 %v14093_v42, %s15594_s30 }
 0x947   : > { %v6250_v31 = vpop.permute.xlu0 %6249 }
 0x948   : > { %v6312_v58 = vpop.permute.xlu1 %6311  ;;  %v6259_v44 = vsel %vm478_vm7, %v6238_v36, %v6250_v31  ;;  %v6265_v35 = vsel %vm478_vm7, %v6250_v31, %v6238_v36  ;;  %v7822_v31 = vld [vmem:[%s15254_s4 + $0x6] ss:$8 sm:$0x3] }
 0x949   : > { %v6320_v16 = vsel %vm516_vm6, %v6300_v45, %v6312_v58  ;;  %v6326_v24 = vsel %vm516_vm6, %v6312_v58, %v6300_v45  ;;  %6185 = vrot.lane.b32.xlu0 %v14091_v51, %s15592_s20  ;;  %v14280_v8 = vmul.f32 %v14242_v59, %v6265_v35  ;;  %v14283_v19 = vmul.f32 %v14245_v15, %v6259_v44 }
 0x94a   : > { %v6346_v39 = vmul.f32 %v14228_v32, %v6326_v24  ;;  %v6347_v34 = vmul.f32 %v14231_v47, %v6320_v16  ;;  %6247 = vrot.lane.b32.xlu1 %v14103_v63, %s15628_s24 }
 0x94b   : > { %v6550_v60 = vpop.permute.xlu0 %6549 }
 0x94c   : > { %v6666_v41 = vpack.c.bf16 %v6346_v39, %v6344_v46  ;;  %v6252_v56 = vpop.permute.xlu1 %6251  ;;  %v6667_v6 = vpack.c.bf16 %v6347_v34, %v6345_v11  ;;  %v6559_v29 = vsel %vm668_vm11, %v6538_v14, %v6550_v60  ;;  %v6565_v18 = vsel %vm668_vm11, %v6550_v60, %v6538_v14  ;;  %v8181_v34 = vld [vmem:[%s15253_s3 + $0x4] ss:$16 sps:$4 sm:$0xff]  }
 0x94d   : > { %v6260_v17 = vsel %vm478_vm7, %v6240_v43, %v6252_v56  ;;  %v6266_v33 = vsel %vm478_vm7, %v6252_v56, %v6240_v43  ;;  %6425 = vrot.lane.b32.xlu0 %v14091_v51, %s15595_s13  ;;  %v14302_v43 = vrot.slane %v6172_v0, %v9190_v21  ;;  %v14325_v16 = vmul.f32 %v14271_v4, %v6559_v29 }
 0x94e   : > { %v14286_v49 = vmul.f32 %v14242_v59, %v6266_v33  ;;  %v14289_v5 = vmul.f32 %v14245_v15, %v6260_v17  ;;  %6914 = vmatprep.subr.bf16.mxu0 %v6667_v6  ;;  %6599 = vrot.lane.b32.xlu1 %v14017_v37, %s15596_s23  ;;  %v14328_v24 = vmul.f32 %v14274_v9, %v6565_v18  ;;  %v7821_v6 = vld [vmem:[%s15254_s4 + $0x5] ss:$8 sm:$0x3] }
 0x94f   : > { %6915 = vmatpush1.bf16.msra.mxu0 %v6666_v41  ;;  %v6190_v38 = vpop.permute.xlu0 %6189  ;;  %v14343_v46 = vrot.slane %v7822_v31, %v9190_v21  ;;  %v14346_v11 = vrot.slane %v7822_v31, %v9192_v22  ;;  %v14384_v18 = vrot.slane %v7821_v6, %v9190_v21  ;;  %6946 = vmatprep.mubr.bf16.mxu0 %v8181_v34 }
 0x950   : > { %v6552_v36 = vpop.permute.xlu1 %6551  ;;  %v6199_v50 = vsel %vm440_vm8, %v14189_v61, %v6190_v38  ;;  %v6205_v58 = vsel %vm440_vm8, %v6190_v38, %v14189_v61 }
 0x951   : > { %v6560_v27 = vsel %vm668_vm11, %v14187_v3, %v6552_v36  ;;  %v6566_v53 = vsel %vm668_vm11, %v6552_v36, %v14187_v3  ;;  %6485 = vrot.lane.b32.xlu0 %v14091_v51, %s15514_s25  ;;  %15827 = vst [vmem:[#allocation65_spill] sm:$0xff] %v14343_v46  ;;  %15828 = vst [vmem:[#allocation32_spill] sm:$0xff] %v14346_v11  ;;  %v14366_v17 = vmul.f32 %v14302_v43, %v6205_v58 }
 0x952   : > { %v14331_v3 = vmul.f32 %v14271_v4, %v6560_v27  ;;  %v14334_v44 = vmul.f32 %v14274_v9, %v6566_v53  ;;  %6547 = vrot.lane.b32.xlu1 %v14103_v63, %s15593_s26  ;;  %v14369_v33 = vmul.f32 %v14305_v26, %v6199_v50  ;;  %v14387_v36 = vrot.slane %v7821_v6, %v9192_v22 }
 0x953   : > { %v6490_v39 = vpop.permute.xlu0 %6489 }
 0x954   : > { %v6192_v35 = vpop.permute.xlu1 %6191  ;;  %v6499_v56 = vsel %vm630_vm12, %v14197_v57, %v6490_v39  ;;  %v6505_v60 = vsel %vm630_vm12, %v6490_v39, %v14197_v57 }
 0x955   : > { %v6200_v2 = vsel %vm440_vm8, %v14195_v62, %v6192_v35  ;;  %v6206_v41 = vsel %vm440_vm8, %v6192_v35, %v14195_v62  ;;  %6353 = vrot.lane.b32.xlu0 %v14083_v25, %s15594_s30  ;;  %v7820_v35 = vld [vmem:[%s15254_s4 + $0x3] ss:$8 sm:$0x3]  ;;  %v14407_v39 = vmul.f32 %v14343_v46, %v6499_v56 }
 0x956   : > { %v14372_v62 = vmul.f32 %v14302_v43, %v6206_v41  ;;  %v14375_v0 = vmul.f32 %v14305_v26, %v6200_v2  ;;  %6187 = vrot.lane.b32.xlu1 %v14103_v63, %s15592_s20  ;;  %v14410_v2 = vmul.f32 %v14346_v11, %v6505_v60  ;;  %v14425_v6 = vrot.slane %v7820_v35, %v9190_v21 }
 0x957   : > { %v6430_v38 = vpop.permute.xlu0 %6429  ;;  %15829 = vst [vmem:[#allocation60_spill] sm:$0xff] %v14407_v39  ;;  %v14428_v60 = vrot.slane %v7820_v35, %v9192_v22 }
 0x958   : > { %v6492_v29 = vpop.permute.xlu1 %6491  ;;  %v6439_v58 = vsel %vm592_vm2, %v14205_v55, %v6430_v38  ;;  %v6445_v31 = vsel %vm592_vm2, %v6430_v38, %v14205_v55  ;;  %15831 = vst [vmem:[#allocation40_spill] sm:$0xff] %v14425_v6 }
 0x959   : > { %v6500_v53 = vsel %vm630_vm12, %v14203_v23, %v6492_v29  ;;  %v6506_v50 = vsel %vm630_vm12, %v6492_v29, %v14203_v23  ;;  %6365 = vrot.lane.b32.xlu0 %v14091_v51, %s15594_s30  ;;  %15832 = vst [vmem:[#allocation24_spill] sm:$0xff] %v14428_v60  ;;  %v14445_v57 = vmul.f32 %v14384_v18, %v6439_v58 }
 0x95a   : > { %v14413_v23 = vmul.f32 %v14343_v46, %v6500_v53  ;;  %v14416_v41 = vmul.f32 %v14346_v11, %v6506_v50  ;;  %6427 = vrot.lane.b32.xlu1 %v14103_v63, %s15595_s13  ;;  %v14448_v38 = vmul.f32 %v14387_v36, %v6445_v31 }
 0x95b   : > { %v6370_v29 = vpop.permute.xlu0 %6369  ;;  %15833 = vst [vmem:[#allocation55_spill] sm:$0xff] %v14445_v57 }
 0x95c   : > { %15830 = vst [vmem:[#allocation25_spill] sm:$0xff] %v14413_v23  ;;  %v6432_v56 = vpop.permute.xlu1 %6431  ;;  %v6379_v55 = vsel %vm554_vm3, %v14213_v13, %v6370_v29  ;;  %v6385_v35 = vsel %vm554_vm3, %v6370_v29, %v14213_v13  ;;  %15834 = vst [vmem:[#allocation33_spill] sm:$0xff] %v14448_v38 }
 0x95d   : > { %v6440_v53 = vsel %vm592_vm2, %v14211_v7, %v6432_v56  ;;  %v6446_v50 = vsel %vm592_vm2, %v6432_v56, %v14211_v7  ;;  %6597 = vrot.lane.b32.xlu0 %v14013_v28, %s15596_s23 }
 0x95e   : > { %v14451_v27 = vmul.f32 %v14384_v18, %v6440_v53  ;;  %v14454_v45 = vmul.f32 %v14387_v36, %v6446_v50  ;;  %6487 = vrot.lane.b32.xlu1 %v14103_v63, %s15514_s25  ;;  %v14471_v53 = vmul.f32 %v14425_v6, %v6385_v35  ;;  %v14474_v50 = vmul.f32 %v14428_v60, %v6379_v55 }
 0x95f   : > { %v6242_v58 = vpop.permute.xlu0 %6241 }
 0x960   : > { %15835 = vst [vmem:[#allocation37_spill] sm:$0xff] %v14451_v27  ;;  %15836 = vst [vmem:[#allocation30_spill] sm:$0xff] %v14454_v45  ;;  %v6372_v13 = vpop.permute.xlu1 %6371 }
 0x961   : > { %v6380_v56 = vsel %vm554_vm3, %v14222_v1, %v6372_v13  ;;  %v6386_v29 = vsel %vm554_vm3, %v6372_v13, %v14222_v1  ;;  %15837 = vst [vmem:[#allocation67_spill] sm:$0xff] %v14471_v53  ;;  %15838 = vst [vmem:[#allocation34_spill] sm:$0xff] %v14474_v50  ;;  %6609 = vrot.lane.b32.xlu0 %v14054_v12, %s15596_s23  ;;  %v8184_v53 = vld [vmem:[%s15253_s3 + $0xc] ss:$16 sps:$4 sm:$0xff]  }
 0x962   : > { %v14477_v7 = vmul.f32 %v14425_v6, %v6386_v29  ;;  %v14480_v14 = vmul.f32 %v14428_v60, %v6380_v56  ;;  %6611 = vrot.lane.b32.xlu1 %v14062_v48, %s15596_s23  ;;  %7857 = vmatprep.mubr.msk.bf16.mxu1 %vm1723_vm13, %v8184_v53 }
 0x963   : > { %v6542_v13 = vpop.permute.xlu0 %6541 }
 0x964   : > { %15839 = vst [vmem:[#allocation29_spill] sm:$0xff] %v14477_v7  ;;  %15840 = vst [vmem:[#allocation75_spill] sm:$0xff] %v14480_v14  ;;  %v6244_v35 = vpop.permute.xlu1 %6243 }
 0x965   : > { %6301 = vrot.lane.b32.xlu0 %v14111_v30, %s15631_s14 }
 0x966   : > { %6303 = vrot.lane.b32.xlu1 %v14117_v54, %s15631_s14 }
 0x967   : > { %v6182_v29 = vpop.permute.xlu0 %6181 }
 0x968   : > { %v6544_v56 = vpop.permute.xlu1 %6543 }
 0x969   : > { %6313 = vrot.lane.b32.xlu0 %v14023_v40, %s15631_s14 }
 0x96a   : > { %6315 = vrot.lane.b32.xlu1 %v14030_v10, %s15631_s14  ;;  %s15050_s14 = scalar_lea.hbm %s15255_s5, %s7879_s6 }
 0x96b   : > { %v6482_v31 = vpop.permute.xlu0 %6481 }
 0x96c   : > { %v6184_v1 = vpop.permute.xlu1 %6183 }
 0x96d   : > { %6593 = vrot.lane.b32.xlu0 %v14083_v25, %s15596_s23 }
 0x96e   : > { %6595 = vrot.lane.b32.xlu1 %v14093_v42, %s15596_s23 }
 0x96f   : > { %v6422_v61 = vpop.permute.xlu0 %6421 }
 0x970   : > { %v6484_v55 = vpop.permute.xlu1 %6483 }
 0x971   : > { %6605 = vrot.lane.b32.xlu0 %v14091_v51, %s15596_s23 }
 0x972   : > { %6367 = vrot.lane.b32.xlu1 %v14103_v63, %s15594_s30 }
 0x973   : > { %v14514_v50 = vpop.permute.xlu0 %6361 }
 0x974   : > { %v14512_v7 = vpop.permute.xlu1 %6423 }
 0x976   : > { %6607 = vrot.lane.b32.xlu1 %v14103_v63, %s15596_s23 }
 0x977   : > { %v14521_v52 = vpop.permute.xlu0 %6601 }
 0x978   : > { %v14519_v14 = vpop.permute.xlu1 %6363 }
 0x97b   : > { %v6254_v57 = vpop.permute.xlu0 %6253 }
 0x97c   : > { %v14523_v34 = vpop.permute.xlu1 %6603  ;;  %v6261_v27 = vsel %vm478_vm7, %v6242_v58, %v6254_v57  ;;  %v6267_v42 = vsel %vm478_vm7, %v6254_v57, %v6242_v58 }
 0x97d   : > { %v14534_v63 = vmul.f32 %v14242_v59, %v6267_v42  ;;  %v14537_v51 = vmul.f32 %v14245_v15, %v6261_v27 }
 0x97f   : > { %v6554_v38 = vpop.permute.xlu0 %6553 }
 0x980   : > { %v6256_v25 = vpop.permute.xlu1 %6255  ;;  %v6561_v57 = vsel %vm668_vm11, %v6542_v13, %v6554_v38  ;;  %v6567_v58 = vsel %vm668_vm11, %v6554_v38, %v6542_v13 }
 0x981   : > { %v6262_v53 = vsel %vm478_vm7, %v6244_v35, %v6256_v25  ;;  %v6268_v45 = vsel %vm478_vm7, %v6256_v25, %v6244_v35  ;;  %v6588_v48 = vmul.f32 %v14271_v4, %v6561_v57  ;;  %v6589_v12 = vmul.f32 %v14274_v9, %v6567_v58 }
 0x982   : > { %v14540_v37 = vmul.f32 %v14242_v59, %v6268_v45  ;;  %v14543_v28 = vmul.f32 %v14245_v15, %v6262_v53 }
 0x983   : > { %v6194_v35 = vpop.permute.xlu0 %6193 }
 0x984   : > { %v6556_v42 = vpop.permute.xlu1 %6555  ;;  %v6201_v25 = vsel %vm440_vm8, %v6182_v29, %v6194_v35  ;;  %v6207_v27 = vsel %vm440_vm8, %v6194_v35, %v6182_v29  ;;  %v15841_v35 = vpack.c.bf16 %v14334_v44, %v14328_v24 }
 0x985   : > { %v6562_v45 = vsel %vm668_vm11, %v6544_v56, %v6556_v42  ;;  %v6568_v53 = vsel %vm668_vm11, %v6556_v42, %v6544_v56  ;;  %v14570_v58 = vmul.f32 %v14302_v43, %v6207_v27  ;;  %v14573_v42 = vmul.f32 %v14305_v26, %v6201_v25 }
 0x986   : > { %v6590_v38 = vmul.f32 %v14271_v4, %v6562_v45  ;;  %v6591_v13 = vmul.f32 %v14274_v9, %v6568_v53 }
 0x987   : > { %v6494_v39 = vpop.permute.xlu0 %6493 }
 0x988   : > { %v6698_v54 = vpack.c.bf16 %v6590_v38, %v6588_v48  ;;  %v6196_v30 = vpop.permute.xlu1 %6195  ;;  %v6699_v23 = vpack.c.bf16 %v6591_v13, %v6589_v12  ;;  %v6501_v12 = vsel %vm630_vm12, %v6482_v31, %v6494_v39  ;;  %v6507_v29 = vsel %vm630_vm12, %v6494_v39, %v6482_v31 }
 0x989   : > { %v6202_v56 = vsel %vm440_vm8, %v6184_v1, %v6196_v30  ;;  %v6208_v57 = vsel %vm440_vm8, %v6196_v30, %v6184_v1  ;;  %v14601_v31 = vmul.f32 %v14343_v46, %v6501_v12  ;;  %v14604_v24 = vmul.f32 %v14346_v11, %v6507_v29 }
 0x98a   : > { %v14576_v45 = vmul.f32 %v14302_v43, %v6208_v57  ;;  %v14579_v48 = vmul.f32 %v14305_v26, %v6202_v56  ;;  %7027 = vmatprep.subr.bf16.mxu1 %v6699_v23 }
 0x98b   : > { %7028 = vmatpush1.bf16.msra.mxu1 %v6698_v54  ;;  %v6434_v25 = vpop.permute.xlu0 %6433 }
 0x98c   : > { %v6496_v1 = vpop.permute.xlu1 %6495  ;;  %7029 = vmatprep.subr.bf16.mxu1 %v15841_v35  ;;  %v6441_v54 = vsel %vm592_vm2, %v6422_v61, %v6434_v25  ;;  %v6447_v39 = vsel %vm592_vm2, %v6434_v25, %v6422_v61 }
 0x98d   : > { %v6502_v23 = vsel %vm630_vm12, %v6484_v55, %v6496_v1  ;;  %v6508_v53 = vsel %vm630_vm12, %v6496_v1, %v6484_v55  ;;  %v15842_v55 = vpack.c.bf16 %v14331_v3, %v14325_v16  ;;  %v14632_v1 = vmul.f32 %v14384_v18, %v6441_v54 }
 0x98e   : > { %v14607_v44 = vmul.f32 %v14343_v46, %v6502_v23  ;;  %v14610_v38 = vmul.f32 %v14346_v11, %v6508_v53  ;;  %v14635_v25 = vmul.f32 %v14387_v36, %v6447_v39 }
 0x98f   : > { %7030 = vmatpush1.bf16.msra.mxu1 %v15842_v55  ;;  %v6374_v56 = vpop.permute.xlu0 %6373  ;;  %15843 = vst [vmem:[#allocation66_spill] sm:$0xff] %v14632_v1 }
 0x990   : > { %v6436_v61 = vpop.permute.xlu1 %6435  ;;  %v6381_v16 = vsel %vm554_vm3, %v14514_v50, %v6374_v56  ;;  %v6387_v3 = vsel %vm554_vm3, %v6374_v56, %v14514_v50  ;;  %15844 = vst [vmem:[#allocation27_spill] sm:$0xff] %v14635_v25 }
 0x991   : > { %v6442_v12 = vsel %vm592_vm2, %v14512_v7, %v6436_v61  ;;  %v6448_v29 = vsel %vm592_vm2, %v6436_v61, %v14512_v7  ;;  %v14654_v61 = vmul.f32 %v14425_v6, %v6387_v3  ;;  %v14657_v56 = vmul.f32 %v14428_v60, %v6381_v16 }
 0x992   : > { %v14638_v35 = vmul.f32 %v14384_v18, %v6442_v12  ;;  %v14641_v23 = vmul.f32 %v14387_v36, %v6448_v29 }
 0x993   : > { %v6294_v55 = vpop.permute.xlu0 %6293  ;;  %15847 = vst [vmem:[#allocation74_spill] sm:$0xff] %v14654_v61  ;;  %15848 = vst [vmem:[#allocation52_spill] sm:$0xff] %v14657_v56 }
 0x994   : > { %15845 = vst [vmem:[#allocation64_spill] sm:$0xff] %v14638_v35  ;;  %15846 = vst [vmem:[#allocation68_spill] sm:$0xff] %v14641_v23  ;;  %v6376_v53 = vpop.permute.xlu1 %6375 }
 0x995   : > { %v6382_v54 = vsel %vm554_vm3, %v14519_v14, %v6376_v53  ;;  %v6388_v39 = vsel %vm554_vm3, %v6376_v53, %v14519_v14  ;;  %v7824_v14 = vld [vmem:[%s15254_s4 + $0x10] ss:$8 sm:$0x3] }
 0x996   : > { %v14660_v12 = vmul.f32 %v14425_v6, %v6388_v39  ;;  %v14663_v29 = vmul.f32 %v14428_v60, %v6382_v54  ;;  %v14694_v1 = vrot.slane %v7824_v14, %v9192_v22 }
 0x997   : > { %v6234_v50 = vpop.permute.xlu0 %6233 }
 0x998   : > { %15849 = vst [vmem:[#allocation62_spill] sm:$0xff] %v14660_v12  ;;  %15850 = vst [vmem:[#allocation46_spill] sm:$0xff] %v14663_v29  ;;  %v6296_v13 = vpop.permute.xlu1 %6295  ;;  %v14691_v29 = vrot.slane %v7824_v14, %v9190_v21 }
 0x99b   : > { %v6534_v53 = vpop.permute.xlu0 %6533 }
 0x99c   : > { %v6236_v3 = vpop.permute.xlu1 %6235 }
 0x99f   : > { %v14669_v57 = vpop.permute.xlu0 %6173 }
 0x9a0   : > { %v14671_v16 = vpop.permute.xlu1 %6535 }
 0x9a3   : > { %v14673_v30 = vpop.permute.xlu0 %6413 }
 0x9a4   : > { %v14675_v39 = vpop.permute.xlu1 %6175 }
 0x9a7   : > { %v14677_v54 = vpop.permute.xlu0 %6473 }
 0x9a8   : > { %v14679_v27 = vpop.permute.xlu1 %6415 }
 0x9ab   : > { %v6306_v7 = vpop.permute.xlu0 %6305 }
 0x9ac   : > { %v14681_v61 = vpop.permute.xlu1 %6475  ;;  %v6317_v12 = vsel %vm516_vm6, %v6294_v55, %v6306_v7  ;;  %v6323_v60 = vsel %vm516_vm6, %v6306_v7, %v6294_v55 }
 0x9ad   : > { %v6340_v23 = vmul.f32 %v14228_v32, %v6323_v60  ;;  %v6341_v11 = vmul.f32 %v14231_v47, %v6317_v12 }
 0x9af   : > { %v6614_v6 = vpop.permute.xlu0 %6613 }
 0x9b0   : > { %v6308_v56 = vpop.permute.xlu1 %6307  ;;  %v6621_v21 = vsel %vm706_vm9, %v14521_v52, %v6614_v6  ;;  %v6627_v22 = vsel %vm706_vm9, %v6614_v6, %v14521_v52 }
 0x9b1   : > { %v6318_v35 = vsel %vm516_vm6, %v6296_v13, %v6308_v56  ;;  %v6324_v25 = vsel %vm516_vm6, %v6308_v56, %v6296_v13  ;;  %v14720_v56 = vmul.f32 %v14694_v1, %v6627_v22 }
 0x9b2   : > { %v6342_v7 = vmul.f32 %v14228_v32, %v6324_v25  ;;  %v6343_v55 = vmul.f32 %v14231_v47, %v6318_v35  ;;  %v14717_v35 = vmul.f32 %v14691_v29, %v6621_v21 }
 0x9b3   : > { %v6246_v46 = vpop.permute.xlu0 %6245 }
 0x9b4   : > { %v6664_v14 = vpack.c.bf16 %v6342_v7, %v6340_v23  ;;  %v6616_v10 = vpop.permute.xlu1 %6615  ;;  %v6665_v13 = vpack.c.bf16 %v6343_v55, %v6341_v11  ;;  %v15852_v7 = vpack.c.bf16 %v14540_v37, %v14534_v63  ;;  %v6257_v55 = vsel %vm478_vm7, %v6234_v50, %v6246_v46 }
 0x9b5   : > { %v6622_v60 = vsel %vm706_vm9, %v14523_v34, %v6616_v10  ;;  %v6628_v25 = vsel %vm706_vm9, %v6616_v10, %v14523_v34  ;;  %v15851_v10 = vpack.c.bf16 %v14543_v28, %v14537_v51  ;;  %v6263_v21 = vsel %vm478_vm7, %v6246_v46, %v6234_v50 }
 0x9b6   : > { %v14723_v52 = vmul.f32 %v14691_v29, %v6622_v60  ;;  %v14726_v6 = vmul.f32 %v14694_v1, %v6628_v25  ;;  %6916 = vmatprep.subr.bf16.mxu0 %v6665_v13  ;;  %v15853_v28 = vpack.c.bf16 %v14289_v5, %v14283_v19  ;;  %v6280_v37 = vmul.f32 %v14242_v59, %v6263_v21 }
 0x9b7   : > { %6917 = vmatpush1.bf16.msra.mxu0 %v6664_v14  ;;  %v6546_v23 = vpop.permute.xlu0 %6545  ;;  %v6281_v63 = vmul.f32 %v14245_v15, %v6257_v55  ;;  %v15854_v50 = vpack.c.bf16 %v14286_v49, %v14280_v8 }
 0x9b8   : > { %v6704_v11 = vpack.c.bf16 %v14723_v52, %v14717_v35  ;;  %6918 = vmatprep.subr.bf16.mxu0 %v15851_v10  ;;  %v14733_v34 = vpop.permute.xlu1 %6355  ;;  %v6705_v12 = vpack.c.bf16 %v14726_v6, %v14720_v56 }
 0x9bb   : > { %6919 = vmatpush1.bf16.msra.mxu0 %v15852_v7  ;;  %v6186_v22 = vpop.permute.xlu0 %6185  ;;  %v6563_v7 = vsel %vm668_vm11, %v6546_v23, %v6534_v53 }
 0x9bc   : > { %6920 = vmatprep.subr.bf16.mxu0 %v15853_v28  ;;  %v6248_v51 = vpop.permute.xlu1 %6247  ;;  %v6581_v28 = vmul.f32 %v14274_v9, %v6563_v7 }
 0x9bd   : > { %v6258_v14 = vsel %vm478_vm7, %v6236_v3, %v6248_v51  ;;  %v6264_v13 = vsel %vm478_vm7, %v6248_v51, %v6236_v3  ;;  %v6557_v3 = vsel %vm668_vm11, %v6534_v53, %v6546_v23  ;;  %v15856_v51 = vpack.c.bf16 %v14576_v45, %v14570_v58 }
 0x9be   : > { %v6282_v60 = vmul.f32 %v14242_v59, %v6264_v13  ;;  %v6283_v46 = vmul.f32 %v14245_v15, %v6258_v14  ;;  %v15855_v15 = vpack.c.bf16 %v14579_v48, %v14573_v42  ;;  %v6580_v21 = vmul.f32 %v14271_v4, %v6557_v3 }
 0x9bf   : > { %6921 = vmatpush1.bf16.msra.mxu0 %v15854_v50  ;;  %v6426_v5 = vpop.permute.xlu0 %6425  ;;  %v6197_v42 = vsel %vm440_vm8, %v14669_v57, %v6186_v22  ;;  %v6203_v48 = vsel %vm440_vm8, %v6186_v22, %v14669_v57 }
 0x9c0   : > { %v6658_v19 = vpack.c.bf16 %v6282_v60, %v6280_v37  ;;  %v14758_v25 = vpop.permute.xlu1 %6599  ;;  %v6659_v10 = vpack.c.bf16 %v6283_v46, %v6281_v63  ;;  %v6220_v58 = vmul.f32 %v14302_v43, %v6203_v48  ;;  %v6221_v45 = vmul.f32 %v14305_v26, %v6197_v42 }
 0x9c2   : > { %6922 = vmatprep.subr.bf16.mxu0 %v6659_v10 }
 0x9c3   : > { %6923 = vmatpush1.bf16.msra.mxu0 %v6658_v19  ;;  %v6486_v59 = vpop.permute.xlu0 %6485 }
 0x9c4   : > { %6924 = vmatprep.subr.bf16.mxu0 %v15855_v15  ;;  %v6548_v8 = vpop.permute.xlu1 %6547 }
 0x9c5   : > { %v6558_v49 = vsel %vm668_vm11, %v14671_v16, %v6548_v8  ;;  %v6564_v55 = vsel %vm668_vm11, %v6548_v8, %v14671_v16 }
 0x9c6   : > { %v6582_v53 = vmul.f32 %v14271_v4, %v6558_v49  ;;  %v6583_v23 = vmul.f32 %v14274_v9, %v6564_v55  ;;  %v15857_v4 = vpack.c.bf16 %v14375_v0, %v14369_v33  ;;  %v6437_v33 = vsel %vm592_vm2, %v14673_v30, %v6426_v5  ;;  %v15864_v55 = vld [vmem:[#allocation32_spill] sm:$0xff] }
 0x9c7   : > { %6925 = vmatpush1.bf16.msra.mxu0 %v15856_v51  ;;  %v14786_v14 = vpop.permute.xlu0 %6353  ;;  %v6443_v0 = vsel %vm592_vm2, %v6426_v5, %v14673_v30 }
 0x9c8   : > { %v6694_v16 = vpack.c.bf16 %v6582_v53, %v6580_v21  ;;  %6926 = vmatprep.subr.bf16.mxu0 %v15857_v4  ;;  %v6188_v9 = vpop.permute.xlu1 %6187  ;;  %v6695_v13 = vpack.c.bf16 %v6583_v23, %v6581_v28  ;;  %v15865_v28 = vld [vmem:[#allocation25_spill] sm:$0xff]  ;;  %v15866_v53 = vld [vmem:[#allocation60_spill] sm:$0xff] }
 0x9c9   : > { %v6198_v37 = vsel %vm440_vm8, %v14675_v39, %v6188_v9  ;;  %v6204_v57 = vsel %vm440_vm8, %v6188_v9, %v14675_v39  ;;  %v15858_v39 = vpack.c.bf16 %v14372_v62, %v14366_v17  ;;  %v6460_v17 = vmul.f32 %v14384_v18, %v6437_v33  ;;  %v15870_v9 = vld [vmem:[#allocation63_spill] sm:$0xff]  ;;  %v15875_v33 = vld [vmem:[#allocation36_spill] sm:$0xff] }
 0x9ca   : > { %v6222_v22 = vmul.f32 %v14302_v43, %v6204_v57  ;;  %v6223_v63 = vmul.f32 %v14305_v26, %v6198_v37  ;;  %7031 = vmatprep.subr.bf16.mxu1 %v6695_v13  ;;  %v15859_v43 = vpack.c.bf16 %v14610_v38, %v14604_v24  ;;  %v6461_v62 = vmul.f32 %v14387_v36, %v6443_v0  ;;  %v15871_v13 = vld [vmem:[#allocation43_spill] sm:$0xff]  ;;  %v15876_v0 = vld [vmem:[#allocation61_spill] sm:$0xff] }
 0x9cb   : > { %6927 = vmatpush1.bf16.msra.mxu0 %v15858_v39  ;;  %7032 = vmatpush1.bf16.msra.mxu1 %v6694_v16  ;;  %v6366_v46 = vpop.permute.xlu0 %6365  ;;  %v6497_v24 = vsel %vm630_vm12, %v14677_v54, %v6486_v59  ;;  %v6503_v38 = vsel %vm630_vm12, %v6486_v59, %v14677_v54  ;;  %v15862_v59 = vld [vmem:[#allocation59_spill] sm:$0xff]  ;;  %v15867_v23 = vpack.c.bf16 %v15865_v28, %v15866_v53  ;;  %v15869_v16 = vld [vmem:[#allocation48_spill] sm:$0xff] }
 0x9cc   : > { %v6652_v60 = vpack.c.bf16 %v6222_v22, %v6220_v58  ;;  %7033 = vmatprep.subr.bf16.mxu1 %v15859_v43  ;;  %v6428_v26 = vpop.permute.xlu1 %6427  ;;  %v6653_v50 = vpack.c.bf16 %v6223_v63, %v6221_v45  ;;  %v6521_v21 = vmul.f32 %v15864_v55, %v6503_v38  ;;  %v6679_v37 = vpack.c.bf16 %v15871_v13, %v15870_v9  ;;  %v15872_v58 = vld [vmem:[#allocation68_spill] sm:$0xff]  ;;  %v15873_v45 = vld [vmem:[#allocation27_spill] sm:$0xff]  ;;  %v15885_v38 = vld [vmem:[#allocation70_spill] sm:$0xff] }
 0x9cd   : > { %v6438_v19 = vsel %vm592_vm2, %v14679_v27, %v6428_v26  ;;  %v6444_v30 = vsel %vm592_vm2, %v6428_v26, %v14679_v27  ;;  %v15860_v27 = vpack.c.bf16 %v14607_v44, %v14601_v31  ;;  %v6681_v31 = vpack.c.bf16 %v15862_v59, %v14023_v40  ;;  %v15863_v44 = vld [vmem:[#allocation65_spill] sm:$0xff]  ;;  %v15868_v40 = vld [vmem:[#allocation54_spill] sm:$0xff]  ;;  %v15878_v43 = vld [vmem:[#allocation23_spill] sm:$0xff] }
 0x9ce   : > { %v6462_v5 = vmul.f32 %v14384_v18, %v6438_v19  ;;  %v6463_v10 = vmul.f32 %v14387_v36, %v6444_v30  ;;  %6928 = vmatprep.subr.bf16.mxu0 %v6653_v50  ;;  %v15861_v18 = vpack.c.bf16 %v14416_v41, %v14410_v2  ;;  %v6520_v49 = vmul.f32 %v15863_v44, %v6497_v24  ;;  %v15879_v50 = vld [vmem:[#allocation64_spill] sm:$0xff]  ;;  %v15880_v19 = vld [vmem:[#allocation66_spill] sm:$0xff] }
 0x9cf   : > { %6929 = vmatpush1.bf16.msra.mxu0 %v6652_v60  ;;  %7034 = vmatpush1.bf16.msra.mxu1 %v15860_v27  ;;  %v6598_v7 = vpop.permute.xlu0 %6597  ;;  %v6680_v4 = vpack.c.bf16 %v15869_v16, %v15868_v40  ;;  %v15874_v22 = vpack.c.bf16 %v15872_v58, %v15873_v45  ;;  %v6678_v39 = vpack.c.bf16 %v15876_v0, %v15875_v33  ;;  %v15877_v60 = vld [vmem:[#allocation26_spill] sm:$0xff]  ;;  %v15886_v27 = vld [vmem:[#allocation49_spill] sm:$0xff]  ;;  %v15895_v16 = vld [vmem:[#allocation24_spill] sm:$0xff] }
 0x9d0   : > { %v6682_v3 = vpack.c.bf16 %v6462_v5, %v6460_v17  ;;  %7035 = vmatprep.subr.bf16.mxu1 %v15861_v18  ;;  %v6488_v36 = vpop.permute.xlu1 %6487  ;;  %v6683_v15 = vpack.c.bf16 %v6463_v10, %v6461_v62  ;;  %v6677_v26 = vpack.c.bf16 %v15878_v43, %v15877_v60  ;;  %v15881_v30 = vpack.c.bf16 %v15879_v50, %v15880_v19  ;;  %v15882_v62 = vld [vmem:[#allocation30_spill] sm:$0xff]  ;;  %v15883_v5 = vld [vmem:[#allocation33_spill] sm:$0xff]  ;;  %v15899_v45 = vld [vmem:[#allocation75_spill] sm:$0xff] }
 0x9d1   : > { %v6498_v8 = vsel %vm630_vm12, %v14681_v61, %v6488_v36  ;;  %v6504_v54 = vsel %vm630_vm12, %v6488_v36, %v14681_v61  ;;  %v15884_v10 = vpack.c.bf16 %v15882_v62, %v15883_v5  ;;  %v6377_v59 = vsel %vm554_vm3, %v14786_v14, %v6366_v46  ;;  %v15896_v9 = vld [vmem:[#allocation62_spill] sm:$0xff]  ;;  %v15902_v50 = vld [vmem:[#allocation29_spill] sm:$0xff]  ;;  %v15903_v19 = vld [vmem:[#allocation67_spill] sm:$0xff] }
 0x9d2   : > { %v6522_v2 = vmul.f32 %v15863_v44, %v6498_v8  ;;  %v6523_v41 = vmul.f32 %v15864_v55, %v6504_v54  ;;  %6930 = vmatprep.subr.bf16.mxu0 %v6683_v15  ;;  %v15887_v15 = vld [vmem:[#allocation37_spill] sm:$0xff]  ;;  %v15888_v8 = vld [vmem:[#allocation55_spill] sm:$0xff]  ;;  %v15890_v55 = vld [vmem:[#allocation46_spill] sm:$0xff] }
 0x9d3   : > { %6931 = vmatpush2.bf16.msra.mxu0 %v6682_v3  ;;  %7036 = vmatpush1.bf16.msra.mxu1 %v15867_v23  ;;  %v6610_v48 = vpop.permute.xlu0 %6609  ;;  %v6676_v3 = vpack.c.bf16 %v15886_v27, %v15885_v38  ;;  %v15889_v54 = vpack.c.bf16 %v15887_v15, %v15888_v8  ;;  %v8182_v15 = vld [vmem:[%s15253_s3 + $0x8] ss:$16 sps:$4 sm:$0xff]   ;;  %v8185_v8 = vld [vmem:[%s15253_s3 + $0x20] ss:$16 sps:$4 sm:$0xff]  }
 0x9d4   : > { %v6688_v42 = vpack.c.bf16 %v6522_v2, %v6520_v49  ;;  %6932 = vmatprep.subr.bf16.mxu0 %v6681_v31  ;;  %v6612_v61 = vpop.permute.xlu1 %6611  ;;  %v6689_v51 = vpack.c.bf16 %v6523_v41, %v6521_v21  ;;  %v6625_v18 = vsel %vm706_vm9, %v6610_v48, %v6598_v7  ;;  %v6383_v31 = vsel %vm554_vm3, %v6366_v46, %v14786_v14  ;;  %v15891_v21 = vld [vmem:[#allocation52_spill] sm:$0xff] }
 0x9d5   : > { %v6626_v36 = vsel %vm706_vm9, %v6612_v61, %v14758_v25  ;;  %v15892_v2 = vpack.c.bf16 %v15890_v55, %v15891_v21  ;;  %v15893_v41 = vld [vmem:[#allocation56_spill] sm:$0xff]  ;;  %v6619_v28 = vsel %vm706_vm9, %v6598_v7, %v6610_v48  ;;  %v6620_v53 = vsel %vm706_vm9, %v14758_v25, %v6612_v61  ;;  %v15897_v7 = vld [vmem:[#allocation74_spill] sm:$0xff]  ;;  %v8199_v55 = vld [vmem:[%s15253_s3 + $0x64] ss:$16 sps:$4 sm:$0xff]  }
 0x9d6   : > { %7037 = vmatprep.subr.bf16.mxu1 %v6689_v51  ;;  %v6645_v23 = vmul.f32 %v14694_v1, %v6625_v18  ;;  %v15894_v51 = vld [vmem:[#allocation40_spill] sm:$0xff]  ;;  %v15898_v48 = vpack.c.bf16 %v15896_v9, %v15897_v7  ;;  %v6644_v25 = vmul.f32 %v14691_v29, %v6619_v28  ;;  %v6646_v61 = vmul.f32 %v14691_v29, %v6620_v53  ;;  %v8205_v28 = vld [vmem:[%s15253_s3 + $0x84] ss:$16 sps:$4 sm:$0xff]   ;;  %v8215_v9 = vld [vmem:[%s15253_s3 + $0xc0] ss:$16 sps:$4 sm:$0xff]  }
 0x9d7   : > { %6933 = vmatpush2.bf16.msra.mxu0 %v6680_v4  ;;  %7038 = vmatpush1.bf16.msra.mxu1 %v6688_v42  ;;  %v6302_v57 = vpop.permute.xlu0 %6301  ;;  %v6647_v42 = vmul.f32 %v14694_v1, %v6626_v36  ;;  %v6400_v40 = vmul.f32 %v15894_v51, %v6383_v31  ;;  %v6401_v4 = vmul.f32 %v15895_v16, %v6377_v59  ;;  %v8193_v59 = vld [vmem:[%s15253_s3 + $0x44] ss:$16 sps:$4 sm:$0xff]   ;;  %v8194_v31 = vld [vmem:[%s15253_s3 + $0x4c] ss:$16 sps:$4 sm:$0xff]   ;;  %v8220_v7 = vld [vmem:[%s15253_s3 + $0xc8] ss:$16 sps:$4 sm:$0xff]  }
 0x9d8   : > { %6934 = vmatprep.subr.bf16.mxu0 %v6679_v37  ;;  %7039 = vmatprep.subr.bf16.mxu1 %v15874_v22  ;;  %v6304_v63 = vpop.permute.xlu1 %6303  ;;  %v15900_v22 = vld [vmem:[#allocation34_spill] sm:$0xff] }
 0x9d9   : > { %v15901_v33 = vpack.c.bf16 %v15899_v45, %v15900_v22  ;;  %v6703_v43 = vpack.c.bf16 %v6647_v42, %v6645_v23  ;;  %v8200_v21 = vld [vmem:[%s15253_s3 + $0x6c] ss:$16 sps:$4 sm:$0xff]   ;;  %v8203_v23 = vld [vmem:[%s15253_s3 + $0x80] ss:$16 sps:$4 sm:$0xff]   ;;  %v8208_v42 = vld [vmem:[%s15253_s3 + $0x88] ss:$16 sps:$4 sm:$0xff]  }
 0x9da   : > { %v8206_v53 = vld [vmem:[%s15253_s3 + $0x8c] ss:$16 sps:$4 sm:$0xff]  }
 0x9db   : > { %6935 = vmatpush2.bf16.msra.mxu0 %v6678_v39  ;;  %7040 = vmatpush1.bf16.msra.mxu1 %v15881_v30  ;;  %v6314_v17 = vpop.permute.xlu0 %6313  ;;  %v15904_v30 = vpack.c.bf16 %v15902_v50, %v15903_v19 }
 0x9dc   : > { %7041 = vmatprep.subr.bf16.mxu1 %v15884_v10  ;;  %v6316_v24 = vpop.permute.xlu1 %6315  ;;  %6936 = vmatprep.subr.bf16.mxu0 %v6677_v26  ;;  %v6321_v14 = vsel %vm516_vm6, %v6302_v57, %v6314_v17  ;;  %v6327_v13 = vsel %vm516_vm6, %v6314_v17, %v6302_v57 }
 0x9dd   : > { %v6322_v46 = vsel %vm516_vm6, %v6304_v63, %v6316_v24  ;;  %v6349_v0 = vmul.f32 %v14231_v47, %v6321_v14  ;;  %v6328_v56 = vsel %vm516_vm6, %v6316_v24, %v6304_v63  ;;  %v6348_v63 = vmul.f32 %v14228_v32, %v6327_v13  ;;  %v8211_v14 = vld [vmem:[%s15253_s3 + $0xa4] ss:$16 sps:$4 sm:$0xff]   ;;  %v8226_v13 = vld [vmem:[%s15253_s3 + $0xe8] ss:$16 sps:$4 sm:$0xff]  }
 0x9de   : > { %v6351_v39 = vmul.f32 %v14231_v47, %v6322_v46  ;;  %v6350_v10 = vmul.f32 %v14228_v32, %v6328_v56  ;;  %v8212_v46 = vld [vmem:[%s15253_s3 + $0xac] ss:$16 sps:$4 sm:$0xff]  }
 0x9df   : > { %6937 = vmatpush2.bf16.msra.mxu0 %v6676_v3  ;;  %7042 = vmatpush1.bf16.msra.mxu1 %v15889_v54  ;;  %v6594_v44 = vpop.permute.xlu0 %6593  ;;  %v8190_v54 = vld [vmem:[%s15253_s3 + $0x28] ss:$16 sps:$4 sm:$0xff]  }
 0x9e0   : > { %v6596_v49 = vpop.permute.xlu1 %6595  ;;  %6938 = vmatprep.subr.bf16.mxu0 %v15892_v2  ;;  %7051 = vmatprep.subr.bf16.mxu1 %v15893_v41  ;;  %v6669_v27 = vpack.c.bf16 %v6351_v39, %v6349_v0  ;;  %v6668_v36 = vpack.c.bf16 %v6350_v10, %v6348_v63  ;;  %v8197_v2 = vld [vmem:[%s15253_s3 + $0x60] ss:$16 sps:$4 sm:$0xff]  }
 0x9e3   : > { %6939 = vmatpush2.bf16.msra.mxu0 %v15898_v48  ;;  %7052 = vmatpush2.bf16.msra.mxu1 %v15893_v41  ;;  %v6606_v37 = vpop.permute.xlu0 %6605  ;;  %v8202_v41 = vld [vmem:[%s15253_s3 + $0x68] ss:$16 sps:$4 sm:$0xff]   ;;  %v8223_v48 = vld [vmem:[%s15253_s3 + $0xe4] ss:$16 sps:$4 sm:$0xff]  }
 0x9e4   : > { %7053 = vmatprep.subr.bf16.mxu1 %v6705_v12  ;;  %v6368_v58 = vpop.permute.xlu1 %6367  ;;  %6940 = vmatprep.subr.bf16.mxu0 %v15901_v33  ;;  %v6617_v26 = vsel %vm706_vm9, %v6594_v44, %v6606_v37  ;;  %v6623_v47 = vsel %vm706_vm9, %v6606_v37, %v6594_v44  ;;  %v8191_v44 = vld [vmem:[%s15253_s3 + $0x40] ss:$16 sps:$4 sm:$0xff]  }
 0x9e5   : > { %v6378_v60 = vsel %vm554_vm3, %v14733_v34, %v6368_v58  ;;  %v6384_v57 = vsel %vm554_vm3, %v6368_v58, %v14733_v34  ;;  %v6702_v34 = vpack.c.bf16 %v6646_v61, %v6644_v25  ;;  %v6640_v3 = vmul.f32 %v14691_v29, %v6617_v26  ;;  %v8224_v25 = vld [vmem:[%s15253_s3 + $0xec] ss:$16 sps:$4 sm:$0xff]   ;;  %v8221_v61 = vld [vmem:[%s15253_s3 + $0xe0] ss:$16 sps:$4 sm:$0xff]  }
 0x9e6   : > { %v6402_v6 = vmul.f32 %v15894_v51, %v6384_v57  ;;  %v6403_v12 = vmul.f32 %v15895_v16, %v6378_v60  ;;  %v6641_v35 = vmul.f32 %v14694_v1, %v6623_v47  ;;  %v8209_v51 = vld [vmem:[%s15253_s3 + $0xa0] ss:$16 sps:$4 sm:$0xff]   ;;  %v8217_v16 = vld [vmem:[%s15253_s3 + $0xc4] ss:$16 sps:$4 sm:$0xff]  }
 0x9e7   : > { %6941 = vmatpush2.bf16.msra.mxu0 %v15904_v30  ;;  %7054 = vmatpush2.bf16.msra.mxu1 %v6704_v11 }
 0x9e8   : > { %v6670_v17 = vpack.c.bf16 %v6402_v6, %v6400_v40  ;;  %7055 = vmatprep.subr.bf16.mxu1 %v6703_v43  ;;  %v6608_v62 = vpop.permute.xlu1 %6607  ;;  %v6671_v5 = vpack.c.bf16 %v6403_v12, %v6401_v4  ;;  %v8214_v40 = vld [vmem:[%s15253_s3 + $0xa8] ss:$16 sps:$4 sm:$0xff]   ;;  %v8218_v4 = vld [vmem:[%s15253_s3 + $0xcc] ss:$16 sps:$4 sm:$0xff]  }
 0x9e9   : > { %v6618_v24 = vsel %vm706_vm9, %v6596_v49, %v6608_v62  ;;  %v6624_v38 = vsel %vm706_vm9, %v6608_v62, %v6596_v49  ;;  %v8196_v49 = vld [vmem:[%s15253_s3 + $0x48] ss:$16 sps:$4 sm:$0xff]  }
 0x9ea   : > { %v6642_v52 = vmul.f32 %v14691_v29, %v6618_v24  ;;  %v6643_v11 = vmul.f32 %v14694_v1, %v6624_v38  ;;  %6942 = vmatprep.subr.bf16.mxu0 %v6671_v5  ;;  %v8187_v1 = vld [vmem:[%s15253_s3 + $0x24] ss:$16 sps:$4 sm:$0xff]   ;;  %v8188_v29 = vld [vmem:[%s15253_s3 + $0x2c] ss:$16 sps:$4 sm:$0xff]  }
 0x9eb   : > { %6943 = vmatpush2.bf16.msra.mxu0 %v6670_v17  ;;  %7056 = vmatpush2.bf16.msra.mxu1 %v6702_v34 }
 0x9ec   : > { %v6700_v18 = vpack.c.bf16 %v6642_v52, %v6640_v3  ;;  %6944 = vmatprep.subr.bf16.mxu0 %v6669_v27  ;;  %v6701_v32 = vpack.c.bf16 %v6643_v11, %v6641_v35 }
 0x9ee   : > { %7057 = vmatprep.subr.bf16.mxu1 %v6701_v32 }
 0x9ef   : > { %6945 = vmatpush2.bf16.msra.mxu0 %v6668_v36  ;;  %7058 = vmatpush2.bf16.msra.mxu1 %v6700_v18 }
 0x9f2   : > { %6947 = vmatmul.mubr.bf16.vlgmr.msra.gmra.mxu0 %v8179_v20  ;;  %7060 = vmatmul.mubr.bf16.vlgmr.msra.gmra.mxu1 %v8182_v15 }
 0x9f3   : > { %6956 = vmatprep.mubr.bf16.mxu0 %v8187_v1  ;;  %7858 = vmatprep.mubr.msk.bf16.mxu1 %vm1723_vm13, %v8188_v29 }
 0x9fa   : > { %6957 = vmatmul.mubr.bf16.gmra.mxu0 %v8185_v8  ;;  %7070 = vmatmul.mubr.bf16.gmra.mxu1 %v8190_v54 }
 0x9fb   : > { %6966 = vmatprep.mubr.bf16.mxu0 %v8193_v59  ;;  %7859 = vmatprep.mubr.msk.bf16.mxu1 %vm1723_vm13, %v8194_v31 }
 0xa02   : > { %6967 = vmatmul.mubr.bf16.gmra.mxu0 %v8191_v44  ;;  %7080 = vmatmul.mubr.bf16.gmra.mxu1 %v8196_v49 }
 0xa03   : > { %6976 = vmatprep.mubr.bf16.mxu0 %v8199_v55  ;;  %7860 = vmatprep.mubr.msk.bf16.mxu1 %vm1723_vm13, %v8200_v21 }
 0xa0a   : > { %6977 = vmatmul.mubr.bf16.gmra.mxu0 %v8197_v2  ;;  %7090 = vmatmul.mubr.bf16.gmra.mxu1 %v8202_v41 }
 0xa0b   : > { %6986 = vmatprep.mubr.bf16.mxu0 %v8205_v28  ;;  %7861 = vmatprep.mubr.msk.bf16.mxu1 %vm1723_vm13, %v8206_v53 }
 0xa12   : > { %6987 = vmatmul.mubr.bf16.gmra.mxu0 %v8203_v23  ;;  %7100 = vmatmul.mubr.bf16.gmra.mxu1 %v8208_v42 }
 0xa13   : > { %6996 = vmatprep.mubr.bf16.mxu0 %v8211_v14  ;;  %7862 = vmatprep.mubr.msk.bf16.mxu1 %vm1723_vm13, %v8212_v46 }
 0xa1a   : > { %6997 = vmatmul.mubr.bf16.gmra.mxu0 %v8209_v51  ;;  %7110 = vmatmul.mubr.bf16.gmra.mxu1 %v8214_v40 }
 0xa1b   : > { %7006 = vmatprep.mubr.bf16.mxu0 %v8217_v16  ;;  %7863 = vmatprep.mubr.msk.bf16.mxu1 %vm1723_vm13, %v8218_v4 }
 0xa22   : > { %7007 = vmatmul.mubr.bf16.gmra.mxu0 %v8215_v9  ;;  %7120 = vmatmul.mubr.bf16.gmra.mxu1 %v8220_v7 }
 0xa23   : > { %7016 = vmatprep.mubr.bf16.mxu0 %v8223_v48  ;;  %7864 = vmatprep.mubr.msk.bf16.mxu1 %vm1723_vm13, %v8224_v25 }
 0xa2a   : > { %7017 = vmatmul.mubr.bf16.gmra.mxu0 %v8221_v61  ;;  %7130 = vmatmul.mubr.bf16.gmra.mxu1 %v8226_v13 }
 0xa2b   : > { %8728 = shalt.err (!%p8725_p8)
}
 0xa2c   : > { %s8729_s15 = scalar_lea.hbm %s15050_s14, 512  ;;  %s8733_s20 = scalar_lea.hbm %s15255_s5, 1024 }
 0xa2d   : > { %p8730_p10 = scmp.ne.s32.totalorder %s15050_s14, %s8729_s15  ;;  %p8734_p13 = scmp.lt.s32.totalorder %s15050_s14, %s15255_s5 }
 0xa2e   : > { %p8735_p0 = scmp.lt.s32.totalorder %s8733_s20, %s8729_s15 }
 0xa2f   : > { %p8731_p11 = pnand %p8730_p10, %p9009_p3 }
 0xa30   : > { %p8736_p1 = por %p8735_p0, %p8734_p13 }
 0xa31   : > { %p8732_p12 = pneg %p8731_p11 }
 0xa33   : > { %p8737_p2 = pnand %p8736_p1, %p8732_p12 }
 0xa35   : > { %8740 = shalt.err (!%p8737_p2)
}
 0xa36   : > { %s8909_s13 = smov 256   ;;  %s7385_s30 = sshll.u32 %s9050_s28, 4  ;;  %s15110_s30 = int_to_ptr.vmem [resolvable:$true] %s7385_s30 }
 0xa37   : > { %7883 = dma.vmem_to_hbm [thread:$0]  (%p9009_p3), %s15052_s7, 512, %s15050_s14, %s7309_s0, %s8909_s13, %s8909_s13, %s15628_s24  }
 0xa38   : > { %s7880_s7 = sshll.u32 %s8881_s9, 10  ;;  %s7324_s27 = scalar_lea.sflag [#allocation8], %s9032_s22 }
 0xa39   : > { %s15108_s0 = scalar_lea.hbm %s15258_s8, %s7880_s7  ;;  %s8741_s11 = scalar_lea.vmem %s15110_s30, 1024 }
 0xa3a   : > { %p8742_p4 = scmp.ne.s32.totalorder %s15110_s30, %s8741_s11  ;;  %s8910_s18 = smov [#allocation7]  }
 0xa3b   : > { %s8745_s10 = sshll.u32 %s8910_s18, 4  ;;  %s8746_s10 = int_to_ptr.vmem [resolvable:$false] %s8745_s10 }
 0xa3c   : > { %p8743_p5 = pnand %p8742_p4, %p9009_p3  ;;  %s8747_s15 = scalar_lea.vmem %s8746_s10, 2048 }
 0xa3d   : > { %p8748_p7 = scmp.lt.s32.totalorder %s15110_s30, %s8746_s10  ;;  %p8749_p8 = scmp.lt.s32.totalorder %s8747_s15, %s8741_s11 }
 0xa3e   : > { %p8744_p6 = pneg %p8743_p5 }
 0xa3f   : > { %p8750_p10 = por %p8749_p8, %p8748_p7 }
 0xa41   : > { %p8751_p11 = pnand %p8750_p10, %p8744_p6 }
 0xab2   : > { %v6948_v37 = vpop.f32.mrf.mxu0  ;;  %v7061_v58 = vpop.f32.mrf.mxu1 }
 0xab3   : > { %v7062_v47 = vadd.f32 %v7061_v58, %v6948_v37 }
 0xab4   : > { %v6950_v45 = vpop.f32.mrf.mxu0  ;;  %v7063_v22 = vpop.f32.mrf.mxu1 }
 0xab5   : > { %v7064_v50 = vadd.f32 %v7063_v22, %v6950_v45  ;;  %v7140_v5 = vmul.f32 0.5, %v7062_v47 }
 0xab6   : > { %v6952_v33 = vpop.f32.mrf.mxu0  ;;  %v7065_v0 = vpop.f32.mrf.mxu1 }
 0xab7   : > { %v7066_v34 = vadd.f32 %v7065_v0, %v6952_v33  ;;  %v7141_v24 = vmul.f32 0.5, %v7064_v50  ;;  %8627 = vtanh.f32 %v7140_v5 }
 0xab8   : > { %v6954_v39 = vpop.f32.mrf.mxu0  ;;  %v7067_v60 = vpop.f32.mrf.mxu1 }
 0xab9   : > { %v7068_v63 = vadd.f32 %v7067_v60, %v6954_v39  ;;  %v7142_v3 = vmul.f32 0.5, %v7066_v34  ;;  %8629 = vtanh.f32 %v7141_v24 }
 0xaba   : > { %v6958_v57 = vpop.f32.mrf.mxu0  ;;  %v7071_v56 = vpop.f32.mrf.mxu1 }
 0xabb   : > { %v7072_v35 = vadd.f32 %v7071_v56, %v6958_v57  ;;  %v7143_v18 = vmul.f32 0.5, %v7068_v63  ;;  %8631 = vtanh.f32 %v7142_v3 }
 0xabc   : > { %v6960_v6 = vpop.f32.mrf.mxu0  ;;  %v7073_v12 = vpop.f32.mrf.mxu1 }
 0xabd   : > { %v7074_v32 = vadd.f32 %v7073_v12, %v6960_v6  ;;  %v7144_v31 = vmul.f32 0.5, %v7072_v35  ;;  %8633 = vtanh.f32 %v7143_v18 }
 0xabe   : > { %v6962_v43 = vpop.f32.mrf.mxu0  ;;  %v7075_v26 = vpop.f32.mrf.mxu1 }
 0xabf   : > { %v7076_v29 = vadd.f32 %v7075_v26, %v6962_v43  ;;  %v7145_v49 = vmul.f32 0.5, %v7074_v32 }
 0xac0   : > { %v6964_v19 = vpop.f32.mrf.mxu0  ;;  %v7077_v30 = vpop.f32.mrf.mxu1 }
 0xac1   : > { %v7078_v28 = vadd.f32 %v7077_v30, %v6964_v19  ;;  %v7146_v23 = vmul.f32 0.5, %v7076_v29 }
 0xac2   : > { %v6968_v17 = vpop.f32.mrf.mxu0  ;;  %v7081_v62 = vpop.f32.mrf.mxu1 }
 0xac3   : > { %v7082_v10 = vadd.f32 %v7081_v62, %v6968_v17  ;;  %v7147_v48 = vmul.f32 0.5, %v7078_v28 }
 0xac4   : > { %v6970_v38 = vpop.f32.mrf.mxu0  ;;  %v7083_v27 = vpop.f32.mrf.mxu1 }
 0xac5   : > { %v7172_v52 = vadd.f32 0.01, %v7082_v10  ;;  %v7084_v11 = vadd.f32 %v7083_v27, %v6970_v38  ;;  %v8628_v57 = vpop.eup %8627 }
 0xac6   : > { %v6972_v36 = vpop.f32.mrf.mxu0  ;;  %v7085_v20 = vpop.f32.mrf.mxu1 }
 0xac7   : > { %v7180_v15 = vmul.f32 0.5, %v7172_v52  ;;  %v7173_v1 = vadd.f32 0.01, %v7084_v11  ;;  %v7086_v8 = vadd.f32 %v7085_v20, %v6972_v36  ;;  %v8630_v26 = vpop.eup %8629  ;;  %v7156_v36 = vmul.f32 0.5, %v8628_v57  ;;  %v6165_v57 = vld [vmem:[%s9050_s28 + $0x8] sm:$0xff] }
 0xac8   : > { %v6974_v54 = vpop.f32.mrf.mxu0  ;;  %v7087_v59 = vpop.f32.mrf.mxu1  ;;  %v7157_v20 = vmul.f32 0.5, %v8630_v26 }
 0xac9   : > { %v7181_v44 = vmul.f32 0.5, %v7173_v1  ;;  %v7174_v55 = vadd.f32 0.01, %v7086_v8  ;;  %v7088_v21 = vadd.f32 %v7087_v59, %v6974_v54  ;;  %8635 = vtanh.f32 %v7180_v15  ;;  %v8632_v50 = vpop.eup %8631 }
 0xaca   : > { %v6978_v2 = vpop.f32.mrf.mxu0  ;;  %v7091_v41 = vpop.f32.mrf.mxu1  ;;  %v7158_v54 = vmul.f32 0.5, %v8632_v50 }
 0xacb   : > { %v7092_v53 = vadd.f32 %v7091_v41, %v6978_v2  ;;  %8637 = vtanh.f32 %v7181_v44  ;;  %v7182_v42 = vmul.f32 0.5, %v7174_v55  ;;  %v7175_v14 = vadd.f32 0.01, %v7088_v21  ;;  %v8634_v63 = vpop.eup %8633 }
 0xacc   : > { %v6980_v46 = vpop.f32.mrf.mxu0  ;;  %v7093_v51 = vpop.f32.mrf.mxu1  ;;  %8639 = vtanh.f32 %v7144_v31  ;;  %v7159_v44 = vmul.f32 0.5, %v8634_v63 }
 0xacd   : > { %v7176_v40 = vadd.f32 0.01, %v7092_v53  ;;  %v7094_v16 = vadd.f32 %v7093_v51, %v6980_v46  ;;  %8641 = vtanh.f32 %v7145_v49  ;;  %v7183_v4 = vmul.f32 0.5, %v7175_v14 }
 0xace   : > { %v6982_v9 = vpop.f32.mrf.mxu0  ;;  %v7095_v7 = vpop.f32.mrf.mxu1  ;;  %8643 = vtanh.f32 %v7182_v42  ;;  %v7164_v14 = vadd.f32 0.5, %v7156_v36  ;;  %v7165_v46 = vadd.f32 0.5, %v7157_v20 }
 0xacf   : > { %v7184_v25 = vmul.f32 0.5, %v7176_v40  ;;  %v7177_v61 = vadd.f32 0.01, %v7094_v16  ;;  %8645 = vtanh.f32 %v7146_v23  ;;  %v7096_v13 = vadd.f32 %v7095_v7, %v6982_v9 }
 0xad0   : > { %v6984_v37 = vpop.f32.mrf.mxu0  ;;  %v7097_v58 = vpop.f32.mrf.mxu1  ;;  %8647 = vtanh.f32 %v7183_v4  ;;  %v7166_v7 = vadd.f32 0.5, %v7158_v54 }
 0xad1   : > { %v7185_v45 = vmul.f32 0.5, %v7177_v61  ;;  %8649 = vtanh.f32 %v7184_v25  ;;  %v7178_v22 = vadd.f32 0.01, %v7096_v13  ;;  %v7098_v33 = vadd.f32 %v7097_v58, %v6984_v37 }
 0xad2   : > { %v6988_v0 = vpop.f32.mrf.mxu0  ;;  %v7101_v39 = vpop.f32.mrf.mxu1  ;;  %8651 = vtanh.f32 %v7147_v48  ;;  %v7167_v13 = vadd.f32 0.5, %v7159_v44 }
 0xad3   : > { %v7102_v60 = vadd.f32 %v7101_v39, %v6988_v0  ;;  %8653 = vtanh.f32 %v7185_v45  ;;  %v7186_v56 = vmul.f32 0.5, %v7178_v22  ;;  %v7179_v6 = vadd.f32 0.01, %v7098_v33  ;;  %v6164_v45 = vld [vmem:[%s9050_s28] sm:$0xff] }
 0xad4   : > { %v6990_v12 = vpop.f32.mrf.mxu0  ;;  %v7103_v43 = vpop.f32.mrf.mxu1 }
 0xad5   : > { %8655 = vtanh.f32 %v7102_v60  ;;  %v7104_v47 = vadd.f32 %v7103_v43, %v6990_v12  ;;  %v7187_v19 = vmul.f32 0.5, %v7179_v6 }
 0xad6   : > { %8657 = vtanh.f32 %v7186_v56  ;;  %v6992_v30 = vpop.f32.mrf.mxu0  ;;  %v7105_v34 = vpop.f32.mrf.mxu1 }
 0xad7   : > { %8659 = vtanh.f32 %v7104_v47  ;;  %v7106_v17 = vadd.f32 %v7105_v34, %v6992_v30  ;;  %v8636_v62 = vpop.eup %8635 }
 0xad8   : > { %8661 = vtanh.f32 %v7187_v19  ;;  %v6994_v5 = vpop.f32.mrf.mxu0  ;;  %v7107_v10 = vpop.f32.mrf.mxu1  ;;  %v7196_v11 = vmul.f32 0.5, %v8636_v62 }
 0xad9   : > { %v8638_v24 = vpop.eup %8637  ;;  %8663 = vtanh.f32 %v7106_v17  ;;  %v7108_v38 = vadd.f32 %v7107_v10, %v6994_v5 }
 0xada   : > { %v8640_v27 = vpop.eup %8639  ;;  %v6998_v3 = vpop.f32.mrf.mxu0  ;;  %v7197_v15 = vmul.f32 0.5, %v8638_v24  ;;  %v7204_v28 = vadd.f32 0.5, %v7196_v11 }
 0xadb   : > { %v7111_v35 = vpop.f32.mrf.mxu1  ;;  %v8642_v52 = vpop.eup %8641  ;;  %8665 = vtanh.f32 %v7108_v38  ;;  %v7160_v49 = vmul.f32 0.5, %v8640_v27  ;;  %v6166_v38 = vld [vmem:[%s9050_s28 + $0x10] sm:$0xff] }
 0xadc   : > { %v7112_v18 = vadd.f32 %v7111_v35, %v6998_v3  ;;  %v8644_v32 = vpop.eup %8643  ;;  %v7000_v1 = vpop.f32.mrf.mxu0  ;;  %v7161_v55 = vmul.f32 0.5, %v8642_v52  ;;  %v7205_v40 = vadd.f32 0.5, %v7197_v15  ;;  %v7252_v60 = vmul.f32 %v7204_v28, %v6164_v45 }
 0xadd   : > { %v7113_v29 = vpop.f32.mrf.mxu1  ;;  %v8646_v8 = vpop.eup %8645  ;;  %v7198_v53 = vmul.f32 0.5, %v8644_v32  ;;  %v7168_v37 = vadd.f32 0.5, %v7160_v49  ;;  %v6168_v49 = vld [vmem:[%s9050_s28 + $0x20] sm:$0xff] }
 0xade   : > { %8667 = vtanh.f32 %v7112_v18  ;;  %v7114_v59 = vadd.f32 %v7113_v29, %v7000_v1  ;;  %v8648_v31 = vpop.eup %8647  ;;  %v7002_v21 = vpop.f32.mrf.mxu0  ;;  %v7162_v51 = vmul.f32 0.5, %v8646_v8  ;;  %v15080_v58 = vadd.f32 0.5, %v7161_v55  ;;  %v6167_v1 = vld [vmem:[%s9050_s28 + $0x18] sm:$0xff] }
 0xadf   : > { %v7115_v2 = vpop.f32.mrf.mxu1  ;;  %v8650_v41 = vpop.eup %8649  ;;  %v7199_v48 = vmul.f32 0.5, %v8648_v31  ;;  %v7206_v56 = vadd.f32 0.5, %v7198_v53  ;;  %v7253_v26 = vmul.f32 %v7205_v40, %v6165_v57 }
 0xae0   : > { %8669 = vtanh.f32 %v7114_v59  ;;  %v7116_v23 = vadd.f32 %v7115_v2, %v7002_v21  ;;  %v8652_v42 = vpop.eup %8651  ;;  %v7004_v16 = vpop.f32.mrf.mxu0  ;;  %v7200_v22 = vmul.f32 0.5, %v8650_v41  ;;  %v15084_v43 = vadd.f32 0.5, %v7162_v51 }
 0xae1   : > { %v7117_v4 = vpop.f32.mrf.mxu1  ;;  %v8654_v9 = vpop.eup %8653  ;;  %v7207_v63 = vadd.f32 0.5, %v7199_v48  ;;  %v7163_v24 = vmul.f32 0.5, %v8652_v42  ;;  %v7254_v18 = vmul.f32 %v7206_v56, %v6166_v38 }
 0xae2   : > { %8671 = vtanh.f32 %v7116_v23  ;;  %v7118_v25 = vadd.f32 %v7117_v4, %v7004_v16  ;;  %v8656_v61 = vpop.eup %8655  ;;  %v7008_v33 = vpop.f32.mrf.mxu0  ;;  %v7201_v47 = vmul.f32 0.5, %v8654_v9  ;;  %v7208_v27 = vadd.f32 0.5, %v7200_v22 }
 0xae3   : > { %v7121_v0 = vpop.f32.mrf.mxu1  ;;  %v8658_v39 = vpop.eup %8657  ;;  %v7260_v6 = vmul.f32 %v8656_v61, %v7164_v14  ;;  %v7255_v44 = vmul.f32 %v7207_v63, %v6167_v1 }
 0xae4   : > { %8673 = vtanh.f32 %v7118_v25  ;;  %v8660_v12 = vpop.eup %8659  ;;  %v7122_v50 = vadd.f32 %v7121_v0, %v7008_v33  ;;  %v7010_v19 = vpop.f32.mrf.mxu0  ;;  %v7202_v3 = vmul.f32 0.5, %v8658_v39  ;;  %v7209_v29 = vadd.f32 0.5, %v7201_v47 }
 0xae5   : > { %v7123_v30 = vpop.f32.mrf.mxu1  ;;  %v8662_v34 = vpop.eup %8661  ;;  %v7268_v17 = vadd.f32 %v7260_v6, %v7252_v60  ;;  %v7261_v62 = vmul.f32 %v8660_v12, %v7165_v46  ;;  %v7256_v28 = vmul.f32 %v7208_v27, %v6168_v49  ;;  %v6169_v46 = vld [vmem:[%s9050_s28 + $0x28] sm:$0xff]  ;;  %v7171_v39 = vadd.f32 0.5, %v7163_v24  ;;  %v6171_v6 = vld [vmem:[%s9050_s28 + $0x38] sm:$0xff] }
 0xae6   : > { %v7124_v5 = vadd.f32 %v7123_v30, %v7010_v19  ;;  %v8664_v10 = vpop.eup %8663  ;;  %v7220_v35 = vmul.f32 0.5, %v7122_v50  ;;  %v7012_v52 = vpop.f32.mrf.mxu0  ;;  %v7203_v8 = vmul.f32 0.5, %v8662_v34  ;;  %v7210_v53 = vadd.f32 0.5, %v7202_v3 }
 0xae7   : > { %v7125_v11 = vpop.f32.mrf.mxu1  ;;  %7292 = vst [vmem:[%s9050_s28] sm:$0xff] %v7268_v17  ;;  %v7269_v32 = vadd.f32 %v7261_v62, %v7253_v26  ;;  %v7262_v36 = vmul.f32 %v8664_v10, %v7166_v7  ;;  %v7257_v9 = vmul.f32 %v7209_v29, %v6169_v46 }
 0xae8   : > { %v7221_v20 = vmul.f32 0.5, %v7124_v5  ;;  %v8666_v15 = vpop.eup %8665  ;;  %8675 = vtanh.f32 %v7220_v35  ;;  %v7126_v54 = vadd.f32 %v7125_v11, %v7012_v52  ;;  %v7014_v59 = vpop.f32.mrf.mxu0  ;;  %v7211_v7 = vadd.f32 0.5, %v7203_v8 }
 0xae9   : > { %v7127_v31 = vpop.f32.mrf.mxu1  ;;  %7293 = vst [vmem:[%s9050_s28 + $0x8] sm:$0xff] %v7269_v32  ;;  %v7270_v55 = vadd.f32 %v7262_v36, %v7254_v18  ;;  %v7263_v21 = vmul.f32 %v8666_v15, %v7167_v13  ;;  %v6170_v13 = vld [vmem:[%s9050_s28 + $0x30] sm:$0xff] }
 0xaea   : > { %v7128_v2 = vadd.f32 %v7127_v31, %v7014_v59  ;;  %8677 = vtanh.f32 %v7221_v20  ;;  %v7222_v23 = vmul.f32 0.5, %v7126_v54  ;;  %v7018_v42 = vpop.f32.mrf.mxu0 }
 0xaeb   : > { %v8668_v41 = vpop.eup %8667  ;;  %v7131_v14 = vpop.f32.mrf.mxu1  ;;  %8679 = vtanh.f32 %v7268_v17  ;;  %7294 = vst [vmem:[%s9050_s28 + $0x10] sm:$0xff] %v7270_v55  ;;  %v7271_v51 = vadd.f32 %v7263_v21, %v7255_v44 }
 0xaec   : > { %v7264_v40 = vmul.f32 %v8668_v41, %v7168_v37  ;;  %v7223_v16 = vmul.f32 0.5, %v7128_v2  ;;  %8681 = vtanh.f32 %v7222_v23  ;;  %v7132_v48 = vadd.f32 %v7131_v14, %v7018_v42  ;;  %v7020_v25 = vpop.f32.mrf.mxu0 }
 0xaed   : > { %v8670_v4 = vpop.eup %8669  ;;  %v7133_v61 = vpop.f32.mrf.mxu1  ;;  %8683 = vtanh.f32 %v7269_v32  ;;  %7295 = vst [vmem:[%s9050_s28 + $0x18] sm:$0xff] %v7271_v51  ;;  %v7258_v37 = vmul.f32 %v7210_v53, %v6170_v13 }
 0xaee   : > { %v7272_v45 = vadd.f32 %v7264_v40, %v7256_v28  ;;  %v7265_v22 = vmul.f32 %v8670_v4, %v15080_v58  ;;  %v7134_v33 = vadd.f32 %v7133_v61, %v7020_v25  ;;  %8685 = vtanh.f32 %v7223_v16  ;;  %v7022_v57 = vpop.f32.mrf.mxu0 }
 0xaef   : > { %v8672_v0 = vpop.eup %8671  ;;  %v7224_v60 = vmul.f32 0.5, %v7132_v48  ;;  %v7135_v56 = vpop.f32.mrf.mxu1  ;;  %8687 = vtanh.f32 %v7270_v55  ;;  %v7259_v58 = vmul.f32 %v7211_v7, %v6171_v6 }
 0xaf0   : > { %7296 = vst [vmem:[%s9050_s28 + $0x20] sm:$0xff] %v7272_v45  ;;  %v7273_v12 = vadd.f32 %v7265_v22, %v7257_v9  ;;  %v7266_v26 = vmul.f32 %v8672_v0, %v15084_v43  ;;  %v7225_v47 = vmul.f32 0.5, %v7134_v33  ;;  %v7136_v19 = vadd.f32 %v7135_v56, %v7022_v57  ;;  %v7024_v30 = vpop.f32.mrf.mxu0 }
 0xaf1   : > { %v8674_v50 = vpop.eup %8673  ;;  %8689 = vtanh.f32 %v7224_v60  ;;  %v7137_v34 = vpop.f32.mrf.mxu1 }
 0xaf2   : > { %8691 = vtanh.f32 %v7271_v51  ;;  %7297 = vst [vmem:[%s9050_s28 + $0x28] sm:$0xff] %v7273_v12  ;;  %v7274_v63 = vadd.f32 %v7266_v26, %v7258_v37  ;;  %v7267_v17 = vmul.f32 %v8674_v50, %v7171_v39  ;;  %v7138_v62 = vadd.f32 %v7137_v34, %v7024_v30 }
 0xaf3   : > { %8693 = vtanh.f32 %v7225_v47  ;;  %v7226_v43 = vmul.f32 0.5, %v7136_v19 }
 0xaf4   : > { %8695 = vtanh.f32 %v7272_v45  ;;  %7298 = vst [vmem:[%s9050_s28 + $0x30] sm:$0xff] %v7274_v63  ;;  %v7275_v5 = vadd.f32 %v7267_v17, %v7259_v58  ;;  %v7227_v10 = vmul.f32 0.5, %v7138_v62 }
 0xaf5   : > { %8697 = vtanh.f32 %v7226_v43  ;;  %v8676_v24 = vpop.eup %8675 }
 0xaf6   : > { %8699 = vtanh.f32 %v7273_v12  ;;  %7299 = vst [vmem:[%s9050_s28 + $0x38] sm:$0xff] %v7275_v5  ;;  %v7236_v38 = vmul.f32 0.5, %v8676_v24 }
 0xaf7   : > { %8701 = vtanh.f32 %v7227_v10 }
 0xaf8   : > { %8754 = shalt.err (!%p8751_p11)
}
 0xaf9   : > { %s8755_s28 = scalar_lea.hbm %s15108_s0, 1024  ;;  %s8759_s16 = scalar_lea.hbm %s15258_s8, 2048 }
 0xafa   : > { %p8756_p12 = scmp.ne.s32.totalorder %s15108_s0, %s8755_s28  ;;  %p8760_p1 = scmp.lt.s32.totalorder %s15108_s0, %s15258_s8 }
 0xafb   : > { %p8761_p2 = scmp.lt.s32.totalorder %s8759_s16, %s8755_s28 }
 0xafc   : > { %p8757_p13 = pnand %p8756_p12, %p9009_p3 }
 0xafd   : > { %p8762_p4 = por %p8761_p2, %p8760_p1 }
 0xafe   : > { %p8758_p0 = pneg %p8757_p13 }
 0xb00   : > { %p8763_p5 = pnand %p8762_p4, %p8758_p0 }
 0xb02   : > { %8766 = shalt.err (!%p8763_p5)
}
 0xb03   : > { %7886 = dma.vmem_to_hbm [thread:$0]  (%p9009_p3), %s15110_s30, 1024, %s15108_s0, %s7324_s27, %s8909_s13, %s8909_s13, %s15628_s24   ;;  %v8678_v27 = vpop.eup %8677  ;;  %8703 = vtanh.f32 %v7274_v63  ;;  %v7244_v35 = vadd.f32 0.5, %v7236_v38 }
 0xb04   : > { %v8680_v3 = vpop.eup %8679  ;;  %v7237_v52 = vmul.f32 0.5, %v8678_v27  ;;  %8705 = vtanh.f32 %v7275_v5  ;;  %s15905_s25 = sadd.s32 4294967295, %s8893_s12   ;;  %s7353_s23 = sshll.u32 %s9046_s21, 4  ;;  %s15157_s23 = int_to_ptr.vmem [resolvable:$true] %s7353_s23 }
 0xb05   : > { %v8682_v11 = vpop.eup %8681  ;;  %v7284_v32 = vmul.f32 %v8680_v3, %v7244_v35  ;;  %s15144_s30 = sand.u32 1, %s15905_s25   ;;  %s7369_s14 = sshll.u32 %s9048_s29, 4  ;;  %s15166_s14 = int_to_ptr.vmem [resolvable:$true] %s7369_s14 }
 0xb06   : > { %v8684_v18 = vpop.eup %8683  ;;  %v7245_v36 = vadd.f32 0.5, %v7237_v52  ;;  %v7238_v20 = vmul.f32 0.5, %v8682_v11  ;;  %s15906_s11 = sld [smem:[#allocation77_spill]]  ;;  %s7314_s29 = scalar_lea.sflag [#allocation5], %s15144_s30 }
 0xb07   : > { %v8686_v15 = vpop.eup %8685  ;;  %7300 = vst [vmem:[%s9046_s21] sm:$0xff] %v7284_v32  ;;  %s15908_s22 = sld [smem:[#allocation78_spill]]  ;;  %s8767_s16 = scalar_lea.vmem %s15157_s23, 1024 }
 0xb08   : > { %v8688_v1 = vpop.eup %8687  ;;  %v7285_v29 = vmul.f32 %v8684_v18, %v7245_v36  ;;  %v7246_v8 = vadd.f32 0.5, %v7238_v20  ;;  %v7239_v54 = vmul.f32 0.5, %v8686_v15  ;;  %p8768_p6 = scmp.ne.s32.totalorder %s15157_s23, %s8767_s16 }
 0xb09   : > { %v8690_v59 = vpop.eup %8689 }
 0xb0a   : > { %v8692_v31 = vpop.eup %8691  ;;  %7301 = vst [vmem:[%s9046_s21 + $0x8] sm:$0xff] %v7285_v29  ;;  %v7286_v44 = vmul.f32 %v8688_v1, %v7246_v8  ;;  %v7247_v49 = vadd.f32 0.5, %v7239_v54  ;;  %v7240_v55 = vmul.f32 0.5, %v8690_v59  ;;  %p8769_p7 = pnand %p8768_p6, %p9009_p3 }
 0xb0b   : > { %v8694_v21 = vpop.eup %8693 }
 0xb0c   : > { %v8696_v2 = vpop.eup %8695  ;;  %7302 = vst [vmem:[%s9046_s21 + $0x10] sm:$0xff] %v7286_v44  ;;  %v7287_v41 = vmul.f32 %v8692_v31, %v7247_v49  ;;  %v7248_v28 = vadd.f32 0.5, %v7240_v55  ;;  %v7241_v53 = vmul.f32 0.5, %v8694_v21  ;;  %s15907_s18 = smov %s15906_s11  ;;  %s15155_s10 = scalar_lea.hbm %s15906_s11, %s7880_s7 }
 0xb0d   : > { %v8698_v23 = vpop.eup %8697  ;;  %s15164_s26 = scalar_lea.hbm %s15908_s22, %s7879_s6  ;;  %p8770_p8 = pneg %p8769_p7 }
 0xb0e   : > { %v8700_v42 = vpop.eup %8699  ;;  %7303 = vst [vmem:[%s9046_s21 + $0x18] sm:$0xff] %v7287_v41  ;;  %v7288_v14 = vmul.f32 %v8696_v2, %v7248_v28  ;;  %v7249_v46 = vadd.f32 0.5, %v7241_v53  ;;  %v7242_v51 = vmul.f32 0.5, %v8698_v23  ;;  %s8911_s7 = smov [#allocation4]  }
 0xb0f   : > { %v8702_v40 = vpop.eup %8701  ;;  %s8771_s20 = sshll.u32 %s8911_s7, 4  ;;  %s8772_s20 = int_to_ptr.vmem [resolvable:$false] %s8771_s20 }
 0xb10   : > { %7304 = vst [vmem:[%s9046_s21 + $0x20] sm:$0xff] %v7288_v14  ;;  %v7289_v16 = vmul.f32 %v8700_v42, %v7249_v46  ;;  %v7250_v4 = vadd.f32 0.5, %v7242_v51  ;;  %v7243_v9 = vmul.f32 0.5, %v8702_v40  ;;  %v8704_v7 = vpop.eup %8703  ;;  %s8773_s9 = scalar_lea.vmem %s8772_s20, 2048  ;;  %p8774_p10 = scmp.lt.s32.totalorder %s15157_s23, %s8772_s20 }
 0xb11   : > { %v8706_v61 = vpop.eup %8705  ;;  %p8775_p11 = scmp.lt.s32.totalorder %s8773_s9, %s8767_s16 }
 0xb12   : > { %7305 = vst [vmem:[%s9046_s21 + $0x28] sm:$0xff] %v7289_v16  ;;  %v7290_v48 = vmul.f32 %v8704_v7, %v7250_v4  ;;  %v7251_v25 = vadd.f32 0.5, %v7243_v9 }
 0xb13   : > { %p8776_p12 = por %p8775_p11, %p8774_p10 }
 0xb14   : > { %7306 = vst [vmem:[%s9046_s21 + $0x30] sm:$0xff] %v7290_v48  ;;  %v7291_v13 = vmul.f32 %v8706_v61, %v7251_v25 }
 0xb15   : > { %p8777_p13 = pnand %p8776_p12, %p8770_p8 }
 0xb16   : > { %7307 = vst [vmem:[%s9046_s21 + $0x38] sm:$0xff] %v7291_v13 }
 0xb17   : > { %8780 = shalt.err (!%p8777_p13)
}
 0xb18   : > { %s8781_s21 = scalar_lea.hbm %s15155_s10, 1024  ;;  %s8785_s25 = scalar_lea.hbm %s15907_s18, 2048 }
 0xb19   : > { %p8782_p0 = scmp.ne.s32.totalorder %s15155_s10, %s8781_s21  ;;  %p8786_p4 = scmp.lt.s32.totalorder %s15155_s10, %s15907_s18 }
 0xb1a   : > { %p8787_p5 = scmp.lt.s32.totalorder %s8785_s25, %s8781_s21 }
 0xb1b   : > { %p8783_p1 = pnand %p8782_p0, %p9009_p3 }
 0xb1c   : > { %p8788_p6 = por %p8787_p5, %p8786_p4 }
 0xb1d   : > { %p8784_p2 = pneg %p8783_p1 }
 0xb1f   : > { %p8789_p7 = pnand %p8788_p6, %p8784_p2 }
 0xb21   : > { %8792 = shalt.err (!%p8789_p7)
}
 0xb22   : > { %7884 = dma.vmem_to_hbm [thread:$0]  (%p9009_p3), %s15157_s23, 1024, %s15155_s10, %s7314_s29, %s8909_s13, %s8909_s13, %s15628_s24  }
 0xb23   : > { %s8793_s11 = scalar_lea.vmem %s15166_s14, 512  ;;  %s8912_s15 = smov [#allocation6]  }
 0xb24   : > { %p8794_p8 = scmp.ne.s32.totalorder %s15166_s14, %s8793_s11  ;;  %s8797_s28 = sshll.u32 %s8912_s15, 4  ;;  %s8798_s28 = int_to_ptr.vmem [resolvable:$false] %s8797_s28 }
 0xb25   : > { %s8799_s16 = scalar_lea.vmem %s8798_s28, 1024  ;;  %p8800_p12 = scmp.lt.s32.totalorder %s15166_s14, %s8798_s28 }
 0xb26   : > { %p8795_p10 = pnand %p8794_p8, %p9009_p3  ;;  %p8801_p13 = scmp.lt.s32.totalorder %s8799_s16, %s8793_s11 }
 0xb28   : > { %p8796_p11 = pneg %p8795_p10  ;;  %p8802_p0 = por %p8801_p13, %p8800_p12 }
 0xb2a   : > { %p8803_p1 = pnand %p8802_p0, %p8796_p11 }
 0xb2c   : > { %8806 = shalt.err (!%p8803_p1)
}
 0xb2d   : > { %s8807_s7 = scalar_lea.hbm %s15164_s26, 512  ;;  %s8811_s20 = scalar_lea.hbm %s15908_s22, 1024 }
 0xb2e   : > { %p8808_p2 = scmp.ne.s32.totalorder %s15164_s26, %s8807_s7  ;;  %p8812_p6 = scmp.lt.s32.totalorder %s15164_s26, %s15908_s22 }
 0xb2f   : > { %p8813_p7 = scmp.lt.s32.totalorder %s8811_s20, %s8807_s7 }
 0xb30   : > { %p8809_p4 = pnand %p8808_p2, %p9009_p3 }
 0xb31   : > { %p8814_p8 = por %p8813_p7, %p8812_p6 }
 0xb32   : > { %p8810_p5 = pneg %p8809_p4 }
 0xb34   : > { %p8815_p10 = pnand %p8814_p8, %p8810_p5 }
 0xb36   : > { %8818 = shalt.err (!%p8815_p10)
}
 0xb37   : > { %7885 = dma.vmem_to_hbm [thread:$0]  (%p9009_p3), %s15166_s14, 512, %s15164_s26, %s7314_s29, %s8909_s13, %s8909_s13, %s15628_s24  }
 0xb38 PF: > { %s15909_s6 = sld [smem:[#allocation12_spill]]  ;;  %p7904_p11 = scmp.ge.s32.totalorder %s8893_s12, 2 }
 0xb3a   : > { %p7892_p12 = pnand %p7904_p11, %p9021_p9 }
 0xb3c   : > { %p7893_p13 = pneg %p7892_p12 }
 0xb3e   : > { %s7400_s25 = sand.u32 1, %s15909_s6  }
 0xb3f   : > { %s7401_s0 = scalar_lea.sflag [#allocation3], %s7400_s25 }
 0xb40   : > { %8852 = dma.done.wait (%p7893_p13), %s7401_s0, 512  }
 0xb41   : > { %8854 = vsyncadd (%p7893_p13), %s7401_s0, 4294966784  ;;  %s15911_s17 = sadd.s32 4294967294, %s8893_s12  }
 0xb42   : > { %s7409_s27 = sand.u32 1, %s15911_s17  }
 0xb43   : > { %s7410_s11 = scalar_lea.sflag [#allocation5], %s7409_s27 }
 0xb44   : > { %8856 = dma.done.wait (%p7893_p13), %s7410_s11, 1536  }
 0xb45   : > { %8858 = vsyncadd (%p7893_p13), %s7410_s11, 4294965760  ;;  %s7428_s30 = scalar_lea.sflag [#allocation8], %s7400_s25 }
 0xb46   : > { %8860 = dma.done.wait (%p7893_p13), %s7428_s30, 1024  }
 0xb47   : > { %8862 = vsyncadd (%p7893_p13), %s7428_s30, 4294966272  ;;  %s28_s12 = sadd.s32 1, %s8893_s12   ;;  %s15912_s27 = sld [smem:[#allocation13_spill]] }
 0xb48   : > { %p25_p3 = scmp.ge.s32.totalorder %s28_s12, 6   ;;  %s15913_s28 = sld [smem:[#allocation14_spill]] }
 0xb49   : > { %s15914_s29 = sld [smem:[#allocation20_spill]] }
 0xb4a   : > { %s15915_s30 = sld [smem:[#allocation15_spill]]  ;;  %27 = sbr.rel (!%p25_p3) target bundleno = 13 (0xd), region = 145 }
 0xb4b   : > { %s15916_s9 = sld [smem:[#allocation16_spill]] }
 0xb4c   : > { %s15917_s10 = sld [smem:[#allocation17_spill]] }
 0xb4d   : > { %s15918_s11 = sld [smem:[#allocation18_spill]] }
 0xb4f   :  { %7433 = vsyncpa [#allocation3], 1 }
 0xb50   :  { %7435 = vsyncpa [#allocation3 + $0x1], 1 }
 0xb51   :  { %7436 = vsyncpa [#allocation5], 1 }
 0xb52   :  { %7438 = vsyncpa [#allocation5 + $0x1], 1 }
 0xb53   :  { %7439 = vsyncpa [#allocation8], 1 }
 0xb54   :  { %7441 = vsyncpa [#allocation8 + $0x1], 1 }

</bundles_post_ra>
